<compile_context>
chip_gen: v7x
topology: tpu7x:2x2x1
jax: 0.10.0
libtpu: 0.0.40
codegen_flags: <defaults>
</compile_context>

<pallas_src>
import jax
import jax.numpy as jnp
from jax.experimental import pallas as pl
from jax.experimental.pallas import tpu as pltpu


HIDDEN_DIMS = [2048, 1024, 512, 256, 1]  # output widths of the 5 Linear layers

_NK = 4                      # number of K-chunks W2 is streamed in
_CK = 2048 // _NK            # 512 rows per chunk (1 MB bf16 each)


def _fused_mlp_kernel(x_ref,
                      w1_ref, b1_ref,
                      w2_hbm, b2_ref,
                      w3_hbm, b3_ref,
                      w4_ref, b4_ref,
                      w5_ref, b5_ref,
                      o_ref,
                      w2_buf, w3_buf, sem):
    """All 5 layers fused; W2/W3 streamed HBM->VMEM overlapping compute."""
    # Issue the big-weight DMAs immediately so they run under layer-1/2 compute.
    w2_copies = [
        pltpu.make_async_copy(w2_hbm.at[pl.ds(c * _CK, _CK), :],
                              w2_buf.at[c], sem.at[c])
        for c in range(_NK)
    ]
    w3_copy = pltpu.make_async_copy(w3_hbm, w3_buf, sem.at[_NK])
    for cp in w2_copies:
        cp.start()
    w3_copy.start()

    # Layer 1: (M,64) @ (64,2048), bf16 inputs, f32 accumulation.
    h = jnp.dot(x_ref[...].astype(jnp.bfloat16), w1_ref[...],
                preferred_element_type=jnp.float32)
    h = jnp.maximum(h + b1_ref[...], 0.0)

    # Layer 2: (M,2048) @ (2048,1024), accumulated over streamed K-chunks.
    h_b = h.astype(jnp.bfloat16)
    w2_copies[0].wait()
    acc = jnp.dot(h_b[:, :_CK], w2_buf[0], preferred_element_type=jnp.float32)
    for c in range(1, _NK):
        w2_copies[c].wait()
        acc = acc + jnp.dot(h_b[:, c * _CK:(c + 1) * _CK], w2_buf[c],
                            preferred_element_type=jnp.float32)
    h = jnp.maximum(acc + b2_ref[...], 0.0)

    # Layer 3: (M,1024) @ (1024,512).  DMA already overlapped layer-2 compute.
    w3_copy.wait()
    h = jnp.dot(h.astype(jnp.bfloat16), w3_buf[...],
                preferred_element_type=jnp.float32)
    h = jnp.maximum(h + b3_ref[...], 0.0)

    # Layer 4: (M,512) @ (512,256).
    h = jnp.dot(h.astype(jnp.bfloat16), w4_ref[...],
                preferred_element_type=jnp.float32)
    h = jnp.maximum(h + b4_ref[...], 0.0)

    # Layer 5: (M,256) -> (M,1) as a VPU multiply + lane reduction (avoids a
    # degenerate 1-lane-wide MXU matmul).  w5 is in PyTorch (1,256) layout.
    h = jnp.sum(h * w5_ref[...].astype(jnp.float32), axis=-1, keepdims=True)
    h = h + b5_ref[...]
    o_ref[...] = h.astype(o_ref.dtype)


def net_forward_pallas(x, params):
    """Forward pass of `Net` as a single fused Pallas kernel.

    x:      (M, K) float32
    params: list of 5 (w, b) pairs.
            w1..w4: (in, out) bf16 (pre-transposed at init time).
            w5:     (1, 256) bf16 (PyTorch native layout; used as a reduction).
            b:      (1, out) f32.
    """
    M = x.shape[0]
    (w1, b1), (w2, b2), (w3, b3), (w4, b4), (w5, b5) = params
    out_dim = b5.shape[1]

    flops = 0
    bytes_accessed = x.size * x.dtype.itemsize + M * out_dim * 4
    for w, b in params:
        flops += 2 * M * w.size
        bytes_accessed += w.size * w.dtype.itemsize + b.size * b.dtype.itemsize

    vmem_spec = pl.BlockSpec(memory_space=pltpu.MemorySpace.VMEM)
    hbm_spec = pl.BlockSpec(memory_space=pl.ANY)

    return pl.pallas_call(
        _fused_mlp_kernel,
        out_shape=jax.ShapeDtypeStruct((M, out_dim), jnp.float32),
        in_specs=[vmem_spec,            # x
                  vmem_spec, vmem_spec,  # w1 (small), b1
                  hbm_spec, vmem_spec,   # w2 (streamed), b2
                  hbm_spec, vmem_spec,   # w3 (streamed), b3
                  vmem_spec, vmem_spec,  # w4 (small), b4
                  vmem_spec, vmem_spec],  # w5 (tiny), b5
        out_specs=vmem_spec,
        scratch_shapes=[
            pltpu.VMEM((_NK, _CK, 2048 // 2), jnp.bfloat16),  # W2 chunk buffers
            pltpu.VMEM((1024, 512), jnp.bfloat16),            # W3 buffer
            pltpu.SemaphoreType.DMA((_NK + 1,)),
        ],
        compiler_params=pltpu.CompilerParams(
            # ~6 MB resident (streamed-weight buffers + small weights/biases
            # + activations); 16 MiB leaves headroom on v7x's 64 MiB VMEM.
            vmem_limit_bytes=16 * 1024 * 1024,
        ),
        cost_estimate=pl.CostEstimate(
            flops=flops, transcendentals=0, bytes_accessed=bytes_accessed),
    )(x, w1, b1, w2, b2, w3, b3, w4, b4, w5, b5)


net_forward = jax.jit(net_forward_pallas)


def init_params(key, input_size):
    """Deterministic init matching the PyTorch module's layer shapes.

    Weights for layers 1..4 are stored already transposed to
    (in_features, out_features) and cast to bf16; the final layer's weight is
    kept in PyTorch's native (1, 256) layout (used as a reduction).  Biases
    stay f32 as (1, out_features)."""
    dims = []
    fan_in = input_size
    for fan_out in HIDDEN_DIMS:
        dims.append((fan_in, fan_out))
        fan_in = fan_out

    params = []
    for li, (f_in, f_out) in enumerate(dims):
        key, kw, kb = jax.random.split(key, 3)
        bound = 1.0 / jnp.sqrt(f_in)
        last = li == len(dims) - 1
        w_shape = (1, f_in) if last else (f_in, f_out)  # last layer: (1, 256)
        w = jax.random.uniform(kw, w_shape, jnp.float32, -bound, bound)
        b = jax.random.uniform(kb, (1, f_out), jnp.float32, -bound, bound)
        params.append((w.astype(jnp.bfloat16), b))
    return params


def net_forward_ref(x, params):
    """Pure-JAX reference with the same bf16-weight quantization as the kernel."""
    h = x
    n = len(params)
    for li, (w, b) in enumerate(params):
        if li < n - 1:
            h = jnp.dot(h.astype(jnp.bfloat16), w,
                        preferred_element_type=jnp.float32) + b
            h = jnp.maximum(h, 0.0)
        else:
            h = jnp.sum(h * w.astype(jnp.float32), axis=-1, keepdims=True) + b
    return h


if __name__ == "__main__":
    key = jax.random.PRNGKey(0)
    batch = 8
    input_size = 64  # stands in for train_data.size()[1]

    kx, kp = jax.random.split(key)
    x = jax.random.normal(kx, (batch, input_size), dtype=jnp.float32)
    params = init_params(kp, input_size)

    out = net_forward(x, params)
    out = jax.block_until_ready(out)

    ref = net_forward_ref(x, params)
    assert out.shape == (batch, 1), out.shape
    # bf16 weights + f32 accumulation: compare against the bf16-aware reference
    # (chunked K-accumulation may differ from XLA's dot only at f32 rounding).
    assert jnp.allclose(out, ref, atol=1e-2, rtol=1e-2), "mismatch vs reference"

    print("KERNEL_OK")
</pallas_src>

<mosaic_0001>
module attributes {stable_mosaic.version = 11 : i64} {
  func.func @_fused_mlp_kernel(%arg0: memref<8x64xf32, #tpu.memory_space<vmem>>, %arg1: memref<64x2048xbf16, #tpu.memory_space<vmem>>, %arg2: memref<1x2048xf32, #tpu.memory_space<vmem>>, %arg3: memref<2048x1024xbf16, #tpu.memory_space<any>>, %arg4: memref<1x1024xf32, #tpu.memory_space<vmem>>, %arg5: memref<1024x512xbf16, #tpu.memory_space<any>>, %arg6: memref<1x512xf32, #tpu.memory_space<vmem>>, %arg7: memref<512x256xbf16, #tpu.memory_space<vmem>>, %arg8: memref<1x256xf32, #tpu.memory_space<vmem>>, %arg9: memref<1x256xbf16, #tpu.memory_space<vmem>>, %arg10: memref<1x1xf32, #tpu.memory_space<vmem>>, %arg11: memref<8x1xf32, #tpu.memory_space<vmem>>, %arg12: memref<4x512x1024xbf16, #tpu.memory_space<vmem>>, %arg13: memref<1024x512xbf16, #tpu.memory_space<vmem>>, %arg14: memref<5x!tpu.dma_semaphore, #tpu.memory_space<semaphore_mem>>) attributes {dimension_semantics = [], scalar_prefetch = 0 : i64, scratch_operands = 3 : i64, tpu.core_type = #tpu.core_type<tc>} {
    %c0_i32 = arith.constant 0 : i32
    %c0_i32_0 = arith.constant 0 : i32
    %c0_i32_1 = arith.constant 0 : i32
    %c0_i32_2 = arith.constant 0 : i32
    %0 = tpu.memref_slice %arg3[%c0_i32_1, %c0_i32_2] : memref<2048x1024xbf16, #tpu.memory_space<any>> -> memref<512x1024xbf16, #tpu.memory_space<any>>
    %c0_i32_3 = arith.constant 0 : i32
    %c0_i32_4 = arith.constant 0 : i32
    %1 = tpu.memref_slice %arg12[%c0_i32, %c0_i32_3, %c0_i32_4] : memref<4x512x1024xbf16, #tpu.memory_space<vmem>> -> memref<1x512x1024xbf16, #tpu.memory_space<vmem>>
    %2 = tpu.memref_squeeze %1 : memref<1x512x1024xbf16, #tpu.memory_space<vmem>> -> memref<512x1024xbf16, #tpu.memory_space<vmem>>
    %3 = tpu.memref_slice %arg14[%c0_i32_0] : memref<5x!tpu.dma_semaphore, #tpu.memory_space<semaphore_mem>> -> memref<1x!tpu.dma_semaphore, #tpu.memory_space<semaphore_mem>>
    %4 = tpu.memref_squeeze %3 : memref<1x!tpu.dma_semaphore, #tpu.memory_space<semaphore_mem>> -> memref<!tpu.dma_semaphore, #tpu.memory_space<semaphore_mem>>
    tpu.enqueue_dma source(%0 : memref<512x1024xbf16, #tpu.memory_space<any>>) target(%2 : memref<512x1024xbf16, #tpu.memory_space<vmem>>) target_semaphore(%4 : memref<!tpu.dma_semaphore, #tpu.memory_space<semaphore_mem>>)
    %c1_i32 = arith.constant 1 : i32
    %c1_i32_5 = arith.constant 1 : i32
    %c512_i32 = arith.constant 512 : i32
    %c0_i32_6 = arith.constant 0 : i32
    %5 = tpu.memref_slice %arg3[%c512_i32, %c0_i32_6] : memref<2048x1024xbf16, #tpu.memory_space<any>> -> memref<512x1024xbf16, #tpu.memory_space<any>>
    %c0_i32_7 = arith.constant 0 : i32
    %c0_i32_8 = arith.constant 0 : i32
    %6 = tpu.memref_slice %arg12[%c1_i32, %c0_i32_7, %c0_i32_8] : memref<4x512x1024xbf16, #tpu.memory_space<vmem>> -> memref<1x512x1024xbf16, #tpu.memory_space<vmem>>
    %7 = tpu.memref_squeeze %6 : memref<1x512x1024xbf16, #tpu.memory_space<vmem>> -> memref<512x1024xbf16, #tpu.memory_space<vmem>>
    %8 = tpu.memref_slice %arg14[%c1_i32_5] : memref<5x!tpu.dma_semaphore, #tpu.memory_space<semaphore_mem>> -> memref<1x!tpu.dma_semaphore, #tpu.memory_space<semaphore_mem>>
    %9 = tpu.memref_squeeze %8 : memref<1x!tpu.dma_semaphore, #tpu.memory_space<semaphore_mem>> -> memref<!tpu.dma_semaphore, #tpu.memory_space<semaphore_mem>>
    tpu.enqueue_dma source(%5 : memref<512x1024xbf16, #tpu.memory_space<any>>) target(%7 : memref<512x1024xbf16, #tpu.memory_space<vmem>>) target_semaphore(%9 : memref<!tpu.dma_semaphore, #tpu.memory_space<semaphore_mem>>)
    %c2_i32 = arith.constant 2 : i32
    %c2_i32_9 = arith.constant 2 : i32
    %c1024_i32 = arith.constant 1024 : i32
    %c0_i32_10 = arith.constant 0 : i32
    %10 = tpu.memref_slice %arg3[%c1024_i32, %c0_i32_10] : memref<2048x1024xbf16, #tpu.memory_space<any>> -> memref<512x1024xbf16, #tpu.memory_space<any>>
    %c0_i32_11 = arith.constant 0 : i32
    %c0_i32_12 = arith.constant 0 : i32
    %11 = tpu.memref_slice %arg12[%c2_i32, %c0_i32_11, %c0_i32_12] : memref<4x512x1024xbf16, #tpu.memory_space<vmem>> -> memref<1x512x1024xbf16, #tpu.memory_space<vmem>>
    %12 = tpu.memref_squeeze %11 : memref<1x512x1024xbf16, #tpu.memory_space<vmem>> -> memref<512x1024xbf16, #tpu.memory_space<vmem>>
    %13 = tpu.memref_slice %arg14[%c2_i32_9] : memref<5x!tpu.dma_semaphore, #tpu.memory_space<semaphore_mem>> -> memref<1x!tpu.dma_semaphore, #tpu.memory_space<semaphore_mem>>
    %14 = tpu.memref_squeeze %13 : memref<1x!tpu.dma_semaphore, #tpu.memory_space<semaphore_mem>> -> memref<!tpu.dma_semaphore, #tpu.memory_space<semaphore_mem>>
    tpu.enqueue_dma source(%10 : memref<512x1024xbf16, #tpu.memory_space<any>>) target(%12 : memref<512x1024xbf16, #tpu.memory_space<vmem>>) target_semaphore(%14 : memref<!tpu.dma_semaphore, #tpu.memory_space<semaphore_mem>>)
    %c3_i32 = arith.constant 3 : i32
    %c3_i32_13 = arith.constant 3 : i32
    %c1536_i32 = arith.constant 1536 : i32
    %c0_i32_14 = arith.constant 0 : i32
    %15 = tpu.memref_slice %arg3[%c1536_i32, %c0_i32_14] : memref<2048x1024xbf16, #tpu.memory_space<any>> -> memref<512x1024xbf16, #tpu.memory_space<any>>
    %c0_i32_15 = arith.constant 0 : i32
    %c0_i32_16 = arith.constant 0 : i32
    %16 = tpu.memref_slice %arg12[%c3_i32, %c0_i32_15, %c0_i32_16] : memref<4x512x1024xbf16, #tpu.memory_space<vmem>> -> memref<1x512x1024xbf16, #tpu.memory_space<vmem>>
    %17 = tpu.memref_squeeze %16 : memref<1x512x1024xbf16, #tpu.memory_space<vmem>> -> memref<512x1024xbf16, #tpu.memory_space<vmem>>
    %18 = tpu.memref_slice %arg14[%c3_i32_13] : memref<5x!tpu.dma_semaphore, #tpu.memory_space<semaphore_mem>> -> memref<1x!tpu.dma_semaphore, #tpu.memory_space<semaphore_mem>>
    %19 = tpu.memref_squeeze %18 : memref<1x!tpu.dma_semaphore, #tpu.memory_space<semaphore_mem>> -> memref<!tpu.dma_semaphore, #tpu.memory_space<semaphore_mem>>
    tpu.enqueue_dma source(%15 : memref<512x1024xbf16, #tpu.memory_space<any>>) target(%17 : memref<512x1024xbf16, #tpu.memory_space<vmem>>) target_semaphore(%19 : memref<!tpu.dma_semaphore, #tpu.memory_space<semaphore_mem>>)
    %c4_i32 = arith.constant 4 : i32
    %20 = tpu.memref_slice %arg14[%c4_i32] : memref<5x!tpu.dma_semaphore, #tpu.memory_space<semaphore_mem>> -> memref<1x!tpu.dma_semaphore, #tpu.memory_space<semaphore_mem>>
    %21 = tpu.memref_squeeze %20 : memref<1x!tpu.dma_semaphore, #tpu.memory_space<semaphore_mem>> -> memref<!tpu.dma_semaphore, #tpu.memory_space<semaphore_mem>>
    tpu.enqueue_dma source(%arg5 : memref<1024x512xbf16, #tpu.memory_space<any>>) target(%arg13 : memref<1024x512xbf16, #tpu.memory_space<vmem>>) target_semaphore(%21 : memref<!tpu.dma_semaphore, #tpu.memory_space<semaphore_mem>>)
    %c0 = arith.constant 0 : index
    %c0_17 = arith.constant 0 : index
    %22 = vector.load %arg0[%c0, %c0_17] : memref<8x64xf32, #tpu.memory_space<vmem>>, vector<8x64xf32>
    %23 = arith.truncf %22 : vector<8x64xf32> to vector<8x64xbf16>
    %c0_18 = arith.constant 0 : index
    %c0_19 = arith.constant 0 : index
    %24 = vector.load %arg1[%c0_18, %c0_19] : memref<64x2048xbf16, #tpu.memory_space<vmem>>, vector<64x2048xbf16>
    %cst = arith.constant dense<0.000000e+00> : vector<8x2048xf32>
    %25 = tpu.matmul %23, %24, %cst {dimension_numbers = #tpu.dot_dimension_numbers<[1], [0], [0], [1], [0, 0, 1, 1], [], []>} : vector<8x64xbf16>, vector<64x2048xbf16>, vector<8x2048xf32> -> vector<8x2048xf32>
    %c0_20 = arith.constant 0 : index
    %c0_21 = arith.constant 0 : index
    %26 = vector.load %arg2[%c0_20, %c0_21] : memref<1x2048xf32, #tpu.memory_space<vmem>>, vector<1x2048xf32>
    %27 = vector.broadcast %26 : vector<1x2048xf32> to vector<8x2048xf32>
    %28 = arith.addf %25, %27 : vector<8x2048xf32>
    %cst_22 = arith.constant 0.000000e+00 : f32
    %29 = vector.broadcast %cst_22 : f32 to vector<8x2048xf32>
    %30 = arith.maximumf %28, %29 : vector<8x2048xf32>
    %31 = arith.truncf %30 : vector<8x2048xf32> to vector<8x2048xbf16>
    %c0_i32_23 = arith.constant 0 : i32
    %c0_i32_24 = arith.constant 0 : i32
    %c0_i32_25 = arith.constant 0 : i32
    %c0_i32_26 = arith.constant 0 : i32
    %32 = tpu.memref_slice %arg3[%c0_i32_25, %c0_i32_26] : memref<2048x1024xbf16, #tpu.memory_space<any>> -> memref<512x1024xbf16, #tpu.memory_space<any>>
    %c0_i32_27 = arith.constant 0 : i32
    %c0_i32_28 = arith.constant 0 : i32
    %33 = tpu.memref_slice %arg12[%c0_i32_23, %c0_i32_27, %c0_i32_28] : memref<4x512x1024xbf16, #tpu.memory_space<vmem>> -> memref<1x512x1024xbf16, #tpu.memory_space<vmem>>
    %34 = tpu.memref_squeeze %33 : memref<1x512x1024xbf16, #tpu.memory_space<vmem>> -> memref<512x1024xbf16, #tpu.memory_space<vmem>>
    %35 = tpu.memref_slice %arg14[%c0_i32_24] : memref<5x!tpu.dma_semaphore, #tpu.memory_space<semaphore_mem>> -> memref<1x!tpu.dma_semaphore, #tpu.memory_space<semaphore_mem>>
    %36 = tpu.memref_squeeze %35 : memref<1x!tpu.dma_semaphore, #tpu.memory_space<semaphore_mem>> -> memref<!tpu.dma_semaphore, #tpu.memory_space<semaphore_mem>>
    tpu.wait_dma2 semaphore(%36 : memref<!tpu.dma_semaphore, #tpu.memory_space<semaphore_mem>>) src(%32 : memref<512x1024xbf16, #tpu.memory_space<any>>) dst(%34 : memref<512x1024xbf16, #tpu.memory_space<vmem>>)
    %37 = vector.extract_strided_slice %31 {offsets = [0, 0], sizes = [8, 512], strides = [1, 1]} : vector<8x2048xbf16> to vector<8x512xbf16>
    %c0_29 = arith.constant 0 : index
    %c0_30 = arith.constant 0 : index
    %c0_31 = arith.constant 0 : index
    %38 = vector.load %arg12[%c0_29, %c0_30, %c0_31] : memref<4x512x1024xbf16, #tpu.memory_space<vmem>>, vector<1x512x1024xbf16>
    %39 = vector.shape_cast %38 : vector<1x512x1024xbf16> to vector<512x1024xbf16>
    %cst_32 = arith.constant dense<0.000000e+00> : vector<8x1024xf32>
    %40 = tpu.matmul %37, %39, %cst_32 {dimension_numbers = #tpu.dot_dimension_numbers<[1], [0], [0], [1], [0, 0, 1, 1], [], []>} : vector<8x512xbf16>, vector<512x1024xbf16>, vector<8x1024xf32> -> vector<8x1024xf32>
    %c1_i32_33 = arith.constant 1 : i32
    %c1_i32_34 = arith.constant 1 : i32
    %c512_i32_35 = arith.constant 512 : i32
    %c0_i32_36 = arith.constant 0 : i32
    %41 = tpu.memref_slice %arg3[%c512_i32_35, %c0_i32_36] : memref<2048x1024xbf16, #tpu.memory_space<any>> -> memref<512x1024xbf16, #tpu.memory_space<any>>
    %c0_i32_37 = arith.constant 0 : i32
    %c0_i32_38 = arith.constant 0 : i32
    %42 = tpu.memref_slice %arg12[%c1_i32_33, %c0_i32_37, %c0_i32_38] : memref<4x512x1024xbf16, #tpu.memory_space<vmem>> -> memref<1x512x1024xbf16, #tpu.memory_space<vmem>>
    %43 = tpu.memref_squeeze %42 : memref<1x512x1024xbf16, #tpu.memory_space<vmem>> -> memref<512x1024xbf16, #tpu.memory_space<vmem>>
    %44 = tpu.memref_slice %arg14[%c1_i32_34] : memref<5x!tpu.dma_semaphore, #tpu.memory_space<semaphore_mem>> -> memref<1x!tpu.dma_semaphore, #tpu.memory_space<semaphore_mem>>
    %45 = tpu.memref_squeeze %44 : memref<1x!tpu.dma_semaphore, #tpu.memory_space<semaphore_mem>> -> memref<!tpu.dma_semaphore, #tpu.memory_space<semaphore_mem>>
    tpu.wait_dma2 semaphore(%45 : memref<!tpu.dma_semaphore, #tpu.memory_space<semaphore_mem>>) src(%41 : memref<512x1024xbf16, #tpu.memory_space<any>>) dst(%43 : memref<512x1024xbf16, #tpu.memory_space<vmem>>)
    %46 = vector.extract_strided_slice %31 {offsets = [0, 512], sizes = [8, 512], strides = [1, 1]} : vector<8x2048xbf16> to vector<8x512xbf16>
    %c1 = arith.constant 1 : index
    %c0_39 = arith.constant 0 : index
    %c0_40 = arith.constant 0 : index
    %47 = vector.load %arg12[%c1, %c0_39, %c0_40] : memref<4x512x1024xbf16, #tpu.memory_space<vmem>>, vector<1x512x1024xbf16>
    %48 = vector.shape_cast %47 : vector<1x512x1024xbf16> to vector<512x1024xbf16>
    %cst_41 = arith.constant dense<0.000000e+00> : vector<8x1024xf32>
    %49 = tpu.matmul %46, %48, %cst_41 {dimension_numbers = #tpu.dot_dimension_numbers<[1], [0], [0], [1], [0, 0, 1, 1], [], []>} : vector<8x512xbf16>, vector<512x1024xbf16>, vector<8x1024xf32> -> vector<8x1024xf32>
    %50 = arith.addf %40, %49 : vector<8x1024xf32>
    %c2_i32_42 = arith.constant 2 : i32
    %c2_i32_43 = arith.constant 2 : i32
    %c1024_i32_44 = arith.constant 1024 : i32
    %c0_i32_45 = arith.constant 0 : i32
    %51 = tpu.memref_slice %arg3[%c1024_i32_44, %c0_i32_45] : memref<2048x1024xbf16, #tpu.memory_space<any>> -> memref<512x1024xbf16, #tpu.memory_space<any>>
    %c0_i32_46 = arith.constant 0 : i32
    %c0_i32_47 = arith.constant 0 : i32
    %52 = tpu.memref_slice %arg12[%c2_i32_42, %c0_i32_46, %c0_i32_47] : memref<4x512x1024xbf16, #tpu.memory_space<vmem>> -> memref<1x512x1024xbf16, #tpu.memory_space<vmem>>
    %53 = tpu.memref_squeeze %52 : memref<1x512x1024xbf16, #tpu.memory_space<vmem>> -> memref<512x1024xbf16, #tpu.memory_space<vmem>>
    %54 = tpu.memref_slice %arg14[%c2_i32_43] : memref<5x!tpu.dma_semaphore, #tpu.memory_space<semaphore_mem>> -> memref<1x!tpu.dma_semaphore, #tpu.memory_space<semaphore_mem>>
    %55 = tpu.memref_squeeze %54 : memref<1x!tpu.dma_semaphore, #tpu.memory_space<semaphore_mem>> -> memref<!tpu.dma_semaphore, #tpu.memory_space<semaphore_mem>>
    tpu.wait_dma2 semaphore(%55 : memref<!tpu.dma_semaphore, #tpu.memory_space<semaphore_mem>>) src(%51 : memref<512x1024xbf16, #tpu.memory_space<any>>) dst(%53 : memref<512x1024xbf16, #tpu.memory_space<vmem>>)
    %56 = vector.extract_strided_slice %31 {offsets = [0, 1024], sizes = [8, 512], strides = [1, 1]} : vector<8x2048xbf16> to vector<8x512xbf16>
    %c2 = arith.constant 2 : index
    %c0_48 = arith.constant 0 : index
    %c0_49 = arith.constant 0 : index
    %57 = vector.load %arg12[%c2, %c0_48, %c0_49] : memref<4x512x1024xbf16, #tpu.memory_space<vmem>>, vector<1x512x1024xbf16>
    %58 = vector.shape_cast %57 : vector<1x512x1024xbf16> to vector<512x1024xbf16>
    %cst_50 = arith.constant dense<0.000000e+00> : vector<8x1024xf32>
    %59 = tpu.matmul %56, %58, %cst_50 {dimension_numbers = #tpu.dot_dimension_numbers<[1], [0], [0], [1], [0, 0, 1, 1], [], []>} : vector<8x512xbf16>, vector<512x1024xbf16>, vector<8x1024xf32> -> vector<8x1024xf32>
    %60 = arith.addf %50, %59 : vector<8x1024xf32>
    %c3_i32_51 = arith.constant 3 : i32
    %c3_i32_52 = arith.constant 3 : i32
    %c1536_i32_53 = arith.constant 1536 : i32
    %c0_i32_54 = arith.constant 0 : i32
    %61 = tpu.memref_slice %arg3[%c1536_i32_53, %c0_i32_54] : memref<2048x1024xbf16, #tpu.memory_space<any>> -> memref<512x1024xbf16, #tpu.memory_space<any>>
    %c0_i32_55 = arith.constant 0 : i32
    %c0_i32_56 = arith.constant 0 : i32
    %62 = tpu.memref_slice %arg12[%c3_i32_51, %c0_i32_55, %c0_i32_56] : memref<4x512x1024xbf16, #tpu.memory_space<vmem>> -> memref<1x512x1024xbf16, #tpu.memory_space<vmem>>
    %63 = tpu.memref_squeeze %62 : memref<1x512x1024xbf16, #tpu.memory_space<vmem>> -> memref<512x1024xbf16, #tpu.memory_space<vmem>>
    %64 = tpu.memref_slice %arg14[%c3_i32_52] : memref<5x!tpu.dma_semaphore, #tpu.memory_space<semaphore_mem>> -> memref<1x!tpu.dma_semaphore, #tpu.memory_space<semaphore_mem>>
    %65 = tpu.memref_squeeze %64 : memref<1x!tpu.dma_semaphore, #tpu.memory_space<semaphore_mem>> -> memref<!tpu.dma_semaphore, #tpu.memory_space<semaphore_mem>>
    tpu.wait_dma2 semaphore(%65 : memref<!tpu.dma_semaphore, #tpu.memory_space<semaphore_mem>>) src(%61 : memref<512x1024xbf16, #tpu.memory_space<any>>) dst(%63 : memref<512x1024xbf16, #tpu.memory_space<vmem>>)
    %66 = vector.extract_strided_slice %31 {offsets = [0, 1536], sizes = [8, 512], strides = [1, 1]} : vector<8x2048xbf16> to vector<8x512xbf16>
    %c3 = arith.constant 3 : index
    %c0_57 = arith.constant 0 : index
    %c0_58 = arith.constant 0 : index
    %67 = vector.load %arg12[%c3, %c0_57, %c0_58] : memref<4x512x1024xbf16, #tpu.memory_space<vmem>>, vector<1x512x1024xbf16>
    %68 = vector.shape_cast %67 : vector<1x512x1024xbf16> to vector<512x1024xbf16>
    %cst_59 = arith.constant dense<0.000000e+00> : vector<8x1024xf32>
    %69 = tpu.matmul %66, %68, %cst_59 {dimension_numbers = #tpu.dot_dimension_numbers<[1], [0], [0], [1], [0, 0, 1, 1], [], []>} : vector<8x512xbf16>, vector<512x1024xbf16>, vector<8x1024xf32> -> vector<8x1024xf32>
    %70 = arith.addf %60, %69 : vector<8x1024xf32>
    %c0_60 = arith.constant 0 : index
    %c0_61 = arith.constant 0 : index
    %71 = vector.load %arg4[%c0_60, %c0_61] : memref<1x1024xf32, #tpu.memory_space<vmem>>, vector<1x1024xf32>
    %72 = vector.broadcast %71 : vector<1x1024xf32> to vector<8x1024xf32>
    %73 = arith.addf %70, %72 : vector<8x1024xf32>
    %cst_62 = arith.constant 0.000000e+00 : f32
    %74 = vector.broadcast %cst_62 : f32 to vector<8x1024xf32>
    %75 = arith.maximumf %73, %74 : vector<8x1024xf32>
    %c4_i32_63 = arith.constant 4 : i32
    %76 = tpu.memref_slice %arg14[%c4_i32_63] : memref<5x!tpu.dma_semaphore, #tpu.memory_space<semaphore_mem>> -> memref<1x!tpu.dma_semaphore, #tpu.memory_space<semaphore_mem>>
    %77 = tpu.memref_squeeze %76 : memref<1x!tpu.dma_semaphore, #tpu.memory_space<semaphore_mem>> -> memref<!tpu.dma_semaphore, #tpu.memory_space<semaphore_mem>>
    tpu.wait_dma2 semaphore(%77 : memref<!tpu.dma_semaphore, #tpu.memory_space<semaphore_mem>>) src(%arg5 : memref<1024x512xbf16, #tpu.memory_space<any>>) dst(%arg13 : memref<1024x512xbf16, #tpu.memory_space<vmem>>)
    %78 = arith.truncf %75 : vector<8x1024xf32> to vector<8x1024xbf16>
    %c0_64 = arith.constant 0 : index
    %c0_65 = arith.constant 0 : index
    %79 = vector.load %arg13[%c0_64, %c0_65] : memref<1024x512xbf16, #tpu.memory_space<vmem>>, vector<1024x512xbf16>
    %cst_66 = arith.constant dense<0.000000e+00> : vector<8x512xf32>
    %80 = tpu.matmul %78, %79, %cst_66 {dimension_numbers = #tpu.dot_dimension_numbers<[1], [0], [0], [1], [0, 0, 1, 1], [], []>} : vector<8x1024xbf16>, vector<1024x512xbf16>, vector<8x512xf32> -> vector<8x512xf32>
    %c0_67 = arith.constant 0 : index
    %c0_68 = arith.constant 0 : index
    %81 = vector.load %arg6[%c0_67, %c0_68] : memref<1x512xf32, #tpu.memory_space<vmem>>, vector<1x512xf32>
    %82 = vector.broadcast %81 : vector<1x512xf32> to vector<8x512xf32>
    %83 = arith.addf %80, %82 : vector<8x512xf32>
    %cst_69 = arith.constant 0.000000e+00 : f32
    %84 = vector.broadcast %cst_69 : f32 to vector<8x512xf32>
    %85 = arith.maximumf %83, %84 : vector<8x512xf32>
    %86 = arith.truncf %85 : vector<8x512xf32> to vector<8x512xbf16>
    %c0_70 = arith.constant 0 : index
    %c0_71 = arith.constant 0 : index
    %87 = vector.load %arg7[%c0_70, %c0_71] : memref<512x256xbf16, #tpu.memory_space<vmem>>, vector<512x256xbf16>
    %cst_72 = arith.constant dense<0.000000e+00> : vector<8x256xf32>
    %88 = tpu.matmul %86, %87, %cst_72 {dimension_numbers = #tpu.dot_dimension_numbers<[1], [0], [0], [1], [0, 0, 1, 1], [], []>} : vector<8x512xbf16>, vector<512x256xbf16>, vector<8x256xf32> -> vector<8x256xf32>
    %c0_73 = arith.constant 0 : index
    %c0_74 = arith.constant 0 : index
    %89 = vector.load %arg8[%c0_73, %c0_74] : memref<1x256xf32, #tpu.memory_space<vmem>>, vector<1x256xf32>
    %90 = vector.broadcast %89 : vector<1x256xf32> to vector<8x256xf32>
    %91 = arith.addf %88, %90 : vector<8x256xf32>
    %cst_75 = arith.constant 0.000000e+00 : f32
    %92 = vector.broadcast %cst_75 : f32 to vector<8x256xf32>
    %93 = arith.maximumf %91, %92 : vector<8x256xf32>
    %c0_76 = arith.constant 0 : index
    %c0_77 = arith.constant 0 : index
    %94 = vector.load %arg9[%c0_76, %c0_77] : memref<1x256xbf16, #tpu.memory_space<vmem>>, vector<1x256xbf16>
    %95 = arith.extf %94 : vector<1x256xbf16> to vector<1x256xf32>
    %96 = vector.broadcast %95 : vector<1x256xf32> to vector<8x256xf32>
    %97 = arith.mulf %93, %96 : vector<8x256xf32>
    %cst_78 = arith.constant dense<0.000000e+00> : vector<8xf32>
    %98 = vector.multi_reduction <add>, %97, %cst_78 [1] : vector<8x256xf32> to vector<8xf32>
    %99 = vector.shape_cast %98 : vector<8xf32> to vector<8x1xf32>
    %c0_79 = arith.constant 0 : index
    %c0_80 = arith.constant 0 : index
    %100 = vector.load %arg10[%c0_79, %c0_80] : memref<1x1xf32, #tpu.memory_space<vmem>>, vector<1x1xf32>
    %101 = vector.broadcast %100 : vector<1x1xf32> to vector<8x1xf32>
    %102 = arith.addf %99, %101 : vector<8x1xf32>
    %c0_81 = arith.constant 0 : index
    %c0_82 = arith.constant 0 : index
    %103 = vector.load %arg11[%c0_81, %c0_82] : memref<8x1xf32, #tpu.memory_space<vmem>>, vector<8x1xf32>
    tpu.vector_store %arg11[%c0_81, %c0_82], %102 {strides = array<i32>} : memref<8x1xf32, #tpu.memory_space<vmem>>, vector<8x1xf32>,
    return
  }
}

</mosaic_0001>

<bundles_post_ra>
// kernel: net_forward_pallas.1
= control target key start
LH: loop header
LB: loop body
LE: loop exit
PB: predicated region body
PF: predicated region fallthrough
CT: control target
= control target key end

     0   :  { %s6627_s0 = inlined_call_operand.hbm [shape: f32[8,64], index: 0, kind: input, shape index: {}]   ;;  %s6628_s1 = inlined_call_operand.hbm [shape: bf16[64,2048], index: 1, kind: input, shape index: {}]   ;;  %s6629_s2 = inlined_call_operand.hbm [shape: f32[1,2048], index: 2, kind: input, shape index: {}]   ;;  %s6630_s3 = inlined_call_operand.hbm [shape: bf16[2048,1024], index: 3, kind: input, shape index: {}]   ;;  %s6631_s4 = inlined_call_operand.hbm [shape: f32[1,1024], index: 4, kind: input, shape index: {}]   ;;  %s6632_s5 = inlined_call_operand.hbm [shape: bf16[1024,512], index: 5, kind: input, shape index: {}]   ;;  %s6633_s6 = inlined_call_operand.hbm [shape: f32[1,512], index: 6, kind: input, shape index: {}]   ;;  %s6634_s7 = inlined_call_operand.hbm [shape: bf16[512,256], index: 7, kind: input, shape index: {}]   ;;  %s6635_s8 = inlined_call_operand.hbm [shape: f32[1,256], index: 8, kind: input, shape index: {}]   ;;  %s6636_s9 = inlined_call_operand.hbm [shape: bf16[1,256], index: 9, kind: input, shape index: {}]   ;;  %s6637_s10 = inlined_call_operand.<no memory space> [shape: f32[1,1], index: 10, kind: input, shape index: {}]   ;;  %s6638_s11 = inlined_call_operand.vmem [shape: f32[8,1], index: 11, kind: output, shape index: {}]  }
   0x1   :  { %v16_v0 = vstv %s6637_s10 }
   0x2   :  { %17 = vst [vmem:[#allocation5] sm:$0x1] %v16_v0 }
   0x3   :  { %18 = vsyncpa [#allocation7], 0 }
   0x4   :  { %19 = vsyncpa [#allocation9], 0 }
   0x5   :  { %20 = vsyncpa [#allocation12], 0 }
   0x6   :  { %21 = vsyncpa [#allocation15], 0 }
   0x7   :  { %22 = vsyncpa [#allocation18], 0  ;;  %s5264_s19 = smov [#allocation8]   ;;  %s5068_s23 = scalar_lea.hbm %s6628_s1, 8192 }
   0x8   :  { %s38_s20 = sshll.u32 %s5264_s19, 4  ;;  %p5069_p0 = scmp.ne.s32.totalorder %s6628_s1, %s5068_s23  ;;  %s39_s20 = int_to_ptr.vmem [resolvable:$true] %s38_s20 }
   0x9   :  { %p5072_p1 = scmp.lt.u32.totalorder %s5068_s23, %s6628_s1 }
   0xb   :  { %p5074_p2 = pnand %p5072_p1, %p5069_p0 }
   0xd   :  { %5077 = shalt.err (!%p5074_p2)
}
   0xe   :  { %s5078_s10 = scalar_lea.vmem %s39_s20, 8192  ;;  %p5083_p4 = scmp.lt.s32.totalorder %s39_s20, %s39_s20 }
   0xf   :  { %p5079_p3 = scmp.ne.s32.totalorder %s39_s20, %s5078_s10  ;;  %p5084_p5 = scmp.lt.s32.totalorder %s5078_s10, %s5078_s10 }
  0x11   :  { %p5085_p6 = por %p5084_p5, %p5083_p4 }
  0x13   :  { %p5086_p7 = pnand %p5085_p6, %p5079_p3 }
  0x15   :  { %5089 = shalt.err (!%p5086_p7)
}
  0x16   :  { %s5265_s28 = smov 1024   ;;  %s5266_s29 = smov 64  }
  0x17   :  { %44 = dma.hbm_to_vmem [thread:$0]  %s6628_s1, 8192, %s39_s20, [#allocation9], %s5265_s28, %s5265_s28, %s5266_s29  }
  0x18   :  { %s5267_s13 = smov [#allocation11]   ;;  %s5268_s15 = smov [#allocation14]  }
  0x19   :  { %s61_s14 = sshll.u32 %s5267_s13, 4  ;;  %s80_s16 = sshll.u32 %s5268_s15, 4  ;;  %s62_s14 = int_to_ptr.vmem [resolvable:$true] %s61_s14  ;;  %s81_s16 = int_to_ptr.vmem [resolvable:$true] %s80_s16 }
  0x1a   :  { %s5090_s19 = scalar_lea.hbm %s6631_s4, 128 }
  0x1b   :  { %p5091_p8 = scmp.ne.s32.totalorder %s6631_s4, %s5090_s19  ;;  %p5094_p9 = scmp.lt.u32.totalorder %s5090_s19, %s6631_s4 }
  0x1d   :  { %p5096_p10 = pnand %p5094_p9, %p5091_p8 }
  0x1f   :  { %5099 = shalt.err (!%p5096_p10)
}
  0x20   :  { %s5100_s1 = scalar_lea.vmem %s62_s14, 128  ;;  %p5105_p12 = scmp.lt.s32.totalorder %s62_s14, %s62_s14 }
  0x21   :  { %p5101_p11 = scmp.ne.s32.totalorder %s62_s14, %s5100_s1  ;;  %p5106_p13 = scmp.lt.s32.totalorder %s5100_s1, %s5100_s1 }
  0x23   :  { %p5107_p0 = por %p5106_p13, %p5105_p12 }
  0x25   :  { %p5108_p1 = pnand %p5107_p0, %p5101_p11 }
  0x27   :  { %5111 = shalt.err (!%p5108_p1)
}
  0x28   :  { %64 = dma.hbm_to_vmem [thread:$0]  %s6631_s4, 128, %s62_s14, [#allocation12]  }
  0x29   :  { %s5112_s10 = scalar_lea.hbm %s6634_s7, 8192 }
  0x2a   :  { %p5113_p2 = scmp.ne.s32.totalorder %s6634_s7, %s5112_s10  ;;  %p5116_p3 = scmp.lt.u32.totalorder %s5112_s10, %s6634_s7 }
  0x2c   :  { %p5118_p4 = pnand %p5116_p3, %p5113_p2 }
  0x2e   :  { %5121 = shalt.err (!%p5118_p4)
}
  0x2f   :  { %s5122_s17 = scalar_lea.vmem %s81_s16, 8192  ;;  %p5127_p6 = scmp.lt.s32.totalorder %s81_s16, %s81_s16 }
  0x30   :  { %p5123_p5 = scmp.ne.s32.totalorder %s81_s16, %s5122_s17  ;;  %p5128_p7 = scmp.lt.s32.totalorder %s5122_s17, %s5122_s17 }
  0x32   :  { %p5129_p8 = por %p5128_p7, %p5127_p6 }
  0x34   :  { %p5130_p9 = pnand %p5129_p8, %p5123_p5 }
  0x36   :  { %5133 = shalt.err (!%p5130_p9)
}
  0x37   :  { %s5269_s4 = smov 128   ;;  %s5270_s14 = smov 8  }
  0x38   :  { %86 = dma.hbm_to_vmem [thread:$0]  %s6634_s7, 8192, %s81_s16, [#allocation15], %s5269_s4, %s5269_s4, %s5270_s14  }
  0x39   :  { %s5271_s21 = smov [#allocation6]   ;;  %s5272_s23 = smov [#allocation10]  }
  0x3a   :  { %s29_s22 = sshll.u32 %s5271_s21, 4  ;;  %s51_s24 = sshll.u32 %s5272_s23, 4  ;;  %s30_s22 = int_to_ptr.vmem [resolvable:$true] %s29_s22  ;;  %s52_s24 = int_to_ptr.vmem [resolvable:$true] %s51_s24 }
  0x3b   :  { %s5134_s25 = scalar_lea.hbm %s6627_s0, 128 }
  0x3c   :  { %p5135_p10 = scmp.ne.s32.totalorder %s6627_s0, %s5134_s25  ;;  %p5138_p11 = scmp.lt.u32.totalorder %s5134_s25, %s6627_s0 }
  0x3e   :  { %p5140_p12 = pnand %p5138_p11, %p5135_p10 }
  0x40   :  { %5143 = shalt.err (!%p5140_p12)
}
  0x41   :  { %s5144_s7 = scalar_lea.vmem %s30_s22, 128  ;;  %p5149_p0 = scmp.lt.s32.totalorder %s30_s22, %s30_s22 }
  0x42   :  { %p5145_p13 = scmp.ne.s32.totalorder %s30_s22, %s5144_s7  ;;  %p5150_p1 = scmp.lt.s32.totalorder %s5144_s7, %s5144_s7 }
  0x44   :  { %p5151_p2 = por %p5150_p1, %p5149_p0 }
  0x46   :  { %p5152_p3 = pnand %p5151_p2, %p5145_p13 }
  0x48   :  { %5155 = shalt.err (!%p5152_p3)
}
  0x49   :  { %32 = dma.hbm_to_vmem [thread:$0]  %s6627_s0, 128, %s30_s22, [#allocation7]  }
  0x4a   :  { %s5156_s17 = scalar_lea.hbm %s6629_s2, 256 }
  0x4b   :  { %p5157_p4 = scmp.ne.s32.totalorder %s6629_s2, %s5156_s17  ;;  %p5160_p5 = scmp.lt.u32.totalorder %s5156_s17, %s6629_s2 }
  0x4d   :  { %p5162_p6 = pnand %p5160_p5, %p5157_p4 }
  0x4f   :  { %5165 = shalt.err (!%p5162_p6)
}
  0x50   :  { %s5166_s1 = scalar_lea.vmem %s52_s24, 256  ;;  %p5171_p8 = scmp.lt.s32.totalorder %s52_s24, %s52_s24 }
  0x51   :  { %p5167_p7 = scmp.ne.s32.totalorder %s52_s24, %s5166_s1  ;;  %p5172_p9 = scmp.lt.s32.totalorder %s5166_s1, %s5166_s1 }
  0x53   :  { %p5173_p10 = por %p5172_p9, %p5171_p8 }
  0x55   :  { %p5174_p11 = pnand %p5173_p10, %p5167_p7 }
  0x57   :  { %5177 = shalt.err (!%p5174_p11)
}
  0x58   :  { %54 = dma.hbm_to_vmem [thread:$0]  %s6629_s2, 256, %s52_s24, [#allocation9]  }
  0x59   :  { %s5273_s20 = smov [#allocation13]   ;;  %s5274_s26 = smov [#allocation16]  }
  0x5a   :  { %s71_s25 = sshll.u32 %s5273_s20, 4  ;;  %s93_s27 = sshll.u32 %s5274_s26, 4  ;;  %s72_s25 = int_to_ptr.vmem [resolvable:$true] %s71_s25  ;;  %s94_s27 = int_to_ptr.vmem [resolvable:$true] %s93_s27 }
  0x5b   :  { %s5178_s7 = scalar_lea.hbm %s6633_s6, 64 }
  0x5c   :  { %p5179_p12 = scmp.ne.s32.totalorder %s6633_s6, %s5178_s7  ;;  %p5182_p13 = scmp.lt.u32.totalorder %s5178_s7, %s6633_s6 }
  0x5e   :  { %p5184_p0 = pnand %p5182_p13, %p5179_p12 }
  0x60   :  { %5187 = shalt.err (!%p5184_p0)
}
  0x61   :  { %s5188_s2 = scalar_lea.vmem %s72_s25, 64  ;;  %p5193_p2 = scmp.lt.s32.totalorder %s72_s25, %s72_s25 }
  0x62   :  { %p5189_p1 = scmp.ne.s32.totalorder %s72_s25, %s5188_s2  ;;  %p5194_p3 = scmp.lt.s32.totalorder %s5188_s2, %s5188_s2 }
  0x64   :  { %p5195_p4 = por %p5194_p3, %p5193_p2 }
  0x66   :  { %p5196_p5 = pnand %p5195_p4, %p5189_p1 }
  0x68   :  { %5199 = shalt.err (!%p5196_p5)
}
  0x69   :  { %74 = dma.hbm_to_vmem [thread:$0]  %s6633_s6, 64, %s72_s25, [#allocation12]  }
  0x6a   :  { %s5200_s21 = scalar_lea.hbm %s6635_s8, 32 }
  0x6b   :  { %p5201_p6 = scmp.ne.s32.totalorder %s6635_s8, %s5200_s21  ;;  %p5204_p7 = scmp.lt.u32.totalorder %s5200_s21, %s6635_s8 }
  0x6d   :  { %p5206_p8 = pnand %p5204_p7, %p5201_p6 }
  0x6f   :  { %5209 = shalt.err (!%p5206_p8)
}
  0x70   :  { %s5210_s20 = scalar_lea.vmem %s94_s27, 32  ;;  %p5215_p10 = scmp.lt.s32.totalorder %s94_s27, %s94_s27 }
  0x71   :  { %p5211_p9 = scmp.ne.s32.totalorder %s94_s27, %s5210_s20  ;;  %p5216_p11 = scmp.lt.s32.totalorder %s5210_s20, %s5210_s20 }
  0x73   :  { %p5217_p12 = por %p5216_p11, %p5215_p10 }
  0x75   :  { %p5218_p13 = pnand %p5217_p12, %p5211_p9 }
  0x77   :  { %5221 = shalt.err (!%p5218_p13)
}
  0x78   :  { %96 = dma.hbm_to_vmem [thread:$0]  %s6635_s8, 32, %s94_s27, [#allocation15]  }
  0x79   :  { %s5275_s26 = smov [#allocation17]   ;;  %s5222_s16 = scalar_lea.hbm %s6636_s9, 32 }
  0x7a   :  { %s103_s10 = sshll.u32 %s5275_s26, 4  ;;  %p5223_p0 = scmp.ne.s32.totalorder %s6636_s9, %s5222_s16  ;;  %s104_s10 = int_to_ptr.vmem [resolvable:$true] %s103_s10 }
  0x7b   :  { %p5226_p1 = scmp.lt.u32.totalorder %s5222_s16, %s6636_s9 }
  0x7d   :  { %p5228_p2 = pnand %p5226_p1, %p5223_p0 }
  0x7f   :  { %5231 = shalt.err (!%p5228_p2)
}
  0x80   :  { %s5232_s24 = scalar_lea.vmem %s104_s10, 32  ;;  %p5237_p4 = scmp.lt.s32.totalorder %s104_s10, %s104_s10 }
  0x81   :  { %p5233_p3 = scmp.ne.s32.totalorder %s104_s10, %s5232_s24  ;;  %p5238_p5 = scmp.lt.s32.totalorder %s5232_s24, %s5232_s24 }
  0x83   :  { %p5239_p6 = por %p5238_p5, %p5237_p4 }
  0x85   :  { %p5240_p7 = pnand %p5239_p6, %p5233_p3 }
  0x87   :  { %5243 = shalt.err (!%p5240_p7)
}
  0x88   :  { %106 = dma.hbm_to_vmem [thread:$0]  %s6636_s9, 32, %s104_s10, [#allocation18]  }
  0x89   :  { %5244 = dma.done.wait [#allocation7], 128  }
  0x8a   :  { %5245 = vsyncadd [#allocation7], 4294967168 }
  0x8b   :  { %5246 = dma.done.wait [#allocation9], 8448  }
  0x8c   :  { %5247 = vsyncadd [#allocation9], 4294958848 }
  0x8d   :  { %5248 = dma.done.wait [#allocation12], 192  }
  0x8e   :  { %5249 = vsyncadd [#allocation12], 4294967104 }
  0x8f   :  { %5250 = dma.done.wait [#allocation15], 8224  }
  0x90   :  { %5251 = vsyncadd [#allocation15], 4294959072 }
  0x91   :  { %5252 = dma.done.wait [#allocation18], 32  }
  0x92   :  { %5253 = vsyncadd [#allocation18], 4294967264  ;;  %s138_s17 = sld [smem:[#allocation0]]   ;;  %150 = sst [smem:[#allocation20]] %s5265_s28  ;;  %v5276_v1 = vmov 0   ;;  %vm785_vm0 = vcmask 523264  }
  0x93   :  { %821 = vmatprep.mubr.bf16.mxu0 %v5276_v1  ;;  %862 = vmatprep.mubr.bf16.mxu1 %v5276_v1  ;;  %152 = sst [smem:[#allocation20 + $0x1]] %s5265_s28  ;;  %s5277_s9 = smov [#allocation2]  }
  0x94   :  { %154 = sst [smem:[#allocation20 + $0x2]] %s5270_s14  ;;  %s146_s18 = sshll.u32 %s5277_s9, 4  ;;  %s147_s18 = int_to_ptr.vmem [resolvable:$true] %s146_s18 }
  0x95   :  { %156 = sst [smem:[#allocation20 + $0x3]] %s5266_s29  ;;  %s5278_s19 = smov 2  }
  0x96   :  { %158 = sst [smem:[#allocation20 + $0x4]] %s5269_s4  ;;  %s5279_s23 = smov 512  }
  0x97   :  { %160 = sst [smem:[#allocation20 + $0x5]] %s5278_s19  ;;  %s5280_s0 = smov 4  }
  0x98   :  { %s4754_s21 = sshll.u32 %s138_s17, 26  ;;  %162 = sst [smem:[#allocation20 + $0x6]] %s5279_s23 }
  0x99   :  { %s5470_s1 = sadd.s32 134217728, %s4754_s21  ;;  %164 = sst [smem:[#allocation20 + $0x7]] %s5266_s29 }
  0x9a   :  { %166 = sst [smem:[#allocation20 + $0x8]] %s5280_s0  ;;  %s5281_s22 = smov [#allocation4]  }
  0x9b   :  { %s5282_s20 = smov [#allocation19]   ;;  %s5283_s26 = smov [#allocation2 + $0x800]  }
  0x9c   :  { %168 = dma.general %s6630_s3, 32768, %s147_s18, %s5281_s22, %s5282_s20, [#allocation20], %s5470_s1, 0  }
  0x9d   :  { %187 = sst [smem:[#allocation22]] %s5265_s28  ;;  %s183_s10 = sshll.u32 %s5283_s26, 4  ;;  %s184_s10 = int_to_ptr.vmem [resolvable:$true] %s183_s10 }
  0x9e   :  { %189 = sst [smem:[#allocation22 + $0x1]] %s5265_s28  ;;  %s169_s16 = scalar_lea.hbm %s6630_s3, 32768 }
  0x9f   :  { %191 = sst [smem:[#allocation22 + $0x2]] %s5270_s14  ;;  %s5284_s12 = smov [#allocation4 + $0x1]  }
  0xa0   :  { %193 = sst [smem:[#allocation22 + $0x3]] %s5266_s29  ;;  %s5285_s13 = smov [#allocation21]  }
  0xa1   :  { %195 = sst [smem:[#allocation22 + $0x4]] %s5269_s4  ;;  %s5286_s15 = smov [#allocation2 + $0x1000]  }
  0xa2   :  { %197 = sst [smem:[#allocation22 + $0x5]] %s5278_s19  ;;  %s220_s2 = sshll.u32 %s5286_s15, 4  ;;  %s221_s2 = int_to_ptr.vmem [resolvable:$true] %s220_s2 }
  0xa3   :  { %199 = sst [smem:[#allocation22 + $0x6]] %s5279_s23  ;;  %s206_s27 = scalar_lea.hbm %s6630_s3, 65536 }
  0xa4   :  { %201 = sst [smem:[#allocation22 + $0x7]] %s5266_s29  ;;  %s5287_s17 = smov [#allocation4 + $0x2]  }
  0xa5   :  { %203 = sst [smem:[#allocation22 + $0x8]] %s5280_s0  ;;  %s5288_s9 = smov [#allocation23]  }
  0xa6   :  { %205 = dma.general %s169_s16, 32768, %s184_s10, %s5284_s12, %s5285_s13, [#allocation22], %s5470_s1, 0  }
  0xa7   :  { %224 = sst [smem:[#allocation24]] %s5265_s28  ;;  %s5289_s18 = smov [#allocation2 + $0x1800]  }
  0xa8   :  { %226 = sst [smem:[#allocation24 + $0x1]] %s5265_s28  ;;  %s257_s21 = sshll.u32 %s5289_s18, 4  ;;  %s258_s21 = int_to_ptr.vmem [resolvable:$true] %s257_s21 }
  0xa9   :  { %228 = sst [smem:[#allocation24 + $0x2]] %s5270_s14  ;;  %s243_s6 = scalar_lea.hbm %s6630_s3, 98304 }
  0xaa   :  { %230 = sst [smem:[#allocation24 + $0x3]] %s5266_s29  ;;  %s5291_s25 = smov [#allocation25]  }
  0xab   :  { %232 = sst [smem:[#allocation24 + $0x4]] %s5269_s4  ;;  %s5292_s3 = smov [#allocation3]  }
  0xac   :  { %234 = sst [smem:[#allocation24 + $0x5]] %s5278_s19  ;;  %s5293_s26 = smov 256  }
  0xad   :  { %236 = sst [smem:[#allocation24 + $0x6]] %s5279_s23  ;;  %s5294_s10 = smov [#allocation4 + $0x4]  }
  0xae   :  { %238 = sst [smem:[#allocation24 + $0x7]] %s5266_s29  ;;  %s5295_s30 = smov [#allocation27]  }
  0xaf   :  { %240 = sst [smem:[#allocation24 + $0x8]] %s5280_s0 }
  0xb0   :  { %242 = dma.general %s206_s27, 32768, %s221_s2, %s5287_s17, %s5288_s9, [#allocation24], %s5470_s1, 0  }
  0xb1   :  { %261 = sst [smem:[#allocation26]] %s5265_s28 }
  0xb2   :  { %263 = sst [smem:[#allocation26 + $0x1]] %s5265_s28  ;;  %s5290_s28 = smov [#allocation4 + $0x3]  }
  0xb3   :  { %265 = sst [smem:[#allocation26 + $0x2]] %s5270_s14  ;;  %s292_s14 = sshll.u32 %s5292_s3, 4  ;;  %s293_s14 = int_to_ptr.vmem [resolvable:$true] %s292_s14 }
  0xb4   :  { %267 = sst [smem:[#allocation26 + $0x3]] %s5266_s29 }
  0xb5   :  { %269 = sst [smem:[#allocation26 + $0x4]] %s5269_s4 }
  0xb6   :  { %271 = sst [smem:[#allocation26 + $0x5]] %s5278_s19 }
  0xb7   :  { %273 = sst [smem:[#allocation26 + $0x6]] %s5279_s23 }
  0xb8   :  { %275 = sst [smem:[#allocation26 + $0x7]] %s5266_s29 }
  0xb9   :  { %277 = sst [smem:[#allocation26 + $0x8]] %s5280_s0 }
  0xba   :  { %279 = dma.general %s243_s6, 32768, %s258_s21, %s5290_s28, %s5291_s25, [#allocation26], %s5470_s1, 0  }
  0xbb   :  { %296 = sst [smem:[#allocation28]] %s5279_s23 }
  0xbc   :  { %298 = sst [smem:[#allocation28 + $0x1]] %s5279_s23 }
  0xbd   :  { %300 = sst [smem:[#allocation28 + $0x2]] %s5280_s0 }
  0xbe   :  { %302 = sst [smem:[#allocation28 + $0x3]] %s5266_s29 }
  0xbf   :  { %304 = sst [smem:[#allocation28 + $0x4]] %s5269_s4 }
  0xc0   :  { %306 = sst [smem:[#allocation28 + $0x5]] %s5278_s19 }
  0xc1   :  { %308 = sst [smem:[#allocation28 + $0x6]] %s5293_s26 }
  0xc2   :  { %310 = sst [smem:[#allocation28 + $0x7]] %s5266_s29 }
  0xc3   :  { %312 = sst [smem:[#allocation28 + $0x8]] %s5280_s0 }
  0xc4   :  { %314 = dma.general %s6632_s5, 32768, %s293_s14, %s5294_s10, %s5295_s30, [#allocation28], %s5470_s1, 0  }
  0xc5   :  { %v317_v2 = vld [vmem:[#allocation8] sm:$0xff]  ;;  %v318_v4 = vld [vmem:[#allocation8 + $0x8] sm:$0xff]  ;;  %v319_v32 = vld [vmem:[#allocation8 + $0x10] sm:$0xff] }
  0xc6   :  { %v325_v3 = vld [vmem:[#allocation8 + $0x40] sm:$0xff]  ;;  %v326_v6 = vld [vmem:[#allocation8 + $0x48] sm:$0xff]  ;;  %v327_v33 = vld [vmem:[#allocation8 + $0x50] sm:$0xff] }
  0xc7   :  { %v4765_v5 = vcombine.high %v317_v2, %v325_v3  ;;  %v4764_v7 = vcombine.low %v317_v2, %v325_v3  ;;  %v333_v8 = vld [vmem:[#allocation8 + $0x80] sm:$0xff]  ;;  %v4767_v10 = vcombine.high %v318_v4, %v326_v6  ;;  %v4766_v11 = vcombine.low %v318_v4, %v326_v6  ;;  %v334_v13 = vld [vmem:[#allocation8 + $0x88] sm:$0xff]  ;;  %v320_v34 = vld [vmem:[#allocation8 + $0x18] sm:$0xff] }
  0xc8   :  { %v341_v9 = vld [vmem:[#allocation8 + $0xc0] sm:$0xff]  ;;  %v342_v14 = vld [vmem:[#allocation8 + $0xc8] sm:$0xff]  ;;  %v328_v35 = vld [vmem:[#allocation8 + $0x58] sm:$0xff]  ;;  %v4769_v39 = vcombine.high %v319_v32, %v327_v33  ;;  %v4768_v46 = vcombine.low %v319_v32, %v327_v33 }
  0xc9   :  { %v4781_v12 = vcombine.high %v333_v8, %v341_v9  ;;  %v349_v15 = vld [vmem:[#allocation8 + $0x100] sm:$0xff]  ;;  %789 = vmatprep.subr.bf16.mxu0 %v4765_v5  ;;  %v4783_v16 = vcombine.high %v334_v13, %v342_v14  ;;  %v350_v18 = vld [vmem:[#allocation8 + $0x108] sm:$0xff]  ;;  %830 = vmatprep.subr.bf16.mxu1 %v4767_v10  ;;  %v4780_v20 = vcombine.low %v333_v8, %v341_v9  ;;  %v315_v37 = vld [vmem:[#allocation6] sm:$0xff] }
  0xca   :  { %v357_v17 = vld [vmem:[#allocation8 + $0x140] sm:$0xff]  ;;  %v358_v19 = vld [vmem:[#allocation8 + $0x148] sm:$0xff]  ;;  %790 = vmatpush1.bf16.msra.mxu0 %v4764_v7  ;;  %831 = vmatpush1.bf16.msra.mxu1 %v4766_v11  ;;  %v4782_v21 = vcombine.low %v334_v13, %v342_v14  ;;  %v4771_v40 = vcombine.high %v320_v34, %v328_v35  ;;  %v335_v41 = vld [vmem:[#allocation8 + $0x90] sm:$0xff]  ;;  %v5529_v43 = vpack.c.bf16 %v315_v37, %v315_v37 }
  0xcb   :  { %791 = vmatprep.subr.bf16.mxu0 %v4781_v12  ;;  %v4797_v22 = vcombine.high %v349_v15, %v357_v17  ;;  %832 = vmatprep.subr.bf16.mxu1 %v4783_v16  ;;  %v4799_v23 = vcombine.high %v350_v18, %v358_v19  ;;  %v365_v24 = vld [vmem:[#allocation8 + $0x180] sm:$0xff]  ;;  %v366_v26 = vld [vmem:[#allocation8 + $0x188] sm:$0xff]  ;;  %v4796_v28 = vcombine.low %v349_v15, %v357_v17  ;;  %v343_v42 = vld [vmem:[#allocation8 + $0xd0] sm:$0xff] }
  0xcc   :  { %v373_v25 = vld [vmem:[#allocation8 + $0x1c0] sm:$0xff]  ;;  %v374_v27 = vld [vmem:[#allocation8 + $0x1c8] sm:$0xff]  ;;  %v4798_v29 = vcombine.low %v350_v18, %v358_v19  ;;  %v336_v44 = vld [vmem:[#allocation8 + $0x98] sm:$0xff]  ;;  %v4770_v47 = vcombine.low %v320_v34, %v328_v35  ;;  %v4785_v48 = vcombine.high %v335_v41, %v343_v42  ;;  %v4784_v54 = vcombine.low %v335_v41, %v343_v42 }
  0xcd   :  { %v4813_v30 = vcombine.high %v365_v24, %v373_v25  ;;  %v4815_v31 = vcombine.high %v366_v26, %v374_v27  ;;  %v4812_v36 = vcombine.low %v365_v24, %v373_v25  ;;  %v4814_v38 = vcombine.low %v366_v26, %v374_v27  ;;  %v344_v45 = vld [vmem:[#allocation8 + $0xd8] sm:$0xff]  ;;  %v351_v50 = vld [vmem:[#allocation8 + $0x110] sm:$0xff]  ;;  %v321_v3 = vld [vmem:[#allocation8 + $0x20] sm:$0xff] }
  0xce   :  { %792 = vmatpush1.bf16.msra.mxu0 %v4780_v20  ;;  %833 = vmatpush1.bf16.msra.mxu1 %v4782_v21  ;;  %v4787_v49 = vcombine.high %v336_v44, %v344_v45  ;;  %v359_v51 = vld [vmem:[#allocation8 + $0x150] sm:$0xff]  ;;  %v352_v52 = vld [vmem:[#allocation8 + $0x118] sm:$0xff]  ;;  %v4786_v55 = vcombine.low %v336_v44, %v344_v45  ;;  %v329_v4 = vld [vmem:[#allocation8 + $0x60] sm:$0xff] }
  0xcf   :  { %793 = vmatprep.subr.bf16.mxu0 %v4797_v22  ;;  %834 = vmatprep.subr.bf16.mxu1 %v4799_v23  ;;  %v360_v53 = vld [vmem:[#allocation8 + $0x158] sm:$0xff]  ;;  %v4801_v56 = vcombine.high %v351_v50, %v359_v51  ;;  %v367_v58 = vld [vmem:[#allocation8 + $0x190] sm:$0xff]  ;;  %v4800_v62 = vcombine.low %v351_v50, %v359_v51  ;;  %v322_v5 = vld [vmem:[#allocation8 + $0x28] sm:$0xff]  ;;  %v4773_v9 = vcombine.high %v321_v3, %v329_v4 }
  0xd0   :  { %v4803_v57 = vcombine.high %v352_v52, %v360_v53  ;;  %v375_v59 = vld [vmem:[#allocation8 + $0x1d0] sm:$0xff]  ;;  %v368_v60 = vld [vmem:[#allocation8 + $0x198] sm:$0xff]  ;;  %v4802_v63 = vcombine.low %v352_v52, %v360_v53  ;;  %v330_v6 = vld [vmem:[#allocation8 + $0x68] sm:$0xff]  ;;  %v4772_v15 = vcombine.low %v321_v3, %v329_v4 }
  0xd1   :  { %v376_v61 = vld [vmem:[#allocation8 + $0x1d8] sm:$0xff]  ;;  %v4817_v0 = vcombine.high %v367_v58, %v375_v59  ;;  %v4816_v7 = vcombine.low %v367_v58, %v375_v59  ;;  %v4775_v10 = vcombine.high %v322_v5, %v330_v6  ;;  %v337_v11 = vld [vmem:[#allocation8 + $0xa0] sm:$0xff]  ;;  %v338_v13 = vld [vmem:[#allocation8 + $0xa8] sm:$0xff]  ;;  %v4774_v16 = vcombine.low %v322_v5, %v330_v6 }
  0xd2   :  { %794 = vmatpush1.bf16.msra.mxu0 %v4796_v28  ;;  %835 = vmatpush1.bf16.msra.mxu1 %v4798_v29  ;;  %v4819_v2 = vcombine.high %v368_v60, %v376_v61  ;;  %v4818_v8 = vcombine.low %v368_v60, %v376_v61  ;;  %v345_v12 = vld [vmem:[#allocation8 + $0xe0] sm:$0xff]  ;;  %v346_v14 = vld [vmem:[#allocation8 + $0xe8] sm:$0xff]  ;;  %v323_v35 = vld [vmem:[#allocation8 + $0x30] sm:$0xff] }
  0xd3   :  { %795 = vmatprep.subr.bf16.mxu0 %v4813_v30  ;;  %836 = vmatprep.subr.bf16.mxu1 %v4815_v31  ;;  %v4789_v17 = vcombine.high %v337_v11, %v345_v12  ;;  %v4791_v18 = vcombine.high %v338_v13, %v346_v14  ;;  %v353_v19 = vld [vmem:[#allocation8 + $0x120] sm:$0xff]  ;;  %v354_v21 = vld [vmem:[#allocation8 + $0x128] sm:$0xff]  ;;  %v4788_v23 = vcombine.low %v337_v11, %v345_v12  ;;  %v324_v37 = vld [vmem:[#allocation8 + $0x38] sm:$0xff] }
  0xd4   :  { %v361_v20 = vld [vmem:[#allocation8 + $0x160] sm:$0xff]  ;;  %v362_v22 = vld [vmem:[#allocation8 + $0x168] sm:$0xff]  ;;  %v4790_v24 = vcombine.low %v338_v13, %v346_v14  ;;  %v339_v44 = vld [vmem:[#allocation8 + $0xb0] sm:$0xff] }
  0xd5   :  { %v4805_v25 = vcombine.high %v353_v19, %v361_v20  ;;  %v4807_v26 = vcombine.high %v354_v21, %v362_v22  ;;  %v369_v27 = vld [vmem:[#allocation8 + $0x1a0] sm:$0xff]  ;;  %v370_v29 = vld [vmem:[#allocation8 + $0x1a8] sm:$0xff]  ;;  %v4804_v31 = vcombine.low %v353_v19, %v361_v20  ;;  %v4806_v32 = vcombine.low %v354_v21, %v362_v22  ;;  %v347_v45 = vld [vmem:[#allocation8 + $0xf0] sm:$0xff] }
  0xd6   :  { %796 = vmatpush1.bf16.msra.mxu0 %v4812_v36  ;;  %837 = vmatpush1.bf16.msra.mxu1 %v4814_v38  ;;  %v377_v28 = vld [vmem:[#allocation8 + $0x1e0] sm:$0xff]  ;;  %v378_v30 = vld [vmem:[#allocation8 + $0x1e8] sm:$0xff]  ;;  %v331_v36 = vld [vmem:[#allocation8 + $0x70] sm:$0xff]  ;;  %v4793_v50 = vcombine.high %v339_v44, %v347_v45 }
  0xd7   :  { %871 = vmatprep.subr.bf16.mxu0 %v4769_v39  ;;  %912 = vmatprep.subr.bf16.mxu1 %v4771_v40  ;;  %v4821_v33 = vcombine.high %v369_v27, %v377_v28  ;;  %v4823_v34 = vcombine.high %v370_v29, %v378_v30  ;;  %v332_v38 = vld [vmem:[#allocation8 + $0x78] sm:$0xff]  ;;  %v4820_v39 = vcombine.low %v369_v27, %v377_v28  ;;  %v355_v52 = vld [vmem:[#allocation8 + $0x130] sm:$0xff] }
  0xd8   :  { %v4822_v40 = vcombine.low %v370_v29, %v378_v30  ;;  %v4777_v41 = vcombine.high %v323_v35, %v331_v36  ;;  %v4779_v42 = vcombine.high %v324_v37, %v332_v38  ;;  %v363_v53 = vld [vmem:[#allocation8 + $0x170] sm:$0xff] }
  0xd9   :  { %4828 = vmatmul.mubr.msk.bf16.vlgmr.msra.gmra.mrb[0].mxu0 %vm785_vm0, %v5529_v43  ;;  %4829 = vmatmul.mubr.msk.bf16.vlgmr.msra.gmra.mrb[0].mxu1 %vm785_vm0, %v5529_v43  ;;  %v4809_v58 = vcombine.high %v355_v52, %v363_v53  ;;  %v371_v60 = vld [vmem:[#allocation8 + $0x1b0] sm:$0xff] }
  0xda   :  { %872 = vmatpush1.bf16.msra.mxu0 %v4768_v46  ;;  %913 = vmatpush1.bf16.msra.mxu1 %v4770_v47  ;;  %v340_v46 = vld [vmem:[#allocation8 + $0xb8] sm:$0xff]  ;;  %v379_v61 = vld [vmem:[#allocation8 + $0x1f0] sm:$0xff] }
  0xdb   :  { %873 = vmatprep.subr.bf16.mxu0 %v4785_v48  ;;  %914 = vmatprep.subr.bf16.mxu1 %v4787_v49  ;;  %v348_v47 = vld [vmem:[#allocation8 + $0xf8] sm:$0xff]  ;;  %v4776_v48 = vcombine.low %v323_v35, %v331_v36  ;;  %v4778_v49 = vcombine.low %v324_v37, %v332_v38  ;;  %v4825_v3 = vcombine.high %v371_v60, %v379_v61 }
  0xdc   :  { %903 = vmatprep.mubr.bf16.mxu0 %v5276_v1  ;;  %944 = vmatprep.mubr.bf16.mxu1 %v5276_v1  ;;  %v4795_v51 = vcombine.high %v340_v46, %v348_v47  ;;  %v4824_v5 = vcombine.low %v371_v60, %v379_v61 }
  0xde   :  { %874 = vmatpush1.bf16.msra.mxu0 %v4784_v54  ;;  %915 = vmatpush1.bf16.msra.mxu1 %v4786_v55  ;;  %v356_v54 = vld [vmem:[#allocation8 + $0x138] sm:$0xff] }
  0xdf   :  { %875 = vmatprep.subr.bf16.mxu0 %v4801_v56  ;;  %916 = vmatprep.subr.bf16.mxu1 %v4803_v57  ;;  %v364_v55 = vld [vmem:[#allocation8 + $0x178] sm:$0xff]  ;;  %v4792_v56 = vcombine.low %v339_v44, %v347_v45  ;;  %v4794_v57 = vcombine.low %v340_v46, %v348_v47 }
  0xe0   :  { %v4811_v59 = vcombine.high %v356_v54, %v364_v55 }
  0xe2   :  { %876 = vmatpush1.bf16.msra.mxu0 %v4800_v62  ;;  %917 = vmatpush1.bf16.msra.mxu1 %v4802_v63  ;;  %v372_v62 = vld [vmem:[#allocation8 + $0x1b8] sm:$0xff] }
  0xe3   :  { %877 = vmatprep.subr.bf16.mxu0 %v4817_v0  ;;  %918 = vmatprep.subr.bf16.mxu1 %v4819_v2  ;;  %v380_v63 = vld [vmem:[#allocation8 + $0x1f8] sm:$0xff]  ;;  %v4808_v0 = vcombine.low %v355_v52, %v363_v53  ;;  %v4810_v2 = vcombine.low %v356_v54, %v364_v55 }
  0xe4   :  { %v4827_v4 = vcombine.high %v372_v62, %v380_v63  ;;  %v4826_v6 = vcombine.low %v372_v62, %v380_v63 }
  0xe6   :  { %878 = vmatpush1.bf16.msra.mxu0 %v4816_v7  ;;  %919 = vmatpush1.bf16.msra.mxu1 %v4818_v8 }
  0xe7   :  { %953 = vmatprep.subr.bf16.mxu0 %v4773_v9  ;;  %994 = vmatprep.subr.bf16.mxu1 %v4775_v10  ;;  %v381_v9 = vld [vmem:[#allocation10] sm:$0xff] }
  0xe9   :  { %4830 = vmatmul.mubr.msk.bf16.vlgmr.msra.gmra.mrb[4].mxu0 %vm785_vm0, %v5529_v43  ;;  %4831 = vmatmul.mubr.msk.bf16.vlgmr.msra.gmra.mrb[4].mxu1 %vm785_vm0, %v5529_v43 }
  0xea   :  { %954 = vmatpush1.bf16.msra.mxu0 %v4772_v15  ;;  %995 = vmatpush1.bf16.msra.mxu1 %v4774_v16 }
  0xeb   :  { %955 = vmatprep.subr.bf16.mxu0 %v4789_v17  ;;  %996 = vmatprep.subr.bf16.mxu1 %v4791_v18 }
  0xec   :  { %985 = vmatprep.mubr.bf16.mxu0 %v5276_v1  ;;  %1026 = vmatprep.mubr.bf16.mxu1 %v5276_v1 }
  0xee   :  { %956 = vmatpush1.bf16.msra.mxu0 %v4788_v23  ;;  %997 = vmatpush1.bf16.msra.mxu1 %v4790_v24 }
  0xef   :  { %957 = vmatprep.subr.bf16.mxu0 %v4805_v25  ;;  %998 = vmatprep.subr.bf16.mxu1 %v4807_v26 }
  0xf2   :  { %958 = vmatpush1.bf16.msra.mxu0 %v4804_v31  ;;  %999 = vmatpush1.bf16.msra.mxu1 %v4806_v32 }
  0xf3   :  { %959 = vmatprep.subr.bf16.mxu0 %v4821_v33  ;;  %1000 = vmatprep.subr.bf16.mxu1 %v4823_v34 }
  0xf6   :  { %960 = vmatpush1.bf16.msra.mxu0 %v4820_v39  ;;  %1001 = vmatpush1.bf16.msra.mxu1 %v4822_v40 }
  0xf7   :  { %1035 = vmatprep.subr.bf16.mxu0 %v4777_v41  ;;  %1076 = vmatprep.subr.bf16.mxu1 %v4779_v42 }
  0xf9   :  { %4832 = vmatmul.mubr.msk.bf16.vlgmr.msra.gmra.mrb[8].mxu0 %vm785_vm0, %v5529_v43  ;;  %4833 = vmatmul.mubr.msk.bf16.vlgmr.msra.gmra.mrb[8].mxu1 %vm785_vm0, %v5529_v43 }
  0xfa   :  { %1036 = vmatpush1.bf16.msra.mxu0 %v4776_v48  ;;  %1077 = vmatpush1.bf16.msra.mxu1 %v4778_v49 }
  0xfb   :  { %1037 = vmatprep.subr.bf16.mxu0 %v4793_v50  ;;  %1078 = vmatprep.subr.bf16.mxu1 %v4795_v51 }
  0xfc   :  { %1067 = vmatprep.mubr.bf16.mxu0 %v5276_v1  ;;  %1108 = vmatprep.mubr.bf16.mxu1 %v5276_v1  ;;  %v385_v1 = vlaneseq }
  0xfe   :  { %1038 = vmatpush1.bf16.msra.mxu0 %v4792_v56  ;;  %1079 = vmatpush1.bf16.msra.mxu1 %v4794_v57  ;;  %v386_v7 = vshrl.u32 %v385_v1, 7 }
  0xff   :  { %1039 = vmatprep.subr.bf16.mxu0 %v4809_v58  ;;  %1080 = vmatprep.subr.bf16.mxu1 %v4811_v59 }
 0x100   :  { %v5553_v8 = vsub.s32 0, %v386_v7  ;;  %v5555_v10 = vsub.s32 2, %v386_v7  ;;  %v5557_v11 = vsub.s32 1, %v386_v7  ;;  %v5559_v12 = vsub.s32 3, %v386_v7 }
 0x101   :  { %v5573_v36 = vsub.s32 4, %v386_v7  ;;  %v5575_v37 = vsub.s32 6, %v386_v7  ;;  %v5577_v38 = vsub.s32 5, %v386_v7  ;;  %v5579_v39 = vsub.s32 7, %v386_v7 }
 0x102   :  { %1040 = vmatpush1.bf16.msra.mxu0 %v4808_v0  ;;  %1081 = vmatpush1.bf16.msra.mxu1 %v4810_v2  ;;  %6661 = vst [vmem:[#allocation39_spill] sm:$0xff] %v5553_v8  ;;  %6662 = vst [vmem:[#allocation40_spill] sm:$0xff] %v5555_v10  ;;  %v388_v13 = vrot.slane %v381_v9, %v5553_v8  ;;  %v396_v14 = vrot.slane %v381_v9, %v5555_v10  ;;  %v382_v2 = vld [vmem:[#allocation10 + $0x8] sm:$0xff] }
 0x103   :  { %1041 = vmatprep.subr.bf16.mxu0 %v4825_v3  ;;  %1082 = vmatprep.subr.bf16.mxu1 %v4827_v4  ;;  %6663 = vst [vmem:[#allocation41_spill] sm:$0xff] %v5557_v11  ;;  %6664 = vst [vmem:[#allocation42_spill] sm:$0xff] %v5559_v12  ;;  %v392_v15 = vrot.slane %v381_v9, %v5557_v11  ;;  %v400_v16 = vrot.slane %v381_v9, %v5559_v12 }
 0x104   :  { %6667 = vst [vmem:[#allocation45_spill] sm:$0xff] %v5573_v36  ;;  %6668 = vst [vmem:[#allocation46_spill] sm:$0xff] %v5575_v37  ;;  %v404_v40 = vrot.slane %v381_v9, %v5573_v36  ;;  %v412_v41 = vrot.slane %v381_v9, %v5575_v37  ;;  %v408_v42 = vrot.slane %v381_v9, %v5577_v38 }
 0x105   :  { %6669 = vst [vmem:[#allocation47_spill] sm:$0xff] %v5577_v38  ;;  %6670 = vst [vmem:[#allocation48_spill] sm:$0xff] %v5579_v39  ;;  %v416_v44 = vrot.slane %v381_v9, %v5579_v39  ;;  %v420_v3 = vrot.slane %v382_v2, %v5553_v8  ;;  %v428_v4 = vrot.slane %v382_v2, %v5555_v10 }
 0x106   :  { %1042 = vmatpush1.bf16.msra.mxu0 %v4824_v5  ;;  %1083 = vmatpush1.bf16.msra.mxu1 %v4826_v6  ;;  %v424_v5 = vrot.slane %v382_v2, %v5557_v11  ;;  %v432_v6 = vrot.slane %v382_v2, %v5559_v12 }
 0x109   :  { %4834 = vmatmul.mubr.msk.bf16.vlgmr.msra.gmra.mrb[12].mxu0 %vm785_vm0, %v5529_v43  ;;  %4835 = vmatmul.mubr.msk.bf16.vlgmr.msra.gmra.mrb[12].mxu1 %vm785_vm0, %v5529_v43 }
 0x1ac   :  { %v823_v43 = vpop.f32.mrb[0].mxu0  ;;  %v864_v18 = vpop.f32.mrb[0].mxu1 }
 0x1ad   :  { %v824_v17 = vadd.f32 %v823_v43, %v388_v13  ;;  %v825_v19 = vpop.f32.mrb[1].mxu0  ;;  %v865_v20 = vadd.f32 %v864_v18, %v396_v14  ;;  %v866_v22 = vpop.f32.mrb[1].mxu1 }
 0x1ae   :  { %v826_v21 = vadd.f32 %v825_v19, %v392_v15  ;;  %v827_v23 = vpop.f32.mrb[2].mxu0  ;;  %v867_v25 = vadd.f32 %v866_v22, %v400_v16  ;;  %v868_v26 = vpop.f32.mrb[2].mxu1 }
 0x1af   :  { %v1117_v24 = vmax.f32 %v824_v17, 0.0  ;;  %v828_v27 = vpop.f32.mrb[3].mxu0  ;;  %v1119_v28 = vmax.f32 %v865_v20, 0.0  ;;  %v869_v30 = vpop.f32.mrb[3].mxu1 }
 0x1b0   :  { %v1118_v29 = vmax.f32 %v826_v21, 0.0  ;;  %v1120_v32 = vmax.f32 %v867_v25, 0.0  ;;  %v444_v30 = vrot.slane %v382_v2, %v5575_v37 }
 0x1b1   :  { %v5565_v31 = vpack.c.bf16 %v1117_v24, %v1117_v24  ;;  %v5567_v33 = vpack.c.bf16 %v1119_v28, %v1119_v28 }
 0x1b2   :  { %v5569_v34 = vpack.c.bf16 %v1118_v29, %v1118_v29  ;;  %v5571_v35 = vpack.c.bf16 %v1120_v32, %v1120_v32  ;;  %v436_v29 = vrot.slane %v382_v2, %v5573_v36  ;;  %v440_v32 = vrot.slane %v382_v2, %v5577_v38 }
 0x1b3   :  { %6665 = vst [vmem:[#allocation43_spill] sm:$0xff] %v5567_v33 }
 0x1b4   :  { %6666 = vst [vmem:[#allocation44_spill] sm:$0xff] %v5571_v35 }
 0x1bc   :  { %v905_v45 = vpop.f32.mrb[4].mxu0  ;;  %v946_v47 = vpop.f32.mrb[4].mxu1 }
 0x1bd   :  { %v906_v46 = vadd.f32 %v905_v45, %v404_v40  ;;  %v907_v48 = vpop.f32.mrb[5].mxu0  ;;  %v947_v49 = vadd.f32 %v946_v47, %v412_v41  ;;  %v948_v51 = vpop.f32.mrb[5].mxu1  ;;  %v448_v40 = vrot.slane %v382_v2, %v5579_v39 }
 0x1be   :  { %v908_v50 = vadd.f32 %v907_v48, %v408_v42  ;;  %v909_v52 = vpop.f32.mrb[6].mxu0  ;;  %v949_v54 = vadd.f32 %v948_v51, %v416_v44  ;;  %v950_v55 = vpop.f32.mrb[6].mxu1 }
 0x1bf   :  { %v1121_v53 = vmax.f32 %v906_v46, 0.0  ;;  %v910_v56 = vpop.f32.mrb[7].mxu0  ;;  %v1123_v57 = vmax.f32 %v947_v49, 0.0  ;;  %v951_v59 = vpop.f32.mrb[7].mxu1 }
 0x1c0   :  { %v1122_v58 = vmax.f32 %v908_v50, 0.0  ;;  %v1124_v61 = vmax.f32 %v949_v54, 0.0 }
 0x1c1   :  { %v5585_v60 = vpack.c.bf16 %v1121_v53, %v1121_v53  ;;  %v5587_v62 = vpack.c.bf16 %v1123_v57, %v1123_v57 }
 0x1c2   :  { %v5589_v63 = vpack.c.bf16 %v1122_v58, %v1122_v58  ;;  %v5591_v0 = vpack.c.bf16 %v1124_v61, %v1124_v61 }
 0x1cc   :  { %v987_v1 = vpop.f32.mrb[8].mxu0  ;;  %v1028_v9 = vpop.f32.mrb[8].mxu1 }
 0x1cd   :  { %v988_v7 = vadd.f32 %v987_v1, %v420_v3  ;;  %v989_v13 = vpop.f32.mrb[9].mxu0  ;;  %v1029_v14 = vadd.f32 %v1028_v9, %v428_v4  ;;  %v1030_v16 = vpop.f32.mrb[9].mxu1 }
 0x1ce   :  { %v990_v15 = vadd.f32 %v989_v13, %v424_v5  ;;  %v991_v43 = vpop.f32.mrb[10].mxu0  ;;  %v1031_v18 = vadd.f32 %v1030_v16, %v432_v6  ;;  %v1032_v19 = vpop.f32.mrb[10].mxu1 }
 0x1cf   :  { %v1125_v17 = vmax.f32 %v988_v7, 0.0  ;;  %v992_v20 = vpop.f32.mrb[11].mxu0  ;;  %v1127_v21 = vmax.f32 %v1029_v14, 0.0  ;;  %v1033_v23 = vpop.f32.mrb[11].mxu1 }
 0x1d0   :  { %v1126_v22 = vmax.f32 %v990_v15, 0.0  ;;  %v1128_v25 = vmax.f32 %v1031_v18, 0.0 }
 0x1d1   :  { %v5597_v24 = vpack.c.bf16 %v1125_v17, %v1125_v17  ;;  %v5599_v26 = vpack.c.bf16 %v1127_v21, %v1127_v21 }
 0x1d2   :  { %v5601_v27 = vpack.c.bf16 %v1126_v22, %v1126_v22  ;;  %v5603_v28 = vpack.c.bf16 %v1128_v25, %v1128_v25 }
 0x1d3   :  { %6671 = vst [vmem:[#allocation49_spill] sm:$0xff] %v5597_v24  ;;  %6672 = vst [vmem:[#allocation50_spill] sm:$0xff] %v5599_v26 }
 0x1d4   :  { %6673 = vst [vmem:[#allocation51_spill] sm:$0xff] %v5601_v27  ;;  %6674 = vst [vmem:[#allocation52_spill] sm:$0xff] %v5603_v28 }
 0x1dc   :  { %v1069_v41 = vpop.f32.mrb[12].mxu0  ;;  %v1110_v44 = vpop.f32.mrb[12].mxu1 }
 0x1dd   :  { %v1070_v42 = vadd.f32 %v1069_v41, %v436_v29  ;;  %v1071_v45 = vpop.f32.mrb[13].mxu0  ;;  %v1111_v46 = vadd.f32 %v1110_v44, %v444_v30  ;;  %v1112_v48 = vpop.f32.mrb[13].mxu1 }
 0x1de   :  { %v1072_v47 = vadd.f32 %v1071_v45, %v440_v32  ;;  %v1073_v49 = vpop.f32.mrb[14].mxu0  ;;  %v1113_v51 = vadd.f32 %v1112_v48, %v448_v40  ;;  %v1114_v52 = vpop.f32.mrb[14].mxu1 }
 0x1df   :  { %v1129_v50 = vmax.f32 %v1070_v42, 0.0  ;;  %v1074_v53 = vpop.f32.mrb[15].mxu0  ;;  %v1131_v54 = vmax.f32 %v1111_v46, 0.0  ;;  %v1115_v56 = vpop.f32.mrb[15].mxu1 }
 0x1e0   :  { %v1130_v55 = vmax.f32 %v1072_v47, 0.0  ;;  %v1132_v58 = vmax.f32 %v1113_v51, 0.0 }
 0x1e1   :  { %v5609_v57 = vpack.c.bf16 %v1129_v50, %v1129_v50  ;;  %v5611_v59 = vpack.c.bf16 %v1131_v54, %v1131_v54 }
 0x1e2   :  { %v5613_v61 = vpack.c.bf16 %v1130_v55, %v1130_v55  ;;  %v5615_v2 = vpack.c.bf16 %v1132_v58, %v1132_v58 }
 0x1e3   :  { %6675 = vst [vmem:[#allocation53_spill] sm:$0xff] %v5609_v57  ;;  %6676 = vst [vmem:[#allocation54_spill] sm:$0xff] %v5611_v59 }
 0x1e4   :  { %6677 = vst [vmem:[#allocation55_spill] sm:$0xff] %v5613_v61  ;;  %6678 = vst [vmem:[#allocation56_spill] sm:$0xff] %v5615_v2 }
 0x1e5   :  { %5254 = dma.done.wait [#allocation4], 32768 }
 0x1e6   :  { %5255 = vsyncadd [#allocation4], 4294934528  ;;  %v5617_v3 = vld [vmem:[#allocation2] sm:$0xff]  ;;  %v5619_v4 = vld [vmem:[#allocation2 + $0x8] sm:$0xff] }
 0x1e7   :  { %v5621_v5 = vld [vmem:[#allocation2 + $0x10] sm:$0xff]  ;;  %v5623_v6 = vld [vmem:[#allocation2 + $0x18] sm:$0xff]  ;;  %v5625_v1 = vld [vmem:[#allocation2 + $0x20] sm:$0xff] }
 0x1e8   :  { %6679 = vst [vmem:[#allocation57_spill] sm:$0xff] %v5625_v1  ;;  %v5627_v7 = vld [vmem:[#allocation2 + $0x28] sm:$0xff]  ;;  %v5629_v9 = vld [vmem:[#allocation2 + $0x30] sm:$0xff]  ;;  %v5631_v13 = vld [vmem:[#allocation2 + $0x38] sm:$0xff] }
 0x1e9   :  { %6680 = vst [vmem:[#allocation58_spill] sm:$0xff] %v5627_v7  ;;  %6681 = vst [vmem:[#allocation59_spill] sm:$0xff] %v5629_v9  ;;  %v5633_v14 = vld [vmem:[#allocation2 + $0x40] sm:$0xff]  ;;  %v5635_v15 = vld [vmem:[#allocation2 + $0x48] sm:$0xff] }
 0x1ea   :  { %6682 = vst [vmem:[#allocation60_spill] sm:$0xff] %v5631_v13  ;;  %v5637_v16 = vld [vmem:[#allocation2 + $0x50] sm:$0xff]  ;;  %v5639_v43 = vld [vmem:[#allocation2 + $0x58] sm:$0xff]  ;;  %v5641_v17 = vld [vmem:[#allocation2 + $0x60] sm:$0xff] }
 0x1eb   :  { %6683 = vst [vmem:[#allocation61_spill] sm:$0xff] %v5641_v17  ;;  %v5643_v18 = vld [vmem:[#allocation2 + $0x68] sm:$0xff]  ;;  %v5645_v19 = vld [vmem:[#allocation2 + $0x70] sm:$0xff]  ;;  %v5647_v20 = vld [vmem:[#allocation2 + $0x78] sm:$0xff] }
 0x1ec   :  { %6684 = vst [vmem:[#allocation62_spill] sm:$0xff] %v5643_v18  ;;  %6685 = vst [vmem:[#allocation63_spill] sm:$0xff] %v5645_v19  ;;  %v5649_v21 = vld [vmem:[#allocation2 + $0x80] sm:$0xff]  ;;  %v5651_v22 = vld [vmem:[#allocation2 + $0x88] sm:$0xff] }
 0x1ed   :  { %6686 = vst [vmem:[#allocation64_spill] sm:$0xff] %v5647_v20  ;;  %v5653_v23 = vld [vmem:[#allocation2 + $0x90] sm:$0xff]  ;;  %v5655_v25 = vld [vmem:[#allocation2 + $0x98] sm:$0xff]  ;;  %v5657_v29 = vld [vmem:[#allocation2 + $0xa0] sm:$0xff] }
 0x1ee   :  { %6687 = vst [vmem:[#allocation65_spill] sm:$0xff] %v5657_v29  ;;  %v5659_v30 = vld [vmem:[#allocation2 + $0xa8] sm:$0xff]  ;;  %v5661_v32 = vld [vmem:[#allocation2 + $0xb0] sm:$0xff]  ;;  %v5663_v40 = vld [vmem:[#allocation2 + $0xb8] sm:$0xff] }
 0x1ef   :  { %6688 = vst [vmem:[#allocation66_spill] sm:$0xff] %v5659_v30  ;;  %6689 = vst [vmem:[#allocation67_spill] sm:$0xff] %v5661_v32  ;;  %v5665_v41 = vld [vmem:[#allocation2 + $0xc0] sm:$0xff]  ;;  %v5667_v42 = vld [vmem:[#allocation2 + $0xc8] sm:$0xff] }
 0x1f0   :  { %6690 = vst [vmem:[#allocation68_spill] sm:$0xff] %v5663_v40  ;;  %v5669_v44 = vld [vmem:[#allocation2 + $0xd0] sm:$0xff]  ;;  %v5671_v45 = vld [vmem:[#allocation2 + $0xd8] sm:$0xff]  ;;  %v5673_v46 = vld [vmem:[#allocation2 + $0xe0] sm:$0xff] }
 0x1f1   :  { %6691 = vst [vmem:[#allocation69_spill] sm:$0xff] %v5673_v46  ;;  %v5675_v47 = vld [vmem:[#allocation2 + $0xe8] sm:$0xff]  ;;  %v5677_v48 = vld [vmem:[#allocation2 + $0xf0] sm:$0xff]  ;;  %v5679_v49 = vld [vmem:[#allocation2 + $0xf8] sm:$0xff] }
 0x1f2   :  { %6692 = vst [vmem:[#allocation70_spill] sm:$0xff] %v5675_v47  ;;  %6693 = vst [vmem:[#allocation71_spill] sm:$0xff] %v5677_v48  ;;  %v5681_v50 = vld [vmem:[#allocation2 + $0x100] sm:$0xff]  ;;  %v5683_v51 = vld [vmem:[#allocation2 + $0x108] sm:$0xff] }
 0x1f3   :  { %6694 = vst [vmem:[#allocation72_spill] sm:$0xff] %v5679_v49  ;;  %v5685_v52 = vld [vmem:[#allocation2 + $0x110] sm:$0xff]  ;;  %v5687_v53 = vld [vmem:[#allocation2 + $0x118] sm:$0xff]  ;;  %v5689_v54 = vld [vmem:[#allocation2 + $0x120] sm:$0xff] }
 0x1f4   :  { %6695 = vst [vmem:[#allocation73_spill] sm:$0xff] %v5689_v54  ;;  %v5691_v55 = vld [vmem:[#allocation2 + $0x128] sm:$0xff]  ;;  %v5693_v56 = vld [vmem:[#allocation2 + $0x130] sm:$0xff]  ;;  %v5695_v58 = vld [vmem:[#allocation2 + $0x138] sm:$0xff] }
 0x1f5   :  { %6696 = vst [vmem:[#allocation74_spill] sm:$0xff] %v5691_v55  ;;  %6697 = vst [vmem:[#allocation75_spill] sm:$0xff] %v5693_v56  ;;  %v5697_v39 = vld [vmem:[#allocation2 + $0x140] sm:$0xff]  ;;  %v5699_v37 = vld [vmem:[#allocation2 + $0x148] sm:$0xff] }
 0x1f6   :  { %6698 = vst [vmem:[#allocation76_spill] sm:$0xff] %v5695_v58  ;;  %v5701_v38 = vld [vmem:[#allocation2 + $0x150] sm:$0xff]  ;;  %v5703_v36 = vld [vmem:[#allocation2 + $0x158] sm:$0xff]  ;;  %v5705_v12 = vld [vmem:[#allocation2 + $0x160] sm:$0xff] }
 0x1f7   :  { %6699 = vst [vmem:[#allocation77_spill] sm:$0xff] %v5705_v12  ;;  %v5707_v10 = vld [vmem:[#allocation2 + $0x168] sm:$0xff]  ;;  %v5709_v11 = vld [vmem:[#allocation2 + $0x170] sm:$0xff]  ;;  %v5711_v8 = vld [vmem:[#allocation2 + $0x178] sm:$0xff] }
 0x1f8   :  { %6700 = vst [vmem:[#allocation78_spill] sm:$0xff] %v5707_v10  ;;  %6701 = vst [vmem:[#allocation79_spill] sm:$0xff] %v5709_v11  ;;  %v5713_v59 = vld [vmem:[#allocation2 + $0x180] sm:$0xff]  ;;  %v5715_v57 = vld [vmem:[#allocation2 + $0x188] sm:$0xff] }
 0x1f9   :  { %6702 = vst [vmem:[#allocation80_spill] sm:$0xff] %v5711_v8  ;;  %v5717_v2 = vld [vmem:[#allocation2 + $0x190] sm:$0xff]  ;;  %v5719_v61 = vld [vmem:[#allocation2 + $0x198] sm:$0xff]  ;;  %v5721_v26 = vld [vmem:[#allocation2 + $0x1a0] sm:$0xff] }
 0x1fa   :  { %6703 = vst [vmem:[#allocation81_spill] sm:$0xff] %v5717_v2  ;;  %6704 = vst [vmem:[#allocation82_spill] sm:$0xff] %v5721_v26  ;;  %v5723_v24 = vld [vmem:[#allocation2 + $0x1a8] sm:$0xff]  ;;  %v5725_v28 = vld [vmem:[#allocation2 + $0x1b0] sm:$0xff] }
 0x1fb   :  { %6705 = vst [vmem:[#allocation83_spill] sm:$0xff] %v5723_v24  ;;  %6706 = vst [vmem:[#allocation84_spill] sm:$0xff] %v5725_v28  ;;  %v5727_v27 = vld [vmem:[#allocation2 + $0x1b8] sm:$0xff]  ;;  %v5729_v56 = vld [vmem:[#allocation2 + $0x1c0] sm:$0xff] }
 0x1fc   :  { %6707 = vst [vmem:[#allocation85_spill] sm:$0xff] %v5727_v27  ;;  %v5731_v11 = vld [vmem:[#allocation2 + $0x1c8] sm:$0xff]  ;;  %v5733_v8 = vld [vmem:[#allocation2 + $0x1d0] sm:$0xff]  ;;  %v5735_v58 = vld [vmem:[#allocation2 + $0x1d8] sm:$0xff] }
 0x1fd   :  { %6708 = vst [vmem:[#allocation86_spill] sm:$0xff] %v5733_v8  ;;  %6709 = vst [vmem:[#allocation87_spill] sm:$0xff] %v5735_v58  ;;  %v5737_v48 = vld [vmem:[#allocation2 + $0x1e0] sm:$0xff]  ;;  %v5739_v49 = vld [vmem:[#allocation2 + $0x1e8] sm:$0xff] }
 0x1fe   :  { %6710 = vst [vmem:[#allocation88_spill] sm:$0xff] %v5737_v48  ;;  %6711 = vst [vmem:[#allocation89_spill] sm:$0xff] %v5739_v49  ;;  %v5741_v32 = vld [vmem:[#allocation2 + $0x1f0] sm:$0xff]  ;;  %v5743_v40 = vld [vmem:[#allocation2 + $0x1f8] sm:$0xff] }
 0x1ff   :  { %6712 = vst [vmem:[#allocation90_spill] sm:$0xff] %v5741_v32  ;;  %6713 = vst [vmem:[#allocation91_spill] sm:$0xff] %v5743_v40  ;;  %v5745_v19 = vld [vmem:[#allocation2 + $0x200] sm:$0xff]  ;;  %v5747_v28 = vld [vmem:[#allocation2 + $0x208] sm:$0xff] }
 0x200   :  { %v5749_v27 = vld [vmem:[#allocation2 + $0x210] sm:$0xff]  ;;  %v5751_v20 = vld [vmem:[#allocation2 + $0x218] sm:$0xff]  ;;  %v5753_v9 = vld [vmem:[#allocation2 + $0x220] sm:$0xff] }
 0x201   :  { %6714 = vst [vmem:[#allocation92_spill] sm:$0xff] %v5749_v27  ;;  %6715 = vst [vmem:[#allocation93_spill] sm:$0xff] %v5751_v20  ;;  %v5755_v33 = vld [vmem:[#allocation2 + $0x228] sm:$0xff]  ;;  %v5757_v13 = vld [vmem:[#allocation2 + $0x230] sm:$0xff] }
 0x202   :  { %6716 = vst [vmem:[#allocation94_spill] sm:$0xff] %v5753_v9  ;;  %6717 = vst [vmem:[#allocation95_spill] sm:$0xff] %v5755_v33  ;;  %v5759_v48 = vld [vmem:[#allocation2 + $0x238] sm:$0xff]  ;;  %v5761_v49 = vld [vmem:[#allocation2 + $0x240] sm:$0xff] }
 0x203   :  { %6718 = vst [vmem:[#allocation96_spill] sm:$0xff] %v5757_v13  ;;  %6719 = vst [vmem:[#allocation97_spill] sm:$0xff] %v5759_v48  ;;  %v5763_v32 = vld [vmem:[#allocation2 + $0x248] sm:$0xff]  ;;  %v5765_v40 = vld [vmem:[#allocation2 + $0x250] sm:$0xff] }
 0x204   :  { %6720 = vst [vmem:[#allocation98_spill] sm:$0xff] %v5765_v40  ;;  %v5767_v26 = vld [vmem:[#allocation2 + $0x258] sm:$0xff]  ;;  %v5769_v24 = vld [vmem:[#allocation2 + $0x260] sm:$0xff]  ;;  %v5771_v12 = vld [vmem:[#allocation2 + $0x268] sm:$0xff] }
 0x205   :  { %6721 = vst [vmem:[#allocation99_spill] sm:$0xff] %v5767_v26  ;;  %6722 = vst [vmem:[#allocation100_spill] sm:$0xff] %v5769_v24  ;;  %v5773_v10 = vld [vmem:[#allocation2 + $0x270] sm:$0xff]  ;;  %v5775_v9 = vld [vmem:[#allocation2 + $0x278] sm:$0xff] }
 0x206   :  { %6723 = vst [vmem:[#allocation101_spill] sm:$0xff] %v5771_v12  ;;  %6724 = vst [vmem:[#allocation102_spill] sm:$0xff] %v5773_v10  ;;  %v5777_v33 = vld [vmem:[#allocation2 + $0x280] sm:$0xff]  ;;  %v5779_v13 = vld [vmem:[#allocation2 + $0x288] sm:$0xff] }
 0x207   :  { %6725 = vst [vmem:[#allocation103_spill] sm:$0xff] %v5775_v9  ;;  %v5781_v48 = vld [vmem:[#allocation2 + $0x290] sm:$0xff]  ;;  %v5783_v54 = vld [vmem:[#allocation2 + $0x298] sm:$0xff]  ;;  %v5785_v55 = vld [vmem:[#allocation2 + $0x2a0] sm:$0xff] }
 0x208   :  { %6726 = vst [vmem:[#allocation104_spill] sm:$0xff] %v5781_v48  ;;  %6727 = vst [vmem:[#allocation105_spill] sm:$0xff] %v5783_v54  ;;  %v5787_v46 = vld [vmem:[#allocation2 + $0x2a8] sm:$0xff]  ;;  %v5789_v47 = vld [vmem:[#allocation2 + $0x2b0] sm:$0xff] }
 0x209   :  { %6728 = vst [vmem:[#allocation106_spill] sm:$0xff] %v5785_v55  ;;  %6729 = vst [vmem:[#allocation107_spill] sm:$0xff] %v5787_v46  ;;  %v5791_v24 = vld [vmem:[#allocation2 + $0x2b8] sm:$0xff]  ;;  %v5793_v12 = vld [vmem:[#allocation2 + $0x2c0] sm:$0xff] }
 0x20a   :  { %6730 = vst [vmem:[#allocation108_spill] sm:$0xff] %v5789_v47  ;;  %6731 = vst [vmem:[#allocation109_spill] sm:$0xff] %v5791_v24  ;;  %v5795_v10 = vld [vmem:[#allocation2 + $0x2c8] sm:$0xff]  ;;  %v5797_v9 = vld [vmem:[#allocation2 + $0x2d0] sm:$0xff] }
 0x20b   :  { %6732 = vst [vmem:[#allocation110_spill] sm:$0xff] %v5797_v9  ;;  %v5799_v29 = vld [vmem:[#allocation2 + $0x2d8] sm:$0xff]  ;;  %v5801_v30 = vld [vmem:[#allocation2 + $0x2e0] sm:$0xff]  ;;  %v5803_v17 = vld [vmem:[#allocation2 + $0x2e8] sm:$0xff] }
 0x20c   :  { %6733 = vst [vmem:[#allocation111_spill] sm:$0xff] %v5799_v29  ;;  %6734 = vst [vmem:[#allocation112_spill] sm:$0xff] %v5801_v30  ;;  %v5805_v35 = vld [vmem:[#allocation2 + $0x2f0] sm:$0xff]  ;;  %v5807_v55 = vld [vmem:[#allocation2 + $0x2f8] sm:$0xff] }
 0x20d   :  { %6735 = vst [vmem:[#allocation113_spill] sm:$0xff] %v5803_v17  ;;  %6736 = vst [vmem:[#allocation114_spill] sm:$0xff] %v5805_v35  ;;  %v5809_v46 = vld [vmem:[#allocation2 + $0x300] sm:$0xff]  ;;  %v5811_v47 = vld [vmem:[#allocation2 + $0x308] sm:$0xff] }
 0x20e   :  { %6737 = vst [vmem:[#allocation115_spill] sm:$0xff] %v5807_v55  ;;  %v5813_v24 = vld [vmem:[#allocation2 + $0x310] sm:$0xff]  ;;  %v5815_v18 = vld [vmem:[#allocation2 + $0x318] sm:$0xff]  ;;  %v5817_v1 = vld [vmem:[#allocation2 + $0x320] sm:$0xff] }
 0x20f   :  { %6738 = vst [vmem:[#allocation116_spill] sm:$0xff] %v5813_v24  ;;  %6739 = vst [vmem:[#allocation117_spill] sm:$0xff] %v5815_v18  ;;  %v5819_v7 = vld [vmem:[#allocation2 + $0x328] sm:$0xff]  ;;  %v5821_v9 = vld [vmem:[#allocation2 + $0x330] sm:$0xff] }
 0x210   :  { %6740 = vst [vmem:[#allocation118_spill] sm:$0xff] %v5817_v1  ;;  %6741 = vst [vmem:[#allocation119_spill] sm:$0xff] %v5819_v7  ;;  %v5823_v30 = vld [vmem:[#allocation2 + $0x338] sm:$0xff]  ;;  %v5825_v17 = vld [vmem:[#allocation2 + $0x340] sm:$0xff] }
 0x211   :  { %6742 = vst [vmem:[#allocation120_spill] sm:$0xff] %v5821_v9  ;;  %6743 = vst [vmem:[#allocation121_spill] sm:$0xff] %v5823_v30  ;;  %v5827_v35 = vld [vmem:[#allocation2 + $0x348] sm:$0xff]  ;;  %v5829_v55 = vld [vmem:[#allocation2 + $0x350] sm:$0xff] }
 0x212   :  { %6744 = vst [vmem:[#allocation122_spill] sm:$0xff] %v5829_v55  ;;  %v5831_v29 = vld [vmem:[#allocation2 + $0x358] sm:$0xff]  ;;  %v5833_v48 = vld [vmem:[#allocation2 + $0x360] sm:$0xff]  ;;  %v5835_v24 = vld [vmem:[#allocation2 + $0x368] sm:$0xff] }
 0x213   :  { %6745 = vst [vmem:[#allocation123_spill] sm:$0xff] %v5831_v29  ;;  %6746 = vst [vmem:[#allocation124_spill] sm:$0xff] %v5833_v48  ;;  %v5837_v18 = vld [vmem:[#allocation2 + $0x370] sm:$0xff]  ;;  %v5839_v1 = vld [vmem:[#allocation2 + $0x378] sm:$0xff] }
 0x214   :  { %6747 = vst [vmem:[#allocation125_spill] sm:$0xff] %v5835_v24  ;;  %6748 = vst [vmem:[#allocation126_spill] sm:$0xff] %v5837_v18  ;;  %v5841_v7 = vld [vmem:[#allocation2 + $0x380] sm:$0xff]  ;;  %v5843_v9 = vld [vmem:[#allocation2 + $0x388] sm:$0xff] }
 0x215   :  { %6749 = vst [vmem:[#allocation127_spill] sm:$0xff] %v5839_v1  ;;  %v5845_v30 = vld [vmem:[#allocation2 + $0x390] sm:$0xff]  ;;  %v5847_v54 = vld [vmem:[#allocation2 + $0x398] sm:$0xff]  ;;  %v5849_v40 = vld [vmem:[#allocation2 + $0x3a0] sm:$0xff] }
 0x216   :  { %6750 = vst [vmem:[#allocation128_spill] sm:$0xff] %v5845_v30  ;;  %6751 = vst [vmem:[#allocation129_spill] sm:$0xff] %v5847_v54  ;;  %v5851_v55 = vld [vmem:[#allocation2 + $0x3a8] sm:$0xff]  ;;  %v5853_v29 = vld [vmem:[#allocation2 + $0x3b0] sm:$0xff] }
 0x217   :  { %6752 = vst [vmem:[#allocation130_spill] sm:$0xff] %v5849_v40  ;;  %6753 = vst [vmem:[#allocation131_spill] sm:$0xff] %v5851_v55  ;;  %v5855_v48 = vld [vmem:[#allocation2 + $0x3b8] sm:$0xff]  ;;  %v5857_v24 = vld [vmem:[#allocation2 + $0x3c0] sm:$0xff] }
 0x218   :  { %6754 = vst [vmem:[#allocation132_spill] sm:$0xff] %v5853_v29  ;;  %6755 = vst [vmem:[#allocation133_spill] sm:$0xff] %v5855_v48  ;;  %v5859_v18 = vld [vmem:[#allocation2 + $0x3c8] sm:$0xff]  ;;  %v5861_v1 = vld [vmem:[#allocation2 + $0x3d0] sm:$0xff] }
 0x219   :  { %6756 = vst [vmem:[#allocation134_spill] sm:$0xff] %v5861_v1  ;;  %v5863_v26 = vld [vmem:[#allocation2 + $0x3d8] sm:$0xff]  ;;  %v5865_v27 = vld [vmem:[#allocation2 + $0x3e0] sm:$0xff]  ;;  %v5867_v30 = vld [vmem:[#allocation2 + $0x3e8] sm:$0xff] }
 0x21a   :  { %6757 = vst [vmem:[#allocation135_spill] sm:$0xff] %v5863_v26  ;;  %6758 = vst [vmem:[#allocation136_spill] sm:$0xff] %v5865_v27  ;;  %v5869_v54 = vld [vmem:[#allocation2 + $0x3f0] sm:$0xff]  ;;  %v5871_v40 = vld [vmem:[#allocation2 + $0x3f8] sm:$0xff] }
 0x21b   :  { %6759 = vst [vmem:[#allocation137_spill] sm:$0xff] %v5867_v30  ;;  %6760 = vst [vmem:[#allocation138_spill] sm:$0xff] %v5869_v54  ;;  %v5873_v55 = vld [vmem:[#allocation2 + $0x400] sm:$0xff]  ;;  %v5875_v29 = vld [vmem:[#allocation2 + $0x408] sm:$0xff] }
 0x21c   :  { %6761 = vst [vmem:[#allocation139_spill] sm:$0xff] %v5871_v40  ;;  %6762 = vst [vmem:[#allocation140_spill] sm:$0xff] %v5873_v55  ;;  %v5877_v48 = vld [vmem:[#allocation2 + $0x410] sm:$0xff]  ;;  %v5879_v20 = vld [vmem:[#allocation2 + $0x418] sm:$0xff] }
 0x21d   :  { %6763 = vst [vmem:[#allocation141_spill] sm:$0xff] %v5875_v29  ;;  %6764 = vst [vmem:[#allocation142_spill] sm:$0xff] %v5877_v48  ;;  %v5881_v8 = vld [vmem:[#allocation2 + $0x420] sm:$0xff]  ;;  %v5883_v1 = vld [vmem:[#allocation2 + $0x428] sm:$0xff] }
 0x21e   :  { %6765 = vst [vmem:[#allocation143_spill] sm:$0xff] %v5879_v20  ;;  %6766 = vst [vmem:[#allocation144_spill] sm:$0xff] %v5881_v8  ;;  %v5885_v26 = vld [vmem:[#allocation2 + $0x430] sm:$0xff]  ;;  %v5887_v27 = vld [vmem:[#allocation2 + $0x438] sm:$0xff] }
 0x21f   :  { %6767 = vst [vmem:[#allocation145_spill] sm:$0xff] %v5883_v1  ;;  %6768 = vst [vmem:[#allocation146_spill] sm:$0xff] %v5885_v26  ;;  %v5889_v30 = vld [vmem:[#allocation2 + $0x440] sm:$0xff]  ;;  %v5891_v54 = vld [vmem:[#allocation2 + $0x448] sm:$0xff] }
 0x220   :  { %6769 = vst [vmem:[#allocation147_spill] sm:$0xff] %v5887_v27  ;;  %6770 = vst [vmem:[#allocation148_spill] sm:$0xff] %v5889_v30  ;;  %v5893_v40 = vld [vmem:[#allocation2 + $0x450] sm:$0xff]  ;;  %v5895_v55 = vld [vmem:[#allocation2 + $0x458] sm:$0xff] }
 0x221   :  { %6771 = vst [vmem:[#allocation149_spill] sm:$0xff] %v5891_v54  ;;  %6772 = vst [vmem:[#allocation150_spill] sm:$0xff] %v5893_v40  ;;  %v5897_v29 = vld [vmem:[#allocation2 + $0x460] sm:$0xff]  ;;  %v5899_v48 = vld [vmem:[#allocation2 + $0x468] sm:$0xff] }
 0x222   :  { %6773 = vst [vmem:[#allocation151_spill] sm:$0xff] %v5895_v55  ;;  %6774 = vst [vmem:[#allocation152_spill] sm:$0xff] %v5897_v29  ;;  %v5901_v20 = vld [vmem:[#allocation2 + $0x470] sm:$0xff]  ;;  %v5903_v8 = vld [vmem:[#allocation2 + $0x478] sm:$0xff] }
 0x223   :  { %6775 = vst [vmem:[#allocation153_spill] sm:$0xff] %v5899_v48  ;;  %6776 = vst [vmem:[#allocation154_spill] sm:$0xff] %v5901_v20  ;;  %v5905_v1 = vld [vmem:[#allocation2 + $0x480] sm:$0xff]  ;;  %v5907_v26 = vld [vmem:[#allocation2 + $0x488] sm:$0xff] }
 0x224   :  { %6777 = vst [vmem:[#allocation155_spill] sm:$0xff] %v5903_v8  ;;  %6778 = vst [vmem:[#allocation156_spill] sm:$0xff] %v5905_v1  ;;  %v5909_v27 = vld [vmem:[#allocation2 + $0x490] sm:$0xff]  ;;  %v5911_v30 = vld [vmem:[#allocation2 + $0x498] sm:$0xff] }
 0x225   :  { %6779 = vst [vmem:[#allocation157_spill] sm:$0xff] %v5907_v26  ;;  %6780 = vst [vmem:[#allocation158_spill] sm:$0xff] %v5909_v27  ;;  %v5913_v54 = vld [vmem:[#allocation2 + $0x4a0] sm:$0xff]  ;;  %v5915_v40 = vld [vmem:[#allocation2 + $0x4a8] sm:$0xff] }
 0x226   :  { %6781 = vst [vmem:[#allocation159_spill] sm:$0xff] %v5911_v30  ;;  %6782 = vst [vmem:[#allocation160_spill] sm:$0xff] %v5913_v54  ;;  %v5917_v55 = vld [vmem:[#allocation2 + $0x4b0] sm:$0xff]  ;;  %v5919_v29 = vld [vmem:[#allocation2 + $0x4b8] sm:$0xff] }
 0x227   :  { %6783 = vst [vmem:[#allocation161_spill] sm:$0xff] %v5915_v40  ;;  %6784 = vst [vmem:[#allocation162_spill] sm:$0xff] %v5917_v55  ;;  %v5921_v48 = vld [vmem:[#allocation2 + $0x4c0] sm:$0xff]  ;;  %v5923_v20 = vld [vmem:[#allocation2 + $0x4c8] sm:$0xff] }
 0x228   :  { %6785 = vst [vmem:[#allocation163_spill] sm:$0xff] %v5919_v29  ;;  %6786 = vst [vmem:[#allocation164_spill] sm:$0xff] %v5921_v48  ;;  %v5925_v8 = vld [vmem:[#allocation2 + $0x4d0] sm:$0xff]  ;;  %v5927_v1 = vld [vmem:[#allocation2 + $0x4d8] sm:$0xff] }
 0x229   :  { %6787 = vst [vmem:[#allocation165_spill] sm:$0xff] %v5923_v20  ;;  %6788 = vst [vmem:[#allocation166_spill] sm:$0xff] %v5925_v8  ;;  %v5929_v26 = vld [vmem:[#allocation2 + $0x4e0] sm:$0xff]  ;;  %v5931_v27 = vld [vmem:[#allocation2 + $0x4e8] sm:$0xff] }
 0x22a   :  { %6789 = vst [vmem:[#allocation167_spill] sm:$0xff] %v5927_v1  ;;  %6790 = vst [vmem:[#allocation168_spill] sm:$0xff] %v5929_v26  ;;  %v5933_v30 = vld [vmem:[#allocation2 + $0x4f0] sm:$0xff]  ;;  %v5935_v54 = vld [vmem:[#allocation2 + $0x4f8] sm:$0xff] }
 0x22b   :  { %6791 = vst [vmem:[#allocation169_spill] sm:$0xff] %v5931_v27  ;;  %6792 = vst [vmem:[#allocation170_spill] sm:$0xff] %v5933_v30  ;;  %v5937_v40 = vld [vmem:[#allocation2 + $0x500] sm:$0xff]  ;;  %v5939_v55 = vld [vmem:[#allocation2 + $0x508] sm:$0xff] }
 0x22c   :  { %6793 = vst [vmem:[#allocation171_spill] sm:$0xff] %v5935_v54  ;;  %6794 = vst [vmem:[#allocation172_spill] sm:$0xff] %v5937_v40  ;;  %v5941_v29 = vld [vmem:[#allocation2 + $0x510] sm:$0xff]  ;;  %v5943_v48 = vld [vmem:[#allocation2 + $0x518] sm:$0xff] }
 0x22d   :  { %6795 = vst [vmem:[#allocation173_spill] sm:$0xff] %v5939_v55  ;;  %6796 = vst [vmem:[#allocation174_spill] sm:$0xff] %v5941_v29  ;;  %v5945_v20 = vld [vmem:[#allocation2 + $0x520] sm:$0xff]  ;;  %v5947_v8 = vld [vmem:[#allocation2 + $0x528] sm:$0xff] }
 0x22e   :  { %6797 = vst [vmem:[#allocation175_spill] sm:$0xff] %v5943_v48  ;;  %6798 = vst [vmem:[#allocation176_spill] sm:$0xff] %v5945_v20  ;;  %v5949_v1 = vld [vmem:[#allocation2 + $0x530] sm:$0xff]  ;;  %v5951_v26 = vld [vmem:[#allocation2 + $0x538] sm:$0xff] }
 0x22f   :  { %6799 = vst [vmem:[#allocation177_spill] sm:$0xff] %v5947_v8  ;;  %6800 = vst [vmem:[#allocation178_spill] sm:$0xff] %v5949_v1  ;;  %v5953_v27 = vld [vmem:[#allocation2 + $0x540] sm:$0xff]  ;;  %v5955_v30 = vld [vmem:[#allocation2 + $0x548] sm:$0xff] }
 0x230   :  { %6801 = vst [vmem:[#allocation179_spill] sm:$0xff] %v5951_v26  ;;  %6802 = vst [vmem:[#allocation180_spill] sm:$0xff] %v5953_v27  ;;  %v5957_v54 = vld [vmem:[#allocation2 + $0x550] sm:$0xff]  ;;  %v5959_v40 = vld [vmem:[#allocation2 + $0x558] sm:$0xff] }
 0x231   :  { %6803 = vst [vmem:[#allocation181_spill] sm:$0xff] %v5955_v30  ;;  %6804 = vst [vmem:[#allocation182_spill] sm:$0xff] %v5957_v54  ;;  %v5961_v55 = vld [vmem:[#allocation2 + $0x560] sm:$0xff]  ;;  %v5963_v29 = vld [vmem:[#allocation2 + $0x568] sm:$0xff] }
 0x232   :  { %6805 = vst [vmem:[#allocation183_spill] sm:$0xff] %v5959_v40  ;;  %6806 = vst [vmem:[#allocation184_spill] sm:$0xff] %v5961_v55  ;;  %v5965_v48 = vld [vmem:[#allocation2 + $0x570] sm:$0xff]  ;;  %v5967_v20 = vld [vmem:[#allocation2 + $0x578] sm:$0xff] }
 0x233   :  { %6807 = vst [vmem:[#allocation185_spill] sm:$0xff] %v5963_v29  ;;  %6808 = vst [vmem:[#allocation186_spill] sm:$0xff] %v5965_v48  ;;  %v5969_v8 = vld [vmem:[#allocation2 + $0x580] sm:$0xff]  ;;  %v5971_v1 = vld [vmem:[#allocation2 + $0x588] sm:$0xff] }
 0x234   :  { %6809 = vst [vmem:[#allocation187_spill] sm:$0xff] %v5967_v20  ;;  %6810 = vst [vmem:[#allocation188_spill] sm:$0xff] %v5969_v8  ;;  %v5973_v26 = vld [vmem:[#allocation2 + $0x590] sm:$0xff]  ;;  %v5975_v27 = vld [vmem:[#allocation2 + $0x598] sm:$0xff] }
 0x235   :  { %6811 = vst [vmem:[#allocation189_spill] sm:$0xff] %v5971_v1  ;;  %6812 = vst [vmem:[#allocation190_spill] sm:$0xff] %v5973_v26  ;;  %v5977_v30 = vld [vmem:[#allocation2 + $0x5a0] sm:$0xff]  ;;  %v5979_v54 = vld [vmem:[#allocation2 + $0x5a8] sm:$0xff] }
 0x236   :  { %6813 = vst [vmem:[#allocation191_spill] sm:$0xff] %v5975_v27  ;;  %6814 = vst [vmem:[#allocation192_spill] sm:$0xff] %v5977_v30  ;;  %v5981_v40 = vld [vmem:[#allocation2 + $0x5b0] sm:$0xff]  ;;  %v5983_v55 = vld [vmem:[#allocation2 + $0x5b8] sm:$0xff] }
 0x237   :  { %6815 = vst [vmem:[#allocation193_spill] sm:$0xff] %v5979_v54  ;;  %6816 = vst [vmem:[#allocation194_spill] sm:$0xff] %v5981_v40  ;;  %v5985_v29 = vld [vmem:[#allocation2 + $0x5c0] sm:$0xff]  ;;  %v5987_v48 = vld [vmem:[#allocation2 + $0x5c8] sm:$0xff] }
 0x238   :  { %6817 = vst [vmem:[#allocation195_spill] sm:$0xff] %v5983_v55  ;;  %6818 = vst [vmem:[#allocation196_spill] sm:$0xff] %v5985_v29  ;;  %v5989_v20 = vld [vmem:[#allocation2 + $0x5d0] sm:$0xff]  ;;  %v5991_v8 = vld [vmem:[#allocation2 + $0x5d8] sm:$0xff] }
 0x239   :  { %6819 = vst [vmem:[#allocation197_spill] sm:$0xff] %v5987_v48  ;;  %6820 = vst [vmem:[#allocation198_spill] sm:$0xff] %v5989_v20  ;;  %v5993_v1 = vld [vmem:[#allocation2 + $0x5e0] sm:$0xff]  ;;  %v5995_v26 = vld [vmem:[#allocation2 + $0x5e8] sm:$0xff] }
 0x23a   :  { %6821 = vst [vmem:[#allocation199_spill] sm:$0xff] %v5991_v8  ;;  %6822 = vst [vmem:[#allocation200_spill] sm:$0xff] %v5993_v1  ;;  %v5997_v27 = vld [vmem:[#allocation2 + $0x5f0] sm:$0xff]  ;;  %v5999_v30 = vld [vmem:[#allocation2 + $0x5f8] sm:$0xff] }
 0x23b   :  { %6823 = vst [vmem:[#allocation201_spill] sm:$0xff] %v5995_v26  ;;  %6824 = vst [vmem:[#allocation202_spill] sm:$0xff] %v5997_v27  ;;  %v6001_v54 = vld [vmem:[#allocation2 + $0x600] sm:$0xff]  ;;  %v6003_v40 = vld [vmem:[#allocation2 + $0x608] sm:$0xff] }
 0x23c   :  { %6825 = vst [vmem:[#allocation203_spill] sm:$0xff] %v5999_v30  ;;  %6826 = vst [vmem:[#allocation204_spill] sm:$0xff] %v6001_v54  ;;  %v6005_v55 = vld [vmem:[#allocation2 + $0x610] sm:$0xff]  ;;  %v6007_v29 = vld [vmem:[#allocation2 + $0x618] sm:$0xff] }
 0x23d   :  { %6827 = vst [vmem:[#allocation205_spill] sm:$0xff] %v6003_v40  ;;  %6828 = vst [vmem:[#allocation206_spill] sm:$0xff] %v6005_v55  ;;  %v6009_v48 = vld [vmem:[#allocation2 + $0x620] sm:$0xff]  ;;  %v6011_v20 = vld [vmem:[#allocation2 + $0x628] sm:$0xff] }
 0x23e   :  { %6829 = vst [vmem:[#allocation207_spill] sm:$0xff] %v6007_v29  ;;  %6830 = vst [vmem:[#allocation208_spill] sm:$0xff] %v6009_v48  ;;  %v6013_v8 = vld [vmem:[#allocation2 + $0x630] sm:$0xff]  ;;  %v6015_v1 = vld [vmem:[#allocation2 + $0x638] sm:$0xff] }
 0x23f   :  { %6831 = vst [vmem:[#allocation209_spill] sm:$0xff] %v6011_v20  ;;  %6832 = vst [vmem:[#allocation210_spill] sm:$0xff] %v6013_v8  ;;  %v6017_v26 = vld [vmem:[#allocation2 + $0x640] sm:$0xff]  ;;  %v6019_v27 = vld [vmem:[#allocation2 + $0x648] sm:$0xff] }
 0x240   :  { %6833 = vst [vmem:[#allocation211_spill] sm:$0xff] %v6015_v1  ;;  %6834 = vst [vmem:[#allocation212_spill] sm:$0xff] %v6017_v26  ;;  %v6021_v30 = vld [vmem:[#allocation2 + $0x650] sm:$0xff]  ;;  %v6023_v54 = vld [vmem:[#allocation2 + $0x658] sm:$0xff] }
 0x241   :  { %6835 = vst [vmem:[#allocation213_spill] sm:$0xff] %v6019_v27  ;;  %6836 = vst [vmem:[#allocation214_spill] sm:$0xff] %v6021_v30  ;;  %v6025_v40 = vld [vmem:[#allocation2 + $0x660] sm:$0xff]  ;;  %v6027_v55 = vld [vmem:[#allocation2 + $0x668] sm:$0xff] }
 0x242   :  { %6837 = vst [vmem:[#allocation215_spill] sm:$0xff] %v6023_v54  ;;  %6838 = vst [vmem:[#allocation216_spill] sm:$0xff] %v6025_v40  ;;  %v6029_v29 = vld [vmem:[#allocation2 + $0x670] sm:$0xff]  ;;  %v6031_v48 = vld [vmem:[#allocation2 + $0x678] sm:$0xff] }
 0x243   :  { %6839 = vst [vmem:[#allocation217_spill] sm:$0xff] %v6027_v55  ;;  %6840 = vst [vmem:[#allocation218_spill] sm:$0xff] %v6029_v29  ;;  %v6033_v20 = vld [vmem:[#allocation2 + $0x680] sm:$0xff]  ;;  %v6035_v8 = vld [vmem:[#allocation2 + $0x688] sm:$0xff] }
 0x244   :  { %6841 = vst [vmem:[#allocation219_spill] sm:$0xff] %v6031_v48  ;;  %6842 = vst [vmem:[#allocation220_spill] sm:$0xff] %v6033_v20  ;;  %v6037_v1 = vld [vmem:[#allocation2 + $0x690] sm:$0xff]  ;;  %v6039_v26 = vld [vmem:[#allocation2 + $0x698] sm:$0xff] }
 0x245   :  { %6843 = vst [vmem:[#allocation221_spill] sm:$0xff] %v6035_v8  ;;  %6844 = vst [vmem:[#allocation222_spill] sm:$0xff] %v6037_v1  ;;  %v6041_v27 = vld [vmem:[#allocation2 + $0x6a0] sm:$0xff]  ;;  %v6043_v30 = vld [vmem:[#allocation2 + $0x6a8] sm:$0xff] }
 0x246   :  { %6845 = vst [vmem:[#allocation223_spill] sm:$0xff] %v6039_v26  ;;  %6846 = vst [vmem:[#allocation224_spill] sm:$0xff] %v6041_v27  ;;  %v6045_v54 = vld [vmem:[#allocation2 + $0x6b0] sm:$0xff]  ;;  %v6047_v40 = vld [vmem:[#allocation2 + $0x6b8] sm:$0xff] }
 0x247   :  { %6847 = vst [vmem:[#allocation225_spill] sm:$0xff] %v6043_v30  ;;  %6848 = vst [vmem:[#allocation226_spill] sm:$0xff] %v6045_v54  ;;  %v6049_v55 = vld [vmem:[#allocation2 + $0x6c0] sm:$0xff]  ;;  %v6051_v29 = vld [vmem:[#allocation2 + $0x6c8] sm:$0xff] }
 0x248   :  { %6849 = vst [vmem:[#allocation227_spill] sm:$0xff] %v6047_v40  ;;  %6850 = vst [vmem:[#allocation228_spill] sm:$0xff] %v6049_v55  ;;  %v6053_v48 = vld [vmem:[#allocation2 + $0x6d0] sm:$0xff]  ;;  %v6055_v20 = vld [vmem:[#allocation2 + $0x6d8] sm:$0xff] }
 0x249   :  { %6851 = vst [vmem:[#allocation229_spill] sm:$0xff] %v6051_v29  ;;  %6852 = vst [vmem:[#allocation230_spill] sm:$0xff] %v6053_v48  ;;  %v6057_v8 = vld [vmem:[#allocation2 + $0x6e0] sm:$0xff]  ;;  %v6059_v1 = vld [vmem:[#allocation2 + $0x6e8] sm:$0xff] }
 0x24a   :  { %6853 = vst [vmem:[#allocation231_spill] sm:$0xff] %v6055_v20  ;;  %6854 = vst [vmem:[#allocation232_spill] sm:$0xff] %v6057_v8  ;;  %v6061_v26 = vld [vmem:[#allocation2 + $0x6f0] sm:$0xff]  ;;  %v6063_v27 = vld [vmem:[#allocation2 + $0x6f8] sm:$0xff] }
 0x24b   :  { %6855 = vst [vmem:[#allocation233_spill] sm:$0xff] %v6059_v1  ;;  %6856 = vst [vmem:[#allocation234_spill] sm:$0xff] %v6061_v26  ;;  %v6065_v30 = vld [vmem:[#allocation2 + $0x700] sm:$0xff]  ;;  %v6067_v54 = vld [vmem:[#allocation2 + $0x708] sm:$0xff] }
 0x24c   :  { %6857 = vst [vmem:[#allocation235_spill] sm:$0xff] %v6063_v27  ;;  %6858 = vst [vmem:[#allocation236_spill] sm:$0xff] %v6065_v30  ;;  %v6069_v40 = vld [vmem:[#allocation2 + $0x710] sm:$0xff]  ;;  %v6071_v55 = vld [vmem:[#allocation2 + $0x718] sm:$0xff] }
 0x24d   :  { %6859 = vst [vmem:[#allocation237_spill] sm:$0xff] %v6067_v54  ;;  %6860 = vst [vmem:[#allocation238_spill] sm:$0xff] %v6069_v40  ;;  %v6073_v29 = vld [vmem:[#allocation2 + $0x720] sm:$0xff]  ;;  %v6075_v48 = vld [vmem:[#allocation2 + $0x728] sm:$0xff] }
 0x24e   :  { %6861 = vst [vmem:[#allocation239_spill] sm:$0xff] %v6071_v55  ;;  %6862 = vst [vmem:[#allocation240_spill] sm:$0xff] %v6073_v29  ;;  %v6077_v20 = vld [vmem:[#allocation2 + $0x730] sm:$0xff]  ;;  %v6079_v8 = vld [vmem:[#allocation2 + $0x738] sm:$0xff] }
 0x24f   :  { %6863 = vst [vmem:[#allocation241_spill] sm:$0xff] %v6075_v48  ;;  %6864 = vst [vmem:[#allocation242_spill] sm:$0xff] %v6077_v20  ;;  %v6081_v1 = vld [vmem:[#allocation2 + $0x740] sm:$0xff]  ;;  %v6083_v26 = vld [vmem:[#allocation2 + $0x748] sm:$0xff] }
 0x250   :  { %6865 = vst [vmem:[#allocation243_spill] sm:$0xff] %v6079_v8  ;;  %6866 = vst [vmem:[#allocation244_spill] sm:$0xff] %v6081_v1  ;;  %v6085_v27 = vld [vmem:[#allocation2 + $0x750] sm:$0xff]  ;;  %v6087_v30 = vld [vmem:[#allocation2 + $0x758] sm:$0xff] }
 0x251   :  { %6867 = vst [vmem:[#allocation245_spill] sm:$0xff] %v6083_v26  ;;  %6868 = vst [vmem:[#allocation246_spill] sm:$0xff] %v6085_v27  ;;  %v6089_v54 = vld [vmem:[#allocation2 + $0x760] sm:$0xff]  ;;  %v6091_v40 = vld [vmem:[#allocation2 + $0x768] sm:$0xff] }
 0x252   :  { %6869 = vst [vmem:[#allocation247_spill] sm:$0xff] %v6087_v30  ;;  %6870 = vst [vmem:[#allocation248_spill] sm:$0xff] %v6089_v54  ;;  %v6093_v55 = vld [vmem:[#allocation2 + $0x770] sm:$0xff]  ;;  %v6095_v29 = vld [vmem:[#allocation2 + $0x778] sm:$0xff] }
 0x253   :  { %6871 = vst [vmem:[#allocation249_spill] sm:$0xff] %v6091_v40  ;;  %6872 = vst [vmem:[#allocation250_spill] sm:$0xff] %v6093_v55  ;;  %v6097_v48 = vld [vmem:[#allocation2 + $0x780] sm:$0xff]  ;;  %v6099_v20 = vld [vmem:[#allocation2 + $0x788] sm:$0xff] }
 0x254   :  { %6873 = vst [vmem:[#allocation251_spill] sm:$0xff] %v6095_v29  ;;  %6874 = vst [vmem:[#allocation252_spill] sm:$0xff] %v6097_v48  ;;  %v6101_v8 = vld [vmem:[#allocation2 + $0x790] sm:$0xff]  ;;  %v6103_v1 = vld [vmem:[#allocation2 + $0x798] sm:$0xff] }
 0x255   :  { %6875 = vst [vmem:[#allocation253_spill] sm:$0xff] %v6099_v20  ;;  %6876 = vst [vmem:[#allocation254_spill] sm:$0xff] %v6101_v8  ;;  %v6105_v26 = vld [vmem:[#allocation2 + $0x7a0] sm:$0xff]  ;;  %v6107_v27 = vld [vmem:[#allocation2 + $0x7a8] sm:$0xff] }
 0x256   :  { %6877 = vst [vmem:[#allocation255_spill] sm:$0xff] %v6103_v1  ;;  %6878 = vst [vmem:[#allocation256_spill] sm:$0xff] %v6105_v26  ;;  %v6109_v30 = vld [vmem:[#allocation2 + $0x7b0] sm:$0xff]  ;;  %v6111_v54 = vld [vmem:[#allocation2 + $0x7b8] sm:$0xff] }
 0x257   :  { %6879 = vst [vmem:[#allocation257_spill] sm:$0xff] %v6107_v27  ;;  %6880 = vst [vmem:[#allocation258_spill] sm:$0xff] %v6109_v30  ;;  %v6113_v40 = vld [vmem:[#allocation2 + $0x7c0] sm:$0xff]  ;;  %v6115_v55 = vld [vmem:[#allocation2 + $0x7c8] sm:$0xff] }
 0x258   :  { %6881 = vst [vmem:[#allocation259_spill] sm:$0xff] %v6111_v54  ;;  %6882 = vst [vmem:[#allocation260_spill] sm:$0xff] %v6113_v40  ;;  %v6117_v29 = vld [vmem:[#allocation2 + $0x7d0] sm:$0xff]  ;;  %v6119_v48 = vld [vmem:[#allocation2 + $0x7d8] sm:$0xff] }
 0x259   :  { %6883 = vst [vmem:[#allocation261_spill] sm:$0xff] %v6115_v55  ;;  %6884 = vst [vmem:[#allocation262_spill] sm:$0xff] %v6117_v29  ;;  %v6121_v20 = vld [vmem:[#allocation2 + $0x7e0] sm:$0xff]  ;;  %v6123_v8 = vld [vmem:[#allocation2 + $0x7e8] sm:$0xff] }
 0x25a   :  { %6885 = vst [vmem:[#allocation263_spill] sm:$0xff] %v6119_v48  ;;  %6886 = vst [vmem:[#allocation264_spill] sm:$0xff] %v6121_v20  ;;  %v6125_v1 = vld [vmem:[#allocation2 + $0x7f0] sm:$0xff]  ;;  %v6127_v26 = vld [vmem:[#allocation2 + $0x7f8] sm:$0xff] }
 0x25b   :  { %6887 = vst [vmem:[#allocation265_spill] sm:$0xff] %v6123_v8  ;;  %6888 = vst [vmem:[#allocation266_spill] sm:$0xff] %v6125_v1 }
 0x25c   :  { %6889 = vst [vmem:[#allocation267_spill] sm:$0xff] %v6127_v26 }
 0x25d   :  { %5256 = dma.done.wait [#allocation4 + $0x1], 32768 }
 0x25e   :  { %5257 = vsyncadd [#allocation4 + $0x1], 4294934528  ;;  %1699 = vmatprep.mubr.bf16.mxu1 %v5589_v63  ;;  %1781 = vmatprep.mubr.bf16.mxu0 %v5589_v63  ;;  %v1412_v30 = vld [vmem:[#allocation2 + $0x808] sm:$0xff]  ;;  %v1414_v54 = vld [vmem:[#allocation2 + $0x818] sm:$0xff] }
 0x25f   :  { %v1411_v27 = vld [vmem:[#allocation2 + $0x800] sm:$0xff]  ;;  %1667 = vmatprep.subr.bf16.mxu1 %v1412_v30  ;;  %1749 = vmatprep.subr.bf16.mxu0 %v1414_v54  ;;  %v1413_v29 = vld [vmem:[#allocation2 + $0x810] sm:$0xff]  ;;  %v1420_v48 = vld [vmem:[#allocation2 + $0x848] sm:$0xff] }
 0x260   :  { %v1422_v20 = vld [vmem:[#allocation2 + $0x858] sm:$0xff]  ;;  %1668 = vmatpush1.bf16.msra.mxu1 %v1411_v27  ;;  %1750 = vmatpush1.bf16.msra.mxu0 %v1413_v29  ;;  %v1419_v1 = vld [vmem:[#allocation2 + $0x840] sm:$0xff]  ;;  %v1421_v26 = vld [vmem:[#allocation2 + $0x850] sm:$0xff] }
 0x261   :  { %1669 = vmatprep.subr.bf16.mxu1 %v1420_v48  ;;  %1751 = vmatprep.subr.bf16.mxu0 %v1422_v20  ;;  %v1428_v8 = vld [vmem:[#allocation2 + $0x888] sm:$0xff]  ;;  %v1430_v40 = vld [vmem:[#allocation2 + $0x898] sm:$0xff]  ;;  %v1427_v55 = vld [vmem:[#allocation2 + $0x880] sm:$0xff] }
 0x262   :  { %v1429_v58 = vld [vmem:[#allocation2 + $0x890] sm:$0xff]  ;;  %v1436_v2 = vld [vmem:[#allocation2 + $0x8c8] sm:$0xff]  ;;  %v1438_v30 = vld [vmem:[#allocation2 + $0x8d8] sm:$0xff] }
 0x263   :  { %v1435_v27 = vld [vmem:[#allocation2 + $0x8c0] sm:$0xff]  ;;  %v1437_v29 = vld [vmem:[#allocation2 + $0x8d0] sm:$0xff]  ;;  %v1444_v48 = vld [vmem:[#allocation2 + $0x908] sm:$0xff] }
 0x264   :  { %1670 = vmatpush1.bf16.msra.mxu1 %v1419_v1  ;;  %1752 = vmatpush1.bf16.msra.mxu0 %v1421_v26  ;;  %v1446_v20 = vld [vmem:[#allocation2 + $0x918] sm:$0xff]  ;;  %v1443_v1 = vld [vmem:[#allocation2 + $0x900] sm:$0xff]  ;;  %v1445_v26 = vld [vmem:[#allocation2 + $0x910] sm:$0xff] }
 0x265   :  { %1671 = vmatprep.subr.bf16.mxu1 %v1428_v8  ;;  %1753 = vmatprep.subr.bf16.mxu0 %v1430_v40  ;;  %v1452_v8 = vld [vmem:[#allocation2 + $0x948] sm:$0xff]  ;;  %v1454_v40 = vld [vmem:[#allocation2 + $0x958] sm:$0xff]  ;;  %v1451_v54 = vld [vmem:[#allocation2 + $0x940] sm:$0xff] }
 0x268   :  { %1672 = vmatpush1.bf16.msra.mxu1 %v1427_v55  ;;  %1754 = vmatpush1.bf16.msra.mxu0 %v1429_v58  ;;  %v1453_v55 = vld [vmem:[#allocation2 + $0x950] sm:$0xff]  ;;  %v1462_v58 = vld [vmem:[#allocation2 + $0x998] sm:$0xff] }
 0x269   :  { %1673 = vmatprep.subr.bf16.mxu1 %v1436_v2  ;;  %1755 = vmatprep.subr.bf16.mxu0 %v1438_v30  ;;  %v1460_v2 = vld [vmem:[#allocation2 + $0x988] sm:$0xff]  ;;  %v1459_v30 = vld [vmem:[#allocation2 + $0x980] sm:$0xff] }
 0x26c   :  { %1674 = vmatpush1.bf16.msra.mxu1 %v1435_v27  ;;  %1756 = vmatpush1.bf16.msra.mxu0 %v1437_v29  ;;  %v1461_v27 = vld [vmem:[#allocation2 + $0x990] sm:$0xff]  ;;  %v1468_v29 = vld [vmem:[#allocation2 + $0x9c8] sm:$0xff] }
 0x26d   :  { %1675 = vmatprep.subr.bf16.mxu1 %v1444_v48  ;;  %1757 = vmatprep.subr.bf16.mxu0 %v1446_v20  ;;  %v1470_v48 = vld [vmem:[#allocation2 + $0x9d8] sm:$0xff]  ;;  %v1467_v20 = vld [vmem:[#allocation2 + $0x9c0] sm:$0xff] }
 0x270   :  { %1676 = vmatpush1.bf16.msra.mxu1 %v1443_v1  ;;  %1758 = vmatpush1.bf16.msra.mxu0 %v1445_v26  ;;  %v1469_v1 = vld [vmem:[#allocation2 + $0x9d0] sm:$0xff]  ;;  %v1476_v26 = vld [vmem:[#allocation2 + $0xa08] sm:$0xff] }
 0x271   :  { %1677 = vmatprep.subr.bf16.mxu1 %v1452_v8  ;;  %1759 = vmatprep.subr.bf16.mxu0 %v1454_v40  ;;  %v1478_v8 = vld [vmem:[#allocation2 + $0xa18] sm:$0xff]  ;;  %v1475_v40 = vld [vmem:[#allocation2 + $0xa00] sm:$0xff] }
 0x274   :  { %1678 = vmatpush1.bf16.msra.mxu1 %v1451_v54  ;;  %1760 = vmatpush1.bf16.msra.mxu0 %v1453_v55  ;;  %v1477_v54 = vld [vmem:[#allocation2 + $0xa10] sm:$0xff]  ;;  %v1484_v55 = vld [vmem:[#allocation2 + $0xa48] sm:$0xff] }
 0x275   :  { %1679 = vmatprep.subr.bf16.mxu1 %v1460_v2  ;;  %1761 = vmatprep.subr.bf16.mxu0 %v1462_v58  ;;  %v1486_v2 = vld [vmem:[#allocation2 + $0xa58] sm:$0xff]  ;;  %v1483_v58 = vld [vmem:[#allocation2 + $0xa40] sm:$0xff] }
 0x278   :  { %1680 = vmatpush1.bf16.msra.mxu1 %v1459_v30  ;;  %1762 = vmatpush1.bf16.msra.mxu0 %v1461_v27  ;;  %v1485_v30 = vld [vmem:[#allocation2 + $0xa50] sm:$0xff]  ;;  %v1492_v27 = vld [vmem:[#allocation2 + $0xa88] sm:$0xff] }
 0x279   :  { %1681 = vmatprep.subr.bf16.mxu1 %v1468_v29  ;;  %1763 = vmatprep.subr.bf16.mxu0 %v1470_v48  ;;  %v1494_v29 = vld [vmem:[#allocation2 + $0xa98] sm:$0xff]  ;;  %v1491_v48 = vld [vmem:[#allocation2 + $0xa80] sm:$0xff] }
 0x27c   :  { %1682 = vmatpush1.bf16.msra.mxu1 %v1467_v20  ;;  %1764 = vmatpush1.bf16.msra.mxu0 %v1469_v1  ;;  %v1493_v20 = vld [vmem:[#allocation2 + $0xa90] sm:$0xff]  ;;  %v1500_v1 = vld [vmem:[#allocation2 + $0xac8] sm:$0xff] }
 0x27d   :  { %1683 = vmatprep.subr.bf16.mxu1 %v1476_v26  ;;  %1765 = vmatprep.subr.bf16.mxu0 %v1478_v8  ;;  %v1502_v26 = vld [vmem:[#allocation2 + $0xad8] sm:$0xff]  ;;  %v1499_v8 = vld [vmem:[#allocation2 + $0xac0] sm:$0xff] }
 0x280   :  { %1684 = vmatpush1.bf16.msra.mxu1 %v1475_v40  ;;  %1766 = vmatpush1.bf16.msra.mxu0 %v1477_v54  ;;  %v1501_v40 = vld [vmem:[#allocation2 + $0xad0] sm:$0xff]  ;;  %v1508_v54 = vld [vmem:[#allocation2 + $0xb08] sm:$0xff] }
 0x281   :  { %1685 = vmatprep.subr.bf16.mxu1 %v1484_v55  ;;  %1767 = vmatprep.subr.bf16.mxu0 %v1486_v2  ;;  %v1510_v55 = vld [vmem:[#allocation2 + $0xb18] sm:$0xff]  ;;  %v1507_v2 = vld [vmem:[#allocation2 + $0xb00] sm:$0xff] }
 0x284   :  { %1686 = vmatpush1.bf16.msra.mxu1 %v1483_v58  ;;  %1768 = vmatpush1.bf16.msra.mxu0 %v1485_v30  ;;  %v1509_v58 = vld [vmem:[#allocation2 + $0xb10] sm:$0xff]  ;;  %v1516_v30 = vld [vmem:[#allocation2 + $0xb48] sm:$0xff] }
 0x285   :  { %1687 = vmatprep.subr.bf16.mxu1 %v1492_v27  ;;  %1769 = vmatprep.subr.bf16.mxu0 %v1494_v29  ;;  %v1518_v27 = vld [vmem:[#allocation2 + $0xb58] sm:$0xff]  ;;  %v1515_v29 = vld [vmem:[#allocation2 + $0xb40] sm:$0xff] }
 0x288   :  { %1688 = vmatpush1.bf16.msra.mxu1 %v1491_v48  ;;  %1770 = vmatpush1.bf16.msra.mxu0 %v1493_v20  ;;  %v1517_v48 = vld [vmem:[#allocation2 + $0xb50] sm:$0xff]  ;;  %v1524_v20 = vld [vmem:[#allocation2 + $0xb88] sm:$0xff] }
 0x289   :  { %1689 = vmatprep.subr.bf16.mxu1 %v1500_v1  ;;  %1771 = vmatprep.subr.bf16.mxu0 %v1502_v26  ;;  %v1526_v1 = vld [vmem:[#allocation2 + $0xb98] sm:$0xff]  ;;  %v1523_v26 = vld [vmem:[#allocation2 + $0xb80] sm:$0xff] }
 0x28c   :  { %1690 = vmatpush1.bf16.msra.mxu1 %v1499_v8  ;;  %1772 = vmatpush1.bf16.msra.mxu0 %v1501_v40  ;;  %v1525_v8 = vld [vmem:[#allocation2 + $0xb90] sm:$0xff]  ;;  %v1532_v40 = vld [vmem:[#allocation2 + $0xbc8] sm:$0xff] }
 0x28d   :  { %1691 = vmatprep.subr.bf16.mxu1 %v1508_v54  ;;  %1773 = vmatprep.subr.bf16.mxu0 %v1510_v55  ;;  %v1534_v54 = vld [vmem:[#allocation2 + $0xbd8] sm:$0xff]  ;;  %v1531_v55 = vld [vmem:[#allocation2 + $0xbc0] sm:$0xff] }
 0x290   :  { %1692 = vmatpush1.bf16.msra.mxu1 %v1507_v2  ;;  %1774 = vmatpush1.bf16.msra.mxu0 %v1509_v58  ;;  %v1533_v2 = vld [vmem:[#allocation2 + $0xbd0] sm:$0xff]  ;;  %v1540_v58 = vld [vmem:[#allocation2 + $0xc08] sm:$0xff] }
 0x291   :  { %1693 = vmatprep.subr.bf16.mxu1 %v1516_v30  ;;  %1775 = vmatprep.subr.bf16.mxu0 %v1518_v27  ;;  %v1416_v30 = vld [vmem:[#allocation2 + $0x828] sm:$0xff]  ;;  %v1539_v27 = vld [vmem:[#allocation2 + $0xc00] sm:$0xff] }
 0x294   :  { %1694 = vmatpush1.bf16.msra.mxu1 %v1515_v29  ;;  %1776 = vmatpush1.bf16.msra.mxu0 %v1517_v48  ;;  %v1415_v29 = vld [vmem:[#allocation2 + $0x820] sm:$0xff]  ;;  %v1548_v48 = vld [vmem:[#allocation2 + $0xc48] sm:$0xff] }
 0x295   :  { %1695 = vmatprep.subr.bf16.mxu1 %v1524_v20  ;;  %1777 = vmatprep.subr.bf16.mxu0 %v1526_v1  ;;  %v1424_v20 = vld [vmem:[#allocation2 + $0x868] sm:$0xff]  ;;  %v1547_v1 = vld [vmem:[#allocation2 + $0xc40] sm:$0xff] }
 0x298   :  { %1696 = vmatpush1.bf16.msra.mxu1 %v1523_v26  ;;  %1778 = vmatpush1.bf16.msra.mxu0 %v1525_v8  ;;  %v1423_v26 = vld [vmem:[#allocation2 + $0x860] sm:$0xff]  ;;  %v1556_v8 = vld [vmem:[#allocation2 + $0xc88] sm:$0xff] }
 0x299   :  { %1697 = vmatprep.subr.bf16.mxu1 %v1532_v40  ;;  %1779 = vmatprep.subr.bf16.mxu0 %v1534_v54  ;;  %v1432_v40 = vld [vmem:[#allocation2 + $0x8a8] sm:$0xff]  ;;  %v1555_v54 = vld [vmem:[#allocation2 + $0xc80] sm:$0xff] }
 0x29c   :  { %1698 = vmatpush1.bf16.msra.mxu1 %v1531_v55  ;;  %1780 = vmatpush1.bf16.msra.mxu0 %v1533_v2  ;;  %v1431_v55 = vld [vmem:[#allocation2 + $0x8a0] sm:$0xff]  ;;  %v1564_v2 = vld [vmem:[#allocation2 + $0xcc8] sm:$0xff] }
 0x29d   :  { %1708 = vmatprep.subr.bf16.mxu1 %v1540_v58  ;;  %1831 = vmatprep.subr.bf16.mxu0 %v1416_v30  ;;  %v1440_v58 = vld [vmem:[#allocation2 + $0x8e8] sm:$0xff]  ;;  %v1563_v30 = vld [vmem:[#allocation2 + $0xcc0] sm:$0xff] }
 0x29f   :  { %1700 = vmatmul.mubr.bf16.vlgmr.msra.gmra.mrb[16].mxu1 %v5585_v60  ;;  %1782 = vmatmul.mubr.bf16.vlgmr.msra.gmra.mrb[16].mxu0 %v5585_v60 }
 0x2a0   :  { %1709 = vmatpush1.bf16.msra.mxu1 %v1539_v27  ;;  %1832 = vmatpush1.bf16.msra.mxu0 %v1415_v29  ;;  %v1439_v27 = vld [vmem:[#allocation2 + $0x8e0] sm:$0xff]  ;;  %v1572_v29 = vld [vmem:[#allocation2 + $0xd08] sm:$0xff] }
 0x2a1   :  { %1710 = vmatprep.subr.bf16.mxu1 %v1548_v48  ;;  %1833 = vmatprep.subr.bf16.mxu0 %v1424_v20  ;;  %v1448_v48 = vld [vmem:[#allocation2 + $0x928] sm:$0xff]  ;;  %v1571_v20 = vld [vmem:[#allocation2 + $0xd00] sm:$0xff] }
 0x2a2   :  { %1740 = vmatprep.mubr.bf16.mxu1 %v5591_v0  ;;  %1863 = vmatprep.mubr.bf16.mxu0 %v5589_v63 }
 0x2a4   :  { %1711 = vmatpush1.bf16.msra.mxu1 %v1547_v1  ;;  %1834 = vmatpush1.bf16.msra.mxu0 %v1423_v26  ;;  %v1447_v1 = vld [vmem:[#allocation2 + $0x920] sm:$0xff]  ;;  %v1580_v26 = vld [vmem:[#allocation2 + $0xd48] sm:$0xff] }
 0x2a5   :  { %1712 = vmatprep.subr.bf16.mxu1 %v1556_v8  ;;  %1835 = vmatprep.subr.bf16.mxu0 %v1432_v40  ;;  %v1456_v8 = vld [vmem:[#allocation2 + $0x968] sm:$0xff]  ;;  %v1579_v40 = vld [vmem:[#allocation2 + $0xd40] sm:$0xff] }
 0x2a8   :  { %1713 = vmatpush1.bf16.msra.mxu1 %v1555_v54  ;;  %1836 = vmatpush1.bf16.msra.mxu0 %v1431_v55  ;;  %v1455_v54 = vld [vmem:[#allocation2 + $0x960] sm:$0xff]  ;;  %v1588_v55 = vld [vmem:[#allocation2 + $0xd88] sm:$0xff] }
 0x2a9   :  { %1714 = vmatprep.subr.bf16.mxu1 %v1564_v2  ;;  %1837 = vmatprep.subr.bf16.mxu0 %v1440_v58  ;;  %v1464_v2 = vld [vmem:[#allocation2 + $0x9a8] sm:$0xff]  ;;  %v1587_v58 = vld [vmem:[#allocation2 + $0xd80] sm:$0xff] }
 0x2ac   :  { %1715 = vmatpush1.bf16.msra.mxu1 %v1563_v30  ;;  %1838 = vmatpush1.bf16.msra.mxu0 %v1439_v27  ;;  %v1463_v30 = vld [vmem:[#allocation2 + $0x9a0] sm:$0xff]  ;;  %v1596_v27 = vld [vmem:[#allocation2 + $0xdc8] sm:$0xff] }
 0x2ad   :  { %1716 = vmatprep.subr.bf16.mxu1 %v1572_v29  ;;  %1839 = vmatprep.subr.bf16.mxu0 %v1448_v48  ;;  %v1472_v29 = vld [vmem:[#allocation2 + $0x9e8] sm:$0xff]  ;;  %v1595_v48 = vld [vmem:[#allocation2 + $0xdc0] sm:$0xff] }
 0x2b0   :  { %1717 = vmatpush1.bf16.msra.mxu1 %v1571_v20  ;;  %1840 = vmatpush1.bf16.msra.mxu0 %v1447_v1  ;;  %v1471_v20 = vld [vmem:[#allocation2 + $0x9e0] sm:$0xff]  ;;  %v1604_v1 = vld [vmem:[#allocation2 + $0xe08] sm:$0xff] }
 0x2b1   :  { %1718 = vmatprep.subr.bf16.mxu1 %v1580_v26  ;;  %1841 = vmatprep.subr.bf16.mxu0 %v1456_v8  ;;  %v1480_v26 = vld [vmem:[#allocation2 + $0xa28] sm:$0xff]  ;;  %v1603_v8 = vld [vmem:[#allocation2 + $0xe00] sm:$0xff] }
 0x2b4   :  { %1719 = vmatpush1.bf16.msra.mxu1 %v1579_v40  ;;  %1842 = vmatpush1.bf16.msra.mxu0 %v1455_v54  ;;  %v1479_v40 = vld [vmem:[#allocation2 + $0xa20] sm:$0xff]  ;;  %v1612_v54 = vld [vmem:[#allocation2 + $0xe48] sm:$0xff] }
 0x2b5   :  { %1720 = vmatprep.subr.bf16.mxu1 %v1588_v55  ;;  %1843 = vmatprep.subr.bf16.mxu0 %v1464_v2  ;;  %v1488_v55 = vld [vmem:[#allocation2 + $0xa68] sm:$0xff]  ;;  %v1611_v2 = vld [vmem:[#allocation2 + $0xe40] sm:$0xff] }
 0x2b8   :  { %1721 = vmatpush1.bf16.msra.mxu1 %v1587_v58  ;;  %1844 = vmatpush1.bf16.msra.mxu0 %v1463_v30  ;;  %v1487_v58 = vld [vmem:[#allocation2 + $0xa60] sm:$0xff]  ;;  %v1620_v30 = vld [vmem:[#allocation2 + $0xe88] sm:$0xff] }
 0x2b9   :  { %1722 = vmatprep.subr.bf16.mxu1 %v1596_v27  ;;  %1845 = vmatprep.subr.bf16.mxu0 %v1472_v29  ;;  %v1496_v27 = vld [vmem:[#allocation2 + $0xaa8] sm:$0xff]  ;;  %v1619_v29 = vld [vmem:[#allocation2 + $0xe80] sm:$0xff] }
 0x2bc   :  { %1723 = vmatpush1.bf16.msra.mxu1 %v1595_v48  ;;  %1846 = vmatpush1.bf16.msra.mxu0 %v1471_v20  ;;  %v1495_v48 = vld [vmem:[#allocation2 + $0xaa0] sm:$0xff]  ;;  %v1628_v20 = vld [vmem:[#allocation2 + $0xec8] sm:$0xff] }
 0x2bd   :  { %1724 = vmatprep.subr.bf16.mxu1 %v1604_v1  ;;  %1847 = vmatprep.subr.bf16.mxu0 %v1480_v26  ;;  %v1504_v1 = vld [vmem:[#allocation2 + $0xae8] sm:$0xff]  ;;  %v1627_v26 = vld [vmem:[#allocation2 + $0xec0] sm:$0xff] }
 0x2c0   :  { %1725 = vmatpush1.bf16.msra.mxu1 %v1603_v8  ;;  %1848 = vmatpush1.bf16.msra.mxu0 %v1479_v40  ;;  %v1503_v8 = vld [vmem:[#allocation2 + $0xae0] sm:$0xff]  ;;  %v1636_v40 = vld [vmem:[#allocation2 + $0xf08] sm:$0xff] }
 0x2c1   :  { %1726 = vmatprep.subr.bf16.mxu1 %v1612_v54  ;;  %1849 = vmatprep.subr.bf16.mxu0 %v1488_v55  ;;  %v1512_v54 = vld [vmem:[#allocation2 + $0xb28] sm:$0xff]  ;;  %v1635_v55 = vld [vmem:[#allocation2 + $0xf00] sm:$0xff] }
 0x2c4   :  { %1727 = vmatpush1.bf16.msra.mxu1 %v1611_v2  ;;  %1850 = vmatpush1.bf16.msra.mxu0 %v1487_v58  ;;  %v1511_v2 = vld [vmem:[#allocation2 + $0xb20] sm:$0xff]  ;;  %v1644_v58 = vld [vmem:[#allocation2 + $0xf48] sm:$0xff] }
 0x2c5   :  { %1728 = vmatprep.subr.bf16.mxu1 %v1620_v30  ;;  %1851 = vmatprep.subr.bf16.mxu0 %v1496_v27  ;;  %v1520_v30 = vld [vmem:[#allocation2 + $0xb68] sm:$0xff]  ;;  %v1643_v27 = vld [vmem:[#allocation2 + $0xf40] sm:$0xff] }
 0x2c8   :  { %1729 = vmatpush1.bf16.msra.mxu1 %v1619_v29  ;;  %1852 = vmatpush1.bf16.msra.mxu0 %v1495_v48  ;;  %v1519_v29 = vld [vmem:[#allocation2 + $0xb60] sm:$0xff]  ;;  %v1652_v48 = vld [vmem:[#allocation2 + $0xf88] sm:$0xff] }
 0x2c9   :  { %1730 = vmatprep.subr.bf16.mxu1 %v1628_v20  ;;  %1853 = vmatprep.subr.bf16.mxu0 %v1504_v1  ;;  %v1528_v20 = vld [vmem:[#allocation2 + $0xba8] sm:$0xff]  ;;  %v1651_v1 = vld [vmem:[#allocation2 + $0xf80] sm:$0xff] }
 0x2cc   :  { %1731 = vmatpush1.bf16.msra.mxu1 %v1627_v26  ;;  %1854 = vmatpush1.bf16.msra.mxu0 %v1503_v8  ;;  %v1527_v26 = vld [vmem:[#allocation2 + $0xba0] sm:$0xff]  ;;  %v1660_v8 = vld [vmem:[#allocation2 + $0xfc8] sm:$0xff] }
 0x2cd   :  { %1732 = vmatprep.subr.bf16.mxu1 %v1636_v40  ;;  %1855 = vmatprep.subr.bf16.mxu0 %v1512_v54  ;;  %v1536_v40 = vld [vmem:[#allocation2 + $0xbe8] sm:$0xff]  ;;  %v1659_v54 = vld [vmem:[#allocation2 + $0xfc0] sm:$0xff] }
 0x2d0   :  { %1733 = vmatpush1.bf16.msra.mxu1 %v1635_v55  ;;  %1856 = vmatpush1.bf16.msra.mxu0 %v1511_v2  ;;  %v1535_v55 = vld [vmem:[#allocation2 + $0xbe0] sm:$0xff]  ;;  %v1542_v2 = vld [vmem:[#allocation2 + $0xc18] sm:$0xff] }
 0x2d1   :  { %1734 = vmatprep.subr.bf16.mxu1 %v1644_v58  ;;  %1857 = vmatprep.subr.bf16.mxu0 %v1520_v30  ;;  %v1418_v58 = vld [vmem:[#allocation2 + $0x838] sm:$0xff]  ;;  %v1541_v30 = vld [vmem:[#allocation2 + $0xc10] sm:$0xff] }
 0x2d4   :  { %1735 = vmatpush1.bf16.msra.mxu1 %v1643_v27  ;;  %1858 = vmatpush1.bf16.msra.mxu0 %v1519_v29  ;;  %v1417_v27 = vld [vmem:[#allocation2 + $0x830] sm:$0xff]  ;;  %v1550_v29 = vld [vmem:[#allocation2 + $0xc58] sm:$0xff] }
 0x2d5   :  { %1736 = vmatprep.subr.bf16.mxu1 %v1652_v48  ;;  %1859 = vmatprep.subr.bf16.mxu0 %v1528_v20  ;;  %v1426_v48 = vld [vmem:[#allocation2 + $0x878] sm:$0xff]  ;;  %v1549_v20 = vld [vmem:[#allocation2 + $0xc50] sm:$0xff] }
 0x2d8   :  { %1737 = vmatpush1.bf16.msra.mxu1 %v1651_v1  ;;  %1860 = vmatpush1.bf16.msra.mxu0 %v1527_v26  ;;  %v1425_v1 = vld [vmem:[#allocation2 + $0x870] sm:$0xff]  ;;  %v1558_v26 = vld [vmem:[#allocation2 + $0xc98] sm:$0xff] }
 0x2d9   :  { %1738 = vmatprep.subr.bf16.mxu1 %v1660_v8  ;;  %1861 = vmatprep.subr.bf16.mxu0 %v1536_v40  ;;  %v1434_v8 = vld [vmem:[#allocation2 + $0x8b8] sm:$0xff]  ;;  %v1557_v40 = vld [vmem:[#allocation2 + $0xc90] sm:$0xff] }
 0x2dc   :  { %1739 = vmatpush1.bf16.msra.mxu1 %v1659_v54  ;;  %1862 = vmatpush1.bf16.msra.mxu0 %v1535_v55  ;;  %v1433_v54 = vld [vmem:[#allocation2 + $0x8b0] sm:$0xff]  ;;  %v1566_v55 = vld [vmem:[#allocation2 + $0xcd8] sm:$0xff] }
 0x2dd   :  { %1790 = vmatprep.subr.bf16.mxu1 %v1542_v2  ;;  %1913 = vmatprep.subr.bf16.mxu0 %v1418_v58  ;;  %v1442_v2 = vld [vmem:[#allocation2 + $0x8f8] sm:$0xff]  ;;  %v1565_v58 = vld [vmem:[#allocation2 + $0xcd0] sm:$0xff] }
 0x2df   :  { %1741 = vmatmul.mubr.bf16.vlgmr.msra.gmra.mrb[20].mxu1 %v5587_v62  ;;  %1864 = vmatmul.mubr.bf16.vlgmr.msra.gmra.mrb[20].mxu0 %v5585_v60 }
 0x2e0   :  { %1791 = vmatpush1.bf16.msra.mxu1 %v1541_v30  ;;  %1914 = vmatpush1.bf16.msra.mxu0 %v1417_v27  ;;  %v1441_v30 = vld [vmem:[#allocation2 + $0x8f0] sm:$0xff]  ;;  %v1574_v27 = vld [vmem:[#allocation2 + $0xd18] sm:$0xff] }
 0x2e1   :  { %1792 = vmatprep.subr.bf16.mxu1 %v1550_v29  ;;  %1915 = vmatprep.subr.bf16.mxu0 %v1426_v48  ;;  %v1450_v29 = vld [vmem:[#allocation2 + $0x938] sm:$0xff]  ;;  %v1449_v48 = vld [vmem:[#allocation2 + $0x930] sm:$0xff] }
 0x2e2   :  { %1822 = vmatprep.mubr.bf16.mxu1 %v5591_v0  ;;  %1945 = vmatprep.mubr.bf16.mxu0 %v5589_v63  ;;  %v1573_v63 = vld [vmem:[#allocation2 + $0xd10] sm:$0xff] }
 0x2e4   :  { %1793 = vmatpush1.bf16.msra.mxu1 %v1549_v20  ;;  %1916 = vmatpush1.bf16.msra.mxu0 %v1425_v1  ;;  %v1582_v20 = vld [vmem:[#allocation2 + $0xd58] sm:$0xff] }
 0x2e5   :  { %1794 = vmatprep.subr.bf16.mxu1 %v1558_v26  ;;  %1917 = vmatprep.subr.bf16.mxu0 %v1434_v8  ;;  %v1458_v1 = vld [vmem:[#allocation2 + $0x978] sm:$0xff]  ;;  %v1581_v26 = vld [vmem:[#allocation2 + $0xd50] sm:$0xff] }
 0x2e6   :  { %v1457_v8 = vld [vmem:[#allocation2 + $0x970] sm:$0xff] }
 0x2e8   :  { %1795 = vmatpush1.bf16.msra.mxu1 %v1557_v40  ;;  %1918 = vmatpush1.bf16.msra.mxu0 %v1433_v54  ;;  %v1590_v40 = vld [vmem:[#allocation2 + $0xd98] sm:$0xff] }
 0x2e9   :  { %1796 = vmatprep.subr.bf16.mxu1 %v1566_v55  ;;  %1919 = vmatprep.subr.bf16.mxu0 %v1442_v2  ;;  %v1466_v54 = vld [vmem:[#allocation2 + $0x9b8] sm:$0xff]  ;;  %v1589_v55 = vld [vmem:[#allocation2 + $0xd90] sm:$0xff] }
 0x2ea   :  { %v1465_v2 = vld [vmem:[#allocation2 + $0x9b0] sm:$0xff] }
 0x2ec   :  { %1797 = vmatpush1.bf16.msra.mxu1 %v1565_v58  ;;  %1920 = vmatpush1.bf16.msra.mxu0 %v1441_v30  ;;  %v1598_v58 = vld [vmem:[#allocation2 + $0xdd8] sm:$0xff] }
 0x2ed   :  { %1798 = vmatprep.subr.bf16.mxu1 %v1574_v27  ;;  %1921 = vmatprep.subr.bf16.mxu0 %v1450_v29  ;;  %v1474_v30 = vld [vmem:[#allocation2 + $0x9f8] sm:$0xff]  ;;  %v1597_v27 = vld [vmem:[#allocation2 + $0xdd0] sm:$0xff] }
 0x2ee   :  { %v1473_v29 = vld [vmem:[#allocation2 + $0x9f0] sm:$0xff] }
 0x2f0   :  { %1799 = vmatpush1.bf16.msra.mxu1 %v1573_v63  ;;  %1922 = vmatpush1.bf16.msra.mxu0 %v1449_v48  ;;  %v1606_v63 = vld [vmem:[#allocation2 + $0xe18] sm:$0xff] }
 0x2f1   :  { %1800 = vmatprep.subr.bf16.mxu1 %v1582_v20  ;;  %1923 = vmatprep.subr.bf16.mxu0 %v1458_v1  ;;  %v1482_v48 = vld [vmem:[#allocation2 + $0xa38] sm:$0xff]  ;;  %v1605_v20 = vld [vmem:[#allocation2 + $0xe10] sm:$0xff] }
 0x2f2   :  { %v1481_v1 = vld [vmem:[#allocation2 + $0xa30] sm:$0xff] }
 0x2f4   :  { %1801 = vmatpush1.bf16.msra.mxu1 %v1581_v26  ;;  %1924 = vmatpush1.bf16.msra.mxu0 %v1457_v8  ;;  %v1614_v26 = vld [vmem:[#allocation2 + $0xe58] sm:$0xff] }
 0x2f5   :  { %1802 = vmatprep.subr.bf16.mxu1 %v1590_v40  ;;  %1925 = vmatprep.subr.bf16.mxu0 %v1466_v54  ;;  %v1490_v8 = vld [vmem:[#allocation2 + $0xa78] sm:$0xff]  ;;  %v1613_v40 = vld [vmem:[#allocation2 + $0xe50] sm:$0xff] }
 0x2f6   :  { %v1489_v54 = vld [vmem:[#allocation2 + $0xa70] sm:$0xff] }
 0x2f8   :  { %1803 = vmatpush1.bf16.msra.mxu1 %v1589_v55  ;;  %1926 = vmatpush1.bf16.msra.mxu0 %v1465_v2  ;;  %v1622_v55 = vld [vmem:[#allocation2 + $0xe98] sm:$0xff] }
 0x2f9   :  { %1804 = vmatprep.subr.bf16.mxu1 %v1598_v58  ;;  %1927 = vmatprep.subr.bf16.mxu0 %v1474_v30  ;;  %v1498_v2 = vld [vmem:[#allocation2 + $0xab8] sm:$0xff]  ;;  %v1621_v58 = vld [vmem:[#allocation2 + $0xe90] sm:$0xff] }
 0x2fa   :  { %v1497_v30 = vld [vmem:[#allocation2 + $0xab0] sm:$0xff] }
 0x2fc   :  { %1805 = vmatpush1.bf16.msra.mxu1 %v1597_v27  ;;  %1928 = vmatpush1.bf16.msra.mxu0 %v1473_v29  ;;  %v1630_v27 = vld [vmem:[#allocation2 + $0xed8] sm:$0xff] }
 0x2fd   :  { %1806 = vmatprep.subr.bf16.mxu1 %v1606_v63  ;;  %1929 = vmatprep.subr.bf16.mxu0 %v1482_v48  ;;  %v1506_v29 = vld [vmem:[#allocation2 + $0xaf8] sm:$0xff]  ;;  %v1629_v63 = vld [vmem:[#allocation2 + $0xed0] sm:$0xff] }
 0x2fe   :  { %v1505_v48 = vld [vmem:[#allocation2 + $0xaf0] sm:$0xff] }
 0x300   :  { %1807 = vmatpush1.bf16.msra.mxu1 %v1605_v20  ;;  %1930 = vmatpush1.bf16.msra.mxu0 %v1481_v1  ;;  %v1638_v20 = vld [vmem:[#allocation2 + $0xf18] sm:$0xff] }
 0x301   :  { %1808 = vmatprep.subr.bf16.mxu1 %v1614_v26  ;;  %1931 = vmatprep.subr.bf16.mxu0 %v1490_v8  ;;  %v1514_v1 = vld [vmem:[#allocation2 + $0xb38] sm:$0xff]  ;;  %v1637_v26 = vld [vmem:[#allocation2 + $0xf10] sm:$0xff] }
 0x302   :  { %v1513_v8 = vld [vmem:[#allocation2 + $0xb30] sm:$0xff] }
 0x304   :  { %1809 = vmatpush1.bf16.msra.mxu1 %v1613_v40  ;;  %1932 = vmatpush1.bf16.msra.mxu0 %v1489_v54  ;;  %v1646_v40 = vld [vmem:[#allocation2 + $0xf58] sm:$0xff] }
 0x305   :  { %1810 = vmatprep.subr.bf16.mxu1 %v1622_v55  ;;  %1933 = vmatprep.subr.bf16.mxu0 %v1498_v2  ;;  %v1522_v54 = vld [vmem:[#allocation2 + $0xb78] sm:$0xff]  ;;  %v1645_v55 = vld [vmem:[#allocation2 + $0xf50] sm:$0xff] }
 0x306   :  { %v1521_v2 = vld [vmem:[#allocation2 + $0xb70] sm:$0xff] }
 0x308   :  { %1811 = vmatpush1.bf16.msra.mxu1 %v1621_v58  ;;  %1934 = vmatpush1.bf16.msra.mxu0 %v1497_v30  ;;  %v1654_v58 = vld [vmem:[#allocation2 + $0xf98] sm:$0xff] }
 0x309   :  { %1812 = vmatprep.subr.bf16.mxu1 %v1630_v27  ;;  %1935 = vmatprep.subr.bf16.mxu0 %v1506_v29  ;;  %v1530_v30 = vld [vmem:[#allocation2 + $0xbb8] sm:$0xff]  ;;  %v1653_v27 = vld [vmem:[#allocation2 + $0xf90] sm:$0xff] }
 0x30a   :  { %v1529_v29 = vld [vmem:[#allocation2 + $0xbb0] sm:$0xff] }
 0x30c   :  { %1813 = vmatpush1.bf16.msra.mxu1 %v1629_v63  ;;  %1936 = vmatpush1.bf16.msra.mxu0 %v1505_v48  ;;  %v1662_v63 = vld [vmem:[#allocation2 + $0xfd8] sm:$0xff] }
 0x30d   :  { %1814 = vmatprep.subr.bf16.mxu1 %v1638_v20  ;;  %1937 = vmatprep.subr.bf16.mxu0 %v1514_v1  ;;  %v1538_v48 = vld [vmem:[#allocation2 + $0xbf8] sm:$0xff]  ;;  %v1661_v20 = vld [vmem:[#allocation2 + $0xfd0] sm:$0xff] }
 0x30e   :  { %v1537_v1 = vld [vmem:[#allocation2 + $0xbf0] sm:$0xff] }
 0x310   :  { %1815 = vmatpush1.bf16.msra.mxu1 %v1637_v26  ;;  %1938 = vmatpush1.bf16.msra.mxu0 %v1513_v8  ;;  %v1544_v26 = vld [vmem:[#allocation2 + $0xc28] sm:$0xff]  ;;  %v1543_v8 = vld [vmem:[#allocation2 + $0xc20] sm:$0xff] }
 0x311   :  { %1816 = vmatprep.subr.bf16.mxu1 %v1646_v40  ;;  %1939 = vmatprep.subr.bf16.mxu0 %v1522_v54  ;;  %v1552_v40 = vld [vmem:[#allocation2 + $0xc68] sm:$0xff]  ;;  %v1551_v54 = vld [vmem:[#allocation2 + $0xc60] sm:$0xff] }
 0x314   :  { %1817 = vmatpush1.bf16.msra.mxu1 %v1645_v55  ;;  %1940 = vmatpush1.bf16.msra.mxu0 %v1521_v2  ;;  %v1560_v55 = vld [vmem:[#allocation2 + $0xca8] sm:$0xff] }
 0x315   :  { %1818 = vmatprep.subr.bf16.mxu1 %v1654_v58  ;;  %1941 = vmatprep.subr.bf16.mxu0 %v1530_v30  ;;  %v1584_v2 = vld [vmem:[#allocation2 + $0xd68] sm:$0xff] }
 0x318   :  { %1819 = vmatpush1.bf16.msra.mxu1 %v1653_v27  ;;  %1942 = vmatpush1.bf16.msra.mxu0 %v1529_v29  ;;  %v1602_v29 = vld [vmem:[#allocation2 + $0xdf8] sm:$0xff] }
 0x319   :  { %1820 = vmatprep.subr.bf16.mxu1 %v1662_v63  ;;  %1943 = vmatprep.subr.bf16.mxu0 %v1538_v48  ;;  %v6890_v63 = vld [vmem:[#allocation81_spill] sm:$0xff]  ;;  %v6891_v48 = vld [vmem:[#allocation87_spill] sm:$0xff] }
 0x31c   :  { %1821 = vmatpush1.bf16.msra.mxu1 %v1661_v20  ;;  %1944 = vmatpush1.bf16.msra.mxu0 %v1537_v1  ;;  %v1601_v20 = vld [vmem:[#allocation2 + $0xdf0] sm:$0xff]  ;;  %v1610_v1 = vld [vmem:[#allocation2 + $0xe38] sm:$0xff] }
 0x31d   :  { %1872 = vmatprep.subr.bf16.mxu1 %v1544_v26  ;;  %1995 = vmatprep.subr.bf16.mxu0 %v5619_v4  ;;  %v1559_v4 = vld [vmem:[#allocation2 + $0xca0] sm:$0xff] }
 0x31e   :  { %v6892_v26 = vld [vmem:[#allocation86_spill] sm:$0xff] }
 0x31f   :  { %1823 = vmatmul.mubr.bf16.vlgmr.msra.gmra.mrb[24].mxu1 %v5587_v62  ;;  %1946 = vmatmul.mubr.bf16.vlgmr.msra.gmra.mrb[24].mxu0 %v5585_v60  ;;  %v1568_v60 = vld [vmem:[#allocation2 + $0xce8] sm:$0xff] }
 0x320   :  { %1873 = vmatpush1.bf16.msra.mxu1 %v1543_v8  ;;  %1996 = vmatpush1.bf16.msra.mxu0 %v5617_v3  ;;  %v1567_v3 = vld [vmem:[#allocation2 + $0xce0] sm:$0xff]  ;;  %v1609_v8 = vld [vmem:[#allocation2 + $0xe30] sm:$0xff] }
 0x321   :  { %1874 = vmatprep.subr.bf16.mxu1 %v1552_v40  ;;  %1997 = vmatprep.subr.bf16.mxu0 %v5635_v15  ;;  %v1576_v15 = vld [vmem:[#allocation2 + $0xd28] sm:$0xff]  ;;  %v1618_v40 = vld [vmem:[#allocation2 + $0xe78] sm:$0xff] }
 0x322   :  { %1904 = vmatprep.mubr.bf16.mxu1 %v5591_v0  ;;  %2027 = vmatprep.mubr.bf16.mxu0 %v5569_v34 }
 0x324   :  { %1875 = vmatpush1.bf16.msra.mxu1 %v1551_v54  ;;  %1998 = vmatpush1.bf16.msra.mxu0 %v5633_v14  ;;  %v1575_v14 = vld [vmem:[#allocation2 + $0xd20] sm:$0xff]  ;;  %v6895_v54 = vld [vmem:[#allocation99_spill] sm:$0xff] }
 0x325   :  { %1876 = vmatprep.subr.bf16.mxu1 %v1560_v55  ;;  %1999 = vmatprep.subr.bf16.mxu0 %v5651_v22  ;;  %v1592_v22 = vld [vmem:[#allocation2 + $0xda8] sm:$0xff]  ;;  %v1617_v55 = vld [vmem:[#allocation2 + $0xe70] sm:$0xff] }
 0x328   :  { %1877 = vmatpush1.bf16.msra.mxu1 %v1559_v4  ;;  %2000 = vmatpush1.bf16.msra.mxu0 %v5649_v21  ;;  %v1583_v21 = vld [vmem:[#allocation2 + $0xd60] sm:$0xff]  ;;  %v1626_v4 = vld [vmem:[#allocation2 + $0xeb8] sm:$0xff] }
 0x329   :  { %1878 = vmatprep.subr.bf16.mxu1 %v1568_v60  ;;  %2001 = vmatprep.subr.bf16.mxu0 %v5667_v42  ;;  %v1600_v42 = vld [vmem:[#allocation2 + $0xde8] sm:$0xff] }
 0x32a   :  { %v6896_v60 = vld [vmem:[#allocation98_spill] sm:$0xff] }
 0x32c   :  { %1879 = vmatpush1.bf16.msra.mxu1 %v1567_v3  ;;  %2002 = vmatpush1.bf16.msra.mxu0 %v5665_v41  ;;  %v1591_v41 = vld [vmem:[#allocation2 + $0xda0] sm:$0xff] }
 0x32d   :  { %1880 = vmatprep.subr.bf16.mxu1 %v1576_v15  ;;  %2003 = vmatprep.subr.bf16.mxu0 %v5683_v51  ;;  %v1608_v51 = vld [vmem:[#allocation2 + $0xe28] sm:$0xff]  ;;  %v6897_v3 = vld [vmem:[#allocation105_spill] sm:$0xff]  ;;  %v1625_v15 = vld [vmem:[#allocation2 + $0xeb0] sm:$0xff] }
 0x330   :  { %1881 = vmatpush1.bf16.msra.mxu1 %v1575_v14  ;;  %2004 = vmatpush1.bf16.msra.mxu0 %v5681_v50  ;;  %v1599_v50 = vld [vmem:[#allocation2 + $0xde0] sm:$0xff]  ;;  %v1634_v14 = vld [vmem:[#allocation2 + $0xef8] sm:$0xff] }
 0x331   :  { %1882 = vmatprep.subr.bf16.mxu1 %v1584_v2  ;;  %2005 = vmatprep.subr.bf16.mxu0 %v5699_v37  ;;  %v1607_v37 = vld [vmem:[#allocation2 + $0xe20] sm:$0xff]  ;;  %v6898_v2 = vld [vmem:[#allocation104_spill] sm:$0xff] }
 0x334   :  { %1883 = vmatpush1.bf16.msra.mxu1 %v1583_v21  ;;  %2006 = vmatpush1.bf16.msra.mxu0 %v5697_v39  ;;  %v1616_v39 = vld [vmem:[#allocation2 + $0xe68] sm:$0xff] }
 0x335   :  { %1884 = vmatprep.subr.bf16.mxu1 %v1592_v22  ;;  %2007 = vmatprep.subr.bf16.mxu0 %v5715_v57  ;;  %v1615_v57 = vld [vmem:[#allocation2 + $0xe60] sm:$0xff]  ;;  %v6899_v21 = vld [vmem:[#allocation111_spill] sm:$0xff] }
 0x336   :  { %v1633_v22 = vld [vmem:[#allocation2 + $0xef0] sm:$0xff] }
 0x338   :  { %1885 = vmatpush1.bf16.msra.mxu1 %v1591_v41  ;;  %2008 = vmatpush1.bf16.msra.mxu0 %v5713_v59  ;;  %v1624_v59 = vld [vmem:[#allocation2 + $0xea8] sm:$0xff]  ;;  %v1642_v41 = vld [vmem:[#allocation2 + $0xf38] sm:$0xff] }
 0x339   :  { %1886 = vmatprep.subr.bf16.mxu1 %v1600_v42  ;;  %2009 = vmatprep.subr.bf16.mxu0 %v5731_v11  ;;  %v1623_v11 = vld [vmem:[#allocation2 + $0xea0] sm:$0xff] }
 0x33a   :  { %v6900_v42 = vld [vmem:[#allocation110_spill] sm:$0xff] }
 0x33c   :  { %1887 = vmatpush1.bf16.msra.mxu1 %v1599_v50  ;;  %2010 = vmatpush1.bf16.msra.mxu0 %v5729_v56  ;;  %v1632_v56 = vld [vmem:[#allocation2 + $0xee8] sm:$0xff]  ;;  %v6901_v50 = vld [vmem:[#allocation117_spill] sm:$0xff] }
 0x33d   :  { %1888 = vmatprep.subr.bf16.mxu1 %v1608_v51  ;;  %2011 = vmatprep.subr.bf16.mxu0 %v5747_v28  ;;  %v1631_v28 = vld [vmem:[#allocation2 + $0xee0] sm:$0xff]  ;;  %v1641_v51 = vld [vmem:[#allocation2 + $0xf30] sm:$0xff] }
 0x340   :  { %1889 = vmatpush1.bf16.msra.mxu1 %v1607_v37  ;;  %2012 = vmatpush1.bf16.msra.mxu0 %v5745_v19  ;;  %v1640_v19 = vld [vmem:[#allocation2 + $0xf28] sm:$0xff]  ;;  %v1650_v37 = vld [vmem:[#allocation2 + $0xf78] sm:$0xff] }
 0x341   :  { %1890 = vmatprep.subr.bf16.mxu1 %v1616_v39  ;;  %2013 = vmatprep.subr.bf16.mxu0 %v5763_v32  ;;  %v1639_v32 = vld [vmem:[#allocation2 + $0xf20] sm:$0xff]  ;;  %v6902_v39 = vld [vmem:[#allocation116_spill] sm:$0xff] }
 0x344   :  { %1891 = vmatpush1.bf16.msra.mxu1 %v1615_v57  ;;  %2014 = vmatpush1.bf16.msra.mxu0 %v5761_v49  ;;  %v1648_v49 = vld [vmem:[#allocation2 + $0xf68] sm:$0xff] }
 0x345   :  { %1892 = vmatprep.subr.bf16.mxu1 %v1624_v59  ;;  %2015 = vmatprep.subr.bf16.mxu0 %v5779_v13  ;;  %v1656_v13 = vld [vmem:[#allocation2 + $0xfa8] sm:$0xff]  ;;  %v1649_v59 = vld [vmem:[#allocation2 + $0xf70] sm:$0xff] }
 0x346   :  { %v6903_v57 = vld [vmem:[#allocation123_spill] sm:$0xff] }
 0x348   :  { %1893 = vmatpush1.bf16.msra.mxu1 %v1623_v11  ;;  %2016 = vmatpush1.bf16.msra.mxu0 %v5777_v33  ;;  %v1647_v33 = vld [vmem:[#allocation2 + $0xf60] sm:$0xff]  ;;  %v1658_v11 = vld [vmem:[#allocation2 + $0xfb8] sm:$0xff] }
 0x349   :  { %1894 = vmatprep.subr.bf16.mxu1 %v1632_v56  ;;  %2017 = vmatprep.subr.bf16.mxu0 %v5795_v10  ;;  %v1655_v10 = vld [vmem:[#allocation2 + $0xfa0] sm:$0xff] }
 0x34a   :  { %v6904_v56 = vld [vmem:[#allocation122_spill] sm:$0xff] }
 0x34c   :  { %1895 = vmatpush1.bf16.msra.mxu1 %v1631_v28  ;;  %2018 = vmatpush1.bf16.msra.mxu0 %v5793_v12  ;;  %v1664_v12 = vld [vmem:[#allocation2 + $0xfe8] sm:$0xff]  ;;  %v6905_v28 = vld [vmem:[#allocation129_spill] sm:$0xff] }
 0x34d   :  { %1896 = vmatprep.subr.bf16.mxu1 %v1640_v19  ;;  %2019 = vmatprep.subr.bf16.mxu0 %v5811_v47  ;;  %v1546_v47 = vld [vmem:[#allocation2 + $0xc38] sm:$0xff]  ;;  %v1657_v19 = vld [vmem:[#allocation2 + $0xfb0] sm:$0xff] }
 0x350   :  { %1897 = vmatpush1.bf16.msra.mxu1 %v1639_v32  ;;  %2020 = vmatpush1.bf16.msra.mxu0 %v5809_v46  ;;  %v1663_v46 = vld [vmem:[#allocation2 + $0xfe0] sm:$0xff]  ;;  %v1666_v32 = vld [vmem:[#allocation2 + $0xff8] sm:$0xff] }
 0x351   :  { %1898 = vmatprep.subr.bf16.mxu1 %v1648_v49  ;;  %2021 = vmatprep.subr.bf16.mxu0 %v5827_v35  ;;  %v1545_v35 = vld [vmem:[#allocation2 + $0xc30] sm:$0xff] }
 0x352   :  { %v6906_v49 = vld [vmem:[#allocation128_spill] sm:$0xff] }
 0x354   :  { %1899 = vmatpush1.bf16.msra.mxu1 %v1647_v33  ;;  %2022 = vmatpush1.bf16.msra.mxu0 %v5825_v17  ;;  %v1554_v17 = vld [vmem:[#allocation2 + $0xc78] sm:$0xff]  ;;  %v6907_v33 = vld [vmem:[#allocation135_spill] sm:$0xff] }
 0x355   :  { %1900 = vmatprep.subr.bf16.mxu1 %v1656_v13  ;;  %2023 = vmatprep.subr.bf16.mxu0 %v5843_v9  ;;  %v1562_v9 = vld [vmem:[#allocation2 + $0xcb8] sm:$0xff]  ;;  %v1665_v13 = vld [vmem:[#allocation2 + $0xff0] sm:$0xff] }
 0x358   :  { %1901 = vmatpush1.bf16.msra.mxu1 %v1655_v10  ;;  %2024 = vmatpush1.bf16.msra.mxu0 %v5841_v7  ;;  %v1553_v7 = vld [vmem:[#allocation2 + $0xc70] sm:$0xff]  ;;  %v6908_v10 = vld [vmem:[#allocation134_spill] sm:$0xff] }
 0x359   :  { %1902 = vmatprep.subr.bf16.mxu1 %v1664_v12  ;;  %2025 = vmatprep.subr.bf16.mxu0 %v5859_v18  ;;  %v1585_v18 = vld [vmem:[#allocation2 + $0xd70] sm:$0xff]  ;;  %v6909_v12 = vld [vmem:[#allocation141_spill] sm:$0xff] }
 0x35c   :  { %1903 = vmatpush1.bf16.msra.mxu1 %v1663_v46  ;;  %2026 = vmatpush1.bf16.msra.mxu0 %v5857_v24  ;;  %v1561_v24 = vld [vmem:[#allocation2 + $0xcb0] sm:$0xff]  ;;  %v6910_v46 = vld [vmem:[#allocation58_spill] sm:$0xff] }
 0x35d   :  { %1954 = vmatprep.subr.bf16.mxu1 %v1546_v47  ;;  %2077 = vmatprep.subr.bf16.mxu0 %v5623_v6  ;;  %v1570_v6 = vld [vmem:[#allocation2 + $0xcf8] sm:$0xff] }
 0x35e   :  { %v6911_v47 = vld [vmem:[#allocation140_spill] sm:$0xff] }
 0x35f   :  { %1905 = vmatmul.mubr.bf16.vlgmr.msra.gmra.mrb[28].mxu1 %v5587_v62  ;;  %2028 = vmatmul.mubr.bf16.vlgmr.msra.gmra.mrb[28].mxu0 %v5565_v31 }
 0x360   :  { %1955 = vmatpush1.bf16.msra.mxu1 %v1545_v35  ;;  %2078 = vmatpush1.bf16.msra.mxu0 %v5621_v5  ;;  %v1569_v5 = vld [vmem:[#allocation2 + $0xcf0] sm:$0xff]  ;;  %v6912_v35 = vld [vmem:[#allocation57_spill] sm:$0xff] }
 0x361   :  { %1956 = vmatprep.subr.bf16.mxu1 %v1554_v17  ;;  %2079 = vmatprep.subr.bf16.mxu0 %v5639_v43  ;;  %v1578_v43 = vld [vmem:[#allocation2 + $0xd38] sm:$0xff] }
 0x362   :  { %1986 = vmatprep.mubr.bf16.mxu1 %v5591_v0  ;;  %2109 = vmatprep.mubr.bf16.mxu0 %v5569_v34  ;;  %v1577_v0 = vld [vmem:[#allocation2 + $0xd30] sm:$0xff]  ;;  %v6913_v17 = vld [vmem:[#allocation149_spill] sm:$0xff] }
 0x364   :  { %1957 = vmatpush1.bf16.msra.mxu1 %v1553_v7  ;;  %2080 = vmatpush1.bf16.msra.mxu0 %v5637_v16  ;;  %v1586_v16 = vld [vmem:[#allocation2 + $0xd78] sm:$0xff]  ;;  %v6914_v7 = vld [vmem:[#allocation62_spill] sm:$0xff] }
 0x365   :  { %1958 = vmatprep.subr.bf16.mxu1 %v1562_v9  ;;  %2081 = vmatprep.subr.bf16.mxu0 %v5655_v25  ;;  %v1594_v25 = vld [vmem:[#allocation2 + $0xdb8] sm:$0xff] }
 0x366   :  { %v6915_v9 = vld [vmem:[#allocation44_spill] sm:$0xff] }
 0x368   :  { %1959 = vmatpush1.bf16.msra.mxu1 %v1561_v24  ;;  %2082 = vmatpush1.bf16.msra.mxu0 %v5653_v23  ;;  %v6916_v24 = vld [vmem:[#allocation148_spill] sm:$0xff] }
 0x369   :  { %1960 = vmatprep.subr.bf16.mxu1 %v1570_v6  ;;  %2083 = vmatprep.subr.bf16.mxu0 %v5671_v45  ;;  %v6917_v6 = vld [vmem:[#allocation61_spill] sm:$0xff] }
 0x36c   :  { %1961 = vmatpush1.bf16.msra.mxu1 %v1569_v5  ;;  %2084 = vmatpush1.bf16.msra.mxu0 %v5669_v44  ;;  %v6918_v5 = vld [vmem:[#allocation157_spill] sm:$0xff] }
 0x36d   :  { %1962 = vmatprep.subr.bf16.mxu1 %v1578_v43  ;;  %2085 = vmatprep.subr.bf16.mxu0 %v5687_v53  ;;  %v6920_v43 = vld [vmem:[#allocation156_spill] sm:$0xff] }
 0x370   :  { %1963 = vmatpush1.bf16.msra.mxu1 %v1577_v0  ;;  %2086 = vmatpush1.bf16.msra.mxu0 %v5685_v52  ;;  %v6921_v0 = vld [vmem:[#allocation65_spill] sm:$0xff] }
 0x371   :  { %1964 = vmatprep.subr.bf16.mxu1 %v1586_v16  ;;  %2087 = vmatprep.subr.bf16.mxu0 %v5703_v36  ;;  %v1593_v36 = vld [vmem:[#allocation2 + $0xdb0] sm:$0xff]  ;;  %v6922_v16 = vld [vmem:[#allocation165_spill] sm:$0xff] }
 0x372   :  { %v6190_v23 = vpop.f32.mrb[16].mxu1  ;;  %v6192_v45 = vpop.f32.mrb[16].mxu0 }
 0x373   :  { %v6194_v58 = vpop.f32.mrb[17].mxu1  ;;  %v6196_v44 = vpop.f32.mrb[17].mxu0 }
 0x374   :  { %v1705_v30 = vpop.f32.mrb[18].mxu1  ;;  %1965 = vmatpush1.bf16.msra.mxu1 %v1585_v18  ;;  %2088 = vmatpush1.bf16.msra.mxu0 %v5701_v38  ;;  %v1787_v53 = vpop.f32.mrb[18].mxu0  ;;  %v6893_v38 = vld [vmem:[#allocation93_spill] sm:$0xff]  ;;  %v6923_v18 = vld [vmem:[#allocation70_spill] sm:$0xff] }
 0x375   :  { %v1706_v27 = vpop.f32.mrb[19].mxu1  ;;  %1966 = vmatprep.subr.bf16.mxu1 %v1594_v25  ;;  %2089 = vmatprep.subr.bf16.mxu0 %v5719_v61  ;;  %v1788_v52 = vpop.f32.mrb[19].mxu0  ;;  %v6894_v61 = vld [vmem:[#allocation92_spill] sm:$0xff]  ;;  %v6925_v30 = vld [vmem:[#allocation69_spill] sm:$0xff] }
 0x376   :  { %v6924_v25 = vld [vmem:[#allocation164_spill] sm:$0xff]  ;;  %v6926_v53 = vld [vmem:[#allocation173_spill] sm:$0xff]  ;;  %v6927_v27 = vld [vmem:[#allocation74_spill] sm:$0xff] }
 0x377   :  { %v6929_v52 = vld [vmem:[#allocation73_spill] sm:$0xff] }
 0x378   :  { %1967 = vmatpush1.bf16.msra.mxu1 %v1593_v36  ;;  %2090 = vmatpush1.bf16.msra.mxu0 %v6890_v63  ;;  %v6928_v36 = vld [vmem:[#allocation172_spill] sm:$0xff]  ;;  %v6931_v63 = vld [vmem:[#allocation78_spill] sm:$0xff] }
 0x379   :  { %1968 = vmatprep.subr.bf16.mxu1 %v1602_v29  ;;  %2091 = vmatprep.subr.bf16.mxu0 %v6891_v48  ;;  %v6930_v29 = vld [vmem:[#allocation181_spill] sm:$0xff] }
 0x37c   :  { %1969 = vmatpush1.bf16.msra.mxu1 %v1601_v20  ;;  %2092 = vmatpush1.bf16.msra.mxu0 %v6892_v26 }
 0x37d   :  { %1970 = vmatprep.subr.bf16.mxu1 %v1610_v1  ;;  %2093 = vmatprep.subr.bf16.mxu0 %v6893_v38 }
 0x380   :  { %1971 = vmatpush1.bf16.msra.mxu1 %v1609_v8  ;;  %2094 = vmatpush1.bf16.msra.mxu0 %v6894_v61  ;;  %v6932_v61 = vld [vmem:[#allocation180_spill] sm:$0xff] }
 0x381   :  { %1972 = vmatprep.subr.bf16.mxu1 %v1618_v40  ;;  %2095 = vmatprep.subr.bf16.mxu0 %v6895_v54  ;;  %v6933_v54 = vld [vmem:[#allocation77_spill] sm:$0xff] }
 0x384   :  { %1973 = vmatpush1.bf16.msra.mxu1 %v1617_v55  ;;  %2096 = vmatpush1.bf16.msra.mxu0 %v6896_v60  ;;  %v6934_v60 = vld [vmem:[#allocation189_spill] sm:$0xff] }
 0x385   :  { %1974 = vmatprep.subr.bf16.mxu1 %v1626_v4  ;;  %2097 = vmatprep.subr.bf16.mxu0 %v6897_v3  ;;  %v6935_v3 = vld [vmem:[#allocation83_spill] sm:$0xff] }
 0x388   :  { %1975 = vmatpush1.bf16.msra.mxu1 %v1625_v15  ;;  %2098 = vmatpush1.bf16.msra.mxu0 %v6898_v2  ;;  %v6938_v2 = vld [vmem:[#allocation197_spill] sm:$0xff] }
 0x389   :  { %1976 = vmatprep.subr.bf16.mxu1 %v1634_v14  ;;  %2099 = vmatprep.subr.bf16.mxu0 %v6899_v21  ;;  %v6937_v14 = vld [vmem:[#allocation82_spill] sm:$0xff]  ;;  %v6940_v21 = vld [vmem:[#allocation196_spill] sm:$0xff] }
 0x38c   :  { %1977 = vmatpush1.bf16.msra.mxu1 %v1633_v22  ;;  %2100 = vmatpush1.bf16.msra.mxu0 %v6900_v42  ;;  %v6941_v22 = vld [vmem:[#allocation88_spill] sm:$0xff]  ;;  %v6943_v42 = vld [vmem:[#allocation95_spill] sm:$0xff] }
 0x38d   :  { %1978 = vmatprep.subr.bf16.mxu1 %v1642_v41  ;;  %2101 = vmatprep.subr.bf16.mxu0 %v6901_v50  ;;  %v6942_v41 = vld [vmem:[#allocation205_spill] sm:$0xff]  ;;  %v6944_v50 = vld [vmem:[#allocation204_spill] sm:$0xff] }
 0x390   :  { %1979 = vmatpush1.bf16.msra.mxu1 %v1641_v51  ;;  %2102 = vmatpush1.bf16.msra.mxu0 %v6902_v39  ;;  %v6945_v51 = vld [vmem:[#allocation94_spill] sm:$0xff]  ;;  %v6947_v39 = vld [vmem:[#allocation101_spill] sm:$0xff] }
 0x391   :  { %1980 = vmatprep.subr.bf16.mxu1 %v1650_v37  ;;  %2103 = vmatprep.subr.bf16.mxu0 %v6903_v57  ;;  %v6946_v37 = vld [vmem:[#allocation213_spill] sm:$0xff]  ;;  %v6948_v57 = vld [vmem:[#allocation212_spill] sm:$0xff] }
 0x394   :  { %1981 = vmatpush1.bf16.msra.mxu1 %v1649_v59  ;;  %2104 = vmatpush1.bf16.msra.mxu0 %v6904_v56  ;;  %v6949_v59 = vld [vmem:[#allocation100_spill] sm:$0xff]  ;;  %v6951_v56 = vld [vmem:[#allocation107_spill] sm:$0xff] }
 0x395   :  { %1982 = vmatprep.subr.bf16.mxu1 %v1658_v11  ;;  %2105 = vmatprep.subr.bf16.mxu0 %v6905_v28  ;;  %v6950_v11 = vld [vmem:[#allocation221_spill] sm:$0xff]  ;;  %v6952_v28 = vld [vmem:[#allocation220_spill] sm:$0xff] }
 0x398   :  { %1983 = vmatpush1.bf16.msra.mxu1 %v1657_v19  ;;  %2106 = vmatpush1.bf16.msra.mxu0 %v6906_v49  ;;  %v6953_v19 = vld [vmem:[#allocation106_spill] sm:$0xff]  ;;  %v6955_v49 = vld [vmem:[#allocation113_spill] sm:$0xff] }
 0x399   :  { %1984 = vmatprep.subr.bf16.mxu1 %v1666_v32  ;;  %2107 = vmatprep.subr.bf16.mxu0 %v6907_v33  ;;  %v6954_v32 = vld [vmem:[#allocation229_spill] sm:$0xff]  ;;  %v6956_v33 = vld [vmem:[#allocation228_spill] sm:$0xff] }
 0x39c   :  { %1985 = vmatpush1.bf16.msra.mxu1 %v1665_v13  ;;  %2108 = vmatpush1.bf16.msra.mxu0 %v6908_v10  ;;  %v6957_v13 = vld [vmem:[#allocation112_spill] sm:$0xff]  ;;  %v6958_v10 = vld [vmem:[#allocation237_spill] sm:$0xff] }
 0x39d   :  { %2036 = vmatprep.subr.bf16.mxu1 %v6909_v12  ;;  %2159 = vmatprep.subr.bf16.mxu0 %v6910_v46  ;;  %v6959_v12 = vld [vmem:[#allocation119_spill] sm:$0xff]  ;;  %v6960_v46 = vld [vmem:[#allocation236_spill] sm:$0xff] }
 0x39f   :  { %1987 = vmatmul.mubr.bf16.vlgmr.msra.gmra.mrb[32].mxu1 %v5587_v62  ;;  %2110 = vmatmul.mubr.bf16.vlgmr.msra.gmra.mrb[32].mxu0 %v5565_v31  ;;  %v6919_v62 = vld [vmem:[#allocation66_spill] sm:$0xff] }
 0x3a0   :  { %2037 = vmatpush1.bf16.msra.mxu1 %v6911_v47  ;;  %2160 = vmatpush1.bf16.msra.mxu0 %v6912_v35  ;;  %v6961_v47 = vld [vmem:[#allocation118_spill] sm:$0xff]  ;;  %v6962_v35 = vld [vmem:[#allocation245_spill] sm:$0xff] }
 0x3a1   :  { %2038 = vmatprep.subr.bf16.mxu1 %v6913_v17  ;;  %2161 = vmatprep.subr.bf16.mxu0 %v6914_v7  ;;  %v6963_v17 = vld [vmem:[#allocation125_spill] sm:$0xff]  ;;  %v6964_v7 = vld [vmem:[#allocation244_spill] sm:$0xff] }
 0x3a2   :  { %2068 = vmatprep.mubr.bf16.mxu1 %v6915_v9  ;;  %2191 = vmatprep.mubr.bf16.mxu0 %v5569_v34 }
 0x3a4   :  { %2039 = vmatpush1.bf16.msra.mxu1 %v6916_v24  ;;  %2162 = vmatpush1.bf16.msra.mxu0 %v6917_v6  ;;  %v6965_v24 = vld [vmem:[#allocation124_spill] sm:$0xff]  ;;  %v6966_v6 = vld [vmem:[#allocation253_spill] sm:$0xff] }
 0x3a5   :  { %2040 = vmatprep.subr.bf16.mxu1 %v6918_v5  ;;  %2163 = vmatprep.subr.bf16.mxu0 %v6919_v62  ;;  %v6967_v5 = vld [vmem:[#allocation131_spill] sm:$0xff]  ;;  %v6968_v62 = vld [vmem:[#allocation252_spill] sm:$0xff] }
 0x3a8   :  { %2041 = vmatpush1.bf16.msra.mxu1 %v6920_v43  ;;  %2164 = vmatpush1.bf16.msra.mxu0 %v6921_v0  ;;  %v6969_v43 = vld [vmem:[#allocation130_spill] sm:$0xff]  ;;  %v6970_v0 = vld [vmem:[#allocation261_spill] sm:$0xff] }
 0x3a9   :  { %2042 = vmatprep.subr.bf16.mxu1 %v6922_v16  ;;  %2165 = vmatprep.subr.bf16.mxu0 %v6923_v18  ;;  %v6971_v16 = vld [vmem:[#allocation137_spill] sm:$0xff]  ;;  %v6972_v18 = vld [vmem:[#allocation260_spill] sm:$0xff] }
 0x3ac   :  { %2043 = vmatpush1.bf16.msra.mxu1 %v6924_v25  ;;  %2166 = vmatpush1.bf16.msra.mxu0 %v6925_v30  ;;  %v6973_v25 = vld [vmem:[#allocation136_spill] sm:$0xff]  ;;  %v6974_v30 = vld [vmem:[#allocation143_spill] sm:$0xff] }
 0x3ad   :  { %2044 = vmatprep.subr.bf16.mxu1 %v6926_v53  ;;  %2167 = vmatprep.subr.bf16.mxu0 %v6927_v27  ;;  %v6975_v53 = vld [vmem:[#allocation60_spill] sm:$0xff]  ;;  %v6976_v27 = vld [vmem:[#allocation43_spill] sm:$0xff] }
 0x3b0   :  { %2045 = vmatpush1.bf16.msra.mxu1 %v6928_v36  ;;  %2168 = vmatpush1.bf16.msra.mxu0 %v6929_v52  ;;  %v6977_v36 = vld [vmem:[#allocation142_spill] sm:$0xff]  ;;  %v6978_v52 = vld [vmem:[#allocation59_spill] sm:$0xff] }
 0x3b1   :  { %2046 = vmatprep.subr.bf16.mxu1 %v6930_v29  ;;  %2169 = vmatprep.subr.bf16.mxu0 %v6931_v63  ;;  %v6979_v29 = vld [vmem:[#allocation151_spill] sm:$0xff]  ;;  %v6980_v63 = vld [vmem:[#allocation64_spill] sm:$0xff] }
 0x3b2   :  { %v1742_v48 = vpop.f32.mrb[20].mxu1  ;;  %v6245_v20 = vpop.f32.mrb[20].mxu0 }
 0x3b3   :  { %v6248_v1 = vadd.f32 %v1742_v48, %v6190_v23  ;;  %v1744_v26 = vpop.f32.mrb[21].mxu1  ;;  %v6250_v38 = vpop.f32.mrb[21].mxu0  ;;  %v6936_v23 = vld [vmem:[#allocation188_spill] sm:$0xff]  ;;  %v6981_v48 = vld [vmem:[#allocation150_spill] sm:$0xff] }
 0x3b4   :  { %v6253_v8 = vadd.f32 %v1744_v26, %v6194_v58  ;;  %v1746_v40 = vpop.f32.mrb[22].mxu1  ;;  %2047 = vmatpush1.bf16.msra.mxu1 %v6932_v61  ;;  %2170 = vmatpush1.bf16.msra.mxu0 %v6933_v54  ;;  %v1869_v55 = vpop.f32.mrb[22].mxu0  ;;  %v6939_v58 = vld [vmem:[#allocation89_spill] sm:$0xff]  ;;  %v6982_v26 = vld [vmem:[#allocation63_spill] sm:$0xff]  ;;  %v6984_v61 = vld [vmem:[#allocation68_spill] sm:$0xff] }
 0x3b5   :  { %v1747_v4 = vpop.f32.mrb[23].mxu1  ;;  %2048 = vmatprep.subr.bf16.mxu1 %v6934_v60  ;;  %2171 = vmatprep.subr.bf16.mxu0 %v6935_v3  ;;  %v1870_v15 = vpop.f32.mrb[23].mxu0  ;;  %v6983_v40 = vld [vmem:[#allocation159_spill] sm:$0xff]  ;;  %v6985_v54 = vld [vmem:[#allocation158_spill] sm:$0xff]  ;;  %v6988_v60 = vld [vmem:[#allocation72_spill] sm:$0xff] }
 0x3b6   :  { %v6986_v55 = vld [vmem:[#allocation67_spill] sm:$0xff]  ;;  %v6989_v3 = vld [vmem:[#allocation166_spill] sm:$0xff] }
 0x3b7   :  { %v6987_v4 = vld [vmem:[#allocation167_spill] sm:$0xff] }
 0x3b8   :  { %2049 = vmatpush1.bf16.msra.mxu1 %v6936_v23  ;;  %2172 = vmatpush1.bf16.msra.mxu0 %v6937_v14  ;;  %v6990_v15 = vld [vmem:[#allocation71_spill] sm:$0xff]  ;;  %v6992_v23 = vld [vmem:[#allocation76_spill] sm:$0xff]  ;;  %v6993_v14 = vld [vmem:[#allocation174_spill] sm:$0xff] }
 0x3b9   :  { %2050 = vmatprep.subr.bf16.mxu1 %v6938_v2  ;;  %2173 = vmatprep.subr.bf16.mxu0 %v6939_v58  ;;  %v6994_v2 = vld [vmem:[#allocation75_spill] sm:$0xff] }
 0x3ba   :  { %v6995_v58 = vld [vmem:[#allocation183_spill] sm:$0xff] }
 0x3bc   :  { %2051 = vmatpush1.bf16.msra.mxu1 %v6940_v21  ;;  %2174 = vmatpush1.bf16.msra.mxu0 %v6941_v22  ;;  %v6996_v21 = vld [vmem:[#allocation80_spill] sm:$0xff] }
 0x3bd   :  { %2052 = vmatprep.subr.bf16.mxu1 %v6942_v41  ;;  %2175 = vmatprep.subr.bf16.mxu0 %v6943_v42 }
 0x3c0   :  { %2053 = vmatpush1.bf16.msra.mxu1 %v6944_v50  ;;  %2176 = vmatpush1.bf16.msra.mxu0 %v6945_v51 }
 0x3c1   :  { %2054 = vmatprep.subr.bf16.mxu1 %v6946_v37  ;;  %2177 = vmatprep.subr.bf16.mxu0 %v6947_v39 }
 0x3c4   :  { %2055 = vmatpush1.bf16.msra.mxu1 %v6948_v57  ;;  %2178 = vmatpush1.bf16.msra.mxu0 %v6949_v59  ;;  %v6997_v57 = vld [vmem:[#allocation182_spill] sm:$0xff]  ;;  %v6998_v59 = vld [vmem:[#allocation79_spill] sm:$0xff] }
 0x3c5   :  { %2056 = vmatprep.subr.bf16.mxu1 %v6950_v11  ;;  %2179 = vmatprep.subr.bf16.mxu0 %v6951_v56 }
 0x3c8   :  { %2057 = vmatpush1.bf16.msra.mxu1 %v6952_v28  ;;  %2180 = vmatpush1.bf16.msra.mxu0 %v6953_v19  ;;  %v6999_v28 = vld [vmem:[#allocation191_spill] sm:$0xff]  ;;  %v7000_v19 = vld [vmem:[#allocation85_spill] sm:$0xff] }
 0x3c9   :  { %2058 = vmatprep.subr.bf16.mxu1 %v6954_v32  ;;  %2181 = vmatprep.subr.bf16.mxu0 %v6955_v49  ;;  %v7002_v49 = vld [vmem:[#allocation84_spill] sm:$0xff] }
 0x3cc   :  { %2059 = vmatpush1.bf16.msra.mxu1 %v6956_v33  ;;  %2182 = vmatpush1.bf16.msra.mxu0 %v6957_v13  ;;  %v7003_v33 = vld [vmem:[#allocation199_spill] sm:$0xff]  ;;  %v7005_v13 = vld [vmem:[#allocation198_spill] sm:$0xff] }
 0x3cd   :  { %2060 = vmatprep.subr.bf16.mxu1 %v6958_v10  ;;  %2183 = vmatprep.subr.bf16.mxu0 %v6959_v12  ;;  %v7006_v10 = vld [vmem:[#allocation90_spill] sm:$0xff]  ;;  %v7007_v12 = vld [vmem:[#allocation207_spill] sm:$0xff] }
 0x3d0   :  { %2061 = vmatpush1.bf16.msra.mxu1 %v6960_v46  ;;  %2184 = vmatpush1.bf16.msra.mxu0 %v6961_v47  ;;  %v7008_v46 = vld [vmem:[#allocation97_spill] sm:$0xff]  ;;  %v7009_v47 = vld [vmem:[#allocation206_spill] sm:$0xff] }
 0x3d1   :  { %2062 = vmatprep.subr.bf16.mxu1 %v6962_v35  ;;  %2185 = vmatprep.subr.bf16.mxu0 %v6963_v17  ;;  %v7010_v35 = vld [vmem:[#allocation96_spill] sm:$0xff]  ;;  %v7011_v17 = vld [vmem:[#allocation215_spill] sm:$0xff] }
 0x3d4   :  { %2063 = vmatpush1.bf16.msra.mxu1 %v6964_v7  ;;  %2186 = vmatpush1.bf16.msra.mxu0 %v6965_v24  ;;  %v7012_v7 = vld [vmem:[#allocation103_spill] sm:$0xff]  ;;  %v7013_v24 = vld [vmem:[#allocation214_spill] sm:$0xff] }
 0x3d5   :  { %2064 = vmatprep.subr.bf16.mxu1 %v6966_v6  ;;  %2187 = vmatprep.subr.bf16.mxu0 %v6967_v5  ;;  %v7014_v6 = vld [vmem:[#allocation102_spill] sm:$0xff]  ;;  %v7015_v5 = vld [vmem:[#allocation223_spill] sm:$0xff] }
 0x3d8   :  { %2065 = vmatpush1.bf16.msra.mxu1 %v6968_v62  ;;  %2188 = vmatpush1.bf16.msra.mxu0 %v6969_v43  ;;  %v7016_v62 = vld [vmem:[#allocation109_spill] sm:$0xff]  ;;  %v7017_v43 = vld [vmem:[#allocation222_spill] sm:$0xff] }
 0x3d9   :  { %2066 = vmatprep.subr.bf16.mxu1 %v6970_v0  ;;  %2189 = vmatprep.subr.bf16.mxu0 %v6971_v16  ;;  %v7018_v0 = vld [vmem:[#allocation108_spill] sm:$0xff]  ;;  %v7019_v16 = vld [vmem:[#allocation231_spill] sm:$0xff] }
 0x3dc   :  { %2067 = vmatpush1.bf16.msra.mxu1 %v6972_v18  ;;  %2190 = vmatpush1.bf16.msra.mxu0 %v6973_v25  ;;  %v7020_v18 = vld [vmem:[#allocation115_spill] sm:$0xff]  ;;  %v7021_v25 = vld [vmem:[#allocation230_spill] sm:$0xff] }
 0x3dd   :  { %2118 = vmatprep.subr.bf16.mxu1 %v6974_v30  ;;  %2241 = vmatprep.subr.bf16.mxu0 %v6975_v53  ;;  %v7022_v30 = vld [vmem:[#allocation114_spill] sm:$0xff]  ;;  %v7023_v53 = vld [vmem:[#allocation239_spill] sm:$0xff] }
 0x3df   :  { %2069 = vmatmul.mubr.bf16.vlgmr.msra.gmra.mrb[36].mxu1 %v6976_v27  ;;  %2192 = vmatmul.mubr.bf16.vlgmr.msra.gmra.mrb[36].mxu0 %v5565_v31 }
 0x3e0   :  { %2119 = vmatpush1.bf16.msra.mxu1 %v6977_v36  ;;  %2242 = vmatpush1.bf16.msra.mxu0 %v6978_v52  ;;  %v7024_v36 = vld [vmem:[#allocation121_spill] sm:$0xff]  ;;  %v7025_v52 = vld [vmem:[#allocation238_spill] sm:$0xff] }
 0x3e1   :  { %2120 = vmatprep.subr.bf16.mxu1 %v6979_v29  ;;  %2243 = vmatprep.subr.bf16.mxu0 %v6980_v63  ;;  %v7026_v29 = vld [vmem:[#allocation120_spill] sm:$0xff]  ;;  %v7027_v63 = vld [vmem:[#allocation247_spill] sm:$0xff] }
 0x3e2   :  { %2150 = vmatprep.mubr.bf16.mxu1 %v6915_v9  ;;  %2273 = vmatprep.mubr.bf16.mxu0 %v5569_v34  ;;  %v6991_v34 = vld [vmem:[#allocation175_spill] sm:$0xff] }
 0x3e4   :  { %2121 = vmatpush1.bf16.msra.mxu1 %v6981_v48  ;;  %2244 = vmatpush1.bf16.msra.mxu0 %v6982_v26  ;;  %v7028_v48 = vld [vmem:[#allocation127_spill] sm:$0xff]  ;;  %v7029_v26 = vld [vmem:[#allocation246_spill] sm:$0xff] }
 0x3e5   :  { %2122 = vmatprep.subr.bf16.mxu1 %v6983_v40  ;;  %2245 = vmatprep.subr.bf16.mxu0 %v6984_v61  ;;  %v7030_v40 = vld [vmem:[#allocation126_spill] sm:$0xff]  ;;  %v7031_v61 = vld [vmem:[#allocation255_spill] sm:$0xff] }
 0x3e8   :  { %2123 = vmatpush1.bf16.msra.mxu1 %v6985_v54  ;;  %2246 = vmatpush1.bf16.msra.mxu0 %v6986_v55  ;;  %v7032_v54 = vld [vmem:[#allocation133_spill] sm:$0xff]  ;;  %v7033_v55 = vld [vmem:[#allocation254_spill] sm:$0xff] }
 0x3e9   :  { %2124 = vmatprep.subr.bf16.mxu1 %v6987_v4  ;;  %2247 = vmatprep.subr.bf16.mxu0 %v6988_v60  ;;  %v7034_v4 = vld [vmem:[#allocation132_spill] sm:$0xff]  ;;  %v7035_v60 = vld [vmem:[#allocation263_spill] sm:$0xff] }
 0x3ec   :  { %2125 = vmatpush1.bf16.msra.mxu1 %v6989_v3  ;;  %2248 = vmatpush1.bf16.msra.mxu0 %v6990_v15  ;;  %v7036_v3 = vld [vmem:[#allocation139_spill] sm:$0xff]  ;;  %v7037_v15 = vld [vmem:[#allocation262_spill] sm:$0xff] }
 0x3ed   :  { %2126 = vmatprep.subr.bf16.mxu1 %v6991_v34  ;;  %2249 = vmatprep.subr.bf16.mxu0 %v6992_v23  ;;  %v7038_v34 = vld [vmem:[#allocation138_spill] sm:$0xff]  ;;  %v7039_v23 = vld [vmem:[#allocation145_spill] sm:$0xff] }
 0x3f0   :  { %2127 = vmatpush1.bf16.msra.mxu1 %v6993_v14  ;;  %2250 = vmatpush1.bf16.msra.mxu0 %v6994_v2  ;;  %v7040_v14 = vld [vmem:[#allocation144_spill] sm:$0xff]  ;;  %v7041_v2 = vld [vmem:[#allocation153_spill] sm:$0xff] }
 0x3f1   :  { %2128 = vmatprep.subr.bf16.mxu1 %v6995_v58  ;;  %2251 = vmatprep.subr.bf16.mxu0 %v6996_v21  ;;  %v7042_v58 = vld [vmem:[#allocation152_spill] sm:$0xff]  ;;  %v7043_v21 = vld [vmem:[#allocation161_spill] sm:$0xff] }
 0x3f2   :  { %v1824_v22 = vpop.f32.mrb[24].mxu1  ;;  %v6323_v41 = vpop.f32.mrb[24].mxu0 }
 0x3f3   :  { %v6326_v42 = vadd.f32 %v1824_v22, %v6192_v45  ;;  %v1826_v50 = vpop.f32.mrb[25].mxu1  ;;  %v6328_v51 = vpop.f32.mrb[25].mxu0  ;;  %v7001_v45 = vld [vmem:[#allocation190_spill] sm:$0xff]  ;;  %v7044_v22 = vld [vmem:[#allocation160_spill] sm:$0xff] }
 0x3f4   :  { %v6331_v37 = vadd.f32 %v1826_v50, %v6196_v44  ;;  %v1828_v39 = vpop.f32.mrb[26].mxu1  ;;  %2129 = vmatpush1.bf16.msra.mxu1 %v6997_v57  ;;  %2252 = vmatpush1.bf16.msra.mxu0 %v6998_v59  ;;  %v1951_v11 = vpop.f32.mrb[26].mxu0  ;;  %v7004_v44 = vld [vmem:[#allocation91_spill] sm:$0xff]  ;;  %v7045_v50 = vld [vmem:[#allocation169_spill] sm:$0xff]  ;;  %v7048_v59 = vld [vmem:[#allocation176_spill] sm:$0xff] }
 0x3f5   :  { %v1829_v56 = vpop.f32.mrb[27].mxu1  ;;  %2130 = vmatprep.subr.bf16.mxu1 %v6999_v28  ;;  %2253 = vmatprep.subr.bf16.mxu0 %v7000_v19  ;;  %v1952_v32 = vpop.f32.mrb[27].mxu0  ;;  %v7046_v39 = vld [vmem:[#allocation168_spill] sm:$0xff]  ;;  %v7047_v57 = vld [vmem:[#allocation177_spill] sm:$0xff] }
 0x3f8   :  { %2131 = vmatpush1.bf16.msra.mxu1 %v7001_v45  ;;  %2254 = vmatpush1.bf16.msra.mxu0 %v7002_v49 }
 0x3f9   :  { %2132 = vmatprep.subr.bf16.mxu1 %v7003_v33  ;;  %2255 = vmatprep.subr.bf16.mxu0 %v7004_v44 }
 0x3fc   :  { %2133 = vmatpush1.bf16.msra.mxu1 %v7005_v13  ;;  %2256 = vmatpush1.bf16.msra.mxu0 %v7006_v10  ;;  %v7050_v13 = vld [vmem:[#allocation184_spill] sm:$0xff] }
 0x3fd   :  { %2134 = vmatprep.subr.bf16.mxu1 %v7007_v12  ;;  %2257 = vmatprep.subr.bf16.mxu0 %v7008_v46  ;;  %v7051_v46 = vld [vmem:[#allocation193_spill] sm:$0xff] }
 0x400   :  { %2135 = vmatpush1.bf16.msra.mxu1 %v7009_v47  ;;  %2258 = vmatpush1.bf16.msra.mxu0 %v7010_v35  ;;  %v7052_v47 = vld [vmem:[#allocation192_spill] sm:$0xff] }
 0x401   :  { %2136 = vmatprep.subr.bf16.mxu1 %v7011_v17  ;;  %2259 = vmatprep.subr.bf16.mxu0 %v7012_v7  ;;  %v7054_v35 = vld [vmem:[#allocation200_spill] sm:$0xff]  ;;  %v7055_v17 = vld [vmem:[#allocation209_spill] sm:$0xff] }
 0x402   :  { %v7058_v7 = vld [vmem:[#allocation216_spill] sm:$0xff] }
 0x404   :  { %2137 = vmatpush1.bf16.msra.mxu1 %v7013_v24  ;;  %2260 = vmatpush1.bf16.msra.mxu0 %v7014_v6  ;;  %v7059_v24 = vld [vmem:[#allocation225_spill] sm:$0xff]  ;;  %v7060_v6 = vld [vmem:[#allocation224_spill] sm:$0xff] }
 0x405   :  { %2138 = vmatprep.subr.bf16.mxu1 %v7015_v5  ;;  %2261 = vmatprep.subr.bf16.mxu0 %v7016_v62  ;;  %v7061_v5 = vld [vmem:[#allocation233_spill] sm:$0xff]  ;;  %v7062_v62 = vld [vmem:[#allocation232_spill] sm:$0xff] }
 0x408   :  { %2139 = vmatpush1.bf16.msra.mxu1 %v7017_v43  ;;  %2262 = vmatpush1.bf16.msra.mxu0 %v7018_v0  ;;  %v7063_v43 = vld [vmem:[#allocation241_spill] sm:$0xff]  ;;  %v7064_v0 = vld [vmem:[#allocation240_spill] sm:$0xff] }
 0x409   :  { %2140 = vmatprep.subr.bf16.mxu1 %v7019_v16  ;;  %2263 = vmatprep.subr.bf16.mxu0 %v7020_v18  ;;  %v7065_v16 = vld [vmem:[#allocation249_spill] sm:$0xff]  ;;  %v7066_v18 = vld [vmem:[#allocation248_spill] sm:$0xff] }
 0x40c   :  { %2141 = vmatpush1.bf16.msra.mxu1 %v7021_v25  ;;  %2264 = vmatpush1.bf16.msra.mxu0 %v7022_v30  ;;  %v7067_v25 = vld [vmem:[#allocation257_spill] sm:$0xff]  ;;  %v7068_v30 = vld [vmem:[#allocation256_spill] sm:$0xff] }
 0x40d   :  { %2142 = vmatprep.subr.bf16.mxu1 %v7023_v53  ;;  %2265 = vmatprep.subr.bf16.mxu0 %v7024_v36  ;;  %v7069_v53 = vld [vmem:[#allocation265_spill] sm:$0xff]  ;;  %v7070_v36 = vld [vmem:[#allocation264_spill] sm:$0xff] }
 0x410   :  { %2143 = vmatpush1.bf16.msra.mxu1 %v7025_v52  ;;  %2266 = vmatpush1.bf16.msra.mxu0 %v7026_v29  ;;  %v7071_v52 = vld [vmem:[#allocation147_spill] sm:$0xff]  ;;  %v7072_v29 = vld [vmem:[#allocation146_spill] sm:$0xff] }
 0x411   :  { %2144 = vmatprep.subr.bf16.mxu1 %v7027_v63  ;;  %2267 = vmatprep.subr.bf16.mxu0 %v7028_v48  ;;  %v7073_v63 = vld [vmem:[#allocation155_spill] sm:$0xff]  ;;  %v7074_v48 = vld [vmem:[#allocation154_spill] sm:$0xff] }
 0x414   :  { %2145 = vmatpush1.bf16.msra.mxu1 %v7029_v26  ;;  %2268 = vmatpush1.bf16.msra.mxu0 %v7030_v40  ;;  %v7075_v26 = vld [vmem:[#allocation163_spill] sm:$0xff]  ;;  %v7076_v40 = vld [vmem:[#allocation162_spill] sm:$0xff] }
 0x415   :  { %2146 = vmatprep.subr.bf16.mxu1 %v7031_v61  ;;  %2269 = vmatprep.subr.bf16.mxu0 %v7032_v54  ;;  %v7077_v61 = vld [vmem:[#allocation171_spill] sm:$0xff]  ;;  %v7078_v54 = vld [vmem:[#allocation170_spill] sm:$0xff] }
 0x418   :  { %2147 = vmatpush1.bf16.msra.mxu1 %v7033_v55  ;;  %2270 = vmatpush1.bf16.msra.mxu0 %v7034_v4  ;;  %v7079_v55 = vld [vmem:[#allocation179_spill] sm:$0xff]  ;;  %v7080_v4 = vld [vmem:[#allocation178_spill] sm:$0xff] }
 0x419   :  { %2148 = vmatprep.subr.bf16.mxu1 %v7035_v60  ;;  %2271 = vmatprep.subr.bf16.mxu0 %v7036_v3  ;;  %v7081_v60 = vld [vmem:[#allocation187_spill] sm:$0xff] }
 0x41c   :  { %2149 = vmatpush1.bf16.msra.mxu1 %v7037_v15  ;;  %2272 = vmatpush1.bf16.msra.mxu0 %v7038_v34 }
 0x41d   :  { %2200 = vmatprep.subr.bf16.mxu1 %v7039_v23 }
 0x41f   :  { %2151 = vmatmul.mubr.bf16.vlgmr.msra.gmra.mrb[40].mxu1 %v6976_v27  ;;  %2274 = vmatmul.mubr.bf16.vlgmr.msra.gmra.mrb[40].mxu0 %v5565_v31  ;;  %v7049_v31 = vld [vmem:[#allocation185_spill] sm:$0xff] }
 0x420   :  { %2201 = vmatpush1.bf16.msra.mxu1 %v7040_v14  ;;  %2232 = vmatprep.mubr.bf16.mxu1 %v6915_v9 }
 0x421   :  { %2202 = vmatprep.subr.bf16.mxu1 %v7041_v2 }
 0x424   :  { %2203 = vmatpush1.bf16.msra.mxu1 %v7042_v58 }
 0x425   :  { %2204 = vmatprep.subr.bf16.mxu1 %v7043_v21 }
 0x428   :  { %2205 = vmatpush1.bf16.msra.mxu1 %v7044_v22  ;;  %v7082_v22 = vld [vmem:[#allocation186_spill] sm:$0xff] }
 0x429   :  { %2206 = vmatprep.subr.bf16.mxu1 %v7045_v50 }
 0x42c   :  { %2207 = vmatpush1.bf16.msra.mxu1 %v7046_v39 }
 0x42d   :  { %2208 = vmatprep.subr.bf16.mxu1 %v7047_v57  ;;  %v7083_v57 = vld [vmem:[#allocation195_spill] sm:$0xff] }
 0x430   :  { %2209 = vmatpush1.bf16.msra.mxu1 %v7048_v59 }
 0x431   :  { %2210 = vmatprep.subr.bf16.mxu1 %v7049_v31  ;;  %v7084_v31 = vld [vmem:[#allocation194_spill] sm:$0xff] }
 0x432   :  { %v1906_v11 = vpop.f32.mrb[28].mxu1  ;;  %v2029_v56 = vpop.f32.mrb[28].mxu0 }
 0x433   :  { %v6390_v28 = vadd.f32 %v1906_v11, %v6245_v20  ;;  %v6393_v19 = vadd.f32 %v2029_v56, %v6248_v1  ;;  %v1908_v32 = vpop.f32.mrb[29].mxu1  ;;  %v2031_v45 = vpop.f32.mrb[29].mxu0  ;;  %v7053_v1 = vld [vmem:[#allocation201_spill] sm:$0xff]  ;;  %v7085_v11 = vld [vmem:[#allocation203_spill] sm:$0xff]  ;;  %v7088_v56 = vld [vmem:[#allocation210_spill] sm:$0xff] }
 0x434   :  { %v6396_v49 = vadd.f32 %v1908_v32, %v6250_v38  ;;  %v6399_v33 = vadd.f32 %v2031_v45, %v6253_v8  ;;  %v1910_v44 = vpop.f32.mrb[30].mxu1  ;;  %2211 = vmatpush1.bf16.msra.mxu1 %v7050_v13  ;;  %v2033_v10 = vpop.f32.mrb[30].mxu0  ;;  %v7056_v38 = vld [vmem:[#allocation208_spill] sm:$0xff]  ;;  %v7057_v8 = vld [vmem:[#allocation217_spill] sm:$0xff]  ;;  %v7091_v32 = vld [vmem:[#allocation227_spill] sm:$0xff] }
 0x435   :  { %v1911_v12 = vpop.f32.mrb[31].mxu1  ;;  %2212 = vmatprep.subr.bf16.mxu1 %v7051_v46  ;;  %v2034_v20 = vpop.f32.mrb[31].mxu0  ;;  %v7092_v45 = vld [vmem:[#allocation226_spill] sm:$0xff]  ;;  %v7093_v44 = vld [vmem:[#allocation235_spill] sm:$0xff] }
 0x436   :  { %v7094_v13 = vld [vmem:[#allocation234_spill] sm:$0xff]  ;;  %v7095_v10 = vld [vmem:[#allocation243_spill] sm:$0xff] }
 0x437   :  { %v7096_v12 = vld [vmem:[#allocation242_spill] sm:$0xff]  ;;  %v7097_v46 = vld [vmem:[#allocation251_spill] sm:$0xff] }
 0x438   :  { %2213 = vmatpush1.bf16.msra.mxu1 %v7052_v47  ;;  %v7098_v20 = vld [vmem:[#allocation250_spill] sm:$0xff]  ;;  %v7099_v47 = vld [vmem:[#allocation259_spill] sm:$0xff] }
 0x439   :  { %2214 = vmatprep.subr.bf16.mxu1 %v7053_v1  ;;  %v7100_v1 = vld [vmem:[#allocation258_spill] sm:$0xff] }
 0x43c   :  { %2215 = vmatpush1.bf16.msra.mxu1 %v7054_v35  ;;  %v7101_v35 = vld [vmem:[#allocation267_spill] sm:$0xff] }
 0x43d   :  { %2216 = vmatprep.subr.bf16.mxu1 %v7055_v17  ;;  %v7102_v17 = vld [vmem:[#allocation266_spill] sm:$0xff] }
 0x440   :  { %2217 = vmatpush1.bf16.msra.mxu1 %v7056_v38 }
 0x441   :  { %2218 = vmatprep.subr.bf16.mxu1 %v7057_v8 }
 0x444   :  { %2219 = vmatpush1.bf16.msra.mxu1 %v7058_v7 }
 0x445   :  { %2220 = vmatprep.subr.bf16.mxu1 %v7059_v24 }
 0x448   :  { %2221 = vmatpush1.bf16.msra.mxu1 %v7060_v6 }
 0x449   :  { %2222 = vmatprep.subr.bf16.mxu1 %v7061_v5 }
 0x44c   :  { %2223 = vmatpush1.bf16.msra.mxu1 %v7062_v62 }
 0x44d   :  { %2224 = vmatprep.subr.bf16.mxu1 %v7063_v43 }
 0x450   :  { %2225 = vmatpush1.bf16.msra.mxu1 %v7064_v0 }
 0x451   :  { %2226 = vmatprep.subr.bf16.mxu1 %v7065_v16 }
 0x454   :  { %2227 = vmatpush1.bf16.msra.mxu1 %v7066_v18 }
 0x455   :  { %2228 = vmatprep.subr.bf16.mxu1 %v7067_v25 }
 0x458   :  { %2229 = vmatpush1.bf16.msra.mxu1 %v7068_v30 }
 0x459   :  { %2230 = vmatprep.subr.bf16.mxu1 %v7069_v53 }
 0x45c   :  { %2231 = vmatpush1.bf16.msra.mxu1 %v7070_v36 }
 0x45d   :  { %2282 = vmatprep.subr.bf16.mxu1 %v7071_v52 }
 0x45f   :  { %2233 = vmatmul.mubr.bf16.vlgmr.msra.gmra.mrb[44].mxu1 %v6976_v27 }
 0x460   :  { %2283 = vmatpush1.bf16.msra.mxu1 %v7072_v29  ;;  %2314 = vmatprep.mubr.bf16.mxu1 %v6915_v9 }
 0x461   :  { %2284 = vmatprep.subr.bf16.mxu1 %v7073_v63 }
 0x464   :  { %2285 = vmatpush1.bf16.msra.mxu1 %v7074_v48 }
 0x465   :  { %2286 = vmatprep.subr.bf16.mxu1 %v7075_v26 }
 0x468   :  { %2287 = vmatpush1.bf16.msra.mxu1 %v7076_v40 }
 0x469   :  { %2288 = vmatprep.subr.bf16.mxu1 %v7077_v61 }
 0x46c   :  { %2289 = vmatpush1.bf16.msra.mxu1 %v7078_v54 }
 0x46d   :  { %2290 = vmatprep.subr.bf16.mxu1 %v7079_v55 }
 0x470   :  { %2291 = vmatpush1.bf16.msra.mxu1 %v7080_v4 }
 0x471   :  { %2292 = vmatprep.subr.bf16.mxu1 %v7081_v60 }
 0x472   :  { %v1988_v3 = vpop.f32.mrb[32].mxu1  ;;  %v2111_v9 = vpop.f32.mrb[32].mxu0 }
 0x473   :  { %v1989_v15 = vadd.f32 %v1988_v3, %v6323_v41  ;;  %v2112_v34 = vadd.f32 %v2111_v9, %v6326_v42  ;;  %v1990_v23 = vpop.f32.mrb[33].mxu1  ;;  %v2113_v14 = vpop.f32.mrb[33].mxu0  ;;  %v7086_v41 = vld [vmem:[#allocation202_spill] sm:$0xff]  ;;  %v7087_v42 = vld [vmem:[#allocation211_spill] sm:$0xff] }
 0x474   :  { %v1991_v2 = vadd.f32 %v1990_v23, %v6328_v51  ;;  %v2114_v58 = vadd.f32 %v2113_v14, %v6331_v37  ;;  %v1992_v21 = vpop.f32.mrb[34].mxu1  ;;  %2293 = vmatpush1.bf16.msra.mxu1 %v7082_v22  ;;  %v2115_v50 = vpop.f32.mrb[34].mxu0  ;;  %v7089_v51 = vld [vmem:[#allocation219_spill] sm:$0xff]  ;;  %v7090_v37 = vld [vmem:[#allocation218_spill] sm:$0xff] }
 0x475   :  { %v1993_v39 = vpop.f32.mrb[35].mxu1  ;;  %2294 = vmatprep.subr.bf16.mxu1 %v7083_v57  ;;  %v2116_v59 = vpop.f32.mrb[35].mxu0 }
 0x478   :  { %2295 = vmatpush1.bf16.msra.mxu1 %v7084_v31 }
 0x479   :  { %2296 = vmatprep.subr.bf16.mxu1 %v7085_v11 }
 0x47c   :  { %2297 = vmatpush1.bf16.msra.mxu1 %v7086_v41 }
 0x47d   :  { %2298 = vmatprep.subr.bf16.mxu1 %v7087_v42 }
 0x480   :  { %2299 = vmatpush1.bf16.msra.mxu1 %v7088_v56 }
 0x481   :  { %2300 = vmatprep.subr.bf16.mxu1 %v7089_v51 }
 0x484   :  { %2301 = vmatpush1.bf16.msra.mxu1 %v7090_v37 }
 0x485   :  { %2302 = vmatprep.subr.bf16.mxu1 %v7091_v32 }
 0x488   :  { %2303 = vmatpush1.bf16.msra.mxu1 %v7092_v45 }
 0x489   :  { %2304 = vmatprep.subr.bf16.mxu1 %v7093_v44 }
 0x48c   :  { %2305 = vmatpush1.bf16.msra.mxu1 %v7094_v13 }
 0x48d   :  { %2306 = vmatprep.subr.bf16.mxu1 %v7095_v10 }
 0x490   :  { %2307 = vmatpush1.bf16.msra.mxu1 %v7096_v12 }
 0x491   :  { %2308 = vmatprep.subr.bf16.mxu1 %v7097_v46 }
 0x494   :  { %2309 = vmatpush1.bf16.msra.mxu1 %v7098_v20 }
 0x495   :  { %2310 = vmatprep.subr.bf16.mxu1 %v7099_v47 }
 0x498   :  { %2311 = vmatpush1.bf16.msra.mxu1 %v7100_v1 }
 0x499   :  { %2312 = vmatprep.subr.bf16.mxu1 %v7101_v35 }
 0x49c   :  { %2313 = vmatpush1.bf16.msra.mxu1 %v7102_v17 }
 0x49f   :  { %2315 = vmatmul.mubr.bf16.vlgmr.msra.gmra.mrb[48].mxu1 %v6976_v27 }
 0x4b2   :  { %v2070_v38 = vpop.f32.mrb[36].mxu1  ;;  %v2193_v8 = vpop.f32.mrb[36].mxu0 }
 0x4b3   :  { %v6462_v7 = vadd.f32 %v2070_v38, %v6393_v19  ;;  %v2194_v24 = vadd.f32 %v2193_v8, %v6390_v28  ;;  %v2072_v6 = vpop.f32.mrb[37].mxu1  ;;  %v2195_v5 = vpop.f32.mrb[37].mxu0 }
 0x4b4   :  { %v6466_v62 = vadd.f32 %v2072_v6, %v6399_v33  ;;  %v2196_v43 = vadd.f32 %v2195_v5, %v6396_v49  ;;  %v2074_v0 = vpop.f32.mrb[38].mxu1  ;;  %v2197_v16 = vpop.f32.mrb[38].mxu0 }
 0x4b5   :  { %v2075_v18 = vpop.f32.mrb[39].mxu1  ;;  %v2198_v25 = vpop.f32.mrb[39].mxu0 }
 0x4f2   :  { %v2152_v30 = vpop.f32.mrb[40].mxu1  ;;  %v2275_v27 = vpop.f32.mrb[40].mxu0 }
 0x4f3   :  { %v6469_v53 = vadd.f32 %v2152_v30, %v2112_v34  ;;  %v2276_v36 = vadd.f32 %v2275_v27, %v1989_v15  ;;  %v2154_v19 = vpop.f32.mrb[41].mxu1  ;;  %v2277_v52 = vpop.f32.mrb[41].mxu0 }
 0x4f4   :  { %v6471_v29 = vadd.f32 %v2154_v19, %v2114_v58  ;;  %v2278_v28 = vadd.f32 %v2277_v52, %v1991_v2  ;;  %v2156_v63 = vpop.f32.mrb[42].mxu1  ;;  %v2279_v48 = vpop.f32.mrb[42].mxu0 }
 0x4f5   :  { %v2157_v33 = vpop.f32.mrb[43].mxu1  ;;  %v2280_v26 = vpop.f32.mrb[43].mxu0 }
 0x532   :  { %v2234_v40 = vpop.f32.mrb[44].mxu1 }
 0x533   :  { %v6473_v49 = vadd.f32 %v2234_v40, %v2194_v24  ;;  %v2236_v61 = vpop.f32.mrb[45].mxu1 }
 0x534   :  { %v6475_v54 = vadd.f32 %v2236_v61, %v2196_v43  ;;  %v2238_v55 = vpop.f32.mrb[46].mxu1 }
 0x535   :  { %v2239_v4 = vpop.f32.mrb[47].mxu1 }
 0x572   :  { %v2316_v60 = vpop.f32.mrb[48].mxu1 }
 0x573   :  { %v6477_v3 = vadd.f32 %v2316_v60, %v2276_v36  ;;  %v2318_v9 = vpop.f32.mrb[49].mxu1 }
 0x574   :  { %v6479_v15 = vadd.f32 %v2318_v9, %v2278_v28  ;;  %v2320_v34 = vpop.f32.mrb[50].mxu1 }
 0x575   :  { %v2321_v23 = vpop.f32.mrb[51].mxu1 }
 0x576   :  { %5258 = dma.done.wait [#allocation4 + $0x2], 32768 }
 0x577   :  { %5259 = vsyncadd [#allocation4 + $0x2], 4294934528  ;;  %v7103_v14 = vld [vmem:[#allocation51_spill] sm:$0xff]  ;;  %v7104_v2 = vld [vmem:[#allocation52_spill] sm:$0xff] }
 0x578   :  { %2613 = vmatprep.mubr.bf16.mxu0 %v7103_v14  ;;  %2654 = vmatprep.mubr.bf16.mxu1 %v7104_v2  ;;  %v2326_v58 = vld [vmem:[#allocation2 + $0x1008] sm:$0xff]  ;;  %v2325_v22 = vld [vmem:[#allocation2 + $0x1000] sm:$0xff] }
 0x579   :  { %v2454_v21 = vld [vmem:[#allocation2 + $0x1408] sm:$0xff]  ;;  %2581 = vmatprep.subr.bf16.mxu0 %v2326_v58  ;;  %v2453_v50 = vld [vmem:[#allocation2 + $0x1400] sm:$0xff] }
 0x57a   :  { %2622 = vmatprep.subr.bf16.mxu1 %v2454_v21  ;;  %v2334_v39 = vld [vmem:[#allocation2 + $0x1048] sm:$0xff]  ;;  %2582 = vmatpush1.bf16.msra.mxu0 %v2325_v22  ;;  %v2333_v59 = vld [vmem:[#allocation2 + $0x1040] sm:$0xff] }
 0x57b   :  { %v2462_v57 = vld [vmem:[#allocation2 + $0x1448] sm:$0xff]  ;;  %2623 = vmatpush1.bf16.msra.mxu1 %v2453_v50  ;;  %2583 = vmatprep.subr.bf16.mxu0 %v2334_v39  ;;  %v2461_v31 = vld [vmem:[#allocation2 + $0x1440] sm:$0xff] }
 0x57c   :  { %2624 = vmatprep.subr.bf16.mxu1 %v2462_v57  ;;  %v2342_v11 = vld [vmem:[#allocation2 + $0x1088] sm:$0xff]  ;;  %v2341_v42 = vld [vmem:[#allocation2 + $0x1080] sm:$0xff] }
 0x57d   :  { %v2470_v41 = vld [vmem:[#allocation2 + $0x1488] sm:$0xff]  ;;  %v2469_v56 = vld [vmem:[#allocation2 + $0x1480] sm:$0xff] }
 0x57e   :  { %2584 = vmatpush1.bf16.msra.mxu0 %v2333_v59  ;;  %v2350_v51 = vld [vmem:[#allocation2 + $0x10c8] sm:$0xff]  ;;  %v2349_v32 = vld [vmem:[#allocation2 + $0x10c0] sm:$0xff] }
 0x57f   :  { %2625 = vmatpush1.bf16.msra.mxu1 %v2461_v31  ;;  %2585 = vmatprep.subr.bf16.mxu0 %v2342_v11  ;;  %v2478_v37 = vld [vmem:[#allocation2 + $0x14c8] sm:$0xff]  ;;  %v2477_v45 = vld [vmem:[#allocation2 + $0x14c0] sm:$0xff] }
 0x580   :  { %2626 = vmatprep.subr.bf16.mxu1 %v2470_v41  ;;  %v2358_v44 = vld [vmem:[#allocation2 + $0x1108] sm:$0xff]  ;;  %v2357_v10 = vld [vmem:[#allocation2 + $0x1100] sm:$0xff] }
 0x581   :  { %v2486_v13 = vld [vmem:[#allocation2 + $0x1508] sm:$0xff]  ;;  %v2485_v12 = vld [vmem:[#allocation2 + $0x1500] sm:$0xff] }
 0x582   :  { %2586 = vmatpush1.bf16.msra.mxu0 %v2341_v42  ;;  %v2366_v46 = vld [vmem:[#allocation2 + $0x1148] sm:$0xff]  ;;  %v2365_v47 = vld [vmem:[#allocation2 + $0x1140] sm:$0xff]  ;;  %v2328_v42 = vld [vmem:[#allocation2 + $0x1018] sm:$0xff] }
 0x583   :  { %2627 = vmatpush1.bf16.msra.mxu1 %v2469_v56  ;;  %2587 = vmatprep.subr.bf16.mxu0 %v2350_v51  ;;  %v2494_v20 = vld [vmem:[#allocation2 + $0x1548] sm:$0xff]  ;;  %v2493_v1 = vld [vmem:[#allocation2 + $0x1540] sm:$0xff]  ;;  %v2456_v56 = vld [vmem:[#allocation2 + $0x1418] sm:$0xff] }
 0x584   :  { %2628 = vmatprep.subr.bf16.mxu1 %v2478_v37  ;;  %v2374_v35 = vld [vmem:[#allocation2 + $0x1188] sm:$0xff]  ;;  %v2373_v38 = vld [vmem:[#allocation2 + $0x1180] sm:$0xff]  ;;  %v2327_v51 = vld [vmem:[#allocation2 + $0x1010] sm:$0xff] }
 0x585   :  { %v2502_v17 = vld [vmem:[#allocation2 + $0x1588] sm:$0xff]  ;;  %v2501_v8 = vld [vmem:[#allocation2 + $0x1580] sm:$0xff]  ;;  %v2455_v37 = vld [vmem:[#allocation2 + $0x1410] sm:$0xff] }
 0x586   :  { %2588 = vmatpush1.bf16.msra.mxu0 %v2349_v32  ;;  %v2382_v24 = vld [vmem:[#allocation2 + $0x11c8] sm:$0xff]  ;;  %v2381_v5 = vld [vmem:[#allocation2 + $0x11c0] sm:$0xff]  ;;  %v2336_v32 = vld [vmem:[#allocation2 + $0x1058] sm:$0xff] }
 0x587   :  { %2629 = vmatpush1.bf16.msra.mxu1 %v2477_v45  ;;  %2589 = vmatprep.subr.bf16.mxu0 %v2358_v44  ;;  %v2510_v6 = vld [vmem:[#allocation2 + $0x15c8] sm:$0xff]  ;;  %v2509_v43 = vld [vmem:[#allocation2 + $0x15c0] sm:$0xff]  ;;  %v2464_v45 = vld [vmem:[#allocation2 + $0x1458] sm:$0xff] }
 0x588   :  { %2630 = vmatprep.subr.bf16.mxu1 %v2486_v13  ;;  %v2390_v0 = vld [vmem:[#allocation2 + $0x1208] sm:$0xff]  ;;  %v2389_v18 = vld [vmem:[#allocation2 + $0x1200] sm:$0xff] }
 0x589   :  { %v2518_v16 = vld [vmem:[#allocation2 + $0x1608] sm:$0xff]  ;;  %v2517_v25 = vld [vmem:[#allocation2 + $0x1600] sm:$0xff] }
 0x58a   :  { %2590 = vmatpush1.bf16.msra.mxu0 %v2357_v10  ;;  %v2398_v30 = vld [vmem:[#allocation2 + $0x1248] sm:$0xff]  ;;  %v2397_v36 = vld [vmem:[#allocation2 + $0x1240] sm:$0xff]  ;;  %v2335_v10 = vld [vmem:[#allocation2 + $0x1050] sm:$0xff] }
 0x58b   :  { %2631 = vmatpush1.bf16.msra.mxu1 %v2485_v12  ;;  %2591 = vmatprep.subr.bf16.mxu0 %v2366_v46  ;;  %v2526_v27 = vld [vmem:[#allocation2 + $0x1648] sm:$0xff]  ;;  %v2525_v19 = vld [vmem:[#allocation2 + $0x1640] sm:$0xff]  ;;  %v2463_v12 = vld [vmem:[#allocation2 + $0x1450] sm:$0xff] }
 0x58c   :  { %2632 = vmatprep.subr.bf16.mxu1 %v2494_v20  ;;  %v2406_v52 = vld [vmem:[#allocation2 + $0x1288] sm:$0xff]  ;;  %v2405_v63 = vld [vmem:[#allocation2 + $0x1280] sm:$0xff]  ;;  %v2344_v46 = vld [vmem:[#allocation2 + $0x1098] sm:$0xff] }
 0x58d   :  { %v2534_v28 = vld [vmem:[#allocation2 + $0x1688] sm:$0xff]  ;;  %v2533_v48 = vld [vmem:[#allocation2 + $0x1680] sm:$0xff]  ;;  %v2472_v20 = vld [vmem:[#allocation2 + $0x1498] sm:$0xff] }
 0x58e   :  { %2592 = vmatpush1.bf16.msra.mxu0 %v2365_v47  ;;  %v2414_v33 = vld [vmem:[#allocation2 + $0x12c8] sm:$0xff]  ;;  %v2413_v40 = vld [vmem:[#allocation2 + $0x12c0] sm:$0xff]  ;;  %v2343_v47 = vld [vmem:[#allocation2 + $0x1090] sm:$0xff] }
 0x58f   :  { %2633 = vmatpush1.bf16.msra.mxu1 %v2493_v1  ;;  %2593 = vmatprep.subr.bf16.mxu0 %v2374_v35  ;;  %v2542_v26 = vld [vmem:[#allocation2 + $0x16c8] sm:$0xff]  ;;  %v2541_v61 = vld [vmem:[#allocation2 + $0x16c0] sm:$0xff]  ;;  %v2471_v1 = vld [vmem:[#allocation2 + $0x1490] sm:$0xff] }
 0x590   :  { %2634 = vmatprep.subr.bf16.mxu1 %v2502_v17  ;;  %v2422_v55 = vld [vmem:[#allocation2 + $0x1308] sm:$0xff]  ;;  %v2421_v60 = vld [vmem:[#allocation2 + $0x1300] sm:$0xff]  ;;  %v2352_v35 = vld [vmem:[#allocation2 + $0x10d8] sm:$0xff] }
 0x591   :  { %v2550_v4 = vld [vmem:[#allocation2 + $0x1708] sm:$0xff]  ;;  %v2549_v9 = vld [vmem:[#allocation2 + $0x1700] sm:$0xff]  ;;  %v2480_v17 = vld [vmem:[#allocation2 + $0x14d8] sm:$0xff] }
 0x592   :  { %2594 = vmatpush1.bf16.msra.mxu0 %v2373_v38  ;;  %v2430_v34 = vld [vmem:[#allocation2 + $0x1348] sm:$0xff]  ;;  %v2429_v58 = vld [vmem:[#allocation2 + $0x1340] sm:$0xff]  ;;  %v2351_v38 = vld [vmem:[#allocation2 + $0x10d0] sm:$0xff] }
 0x593   :  { %2635 = vmatpush1.bf16.msra.mxu1 %v2501_v8  ;;  %2595 = vmatprep.subr.bf16.mxu0 %v2382_v24  ;;  %v2558_v23 = vld [vmem:[#allocation2 + $0x1748] sm:$0xff]  ;;  %v2557_v21 = vld [vmem:[#allocation2 + $0x1740] sm:$0xff]  ;;  %v2479_v8 = vld [vmem:[#allocation2 + $0x14d0] sm:$0xff] }
 0x594   :  { %2636 = vmatprep.subr.bf16.mxu1 %v2510_v6  ;;  %v2438_v22 = vld [vmem:[#allocation2 + $0x1388] sm:$0xff]  ;;  %v2437_v39 = vld [vmem:[#allocation2 + $0x1380] sm:$0xff]  ;;  %v2360_v24 = vld [vmem:[#allocation2 + $0x1118] sm:$0xff] }
 0x595   :  { %v2566_v50 = vld [vmem:[#allocation2 + $0x1788] sm:$0xff]  ;;  %v2565_v57 = vld [vmem:[#allocation2 + $0x1780] sm:$0xff]  ;;  %v2488_v6 = vld [vmem:[#allocation2 + $0x1518] sm:$0xff] }
 0x596   :  { %2596 = vmatpush1.bf16.msra.mxu0 %v2381_v5  ;;  %v2446_v59 = vld [vmem:[#allocation2 + $0x13c8] sm:$0xff]  ;;  %v2445_v11 = vld [vmem:[#allocation2 + $0x13c0] sm:$0xff]  ;;  %v2359_v5 = vld [vmem:[#allocation2 + $0x1110] sm:$0xff] }
 0x597   :  { %2637 = vmatpush1.bf16.msra.mxu1 %v2509_v43  ;;  %2597 = vmatprep.subr.bf16.mxu0 %v2390_v0  ;;  %v2574_v31 = vld [vmem:[#allocation2 + $0x17c8] sm:$0xff]  ;;  %v2573_v41 = vld [vmem:[#allocation2 + $0x17c0] sm:$0xff]  ;;  %v2487_v43 = vld [vmem:[#allocation2 + $0x1510] sm:$0xff] }
 0x598   :  { %2638 = vmatprep.subr.bf16.mxu1 %v2518_v16  ;;  %v7105_v44 = vld [vmem:[#allocation49_spill] sm:$0xff]  ;;  %v7106_v13 = vld [vmem:[#allocation50_spill] sm:$0xff] }
 0x599   :  { %v2368_v0 = vld [vmem:[#allocation2 + $0x1158] sm:$0xff] }
 0x59a   :  { %2598 = vmatpush1.bf16.msra.mxu0 %v2389_v18  ;;  %v2496_v16 = vld [vmem:[#allocation2 + $0x1558] sm:$0xff]  ;;  %v2367_v18 = vld [vmem:[#allocation2 + $0x1150] sm:$0xff] }
 0x59b   :  { %2639 = vmatpush1.bf16.msra.mxu1 %v2517_v25  ;;  %2599 = vmatprep.subr.bf16.mxu0 %v2398_v30  ;;  %v2495_v25 = vld [vmem:[#allocation2 + $0x1550] sm:$0xff]  ;;  %v2376_v30 = vld [vmem:[#allocation2 + $0x1198] sm:$0xff] }
 0x59c   :  { %2640 = vmatprep.subr.bf16.mxu1 %v2526_v27  ;;  %v2504_v27 = vld [vmem:[#allocation2 + $0x1598] sm:$0xff] }
 0x59e   :  { %2600 = vmatpush1.bf16.msra.mxu0 %v2397_v36  ;;  %v2375_v36 = vld [vmem:[#allocation2 + $0x1190] sm:$0xff] }
 0x59f   :  { %2641 = vmatpush1.bf16.msra.mxu1 %v2525_v19  ;;  %2601 = vmatprep.subr.bf16.mxu0 %v2406_v52  ;;  %v2503_v19 = vld [vmem:[#allocation2 + $0x1590] sm:$0xff]  ;;  %v2384_v52 = vld [vmem:[#allocation2 + $0x11d8] sm:$0xff] }
 0x5a0   :  { %2642 = vmatprep.subr.bf16.mxu1 %v2534_v28  ;;  %v2512_v28 = vld [vmem:[#allocation2 + $0x15d8] sm:$0xff] }
 0x5a2   :  { %2602 = vmatpush1.bf16.msra.mxu0 %v2405_v63  ;;  %v2383_v63 = vld [vmem:[#allocation2 + $0x11d0] sm:$0xff] }
 0x5a3   :  { %2643 = vmatpush1.bf16.msra.mxu1 %v2533_v48  ;;  %2603 = vmatprep.subr.bf16.mxu0 %v2414_v33  ;;  %v2511_v48 = vld [vmem:[#allocation2 + $0x15d0] sm:$0xff]  ;;  %v2392_v33 = vld [vmem:[#allocation2 + $0x1218] sm:$0xff] }
 0x5a4   :  { %2644 = vmatprep.subr.bf16.mxu1 %v2542_v26  ;;  %v2520_v26 = vld [vmem:[#allocation2 + $0x1618] sm:$0xff] }
 0x5a6   :  { %2604 = vmatpush1.bf16.msra.mxu0 %v2413_v40  ;;  %v2391_v40 = vld [vmem:[#allocation2 + $0x1210] sm:$0xff] }
 0x5a7   :  { %2645 = vmatpush1.bf16.msra.mxu1 %v2541_v61  ;;  %2605 = vmatprep.subr.bf16.mxu0 %v2422_v55  ;;  %v2519_v61 = vld [vmem:[#allocation2 + $0x1610] sm:$0xff]  ;;  %v2400_v55 = vld [vmem:[#allocation2 + $0x1258] sm:$0xff] }
 0x5a8   :  { %2646 = vmatprep.subr.bf16.mxu1 %v2550_v4  ;;  %v2528_v4 = vld [vmem:[#allocation2 + $0x1658] sm:$0xff] }
 0x5aa   :  { %2606 = vmatpush1.bf16.msra.mxu0 %v2421_v60  ;;  %v2399_v60 = vld [vmem:[#allocation2 + $0x1250] sm:$0xff] }
 0x5ab   :  { %2647 = vmatpush1.bf16.msra.mxu1 %v2549_v9  ;;  %2607 = vmatprep.subr.bf16.mxu0 %v2430_v34  ;;  %v2527_v9 = vld [vmem:[#allocation2 + $0x1650] sm:$0xff]  ;;  %v2408_v34 = vld [vmem:[#allocation2 + $0x1298] sm:$0xff] }
 0x5ac   :  { %2648 = vmatprep.subr.bf16.mxu1 %v2558_v23  ;;  %v2536_v23 = vld [vmem:[#allocation2 + $0x1698] sm:$0xff] }
 0x5ae   :  { %2608 = vmatpush1.bf16.msra.mxu0 %v2429_v58  ;;  %v2407_v58 = vld [vmem:[#allocation2 + $0x1290] sm:$0xff] }
 0x5af   :  { %2649 = vmatpush1.bf16.msra.mxu1 %v2557_v21  ;;  %2609 = vmatprep.subr.bf16.mxu0 %v2438_v22  ;;  %v2535_v21 = vld [vmem:[#allocation2 + $0x1690] sm:$0xff]  ;;  %v2416_v22 = vld [vmem:[#allocation2 + $0x12d8] sm:$0xff] }
 0x5b0   :  { %2650 = vmatprep.subr.bf16.mxu1 %v2566_v50  ;;  %v2544_v50 = vld [vmem:[#allocation2 + $0x16d8] sm:$0xff] }
 0x5b2   :  { %2610 = vmatpush1.bf16.msra.mxu0 %v2437_v39  ;;  %v2415_v39 = vld [vmem:[#allocation2 + $0x12d0] sm:$0xff] }
 0x5b3   :  { %2651 = vmatpush1.bf16.msra.mxu1 %v2565_v57  ;;  %2611 = vmatprep.subr.bf16.mxu0 %v2446_v59  ;;  %v2543_v57 = vld [vmem:[#allocation2 + $0x16d0] sm:$0xff]  ;;  %v2424_v59 = vld [vmem:[#allocation2 + $0x1318] sm:$0xff] }
 0x5b4   :  { %2652 = vmatprep.subr.bf16.mxu1 %v2574_v31  ;;  %v2552_v31 = vld [vmem:[#allocation2 + $0x1718] sm:$0xff] }
 0x5b6   :  { %2612 = vmatpush1.bf16.msra.mxu0 %v2445_v11  ;;  %v2423_v11 = vld [vmem:[#allocation2 + $0x1310] sm:$0xff] }
 0x5b7   :  { %2653 = vmatpush1.bf16.msra.mxu1 %v2573_v41  ;;  %2663 = vmatprep.subr.bf16.mxu0 %v2328_v42  ;;  %v2551_v41 = vld [vmem:[#allocation2 + $0x1710] sm:$0xff]  ;;  %v2432_v42 = vld [vmem:[#allocation2 + $0x1358] sm:$0xff] }
 0x5b8   :  { %2704 = vmatprep.subr.bf16.mxu1 %v2456_v56  ;;  %v2560_v56 = vld [vmem:[#allocation2 + $0x1758] sm:$0xff] }
 0x5b9   :  { %2614 = vmatmul.mubr.bf16.vlgmr.msra.gmra.mrb[44].mxu0 %v7105_v44 }
 0x5ba   :  { %2655 = vmatmul.mubr.bf16.vlgmr.msra.gmra.mrb[52].mxu1 %v7106_v13  ;;  %2664 = vmatpush1.bf16.msra.mxu0 %v2327_v51  ;;  %v2431_v51 = vld [vmem:[#allocation2 + $0x1350] sm:$0xff] }
 0x5bb   :  { %2705 = vmatpush1.bf16.msra.mxu1 %v2455_v37  ;;  %2665 = vmatprep.subr.bf16.mxu0 %v2336_v32  ;;  %v2559_v37 = vld [vmem:[#allocation2 + $0x1750] sm:$0xff]  ;;  %v2440_v32 = vld [vmem:[#allocation2 + $0x1398] sm:$0xff] }
 0x5bc   :  { %2706 = vmatprep.subr.bf16.mxu1 %v2464_v45  ;;  %2695 = vmatprep.mubr.bf16.mxu0 %v7103_v14  ;;  %v2568_v45 = vld [vmem:[#allocation2 + $0x1798] sm:$0xff] }
 0x5bd   :  { %2736 = vmatprep.mubr.bf16.mxu1 %v7104_v2 }
 0x5be   :  { %2666 = vmatpush1.bf16.msra.mxu0 %v2335_v10  ;;  %v2439_v10 = vld [vmem:[#allocation2 + $0x1390] sm:$0xff] }
 0x5bf   :  { %2707 = vmatpush1.bf16.msra.mxu1 %v2463_v12  ;;  %2667 = vmatprep.subr.bf16.mxu0 %v2344_v46  ;;  %v2567_v12 = vld [vmem:[#allocation2 + $0x1790] sm:$0xff]  ;;  %v2448_v46 = vld [vmem:[#allocation2 + $0x13d8] sm:$0xff] }
 0x5c0   :  { %2708 = vmatprep.subr.bf16.mxu1 %v2472_v20  ;;  %v2576_v20 = vld [vmem:[#allocation2 + $0x17d8] sm:$0xff] }
 0x5c2   :  { %2668 = vmatpush1.bf16.msra.mxu0 %v2343_v47  ;;  %v2447_v47 = vld [vmem:[#allocation2 + $0x13d0] sm:$0xff] }
 0x5c3   :  { %2709 = vmatpush1.bf16.msra.mxu1 %v2471_v1  ;;  %2669 = vmatprep.subr.bf16.mxu0 %v2352_v35  ;;  %v2575_v1 = vld [vmem:[#allocation2 + $0x17d0] sm:$0xff]  ;;  %v2330_v35 = vld [vmem:[#allocation2 + $0x1028] sm:$0xff] }
 0x5c4   :  { %2710 = vmatprep.subr.bf16.mxu1 %v2480_v17  ;;  %v2458_v17 = vld [vmem:[#allocation2 + $0x1428] sm:$0xff] }
 0x5c6   :  { %2670 = vmatpush1.bf16.msra.mxu0 %v2351_v38  ;;  %v2329_v38 = vld [vmem:[#allocation2 + $0x1020] sm:$0xff] }
 0x5c7   :  { %2711 = vmatpush1.bf16.msra.mxu1 %v2479_v8  ;;  %2671 = vmatprep.subr.bf16.mxu0 %v2360_v24  ;;  %v2457_v8 = vld [vmem:[#allocation2 + $0x1420] sm:$0xff]  ;;  %v2338_v24 = vld [vmem:[#allocation2 + $0x1068] sm:$0xff] }
 0x5c8   :  { %2712 = vmatprep.subr.bf16.mxu1 %v2488_v6  ;;  %v2466_v6 = vld [vmem:[#allocation2 + $0x1468] sm:$0xff] }
 0x5ca   :  { %2672 = vmatpush1.bf16.msra.mxu0 %v2359_v5  ;;  %v2337_v5 = vld [vmem:[#allocation2 + $0x1060] sm:$0xff] }
 0x5cb   :  { %2713 = vmatpush1.bf16.msra.mxu1 %v2487_v43  ;;  %2673 = vmatprep.subr.bf16.mxu0 %v2368_v0  ;;  %v2465_v43 = vld [vmem:[#allocation2 + $0x1460] sm:$0xff]  ;;  %v2346_v0 = vld [vmem:[#allocation2 + $0x10a8] sm:$0xff] }
 0x5cc   :  { %2714 = vmatprep.subr.bf16.mxu1 %v2496_v16  ;;  %v2474_v16 = vld [vmem:[#allocation2 + $0x14a8] sm:$0xff] }
 0x5ce   :  { %2674 = vmatpush1.bf16.msra.mxu0 %v2367_v18  ;;  %v2345_v18 = vld [vmem:[#allocation2 + $0x10a0] sm:$0xff] }
 0x5cf   :  { %2715 = vmatpush1.bf16.msra.mxu1 %v2495_v25  ;;  %2675 = vmatprep.subr.bf16.mxu0 %v2376_v30  ;;  %v2473_v25 = vld [vmem:[#allocation2 + $0x14a0] sm:$0xff]  ;;  %v2354_v30 = vld [vmem:[#allocation2 + $0x10e8] sm:$0xff] }
 0x5d0   :  { %2716 = vmatprep.subr.bf16.mxu1 %v2504_v27  ;;  %v2482_v27 = vld [vmem:[#allocation2 + $0x14e8] sm:$0xff] }
 0x5d2   :  { %2676 = vmatpush1.bf16.msra.mxu0 %v2375_v36  ;;  %v2353_v36 = vld [vmem:[#allocation2 + $0x10e0] sm:$0xff] }
 0x5d3   :  { %2717 = vmatpush1.bf16.msra.mxu1 %v2503_v19  ;;  %2677 = vmatprep.subr.bf16.mxu0 %v2384_v52  ;;  %v2481_v19 = vld [vmem:[#allocation2 + $0x14e0] sm:$0xff]  ;;  %v2362_v52 = vld [vmem:[#allocation2 + $0x1128] sm:$0xff] }
 0x5d4   :  { %2718 = vmatprep.subr.bf16.mxu1 %v2512_v28  ;;  %v2490_v28 = vld [vmem:[#allocation2 + $0x1528] sm:$0xff] }
 0x5d6   :  { %2678 = vmatpush1.bf16.msra.mxu0 %v2383_v63  ;;  %v2361_v63 = vld [vmem:[#allocation2 + $0x1120] sm:$0xff] }
 0x5d7   :  { %2719 = vmatpush1.bf16.msra.mxu1 %v2511_v48  ;;  %2679 = vmatprep.subr.bf16.mxu0 %v2392_v33  ;;  %v2489_v48 = vld [vmem:[#allocation2 + $0x1520] sm:$0xff]  ;;  %v2370_v33 = vld [vmem:[#allocation2 + $0x1168] sm:$0xff] }
 0x5d8   :  { %2720 = vmatprep.subr.bf16.mxu1 %v2520_v26  ;;  %v2498_v26 = vld [vmem:[#allocation2 + $0x1568] sm:$0xff] }
 0x5da   :  { %2680 = vmatpush1.bf16.msra.mxu0 %v2391_v40  ;;  %v2369_v40 = vld [vmem:[#allocation2 + $0x1160] sm:$0xff] }
 0x5db   :  { %2721 = vmatpush1.bf16.msra.mxu1 %v2519_v61  ;;  %2681 = vmatprep.subr.bf16.mxu0 %v2400_v55  ;;  %v2497_v61 = vld [vmem:[#allocation2 + $0x1560] sm:$0xff]  ;;  %v2378_v55 = vld [vmem:[#allocation2 + $0x11a8] sm:$0xff] }
 0x5dc   :  { %2722 = vmatprep.subr.bf16.mxu1 %v2528_v4  ;;  %v2506_v4 = vld [vmem:[#allocation2 + $0x15a8] sm:$0xff] }
 0x5de   :  { %2682 = vmatpush1.bf16.msra.mxu0 %v2399_v60  ;;  %v2377_v60 = vld [vmem:[#allocation2 + $0x11a0] sm:$0xff] }
 0x5df   :  { %2723 = vmatpush1.bf16.msra.mxu1 %v2527_v9  ;;  %2683 = vmatprep.subr.bf16.mxu0 %v2408_v34  ;;  %v2505_v9 = vld [vmem:[#allocation2 + $0x15a0] sm:$0xff]  ;;  %v2386_v34 = vld [vmem:[#allocation2 + $0x11e8] sm:$0xff] }
 0x5e0   :  { %2724 = vmatprep.subr.bf16.mxu1 %v2536_v23  ;;  %v2514_v23 = vld [vmem:[#allocation2 + $0x15e8] sm:$0xff] }
 0x5e2   :  { %2684 = vmatpush1.bf16.msra.mxu0 %v2407_v58  ;;  %v2385_v58 = vld [vmem:[#allocation2 + $0x11e0] sm:$0xff] }
 0x5e3   :  { %2725 = vmatpush1.bf16.msra.mxu1 %v2535_v21  ;;  %2685 = vmatprep.subr.bf16.mxu0 %v2416_v22  ;;  %v2513_v21 = vld [vmem:[#allocation2 + $0x15e0] sm:$0xff]  ;;  %v2394_v22 = vld [vmem:[#allocation2 + $0x1228] sm:$0xff] }
 0x5e4   :  { %2726 = vmatprep.subr.bf16.mxu1 %v2544_v50  ;;  %v2522_v50 = vld [vmem:[#allocation2 + $0x1628] sm:$0xff] }
 0x5e6   :  { %2686 = vmatpush1.bf16.msra.mxu0 %v2415_v39  ;;  %v2393_v39 = vld [vmem:[#allocation2 + $0x1220] sm:$0xff] }
 0x5e7   :  { %2727 = vmatpush1.bf16.msra.mxu1 %v2543_v57  ;;  %2687 = vmatprep.subr.bf16.mxu0 %v2424_v59  ;;  %v2521_v57 = vld [vmem:[#allocation2 + $0x1620] sm:$0xff]  ;;  %v2402_v59 = vld [vmem:[#allocation2 + $0x1268] sm:$0xff] }
 0x5e8   :  { %2728 = vmatprep.subr.bf16.mxu1 %v2552_v31  ;;  %v2530_v31 = vld [vmem:[#allocation2 + $0x1668] sm:$0xff] }
 0x5ea   :  { %2688 = vmatpush1.bf16.msra.mxu0 %v2423_v11  ;;  %v2401_v11 = vld [vmem:[#allocation2 + $0x1260] sm:$0xff] }
 0x5eb   :  { %2729 = vmatpush1.bf16.msra.mxu1 %v2551_v41  ;;  %2689 = vmatprep.subr.bf16.mxu0 %v2432_v42  ;;  %v2529_v41 = vld [vmem:[#allocation2 + $0x1660] sm:$0xff]  ;;  %v2410_v42 = vld [vmem:[#allocation2 + $0x12a8] sm:$0xff] }
 0x5ec   :  { %2730 = vmatprep.subr.bf16.mxu1 %v2560_v56  ;;  %v2538_v56 = vld [vmem:[#allocation2 + $0x16a8] sm:$0xff] }
 0x5ee   :  { %2690 = vmatpush1.bf16.msra.mxu0 %v2431_v51  ;;  %v2409_v51 = vld [vmem:[#allocation2 + $0x12a0] sm:$0xff] }
 0x5ef   :  { %2731 = vmatpush1.bf16.msra.mxu1 %v2559_v37  ;;  %2691 = vmatprep.subr.bf16.mxu0 %v2440_v32  ;;  %v2537_v37 = vld [vmem:[#allocation2 + $0x16a0] sm:$0xff]  ;;  %v2418_v32 = vld [vmem:[#allocation2 + $0x12e8] sm:$0xff] }
 0x5f0   :  { %2732 = vmatprep.subr.bf16.mxu1 %v2568_v45  ;;  %v2546_v45 = vld [vmem:[#allocation2 + $0x16e8] sm:$0xff] }
 0x5f2   :  { %2692 = vmatpush1.bf16.msra.mxu0 %v2439_v10  ;;  %v2417_v10 = vld [vmem:[#allocation2 + $0x12e0] sm:$0xff] }
 0x5f3   :  { %2733 = vmatpush1.bf16.msra.mxu1 %v2567_v12  ;;  %2693 = vmatprep.subr.bf16.mxu0 %v2448_v46  ;;  %v2545_v12 = vld [vmem:[#allocation2 + $0x16e0] sm:$0xff]  ;;  %v2426_v46 = vld [vmem:[#allocation2 + $0x1328] sm:$0xff] }
 0x5f4   :  { %2734 = vmatprep.subr.bf16.mxu1 %v2576_v20  ;;  %v2554_v20 = vld [vmem:[#allocation2 + $0x1728] sm:$0xff] }
 0x5f6   :  { %2694 = vmatpush1.bf16.msra.mxu0 %v2447_v47  ;;  %v2425_v47 = vld [vmem:[#allocation2 + $0x1320] sm:$0xff] }
 0x5f7   :  { %2735 = vmatpush1.bf16.msra.mxu1 %v2575_v1  ;;  %2745 = vmatprep.subr.bf16.mxu0 %v2330_v35  ;;  %v2553_v1 = vld [vmem:[#allocation2 + $0x1720] sm:$0xff]  ;;  %v2434_v35 = vld [vmem:[#allocation2 + $0x1368] sm:$0xff] }
 0x5f8   :  { %2786 = vmatprep.subr.bf16.mxu1 %v2458_v17  ;;  %v2562_v17 = vld [vmem:[#allocation2 + $0x1768] sm:$0xff] }
 0x5f9   :  { %2696 = vmatmul.mubr.bf16.vlgmr.msra.gmra.mrb[48].mxu0 %v7105_v44 }
 0x5fa   :  { %2737 = vmatmul.mubr.bf16.vlgmr.msra.gmra.mrb[56].mxu1 %v7106_v13  ;;  %2746 = vmatpush1.bf16.msra.mxu0 %v2329_v38  ;;  %v2433_v38 = vld [vmem:[#allocation2 + $0x1360] sm:$0xff] }
 0x5fb   :  { %2787 = vmatpush1.bf16.msra.mxu1 %v2457_v8  ;;  %2747 = vmatprep.subr.bf16.mxu0 %v2338_v24  ;;  %v2561_v8 = vld [vmem:[#allocation2 + $0x1760] sm:$0xff]  ;;  %v2442_v24 = vld [vmem:[#allocation2 + $0x13a8] sm:$0xff] }
 0x5fc   :  { %2788 = vmatprep.subr.bf16.mxu1 %v2466_v6  ;;  %2777 = vmatprep.mubr.bf16.mxu0 %v7103_v14  ;;  %v2570_v6 = vld [vmem:[#allocation2 + $0x17a8] sm:$0xff] }
 0x5fd   :  { %2818 = vmatprep.mubr.bf16.mxu1 %v7104_v2 }
 0x5fe   :  { %2748 = vmatpush1.bf16.msra.mxu0 %v2337_v5  ;;  %v2441_v5 = vld [vmem:[#allocation2 + $0x13a0] sm:$0xff] }
 0x5ff   :  { %2789 = vmatpush1.bf16.msra.mxu1 %v2465_v43  ;;  %2749 = vmatprep.subr.bf16.mxu0 %v2346_v0  ;;  %v2569_v43 = vld [vmem:[#allocation2 + $0x17a0] sm:$0xff]  ;;  %v2450_v0 = vld [vmem:[#allocation2 + $0x13e8] sm:$0xff] }
 0x600   :  { %2790 = vmatprep.subr.bf16.mxu1 %v2474_v16  ;;  %v2578_v16 = vld [vmem:[#allocation2 + $0x17e8] sm:$0xff] }
 0x602   :  { %2750 = vmatpush1.bf16.msra.mxu0 %v2345_v18  ;;  %v2449_v18 = vld [vmem:[#allocation2 + $0x13e0] sm:$0xff] }
 0x603   :  { %2791 = vmatpush1.bf16.msra.mxu1 %v2473_v25  ;;  %2751 = vmatprep.subr.bf16.mxu0 %v2354_v30  ;;  %v2577_v25 = vld [vmem:[#allocation2 + $0x17e0] sm:$0xff]  ;;  %v2332_v30 = vld [vmem:[#allocation2 + $0x1038] sm:$0xff] }
 0x604   :  { %2792 = vmatprep.subr.bf16.mxu1 %v2482_v27  ;;  %v2460_v27 = vld [vmem:[#allocation2 + $0x1438] sm:$0xff] }
 0x606   :  { %2752 = vmatpush1.bf16.msra.mxu0 %v2353_v36  ;;  %v2331_v36 = vld [vmem:[#allocation2 + $0x1030] sm:$0xff] }
 0x607   :  { %2793 = vmatpush1.bf16.msra.mxu1 %v2481_v19  ;;  %2753 = vmatprep.subr.bf16.mxu0 %v2362_v52  ;;  %v2459_v19 = vld [vmem:[#allocation2 + $0x1430] sm:$0xff]  ;;  %v2340_v52 = vld [vmem:[#allocation2 + $0x1078] sm:$0xff] }
 0x608   :  { %2794 = vmatprep.subr.bf16.mxu1 %v2490_v28  ;;  %v2468_v28 = vld [vmem:[#allocation2 + $0x1478] sm:$0xff] }
 0x60a   :  { %2754 = vmatpush1.bf16.msra.mxu0 %v2361_v63  ;;  %v2339_v63 = vld [vmem:[#allocation2 + $0x1070] sm:$0xff] }
 0x60b   :  { %2795 = vmatpush1.bf16.msra.mxu1 %v2489_v48  ;;  %2755 = vmatprep.subr.bf16.mxu0 %v2370_v33  ;;  %v2467_v48 = vld [vmem:[#allocation2 + $0x1470] sm:$0xff]  ;;  %v2348_v33 = vld [vmem:[#allocation2 + $0x10b8] sm:$0xff] }
 0x60c   :  { %2796 = vmatprep.subr.bf16.mxu1 %v2498_v26  ;;  %v2476_v26 = vld [vmem:[#allocation2 + $0x14b8] sm:$0xff] }
 0x60e   :  { %2756 = vmatpush1.bf16.msra.mxu0 %v2369_v40  ;;  %v2347_v40 = vld [vmem:[#allocation2 + $0x10b0] sm:$0xff] }
 0x60f   :  { %2797 = vmatpush1.bf16.msra.mxu1 %v2497_v61  ;;  %2757 = vmatprep.subr.bf16.mxu0 %v2378_v55  ;;  %v2475_v61 = vld [vmem:[#allocation2 + $0x14b0] sm:$0xff]  ;;  %v2356_v55 = vld [vmem:[#allocation2 + $0x10f8] sm:$0xff] }
 0x610   :  { %2798 = vmatprep.subr.bf16.mxu1 %v2506_v4  ;;  %v2484_v4 = vld [vmem:[#allocation2 + $0x14f8] sm:$0xff] }
 0x612   :  { %2758 = vmatpush1.bf16.msra.mxu0 %v2377_v60  ;;  %v2355_v60 = vld [vmem:[#allocation2 + $0x10f0] sm:$0xff] }
 0x613   :  { %2799 = vmatpush1.bf16.msra.mxu1 %v2505_v9  ;;  %2759 = vmatprep.subr.bf16.mxu0 %v2386_v34  ;;  %v2483_v9 = vld [vmem:[#allocation2 + $0x14f0] sm:$0xff]  ;;  %v2364_v34 = vld [vmem:[#allocation2 + $0x1138] sm:$0xff] }
 0x614   :  { %2800 = vmatprep.subr.bf16.mxu1 %v2514_v23  ;;  %v2492_v23 = vld [vmem:[#allocation2 + $0x1538] sm:$0xff] }
 0x616   :  { %2760 = vmatpush1.bf16.msra.mxu0 %v2385_v58  ;;  %v2372_v58 = vld [vmem:[#allocation2 + $0x1178] sm:$0xff] }
 0x617   :  { %2801 = vmatpush1.bf16.msra.mxu1 %v2513_v21  ;;  %2761 = vmatprep.subr.bf16.mxu0 %v2394_v22  ;;  %v2500_v21 = vld [vmem:[#allocation2 + $0x1578] sm:$0xff]  ;;  %v2371_v22 = vld [vmem:[#allocation2 + $0x1170] sm:$0xff] }
 0x618   :  { %2802 = vmatprep.subr.bf16.mxu1 %v2522_v50  ;;  %v2499_v50 = vld [vmem:[#allocation2 + $0x1570] sm:$0xff] }
 0x61a   :  { %2762 = vmatpush1.bf16.msra.mxu0 %v2393_v39  ;;  %v2380_v39 = vld [vmem:[#allocation2 + $0x11b8] sm:$0xff] }
 0x61b   :  { %2803 = vmatpush1.bf16.msra.mxu1 %v2521_v57  ;;  %2763 = vmatprep.subr.bf16.mxu0 %v2402_v59  ;;  %v2508_v57 = vld [vmem:[#allocation2 + $0x15b8] sm:$0xff]  ;;  %v2379_v59 = vld [vmem:[#allocation2 + $0x11b0] sm:$0xff] }
 0x61c   :  { %2804 = vmatprep.subr.bf16.mxu1 %v2530_v31  ;;  %v2507_v31 = vld [vmem:[#allocation2 + $0x15b0] sm:$0xff] }
 0x61e   :  { %2764 = vmatpush1.bf16.msra.mxu0 %v2401_v11  ;;  %v2388_v11 = vld [vmem:[#allocation2 + $0x11f8] sm:$0xff] }
 0x61f   :  { %2805 = vmatpush1.bf16.msra.mxu1 %v2529_v41  ;;  %2765 = vmatprep.subr.bf16.mxu0 %v2410_v42  ;;  %v2516_v41 = vld [vmem:[#allocation2 + $0x15f8] sm:$0xff]  ;;  %v2387_v42 = vld [vmem:[#allocation2 + $0x11f0] sm:$0xff] }
 0x620   :  { %2806 = vmatprep.subr.bf16.mxu1 %v2538_v56  ;;  %v2515_v56 = vld [vmem:[#allocation2 + $0x15f0] sm:$0xff] }
 0x622   :  { %2766 = vmatpush1.bf16.msra.mxu0 %v2409_v51  ;;  %v2396_v51 = vld [vmem:[#allocation2 + $0x1238] sm:$0xff] }
 0x623   :  { %2807 = vmatpush1.bf16.msra.mxu1 %v2537_v37  ;;  %2767 = vmatprep.subr.bf16.mxu0 %v2418_v32  ;;  %v2524_v37 = vld [vmem:[#allocation2 + $0x1638] sm:$0xff]  ;;  %v2395_v32 = vld [vmem:[#allocation2 + $0x1230] sm:$0xff] }
 0x624   :  { %2808 = vmatprep.subr.bf16.mxu1 %v2546_v45  ;;  %v2523_v45 = vld [vmem:[#allocation2 + $0x1630] sm:$0xff] }
 0x626   :  { %2768 = vmatpush1.bf16.msra.mxu0 %v2417_v10  ;;  %v2404_v10 = vld [vmem:[#allocation2 + $0x1278] sm:$0xff] }
 0x627   :  { %2809 = vmatpush1.bf16.msra.mxu1 %v2545_v12  ;;  %2769 = vmatprep.subr.bf16.mxu0 %v2426_v46  ;;  %v2532_v12 = vld [vmem:[#allocation2 + $0x1678] sm:$0xff]  ;;  %v2403_v46 = vld [vmem:[#allocation2 + $0x1270] sm:$0xff] }
 0x628   :  { %2810 = vmatprep.subr.bf16.mxu1 %v2554_v20  ;;  %v2531_v20 = vld [vmem:[#allocation2 + $0x1670] sm:$0xff] }
 0x62a   :  { %2770 = vmatpush1.bf16.msra.mxu0 %v2425_v47  ;;  %v2412_v47 = vld [vmem:[#allocation2 + $0x12b8] sm:$0xff] }
 0x62b   :  { %2811 = vmatpush1.bf16.msra.mxu1 %v2553_v1  ;;  %2771 = vmatprep.subr.bf16.mxu0 %v2434_v35  ;;  %v2540_v1 = vld [vmem:[#allocation2 + $0x16b8] sm:$0xff]  ;;  %v2411_v35 = vld [vmem:[#allocation2 + $0x12b0] sm:$0xff] }
 0x62c   :  { %2812 = vmatprep.subr.bf16.mxu1 %v2562_v17  ;;  %v2539_v17 = vld [vmem:[#allocation2 + $0x16b0] sm:$0xff] }
 0x62e   :  { %2772 = vmatpush1.bf16.msra.mxu0 %v2433_v38  ;;  %v2420_v38 = vld [vmem:[#allocation2 + $0x12f8] sm:$0xff] }
 0x62f   :  { %2813 = vmatpush1.bf16.msra.mxu1 %v2561_v8  ;;  %2773 = vmatprep.subr.bf16.mxu0 %v2442_v24  ;;  %v2548_v8 = vld [vmem:[#allocation2 + $0x16f8] sm:$0xff]  ;;  %v2419_v24 = vld [vmem:[#allocation2 + $0x12f0] sm:$0xff] }
 0x630   :  { %2814 = vmatprep.subr.bf16.mxu1 %v2570_v6  ;;  %v2547_v6 = vld [vmem:[#allocation2 + $0x16f0] sm:$0xff] }
 0x632   :  { %2774 = vmatpush1.bf16.msra.mxu0 %v2441_v5  ;;  %v2428_v5 = vld [vmem:[#allocation2 + $0x1338] sm:$0xff] }
 0x633   :  { %2815 = vmatpush1.bf16.msra.mxu1 %v2569_v43  ;;  %2775 = vmatprep.subr.bf16.mxu0 %v2450_v0  ;;  %v2556_v43 = vld [vmem:[#allocation2 + $0x1738] sm:$0xff]  ;;  %v2427_v0 = vld [vmem:[#allocation2 + $0x1330] sm:$0xff] }
 0x634   :  { %2816 = vmatprep.subr.bf16.mxu1 %v2578_v16  ;;  %v2555_v16 = vld [vmem:[#allocation2 + $0x1730] sm:$0xff] }
 0x636   :  { %2776 = vmatpush1.bf16.msra.mxu0 %v2449_v18  ;;  %v2436_v18 = vld [vmem:[#allocation2 + $0x1378] sm:$0xff] }
 0x637   :  { %2817 = vmatpush1.bf16.msra.mxu1 %v2577_v25  ;;  %2827 = vmatprep.subr.bf16.mxu0 %v2332_v30  ;;  %v2564_v25 = vld [vmem:[#allocation2 + $0x1778] sm:$0xff]  ;;  %v2435_v30 = vld [vmem:[#allocation2 + $0x1370] sm:$0xff] }
 0x638   :  { %2868 = vmatprep.subr.bf16.mxu1 %v2460_v27  ;;  %v2563_v27 = vld [vmem:[#allocation2 + $0x1770] sm:$0xff] }
 0x639   :  { %2778 = vmatmul.mubr.bf16.vlgmr.msra.gmra.mrb[52].mxu0 %v7105_v44 }
 0x63a   :  { %2819 = vmatmul.mubr.bf16.vlgmr.msra.gmra.mrb[60].mxu1 %v7106_v13  ;;  %2828 = vmatpush1.bf16.msra.mxu0 %v2331_v36  ;;  %v2444_v36 = vld [vmem:[#allocation2 + $0x13b8] sm:$0xff] }
 0x63b   :  { %2869 = vmatpush1.bf16.msra.mxu1 %v2459_v19  ;;  %2829 = vmatprep.subr.bf16.mxu0 %v2340_v52  ;;  %v2572_v19 = vld [vmem:[#allocation2 + $0x17b8] sm:$0xff]  ;;  %v2443_v52 = vld [vmem:[#allocation2 + $0x13b0] sm:$0xff] }
 0x63c   :  { %2870 = vmatprep.subr.bf16.mxu1 %v2468_v28  ;;  %2859 = vmatprep.mubr.bf16.mxu0 %v7103_v14  ;;  %v2363_v14 = vld [vmem:[#allocation2 + $0x1130] sm:$0xff] }
 0x63d   :  { %2900 = vmatprep.mubr.bf16.mxu1 %v7104_v2  ;;  %v2491_v2 = vld [vmem:[#allocation2 + $0x1530] sm:$0xff] }
 0x63e   :  { %2830 = vmatpush1.bf16.msra.mxu0 %v2339_v63  ;;  %v2571_v28 = vld [vmem:[#allocation2 + $0x17b0] sm:$0xff]  ;;  %v2452_v63 = vld [vmem:[#allocation2 + $0x13f8] sm:$0xff] }
 0x63f   :  { %2871 = vmatpush1.bf16.msra.mxu1 %v2467_v48  ;;  %2831 = vmatprep.subr.bf16.mxu0 %v2348_v33  ;;  %v2580_v48 = vld [vmem:[#allocation2 + $0x17f8] sm:$0xff]  ;;  %v2451_v33 = vld [vmem:[#allocation2 + $0x13f0] sm:$0xff] }
 0x640   :  { %2872 = vmatprep.subr.bf16.mxu1 %v2476_v26  ;;  %v2579_v26 = vld [vmem:[#allocation2 + $0x17f0] sm:$0xff] }
 0x642   :  { %2832 = vmatpush1.bf16.msra.mxu0 %v2347_v40 }
 0x643   :  { %2873 = vmatpush1.bf16.msra.mxu1 %v2475_v61  ;;  %2833 = vmatprep.subr.bf16.mxu0 %v2356_v55 }
 0x644   :  { %2874 = vmatprep.subr.bf16.mxu1 %v2484_v4 }
 0x646   :  { %2834 = vmatpush1.bf16.msra.mxu0 %v2355_v60 }
 0x647   :  { %2875 = vmatpush1.bf16.msra.mxu1 %v2483_v9  ;;  %2835 = vmatprep.subr.bf16.mxu0 %v2364_v34 }
 0x648   :  { %2876 = vmatprep.subr.bf16.mxu1 %v2492_v23 }
 0x64a   :  { %2836 = vmatpush1.bf16.msra.mxu0 %v2363_v14 }
 0x64b   :  { %2877 = vmatpush1.bf16.msra.mxu1 %v2491_v2  ;;  %2837 = vmatprep.subr.bf16.mxu0 %v2372_v58 }
 0x64c   :  { %2878 = vmatprep.subr.bf16.mxu1 %v2500_v21 }
 0x64e   :  { %2838 = vmatpush1.bf16.msra.mxu0 %v2371_v22 }
 0x64f   :  { %2879 = vmatpush1.bf16.msra.mxu1 %v2499_v50  ;;  %2839 = vmatprep.subr.bf16.mxu0 %v2380_v39 }
 0x650   :  { %2880 = vmatprep.subr.bf16.mxu1 %v2508_v57 }
 0x652   :  { %2840 = vmatpush1.bf16.msra.mxu0 %v2379_v59 }
 0x653   :  { %2881 = vmatpush1.bf16.msra.mxu1 %v2507_v31  ;;  %2841 = vmatprep.subr.bf16.mxu0 %v2388_v11 }
 0x654   :  { %2882 = vmatprep.subr.bf16.mxu1 %v2516_v41 }
 0x656   :  { %2842 = vmatpush1.bf16.msra.mxu0 %v2387_v42 }
 0x657   :  { %2883 = vmatpush1.bf16.msra.mxu1 %v2515_v56  ;;  %2843 = vmatprep.subr.bf16.mxu0 %v2396_v51 }
 0x658   :  { %2884 = vmatprep.subr.bf16.mxu1 %v2524_v37 }
 0x65a   :  { %2844 = vmatpush1.bf16.msra.mxu0 %v2395_v32 }
 0x65b   :  { %2885 = vmatpush1.bf16.msra.mxu1 %v2523_v45  ;;  %2845 = vmatprep.subr.bf16.mxu0 %v2404_v10 }
 0x65c   :  { %2886 = vmatprep.subr.bf16.mxu1 %v2532_v12 }
 0x65e   :  { %2846 = vmatpush1.bf16.msra.mxu0 %v2403_v46 }
 0x65f   :  { %2887 = vmatpush1.bf16.msra.mxu1 %v2531_v20  ;;  %2847 = vmatprep.subr.bf16.mxu0 %v2412_v47 }
 0x660   :  { %2888 = vmatprep.subr.bf16.mxu1 %v2540_v1 }
 0x662   :  { %2848 = vmatpush1.bf16.msra.mxu0 %v2411_v35 }
 0x663   :  { %2889 = vmatpush1.bf16.msra.mxu1 %v2539_v17  ;;  %2849 = vmatprep.subr.bf16.mxu0 %v2420_v38 }
 0x664   :  { %2890 = vmatprep.subr.bf16.mxu1 %v2548_v8 }
 0x666   :  { %2850 = vmatpush1.bf16.msra.mxu0 %v2419_v24 }
 0x667   :  { %2891 = vmatpush1.bf16.msra.mxu1 %v2547_v6  ;;  %2851 = vmatprep.subr.bf16.mxu0 %v2428_v5 }
 0x668   :  { %2892 = vmatprep.subr.bf16.mxu1 %v2556_v43 }
 0x66a   :  { %2852 = vmatpush1.bf16.msra.mxu0 %v2427_v0 }
 0x66b   :  { %2893 = vmatpush1.bf16.msra.mxu1 %v2555_v16  ;;  %2853 = vmatprep.subr.bf16.mxu0 %v2436_v18 }
 0x66c   :  { %2894 = vmatprep.subr.bf16.mxu1 %v2564_v25 }
 0x66e   :  { %2854 = vmatpush1.bf16.msra.mxu0 %v2435_v30 }
 0x66f   :  { %2895 = vmatpush1.bf16.msra.mxu1 %v2563_v27  ;;  %2855 = vmatprep.subr.bf16.mxu0 %v2444_v36 }
 0x670   :  { %2896 = vmatprep.subr.bf16.mxu1 %v2572_v19 }
 0x672   :  { %2856 = vmatpush1.bf16.msra.mxu0 %v2443_v52 }
 0x673   :  { %2897 = vmatpush1.bf16.msra.mxu1 %v2571_v28  ;;  %2857 = vmatprep.subr.bf16.mxu0 %v2452_v63 }
 0x674   :  { %2898 = vmatprep.subr.bf16.mxu1 %v2580_v48 }
 0x676   :  { %2858 = vmatpush1.bf16.msra.mxu0 %v2451_v33 }
 0x677   :  { %2899 = vmatpush1.bf16.msra.mxu1 %v2579_v26 }
 0x679   :  { %2860 = vmatmul.mubr.bf16.vlgmr.msra.gmra.mrb[56].mxu0 %v7105_v44 }
 0x67a   :  { %2901 = vmatmul.mubr.bf16.vlgmr.msra.gmra.mrb[64].mxu1 %v7106_v13 }
 0x68c   :  { %v2615_v40 = vpop.f32.mrb[44].mxu0 }
 0x68d   :  { %v2656_v61 = vpop.f32.mrb[52].mxu1  ;;  %v2617_v4 = vpop.f32.mrb[45].mxu0 }
 0x68e   :  { %v2657_v55 = vadd.f32 %v2656_v61, %v2615_v40  ;;  %v2658_v60 = vpop.f32.mrb[53].mxu1  ;;  %v2619_v34 = vpop.f32.mrb[46].mxu0 }
 0x68f   :  { %v2659_v9 = vadd.f32 %v2658_v60, %v2617_v4  ;;  %v2660_v23 = vpop.f32.mrb[54].mxu1  ;;  %v2620_v2 = vpop.f32.mrb[47].mxu0 }
 0x690   :  { %v6498_v14 = vadd.f32 %v2657_v55, %v6462_v7  ;;  %v2661_v58 = vpop.f32.mrb[55].mxu1 }
 0x691   :  { %v6501_v21 = vadd.f32 %v2659_v9, %v6466_v62 }
 0x6cc   :  { %v2697_v22 = vpop.f32.mrb[48].mxu0 }
 0x6cd   :  { %v2738_v44 = vpop.f32.mrb[56].mxu1  ;;  %v2699_v13 = vpop.f32.mrb[49].mxu0 }
 0x6ce   :  { %v2739_v50 = vadd.f32 %v2738_v44, %v2697_v22  ;;  %v2740_v39 = vpop.f32.mrb[57].mxu1  ;;  %v2701_v59 = vpop.f32.mrb[50].mxu0 }
 0x6cf   :  { %v2741_v57 = vadd.f32 %v2740_v39, %v2699_v13  ;;  %v2742_v31 = vpop.f32.mrb[58].mxu1  ;;  %v2702_v41 = vpop.f32.mrb[51].mxu0 }
 0x6d0   :  { %v6504_v11 = vadd.f32 %v2739_v50, %v6469_v53  ;;  %v2743_v42 = vpop.f32.mrb[59].mxu1 }
 0x6d1   :  { %v6507_v7 = vadd.f32 %v2741_v57, %v6471_v29 }
 0x70c   :  { %v2779_v56 = vpop.f32.mrb[52].mxu0 }
 0x70d   :  { %v2820_v51 = vpop.f32.mrb[60].mxu1  ;;  %v2781_v37 = vpop.f32.mrb[53].mxu0 }
 0x70e   :  { %v2821_v62 = vadd.f32 %v2820_v51, %v2779_v56  ;;  %v2822_v32 = vpop.f32.mrb[61].mxu1  ;;  %v2783_v10 = vpop.f32.mrb[54].mxu0 }
 0x70f   :  { %v2823_v45 = vadd.f32 %v2822_v32, %v2781_v37  ;;  %v2824_v12 = vpop.f32.mrb[62].mxu1  ;;  %v2784_v20 = vpop.f32.mrb[55].mxu0 }
 0x710   :  { %v6510_v46 = vadd.f32 %v2821_v62, %v6473_v49  ;;  %v2825_v47 = vpop.f32.mrb[63].mxu1 }
 0x711   :  { %v6513_v53 = vadd.f32 %v2823_v45, %v6475_v54 }
 0x74c   :  { %v2861_v1 = vpop.f32.mrb[56].mxu0 }
 0x74d   :  { %v2902_v35 = vpop.f32.mrb[64].mxu1  ;;  %v2863_v17 = vpop.f32.mrb[57].mxu0 }
 0x74e   :  { %v2903_v29 = vadd.f32 %v2902_v35, %v2861_v1  ;;  %v2904_v38 = vpop.f32.mrb[65].mxu1  ;;  %v2865_v24 = vpop.f32.mrb[58].mxu0 }
 0x74f   :  { %v2905_v8 = vadd.f32 %v2904_v38, %v2863_v17  ;;  %v2906_v6 = vpop.f32.mrb[66].mxu1  ;;  %v2866_v43 = vpop.f32.mrb[59].mxu0 }
 0x750   :  { %v6516_v5 = vadd.f32 %v2903_v29, %v6477_v3  ;;  %v2907_v0 = vpop.f32.mrb[67].mxu1 }
 0x751   :  { %v6519_v49 = vadd.f32 %v2905_v8, %v6479_v15 }
 0x752   :  { %5260 = dma.done.wait [#allocation4 + $0x3], 32768 }
 0x753   :  { %5261 = vsyncadd [#allocation4 + $0x3], 4294934528  ;;  %v7107_v54 = vld [vmem:[#allocation55_spill] sm:$0xff]  ;;  %v7108_v16 = vld [vmem:[#allocation56_spill] sm:$0xff] }
 0x754   :  { %3207 = vmatprep.mubr.bf16.mxu0 %v7107_v54  ;;  %3248 = vmatprep.mubr.bf16.mxu1 %v7108_v16  ;;  %v2920_v18 = vld [vmem:[#allocation2 + $0x1808] sm:$0xff]  ;;  %v2919_v30 = vld [vmem:[#allocation2 + $0x1800] sm:$0xff] }
 0x755   :  { %v3048_v25 = vld [vmem:[#allocation2 + $0x1c08] sm:$0xff]  ;;  %3175 = vmatprep.subr.bf16.mxu0 %v2920_v18  ;;  %v3047_v27 = vld [vmem:[#allocation2 + $0x1c00] sm:$0xff] }
 0x756   :  { %3216 = vmatprep.subr.bf16.mxu1 %v3048_v25  ;;  %v2928_v36 = vld [vmem:[#allocation2 + $0x1848] sm:$0xff]  ;;  %3176 = vmatpush1.bf16.msra.mxu0 %v2919_v30  ;;  %v2927_v15 = vld [vmem:[#allocation2 + $0x1840] sm:$0xff] }
 0x757   :  { %v3056_v3 = vld [vmem:[#allocation2 + $0x1c48] sm:$0xff]  ;;  %3217 = vmatpush1.bf16.msra.mxu1 %v3047_v27  ;;  %3177 = vmatprep.subr.bf16.mxu0 %v2928_v36  ;;  %v3055_v19 = vld [vmem:[#allocation2 + $0x1c40] sm:$0xff] }
 0x758   :  { %3218 = vmatprep.subr.bf16.mxu1 %v3056_v3  ;;  %v2936_v52 = vld [vmem:[#allocation2 + $0x1888] sm:$0xff]  ;;  %v2935_v63 = vld [vmem:[#allocation2 + $0x1880] sm:$0xff] }
 0x759   :  { %v3064_v28 = vld [vmem:[#allocation2 + $0x1c88] sm:$0xff]  ;;  %v3063_v48 = vld [vmem:[#allocation2 + $0x1c80] sm:$0xff] }
 0x75a   :  { %3178 = vmatpush1.bf16.msra.mxu0 %v2927_v15  ;;  %v2944_v33 = vld [vmem:[#allocation2 + $0x18c8] sm:$0xff]  ;;  %v2943_v40 = vld [vmem:[#allocation2 + $0x18c0] sm:$0xff] }
 0x75b   :  { %3219 = vmatpush1.bf16.msra.mxu1 %v3055_v19  ;;  %3179 = vmatprep.subr.bf16.mxu0 %v2936_v52  ;;  %v3072_v26 = vld [vmem:[#allocation2 + $0x1cc8] sm:$0xff]  ;;  %v3071_v61 = vld [vmem:[#allocation2 + $0x1cc0] sm:$0xff] }
 0x75c   :  { %3220 = vmatprep.subr.bf16.mxu1 %v3064_v28  ;;  %v2952_v55 = vld [vmem:[#allocation2 + $0x1908] sm:$0xff]  ;;  %v2951_v60 = vld [vmem:[#allocation2 + $0x1900] sm:$0xff] }
 0x75d   :  { %v3080_v4 = vld [vmem:[#allocation2 + $0x1d08] sm:$0xff]  ;;  %v3079_v9 = vld [vmem:[#allocation2 + $0x1d00] sm:$0xff] }
 0x75e   :  { %3180 = vmatpush1.bf16.msra.mxu0 %v2935_v63  ;;  %v2960_v34 = vld [vmem:[#allocation2 + $0x1948] sm:$0xff]  ;;  %v2959_v2 = vld [vmem:[#allocation2 + $0x1940] sm:$0xff]  ;;  %v2922_v63 = vld [vmem:[#allocation2 + $0x1818] sm:$0xff] }
 0x75f   :  { %3221 = vmatpush1.bf16.msra.mxu1 %v3063_v48  ;;  %3181 = vmatprep.subr.bf16.mxu0 %v2944_v33  ;;  %v3088_v23 = vld [vmem:[#allocation2 + $0x1d48] sm:$0xff]  ;;  %v3087_v58 = vld [vmem:[#allocation2 + $0x1d40] sm:$0xff]  ;;  %v3050_v48 = vld [vmem:[#allocation2 + $0x1c18] sm:$0xff] }
 0x760   :  { %3222 = vmatprep.subr.bf16.mxu1 %v3072_v26  ;;  %v2968_v22 = vld [vmem:[#allocation2 + $0x1988] sm:$0xff]  ;;  %v2967_v50 = vld [vmem:[#allocation2 + $0x1980] sm:$0xff]  ;;  %v2921_v33 = vld [vmem:[#allocation2 + $0x1810] sm:$0xff] }
 0x761   :  { %v3096_v44 = vld [vmem:[#allocation2 + $0x1d88] sm:$0xff]  ;;  %v3095_v13 = vld [vmem:[#allocation2 + $0x1d80] sm:$0xff]  ;;  %v3049_v26 = vld [vmem:[#allocation2 + $0x1c10] sm:$0xff] }
 0x762   :  { %3182 = vmatpush1.bf16.msra.mxu0 %v2943_v40  ;;  %v2976_v39 = vld [vmem:[#allocation2 + $0x19c8] sm:$0xff]  ;;  %v2975_v59 = vld [vmem:[#allocation2 + $0x19c0] sm:$0xff]  ;;  %v2930_v40 = vld [vmem:[#allocation2 + $0x1858] sm:$0xff] }
 0x763   :  { %3223 = vmatpush1.bf16.msra.mxu1 %v3071_v61  ;;  %3183 = vmatprep.subr.bf16.mxu0 %v2952_v55  ;;  %v3104_v57 = vld [vmem:[#allocation2 + $0x1dc8] sm:$0xff]  ;;  %v3103_v31 = vld [vmem:[#allocation2 + $0x1dc0] sm:$0xff]  ;;  %v3058_v61 = vld [vmem:[#allocation2 + $0x1c58] sm:$0xff] }
 0x764   :  { %3224 = vmatprep.subr.bf16.mxu1 %v3080_v4  ;;  %v2984_v41 = vld [vmem:[#allocation2 + $0x1a08] sm:$0xff]  ;;  %v2983_v56 = vld [vmem:[#allocation2 + $0x1a00] sm:$0xff] }
 0x765   :  { %v3112_v42 = vld [vmem:[#allocation2 + $0x1e08] sm:$0xff]  ;;  %v3111_v51 = vld [vmem:[#allocation2 + $0x1e00] sm:$0xff] }
 0x766   :  { %3184 = vmatpush1.bf16.msra.mxu0 %v2951_v60  ;;  %v2992_v62 = vld [vmem:[#allocation2 + $0x1a48] sm:$0xff]  ;;  %v2991_v32 = vld [vmem:[#allocation2 + $0x1a40] sm:$0xff]  ;;  %v2929_v60 = vld [vmem:[#allocation2 + $0x1850] sm:$0xff] }
 0x767   :  { %3225 = vmatpush1.bf16.msra.mxu1 %v3079_v9  ;;  %3185 = vmatprep.subr.bf16.mxu0 %v2960_v34  ;;  %v3120_v37 = vld [vmem:[#allocation2 + $0x1e48] sm:$0xff]  ;;  %v3119_v45 = vld [vmem:[#allocation2 + $0x1e40] sm:$0xff]  ;;  %v3057_v9 = vld [vmem:[#allocation2 + $0x1c50] sm:$0xff] }
 0x768   :  { %3226 = vmatprep.subr.bf16.mxu1 %v3088_v23  ;;  %v3000_v10 = vld [vmem:[#allocation2 + $0x1a88] sm:$0xff]  ;;  %v2999_v20 = vld [vmem:[#allocation2 + $0x1a80] sm:$0xff]  ;;  %v2938_v34 = vld [vmem:[#allocation2 + $0x1898] sm:$0xff] }
 0x769   :  { %v3128_v12 = vld [vmem:[#allocation2 + $0x1e88] sm:$0xff]  ;;  %v3127_v47 = vld [vmem:[#allocation2 + $0x1e80] sm:$0xff]  ;;  %v3066_v23 = vld [vmem:[#allocation2 + $0x1c98] sm:$0xff] }
 0x76a   :  { %3186 = vmatpush1.bf16.msra.mxu0 %v2959_v2  ;;  %v3008_v1 = vld [vmem:[#allocation2 + $0x1ac8] sm:$0xff]  ;;  %v3007_v29 = vld [vmem:[#allocation2 + $0x1ac0] sm:$0xff]  ;;  %v2937_v2 = vld [vmem:[#allocation2 + $0x1890] sm:$0xff] }
 0x76b   :  { %3227 = vmatpush1.bf16.msra.mxu1 %v3087_v58  ;;  %3187 = vmatprep.subr.bf16.mxu0 %v2968_v22  ;;  %v3136_v35 = vld [vmem:[#allocation2 + $0x1ec8] sm:$0xff]  ;;  %v3135_v17 = vld [vmem:[#allocation2 + $0x1ec0] sm:$0xff]  ;;  %v3065_v58 = vld [vmem:[#allocation2 + $0x1c90] sm:$0xff] }
 0x76c   :  { %3228 = vmatprep.subr.bf16.mxu1 %v3096_v44  ;;  %v3016_v38 = vld [vmem:[#allocation2 + $0x1b08] sm:$0xff]  ;;  %v3015_v24 = vld [vmem:[#allocation2 + $0x1b00] sm:$0xff]  ;;  %v2946_v22 = vld [vmem:[#allocation2 + $0x18d8] sm:$0xff] }
 0x76d   :  { %v3144_v8 = vld [vmem:[#allocation2 + $0x1f08] sm:$0xff]  ;;  %v3143_v6 = vld [vmem:[#allocation2 + $0x1f00] sm:$0xff]  ;;  %v3074_v44 = vld [vmem:[#allocation2 + $0x1cd8] sm:$0xff] }
 0x76e   :  { %3188 = vmatpush1.bf16.msra.mxu0 %v2967_v50  ;;  %v3024_v43 = vld [vmem:[#allocation2 + $0x1b48] sm:$0xff]  ;;  %v3023_v18 = vld [vmem:[#allocation2 + $0x1b40] sm:$0xff]  ;;  %v2945_v50 = vld [vmem:[#allocation2 + $0x18d0] sm:$0xff] }
 0x76f   :  { %3229 = vmatpush1.bf16.msra.mxu1 %v3095_v13  ;;  %3189 = vmatprep.subr.bf16.mxu0 %v2976_v39  ;;  %v3152_v0 = vld [vmem:[#allocation2 + $0x1f48] sm:$0xff]  ;;  %v3151_v25 = vld [vmem:[#allocation2 + $0x1f40] sm:$0xff]  ;;  %v3073_v13 = vld [vmem:[#allocation2 + $0x1cd0] sm:$0xff] }
 0x770   :  { %3230 = vmatprep.subr.bf16.mxu1 %v3104_v57  ;;  %v3032_v30 = vld [vmem:[#allocation2 + $0x1b88] sm:$0xff]  ;;  %v3031_v36 = vld [vmem:[#allocation2 + $0x1b80] sm:$0xff]  ;;  %v2954_v39 = vld [vmem:[#allocation2 + $0x1918] sm:$0xff] }
 0x771   :  { %v3160_v27 = vld [vmem:[#allocation2 + $0x1f88] sm:$0xff]  ;;  %v3159_v3 = vld [vmem:[#allocation2 + $0x1f80] sm:$0xff]  ;;  %v3082_v57 = vld [vmem:[#allocation2 + $0x1d18] sm:$0xff] }
 0x772   :  { %3190 = vmatpush1.bf16.msra.mxu0 %v2975_v59  ;;  %v3040_v15 = vld [vmem:[#allocation2 + $0x1bc8] sm:$0xff]  ;;  %v3039_v52 = vld [vmem:[#allocation2 + $0x1bc0] sm:$0xff]  ;;  %v2953_v59 = vld [vmem:[#allocation2 + $0x1910] sm:$0xff] }
 0x773   :  { %3231 = vmatpush1.bf16.msra.mxu1 %v3103_v31  ;;  %3191 = vmatprep.subr.bf16.mxu0 %v2984_v41  ;;  %v3168_v19 = vld [vmem:[#allocation2 + $0x1fc8] sm:$0xff]  ;;  %v3167_v28 = vld [vmem:[#allocation2 + $0x1fc0] sm:$0xff]  ;;  %v3081_v31 = vld [vmem:[#allocation2 + $0x1d10] sm:$0xff] }
 0x774   :  { %3232 = vmatprep.subr.bf16.mxu1 %v3112_v42  ;;  %v7109_v55 = vld [vmem:[#allocation53_spill] sm:$0xff]  ;;  %v7110_v4 = vld [vmem:[#allocation54_spill] sm:$0xff] }
 0x775   :  { %v2962_v41 = vld [vmem:[#allocation2 + $0x1958] sm:$0xff] }
 0x776   :  { %3192 = vmatpush1.bf16.msra.mxu0 %v2983_v56  ;;  %v3090_v42 = vld [vmem:[#allocation2 + $0x1d58] sm:$0xff]  ;;  %v2961_v56 = vld [vmem:[#allocation2 + $0x1950] sm:$0xff] }
 0x777   :  { %3233 = vmatpush1.bf16.msra.mxu1 %v3111_v51  ;;  %3193 = vmatprep.subr.bf16.mxu0 %v2992_v62  ;;  %v3089_v51 = vld [vmem:[#allocation2 + $0x1d50] sm:$0xff]  ;;  %v2970_v62 = vld [vmem:[#allocation2 + $0x1998] sm:$0xff] }
 0x778   :  { %3234 = vmatprep.subr.bf16.mxu1 %v3120_v37  ;;  %v3098_v37 = vld [vmem:[#allocation2 + $0x1d98] sm:$0xff] }
 0x77a   :  { %3194 = vmatpush1.bf16.msra.mxu0 %v2991_v32  ;;  %v2969_v32 = vld [vmem:[#allocation2 + $0x1990] sm:$0xff] }
 0x77b   :  { %3235 = vmatpush1.bf16.msra.mxu1 %v3119_v45  ;;  %3195 = vmatprep.subr.bf16.mxu0 %v3000_v10  ;;  %v3097_v45 = vld [vmem:[#allocation2 + $0x1d90] sm:$0xff]  ;;  %v2978_v10 = vld [vmem:[#allocation2 + $0x19d8] sm:$0xff] }
 0x77c   :  { %3236 = vmatprep.subr.bf16.mxu1 %v3128_v12  ;;  %v3106_v12 = vld [vmem:[#allocation2 + $0x1dd8] sm:$0xff] }
 0x77e   :  { %3196 = vmatpush1.bf16.msra.mxu0 %v2999_v20  ;;  %v2977_v20 = vld [vmem:[#allocation2 + $0x19d0] sm:$0xff] }
 0x77f   :  { %3237 = vmatpush1.bf16.msra.mxu1 %v3127_v47  ;;  %3197 = vmatprep.subr.bf16.mxu0 %v3008_v1  ;;  %v3105_v47 = vld [vmem:[#allocation2 + $0x1dd0] sm:$0xff]  ;;  %v2986_v1 = vld [vmem:[#allocation2 + $0x1a18] sm:$0xff] }
 0x780   :  { %3238 = vmatprep.subr.bf16.mxu1 %v3136_v35  ;;  %v3114_v35 = vld [vmem:[#allocation2 + $0x1e18] sm:$0xff] }
 0x782   :  { %3198 = vmatpush1.bf16.msra.mxu0 %v3007_v29  ;;  %v2985_v29 = vld [vmem:[#allocation2 + $0x1a10] sm:$0xff] }
 0x783   :  { %3239 = vmatpush1.bf16.msra.mxu1 %v3135_v17  ;;  %3199 = vmatprep.subr.bf16.mxu0 %v3016_v38  ;;  %v3113_v17 = vld [vmem:[#allocation2 + $0x1e10] sm:$0xff]  ;;  %v2994_v38 = vld [vmem:[#allocation2 + $0x1a58] sm:$0xff] }
 0x784   :  { %3240 = vmatprep.subr.bf16.mxu1 %v3144_v8  ;;  %v3122_v8 = vld [vmem:[#allocation2 + $0x1e58] sm:$0xff] }
 0x786   :  { %3200 = vmatpush1.bf16.msra.mxu0 %v3015_v24  ;;  %v2993_v24 = vld [vmem:[#allocation2 + $0x1a50] sm:$0xff] }
 0x787   :  { %3241 = vmatpush1.bf16.msra.mxu1 %v3143_v6  ;;  %3201 = vmatprep.subr.bf16.mxu0 %v3024_v43  ;;  %v3121_v6 = vld [vmem:[#allocation2 + $0x1e50] sm:$0xff]  ;;  %v3002_v43 = vld [vmem:[#allocation2 + $0x1a98] sm:$0xff] }
 0x788   :  { %3242 = vmatprep.subr.bf16.mxu1 %v3152_v0  ;;  %v3130_v0 = vld [vmem:[#allocation2 + $0x1e98] sm:$0xff] }
 0x78a   :  { %3202 = vmatpush1.bf16.msra.mxu0 %v3023_v18  ;;  %v3001_v18 = vld [vmem:[#allocation2 + $0x1a90] sm:$0xff] }
 0x78b   :  { %3243 = vmatpush1.bf16.msra.mxu1 %v3151_v25  ;;  %3203 = vmatprep.subr.bf16.mxu0 %v3032_v30  ;;  %v3129_v25 = vld [vmem:[#allocation2 + $0x1e90] sm:$0xff]  ;;  %v3010_v30 = vld [vmem:[#allocation2 + $0x1ad8] sm:$0xff] }
 0x78c   :  { %3244 = vmatprep.subr.bf16.mxu1 %v3160_v27  ;;  %v3138_v27 = vld [vmem:[#allocation2 + $0x1ed8] sm:$0xff] }
 0x78e   :  { %3204 = vmatpush1.bf16.msra.mxu0 %v3031_v36  ;;  %v3009_v36 = vld [vmem:[#allocation2 + $0x1ad0] sm:$0xff] }
 0x78f   :  { %3245 = vmatpush1.bf16.msra.mxu1 %v3159_v3  ;;  %3205 = vmatprep.subr.bf16.mxu0 %v3040_v15  ;;  %v3137_v3 = vld [vmem:[#allocation2 + $0x1ed0] sm:$0xff]  ;;  %v3018_v15 = vld [vmem:[#allocation2 + $0x1b18] sm:$0xff] }
 0x790   :  { %3246 = vmatprep.subr.bf16.mxu1 %v3168_v19  ;;  %v3146_v19 = vld [vmem:[#allocation2 + $0x1f18] sm:$0xff] }
 0x792   :  { %3206 = vmatpush1.bf16.msra.mxu0 %v3039_v52  ;;  %v3017_v52 = vld [vmem:[#allocation2 + $0x1b10] sm:$0xff] }
 0x793   :  { %3247 = vmatpush1.bf16.msra.mxu1 %v3167_v28  ;;  %3257 = vmatprep.subr.bf16.mxu0 %v2922_v63  ;;  %v3145_v28 = vld [vmem:[#allocation2 + $0x1f10] sm:$0xff]  ;;  %v3026_v63 = vld [vmem:[#allocation2 + $0x1b58] sm:$0xff] }
 0x794   :  { %3298 = vmatprep.subr.bf16.mxu1 %v3050_v48  ;;  %v3154_v48 = vld [vmem:[#allocation2 + $0x1f58] sm:$0xff] }
 0x795   :  { %3208 = vmatmul.mubr.bf16.vlgmr.msra.gmra.mrb[60].mxu0 %v7109_v55 }
 0x796   :  { %3249 = vmatmul.mubr.bf16.vlgmr.msra.gmra.mrb[68].mxu1 %v7110_v4  ;;  %3258 = vmatpush1.bf16.msra.mxu0 %v2921_v33  ;;  %v3025_v33 = vld [vmem:[#allocation2 + $0x1b50] sm:$0xff] }
 0x797   :  { %3299 = vmatpush1.bf16.msra.mxu1 %v3049_v26  ;;  %3259 = vmatprep.subr.bf16.mxu0 %v2930_v40  ;;  %v3153_v26 = vld [vmem:[#allocation2 + $0x1f50] sm:$0xff]  ;;  %v3034_v40 = vld [vmem:[#allocation2 + $0x1b98] sm:$0xff] }
 0x798   :  { %3300 = vmatprep.subr.bf16.mxu1 %v3058_v61  ;;  %3289 = vmatprep.mubr.bf16.mxu0 %v7107_v54  ;;  %v3162_v61 = vld [vmem:[#allocation2 + $0x1f98] sm:$0xff] }
 0x799   :  { %3330 = vmatprep.mubr.bf16.mxu1 %v7108_v16 }
 0x79a   :  { %3260 = vmatpush1.bf16.msra.mxu0 %v2929_v60  ;;  %v3033_v60 = vld [vmem:[#allocation2 + $0x1b90] sm:$0xff] }
 0x79b   :  { %3301 = vmatpush1.bf16.msra.mxu1 %v3057_v9  ;;  %3261 = vmatprep.subr.bf16.mxu0 %v2938_v34  ;;  %v3161_v9 = vld [vmem:[#allocation2 + $0x1f90] sm:$0xff]  ;;  %v3042_v34 = vld [vmem:[#allocation2 + $0x1bd8] sm:$0xff] }
 0x79c   :  { %3302 = vmatprep.subr.bf16.mxu1 %v3066_v23  ;;  %v3170_v23 = vld [vmem:[#allocation2 + $0x1fd8] sm:$0xff] }
 0x79e   :  { %3262 = vmatpush1.bf16.msra.mxu0 %v2937_v2  ;;  %v3041_v2 = vld [vmem:[#allocation2 + $0x1bd0] sm:$0xff] }
 0x79f   :  { %3303 = vmatpush1.bf16.msra.mxu1 %v3065_v58  ;;  %3263 = vmatprep.subr.bf16.mxu0 %v2946_v22  ;;  %v3169_v58 = vld [vmem:[#allocation2 + $0x1fd0] sm:$0xff]  ;;  %v2924_v22 = vld [vmem:[#allocation2 + $0x1828] sm:$0xff] }
 0x7a0   :  { %3304 = vmatprep.subr.bf16.mxu1 %v3074_v44  ;;  %v3052_v44 = vld [vmem:[#allocation2 + $0x1c28] sm:$0xff] }
 0x7a2   :  { %3264 = vmatpush1.bf16.msra.mxu0 %v2945_v50  ;;  %v2923_v50 = vld [vmem:[#allocation2 + $0x1820] sm:$0xff] }
 0x7a3   :  { %3305 = vmatpush1.bf16.msra.mxu1 %v3073_v13  ;;  %3265 = vmatprep.subr.bf16.mxu0 %v2954_v39  ;;  %v3051_v13 = vld [vmem:[#allocation2 + $0x1c20] sm:$0xff]  ;;  %v2932_v39 = vld [vmem:[#allocation2 + $0x1868] sm:$0xff] }
 0x7a4   :  { %3306 = vmatprep.subr.bf16.mxu1 %v3082_v57  ;;  %v3060_v57 = vld [vmem:[#allocation2 + $0x1c68] sm:$0xff] }
 0x7a6   :  { %3266 = vmatpush1.bf16.msra.mxu0 %v2953_v59  ;;  %v2931_v59 = vld [vmem:[#allocation2 + $0x1860] sm:$0xff] }
 0x7a7   :  { %3307 = vmatpush1.bf16.msra.mxu1 %v3081_v31  ;;  %3267 = vmatprep.subr.bf16.mxu0 %v2962_v41  ;;  %v3059_v31 = vld [vmem:[#allocation2 + $0x1c60] sm:$0xff]  ;;  %v2940_v41 = vld [vmem:[#allocation2 + $0x18a8] sm:$0xff] }
 0x7a8   :  { %3308 = vmatprep.subr.bf16.mxu1 %v3090_v42  ;;  %v3068_v42 = vld [vmem:[#allocation2 + $0x1ca8] sm:$0xff] }
 0x7aa   :  { %3268 = vmatpush1.bf16.msra.mxu0 %v2961_v56  ;;  %v2939_v56 = vld [vmem:[#allocation2 + $0x18a0] sm:$0xff] }
 0x7ab   :  { %3309 = vmatpush1.bf16.msra.mxu1 %v3089_v51  ;;  %3269 = vmatprep.subr.bf16.mxu0 %v2970_v62  ;;  %v3067_v51 = vld [vmem:[#allocation2 + $0x1ca0] sm:$0xff]  ;;  %v2948_v62 = vld [vmem:[#allocation2 + $0x18e8] sm:$0xff] }
 0x7ac   :  { %3310 = vmatprep.subr.bf16.mxu1 %v3098_v37  ;;  %v3076_v37 = vld [vmem:[#allocation2 + $0x1ce8] sm:$0xff] }
 0x7ae   :  { %3270 = vmatpush1.bf16.msra.mxu0 %v2969_v32  ;;  %v2947_v32 = vld [vmem:[#allocation2 + $0x18e0] sm:$0xff] }
 0x7af   :  { %3311 = vmatpush1.bf16.msra.mxu1 %v3097_v45  ;;  %3271 = vmatprep.subr.bf16.mxu0 %v2978_v10  ;;  %v3075_v45 = vld [vmem:[#allocation2 + $0x1ce0] sm:$0xff]  ;;  %v2956_v10 = vld [vmem:[#allocation2 + $0x1928] sm:$0xff] }
 0x7b0   :  { %3312 = vmatprep.subr.bf16.mxu1 %v3106_v12  ;;  %v3084_v12 = vld [vmem:[#allocation2 + $0x1d28] sm:$0xff] }
 0x7b2   :  { %3272 = vmatpush1.bf16.msra.mxu0 %v2977_v20  ;;  %v2955_v20 = vld [vmem:[#allocation2 + $0x1920] sm:$0xff] }
 0x7b3   :  { %3313 = vmatpush1.bf16.msra.mxu1 %v3105_v47  ;;  %3273 = vmatprep.subr.bf16.mxu0 %v2986_v1  ;;  %v3083_v47 = vld [vmem:[#allocation2 + $0x1d20] sm:$0xff]  ;;  %v2964_v1 = vld [vmem:[#allocation2 + $0x1968] sm:$0xff] }
 0x7b4   :  { %3314 = vmatprep.subr.bf16.mxu1 %v3114_v35  ;;  %v3092_v35 = vld [vmem:[#allocation2 + $0x1d68] sm:$0xff] }
 0x7b6   :  { %3274 = vmatpush1.bf16.msra.mxu0 %v2985_v29  ;;  %v2963_v29 = vld [vmem:[#allocation2 + $0x1960] sm:$0xff] }
 0x7b7   :  { %3315 = vmatpush1.bf16.msra.mxu1 %v3113_v17  ;;  %3275 = vmatprep.subr.bf16.mxu0 %v2994_v38  ;;  %v3091_v17 = vld [vmem:[#allocation2 + $0x1d60] sm:$0xff]  ;;  %v2972_v38 = vld [vmem:[#allocation2 + $0x19a8] sm:$0xff] }
 0x7b8   :  { %3316 = vmatprep.subr.bf16.mxu1 %v3122_v8  ;;  %v3100_v8 = vld [vmem:[#allocation2 + $0x1da8] sm:$0xff] }
 0x7ba   :  { %3276 = vmatpush1.bf16.msra.mxu0 %v2993_v24  ;;  %v2971_v24 = vld [vmem:[#allocation2 + $0x19a0] sm:$0xff] }
 0x7bb   :  { %3317 = vmatpush1.bf16.msra.mxu1 %v3121_v6  ;;  %3277 = vmatprep.subr.bf16.mxu0 %v3002_v43  ;;  %v3099_v6 = vld [vmem:[#allocation2 + $0x1da0] sm:$0xff]  ;;  %v2980_v43 = vld [vmem:[#allocation2 + $0x19e8] sm:$0xff] }
 0x7bc   :  { %3318 = vmatprep.subr.bf16.mxu1 %v3130_v0  ;;  %v3108_v0 = vld [vmem:[#allocation2 + $0x1de8] sm:$0xff] }
 0x7be   :  { %3278 = vmatpush1.bf16.msra.mxu0 %v3001_v18  ;;  %v2979_v18 = vld [vmem:[#allocation2 + $0x19e0] sm:$0xff] }
 0x7bf   :  { %3319 = vmatpush1.bf16.msra.mxu1 %v3129_v25  ;;  %3279 = vmatprep.subr.bf16.mxu0 %v3010_v30  ;;  %v3107_v25 = vld [vmem:[#allocation2 + $0x1de0] sm:$0xff]  ;;  %v2988_v30 = vld [vmem:[#allocation2 + $0x1a28] sm:$0xff] }
 0x7c0   :  { %3320 = vmatprep.subr.bf16.mxu1 %v3138_v27  ;;  %v3116_v27 = vld [vmem:[#allocation2 + $0x1e28] sm:$0xff] }
 0x7c2   :  { %3280 = vmatpush1.bf16.msra.mxu0 %v3009_v36  ;;  %v2987_v36 = vld [vmem:[#allocation2 + $0x1a20] sm:$0xff] }
 0x7c3   :  { %3321 = vmatpush1.bf16.msra.mxu1 %v3137_v3  ;;  %3281 = vmatprep.subr.bf16.mxu0 %v3018_v15  ;;  %v3115_v3 = vld [vmem:[#allocation2 + $0x1e20] sm:$0xff]  ;;  %v2996_v15 = vld [vmem:[#allocation2 + $0x1a68] sm:$0xff] }
 0x7c4   :  { %3322 = vmatprep.subr.bf16.mxu1 %v3146_v19  ;;  %v3124_v19 = vld [vmem:[#allocation2 + $0x1e68] sm:$0xff] }
 0x7c6   :  { %3282 = vmatpush1.bf16.msra.mxu0 %v3017_v52  ;;  %v2995_v52 = vld [vmem:[#allocation2 + $0x1a60] sm:$0xff] }
 0x7c7   :  { %3323 = vmatpush1.bf16.msra.mxu1 %v3145_v28  ;;  %3283 = vmatprep.subr.bf16.mxu0 %v3026_v63  ;;  %v3123_v28 = vld [vmem:[#allocation2 + $0x1e60] sm:$0xff]  ;;  %v3004_v63 = vld [vmem:[#allocation2 + $0x1aa8] sm:$0xff] }
 0x7c8   :  { %3324 = vmatprep.subr.bf16.mxu1 %v3154_v48  ;;  %v3132_v48 = vld [vmem:[#allocation2 + $0x1ea8] sm:$0xff] }
 0x7ca   :  { %3284 = vmatpush1.bf16.msra.mxu0 %v3025_v33  ;;  %v3003_v33 = vld [vmem:[#allocation2 + $0x1aa0] sm:$0xff] }
 0x7cb   :  { %3325 = vmatpush1.bf16.msra.mxu1 %v3153_v26  ;;  %3285 = vmatprep.subr.bf16.mxu0 %v3034_v40  ;;  %v3131_v26 = vld [vmem:[#allocation2 + $0x1ea0] sm:$0xff]  ;;  %v3012_v40 = vld [vmem:[#allocation2 + $0x1ae8] sm:$0xff] }
 0x7cc   :  { %3326 = vmatprep.subr.bf16.mxu1 %v3162_v61  ;;  %v3140_v61 = vld [vmem:[#allocation2 + $0x1ee8] sm:$0xff] }
 0x7ce   :  { %3286 = vmatpush1.bf16.msra.mxu0 %v3033_v60  ;;  %v3011_v60 = vld [vmem:[#allocation2 + $0x1ae0] sm:$0xff] }
 0x7cf   :  { %3327 = vmatpush1.bf16.msra.mxu1 %v3161_v9  ;;  %3287 = vmatprep.subr.bf16.mxu0 %v3042_v34  ;;  %v3139_v9 = vld [vmem:[#allocation2 + $0x1ee0] sm:$0xff]  ;;  %v3020_v34 = vld [vmem:[#allocation2 + $0x1b28] sm:$0xff] }
 0x7d0   :  { %3328 = vmatprep.subr.bf16.mxu1 %v3170_v23  ;;  %v3148_v23 = vld [vmem:[#allocation2 + $0x1f28] sm:$0xff] }
 0x7d2   :  { %3288 = vmatpush1.bf16.msra.mxu0 %v3041_v2  ;;  %v3019_v2 = vld [vmem:[#allocation2 + $0x1b20] sm:$0xff] }
 0x7d3   :  { %3329 = vmatpush1.bf16.msra.mxu1 %v3169_v58  ;;  %3339 = vmatprep.subr.bf16.mxu0 %v2924_v22  ;;  %v3147_v58 = vld [vmem:[#allocation2 + $0x1f20] sm:$0xff]  ;;  %v3028_v22 = vld [vmem:[#allocation2 + $0x1b68] sm:$0xff] }
 0x7d4   :  { %3380 = vmatprep.subr.bf16.mxu1 %v3052_v44  ;;  %v3156_v44 = vld [vmem:[#allocation2 + $0x1f68] sm:$0xff] }
 0x7d5   :  { %3290 = vmatmul.mubr.bf16.vlgmr.msra.gmra.mrb[64].mxu0 %v7109_v55 }
 0x7d6   :  { %3331 = vmatmul.mubr.bf16.vlgmr.msra.gmra.mrb[72].mxu1 %v7110_v4  ;;  %3340 = vmatpush1.bf16.msra.mxu0 %v2923_v50  ;;  %v3027_v50 = vld [vmem:[#allocation2 + $0x1b60] sm:$0xff] }
 0x7d7   :  { %3381 = vmatpush1.bf16.msra.mxu1 %v3051_v13  ;;  %3341 = vmatprep.subr.bf16.mxu0 %v2932_v39  ;;  %v3155_v13 = vld [vmem:[#allocation2 + $0x1f60] sm:$0xff]  ;;  %v3036_v39 = vld [vmem:[#allocation2 + $0x1ba8] sm:$0xff] }
 0x7d8   :  { %3382 = vmatprep.subr.bf16.mxu1 %v3060_v57  ;;  %3371 = vmatprep.mubr.bf16.mxu0 %v7107_v54  ;;  %v3164_v57 = vld [vmem:[#allocation2 + $0x1fa8] sm:$0xff] }
 0x7d9   :  { %3412 = vmatprep.mubr.bf16.mxu1 %v7108_v16 }
 0x7da   :  { %3342 = vmatpush1.bf16.msra.mxu0 %v2931_v59  ;;  %v3035_v59 = vld [vmem:[#allocation2 + $0x1ba0] sm:$0xff] }
 0x7db   :  { %3383 = vmatpush1.bf16.msra.mxu1 %v3059_v31  ;;  %3343 = vmatprep.subr.bf16.mxu0 %v2940_v41  ;;  %v3163_v31 = vld [vmem:[#allocation2 + $0x1fa0] sm:$0xff]  ;;  %v3044_v41 = vld [vmem:[#allocation2 + $0x1be8] sm:$0xff] }
 0x7dc   :  { %3384 = vmatprep.subr.bf16.mxu1 %v3068_v42  ;;  %v3172_v42 = vld [vmem:[#allocation2 + $0x1fe8] sm:$0xff] }
 0x7de   :  { %3344 = vmatpush1.bf16.msra.mxu0 %v2939_v56  ;;  %v3043_v56 = vld [vmem:[#allocation2 + $0x1be0] sm:$0xff] }
 0x7df   :  { %3385 = vmatpush1.bf16.msra.mxu1 %v3067_v51  ;;  %3345 = vmatprep.subr.bf16.mxu0 %v2948_v62  ;;  %v3171_v51 = vld [vmem:[#allocation2 + $0x1fe0] sm:$0xff]  ;;  %v2926_v62 = vld [vmem:[#allocation2 + $0x1838] sm:$0xff] }
 0x7e0   :  { %3386 = vmatprep.subr.bf16.mxu1 %v3076_v37  ;;  %v3054_v37 = vld [vmem:[#allocation2 + $0x1c38] sm:$0xff] }
 0x7e2   :  { %3346 = vmatpush1.bf16.msra.mxu0 %v2947_v32  ;;  %v2925_v32 = vld [vmem:[#allocation2 + $0x1830] sm:$0xff] }
 0x7e3   :  { %3387 = vmatpush1.bf16.msra.mxu1 %v3075_v45  ;;  %3347 = vmatprep.subr.bf16.mxu0 %v2956_v10  ;;  %v3053_v45 = vld [vmem:[#allocation2 + $0x1c30] sm:$0xff]  ;;  %v2934_v10 = vld [vmem:[#allocation2 + $0x1878] sm:$0xff] }
 0x7e4   :  { %3388 = vmatprep.subr.bf16.mxu1 %v3084_v12  ;;  %v3062_v12 = vld [vmem:[#allocation2 + $0x1c78] sm:$0xff] }
 0x7e6   :  { %3348 = vmatpush1.bf16.msra.mxu0 %v2955_v20  ;;  %v2933_v20 = vld [vmem:[#allocation2 + $0x1870] sm:$0xff] }
 0x7e7   :  { %3389 = vmatpush1.bf16.msra.mxu1 %v3083_v47  ;;  %3349 = vmatprep.subr.bf16.mxu0 %v2964_v1  ;;  %v3061_v47 = vld [vmem:[#allocation2 + $0x1c70] sm:$0xff]  ;;  %v2942_v1 = vld [vmem:[#allocation2 + $0x18b8] sm:$0xff] }
 0x7e8   :  { %3390 = vmatprep.subr.bf16.mxu1 %v3092_v35  ;;  %v3070_v35 = vld [vmem:[#allocation2 + $0x1cb8] sm:$0xff] }
 0x7ea   :  { %3350 = vmatpush1.bf16.msra.mxu0 %v2963_v29  ;;  %v2941_v29 = vld [vmem:[#allocation2 + $0x18b0] sm:$0xff] }
 0x7eb   :  { %3391 = vmatpush1.bf16.msra.mxu1 %v3091_v17  ;;  %3351 = vmatprep.subr.bf16.mxu0 %v2972_v38  ;;  %v3069_v17 = vld [vmem:[#allocation2 + $0x1cb0] sm:$0xff]  ;;  %v2950_v38 = vld [vmem:[#allocation2 + $0x18f8] sm:$0xff] }
 0x7ec   :  { %3392 = vmatprep.subr.bf16.mxu1 %v3100_v8  ;;  %v3078_v8 = vld [vmem:[#allocation2 + $0x1cf8] sm:$0xff] }
 0x7ee   :  { %3352 = vmatpush1.bf16.msra.mxu0 %v2971_v24  ;;  %v2949_v24 = vld [vmem:[#allocation2 + $0x18f0] sm:$0xff] }
 0x7ef   :  { %3393 = vmatpush1.bf16.msra.mxu1 %v3099_v6  ;;  %3353 = vmatprep.subr.bf16.mxu0 %v2980_v43  ;;  %v3077_v6 = vld [vmem:[#allocation2 + $0x1cf0] sm:$0xff]  ;;  %v2958_v43 = vld [vmem:[#allocation2 + $0x1938] sm:$0xff] }
 0x7f0   :  { %3394 = vmatprep.subr.bf16.mxu1 %v3108_v0  ;;  %v3086_v0 = vld [vmem:[#allocation2 + $0x1d38] sm:$0xff] }
 0x7f2   :  { %3354 = vmatpush1.bf16.msra.mxu0 %v2979_v18  ;;  %v2966_v18 = vld [vmem:[#allocation2 + $0x1978] sm:$0xff] }
 0x7f3   :  { %3395 = vmatpush1.bf16.msra.mxu1 %v3107_v25  ;;  %3355 = vmatprep.subr.bf16.mxu0 %v2988_v30  ;;  %v3094_v25 = vld [vmem:[#allocation2 + $0x1d78] sm:$0xff]  ;;  %v2965_v30 = vld [vmem:[#allocation2 + $0x1970] sm:$0xff] }
 0x7f4   :  { %3396 = vmatprep.subr.bf16.mxu1 %v3116_v27  ;;  %v3093_v27 = vld [vmem:[#allocation2 + $0x1d70] sm:$0xff] }
 0x7f6   :  { %3356 = vmatpush1.bf16.msra.mxu0 %v2987_v36  ;;  %v2974_v36 = vld [vmem:[#allocation2 + $0x19b8] sm:$0xff] }
 0x7f7   :  { %3397 = vmatpush1.bf16.msra.mxu1 %v3115_v3  ;;  %3357 = vmatprep.subr.bf16.mxu0 %v2996_v15  ;;  %v3102_v3 = vld [vmem:[#allocation2 + $0x1db8] sm:$0xff]  ;;  %v2973_v15 = vld [vmem:[#allocation2 + $0x19b0] sm:$0xff] }
 0x7f8   :  { %3398 = vmatprep.subr.bf16.mxu1 %v3124_v19  ;;  %v3101_v19 = vld [vmem:[#allocation2 + $0x1db0] sm:$0xff] }
 0x7fa   :  { %3358 = vmatpush1.bf16.msra.mxu0 %v2995_v52  ;;  %v2982_v52 = vld [vmem:[#allocation2 + $0x19f8] sm:$0xff] }
 0x7fb   :  { %3399 = vmatpush1.bf16.msra.mxu1 %v3123_v28  ;;  %3359 = vmatprep.subr.bf16.mxu0 %v3004_v63  ;;  %v3110_v28 = vld [vmem:[#allocation2 + $0x1df8] sm:$0xff]  ;;  %v2981_v63 = vld [vmem:[#allocation2 + $0x19f0] sm:$0xff] }
 0x7fc   :  { %3400 = vmatprep.subr.bf16.mxu1 %v3132_v48  ;;  %v3109_v48 = vld [vmem:[#allocation2 + $0x1df0] sm:$0xff] }
 0x7fe   :  { %3360 = vmatpush1.bf16.msra.mxu0 %v3003_v33  ;;  %v2990_v33 = vld [vmem:[#allocation2 + $0x1a38] sm:$0xff] }
 0x7ff   :  { %3401 = vmatpush1.bf16.msra.mxu1 %v3131_v26  ;;  %3361 = vmatprep.subr.bf16.mxu0 %v3012_v40  ;;  %v3118_v26 = vld [vmem:[#allocation2 + $0x1e38] sm:$0xff]  ;;  %v2989_v40 = vld [vmem:[#allocation2 + $0x1a30] sm:$0xff] }
 0x800   :  { %3402 = vmatprep.subr.bf16.mxu1 %v3140_v61  ;;  %v3117_v61 = vld [vmem:[#allocation2 + $0x1e30] sm:$0xff] }
 0x802   :  { %3362 = vmatpush1.bf16.msra.mxu0 %v3011_v60  ;;  %v2998_v60 = vld [vmem:[#allocation2 + $0x1a78] sm:$0xff] }
 0x803   :  { %3403 = vmatpush1.bf16.msra.mxu1 %v3139_v9  ;;  %3363 = vmatprep.subr.bf16.mxu0 %v3020_v34  ;;  %v3126_v9 = vld [vmem:[#allocation2 + $0x1e78] sm:$0xff]  ;;  %v2997_v34 = vld [vmem:[#allocation2 + $0x1a70] sm:$0xff] }
 0x804   :  { %3404 = vmatprep.subr.bf16.mxu1 %v3148_v23  ;;  %v3125_v23 = vld [vmem:[#allocation2 + $0x1e70] sm:$0xff] }
 0x806   :  { %3364 = vmatpush1.bf16.msra.mxu0 %v3019_v2  ;;  %v3006_v2 = vld [vmem:[#allocation2 + $0x1ab8] sm:$0xff] }
 0x807   :  { %3405 = vmatpush1.bf16.msra.mxu1 %v3147_v58  ;;  %3365 = vmatprep.subr.bf16.mxu0 %v3028_v22  ;;  %v3134_v58 = vld [vmem:[#allocation2 + $0x1eb8] sm:$0xff]  ;;  %v3005_v22 = vld [vmem:[#allocation2 + $0x1ab0] sm:$0xff] }
 0x808   :  { %3406 = vmatprep.subr.bf16.mxu1 %v3156_v44  ;;  %v3133_v44 = vld [vmem:[#allocation2 + $0x1eb0] sm:$0xff] }
 0x80a   :  { %3366 = vmatpush1.bf16.msra.mxu0 %v3027_v50  ;;  %v3014_v50 = vld [vmem:[#allocation2 + $0x1af8] sm:$0xff] }
 0x80b   :  { %3407 = vmatpush1.bf16.msra.mxu1 %v3155_v13  ;;  %3367 = vmatprep.subr.bf16.mxu0 %v3036_v39  ;;  %v3142_v13 = vld [vmem:[#allocation2 + $0x1ef8] sm:$0xff]  ;;  %v3013_v39 = vld [vmem:[#allocation2 + $0x1af0] sm:$0xff] }
 0x80c   :  { %3408 = vmatprep.subr.bf16.mxu1 %v3164_v57  ;;  %v3141_v57 = vld [vmem:[#allocation2 + $0x1ef0] sm:$0xff] }
 0x80e   :  { %3368 = vmatpush1.bf16.msra.mxu0 %v3035_v59  ;;  %v3022_v59 = vld [vmem:[#allocation2 + $0x1b38] sm:$0xff] }
 0x80f   :  { %3409 = vmatpush1.bf16.msra.mxu1 %v3163_v31  ;;  %3369 = vmatprep.subr.bf16.mxu0 %v3044_v41  ;;  %v3150_v31 = vld [vmem:[#allocation2 + $0x1f38] sm:$0xff]  ;;  %v3021_v41 = vld [vmem:[#allocation2 + $0x1b30] sm:$0xff] }
 0x810   :  { %3410 = vmatprep.subr.bf16.mxu1 %v3172_v42  ;;  %v3149_v42 = vld [vmem:[#allocation2 + $0x1f30] sm:$0xff] }
 0x812   :  { %3370 = vmatpush1.bf16.msra.mxu0 %v3043_v56  ;;  %v3030_v56 = vld [vmem:[#allocation2 + $0x1b78] sm:$0xff] }
 0x813   :  { %3411 = vmatpush1.bf16.msra.mxu1 %v3171_v51  ;;  %3421 = vmatprep.subr.bf16.mxu0 %v2926_v62  ;;  %v3158_v51 = vld [vmem:[#allocation2 + $0x1f78] sm:$0xff]  ;;  %v3029_v62 = vld [vmem:[#allocation2 + $0x1b70] sm:$0xff] }
 0x814   :  { %3462 = vmatprep.subr.bf16.mxu1 %v3054_v37  ;;  %v3157_v37 = vld [vmem:[#allocation2 + $0x1f70] sm:$0xff] }
 0x815   :  { %3372 = vmatmul.mubr.bf16.vlgmr.msra.gmra.mrb[68].mxu0 %v7109_v55 }
 0x816   :  { %3413 = vmatmul.mubr.bf16.vlgmr.msra.gmra.mrb[76].mxu1 %v7110_v4  ;;  %3422 = vmatpush1.bf16.msra.mxu0 %v2925_v32  ;;  %v3038_v32 = vld [vmem:[#allocation2 + $0x1bb8] sm:$0xff] }
 0x817   :  { %3463 = vmatpush1.bf16.msra.mxu1 %v3053_v45  ;;  %3423 = vmatprep.subr.bf16.mxu0 %v2934_v10  ;;  %v3166_v45 = vld [vmem:[#allocation2 + $0x1fb8] sm:$0xff]  ;;  %v3037_v10 = vld [vmem:[#allocation2 + $0x1bb0] sm:$0xff] }
 0x818   :  { %3464 = vmatprep.subr.bf16.mxu1 %v3062_v12  ;;  %3453 = vmatprep.mubr.bf16.mxu0 %v7107_v54  ;;  %v2957_v54 = vld [vmem:[#allocation2 + $0x1930] sm:$0xff] }
 0x819   :  { %3494 = vmatprep.mubr.bf16.mxu1 %v7108_v16  ;;  %v3085_v16 = vld [vmem:[#allocation2 + $0x1d30] sm:$0xff] }
 0x81a   :  { %3424 = vmatpush1.bf16.msra.mxu0 %v2933_v20  ;;  %v3165_v12 = vld [vmem:[#allocation2 + $0x1fb0] sm:$0xff]  ;;  %v3046_v20 = vld [vmem:[#allocation2 + $0x1bf8] sm:$0xff] }
 0x81b   :  { %3465 = vmatpush1.bf16.msra.mxu1 %v3061_v47  ;;  %3425 = vmatprep.subr.bf16.mxu0 %v2942_v1  ;;  %v3174_v47 = vld [vmem:[#allocation2 + $0x1ff8] sm:$0xff]  ;;  %v3045_v1 = vld [vmem:[#allocation2 + $0x1bf0] sm:$0xff] }
 0x81c   :  { %3466 = vmatprep.subr.bf16.mxu1 %v3070_v35  ;;  %v3173_v35 = vld [vmem:[#allocation2 + $0x1ff0] sm:$0xff] }
 0x81e   :  { %3426 = vmatpush1.bf16.msra.mxu0 %v2941_v29  ;;  %v6537_v29 = vld [vmem:[#allocation11] sm:$0xff] }
 0x81f   :  { %3467 = vmatpush1.bf16.msra.mxu1 %v3069_v17  ;;  %3427 = vmatprep.subr.bf16.mxu0 %v2950_v38 }
 0x820   :  { %3468 = vmatprep.subr.bf16.mxu1 %v3078_v8 }
 0x822   :  { %3428 = vmatpush1.bf16.msra.mxu0 %v2949_v24  ;;  %v7111_v24 = vld [vmem:[#allocation39_spill] sm:$0xff] }
 0x823   :  { %3469 = vmatpush1.bf16.msra.mxu1 %v3077_v6  ;;  %3429 = vmatprep.subr.bf16.mxu0 %v2958_v43  ;;  %v3516_v6 = vrot.slane %v6537_v29, %v7111_v24 }
 0x824   :  { %3470 = vmatprep.subr.bf16.mxu1 %v3086_v0 }
 0x826   :  { %3430 = vmatpush1.bf16.msra.mxu0 %v2957_v54 }
 0x827   :  { %3471 = vmatpush1.bf16.msra.mxu1 %v3085_v16  ;;  %3431 = vmatprep.subr.bf16.mxu0 %v2966_v18  ;;  %v7112_v16 = vld [vmem:[#allocation41_spill] sm:$0xff] }
 0x828   :  { %3472 = vmatprep.subr.bf16.mxu1 %v3094_v25  ;;  %v3520_v18 = vrot.slane %v6537_v29, %v7112_v16 }
 0x82a   :  { %3432 = vmatpush1.bf16.msra.mxu0 %v2965_v30 }
 0x82b   :  { %3473 = vmatpush1.bf16.msra.mxu1 %v3093_v27  ;;  %3433 = vmatprep.subr.bf16.mxu0 %v2974_v36 }
 0x82c   :  { %3474 = vmatprep.subr.bf16.mxu1 %v3102_v3 }
 0x82e   :  { %3434 = vmatpush1.bf16.msra.mxu0 %v2973_v15 }
 0x82f   :  { %3475 = vmatpush1.bf16.msra.mxu1 %v3101_v19  ;;  %3435 = vmatprep.subr.bf16.mxu0 %v2982_v52 }
 0x830   :  { %3476 = vmatprep.subr.bf16.mxu1 %v3110_v28 }
 0x832   :  { %3436 = vmatpush1.bf16.msra.mxu0 %v2981_v63 }
 0x833   :  { %3477 = vmatpush1.bf16.msra.mxu1 %v3109_v48  ;;  %3437 = vmatprep.subr.bf16.mxu0 %v2990_v33  ;;  %v7113_v33 = vld [vmem:[#allocation40_spill] sm:$0xff] }
 0x834   :  { %3478 = vmatprep.subr.bf16.mxu1 %v3118_v26  ;;  %v3524_v26 = vrot.slane %v6537_v29, %v7113_v33 }
 0x836   :  { %3438 = vmatpush1.bf16.msra.mxu0 %v2989_v40 }
 0x837   :  { %3479 = vmatpush1.bf16.msra.mxu1 %v3117_v61  ;;  %3439 = vmatprep.subr.bf16.mxu0 %v2998_v60 }
 0x838   :  { %3480 = vmatprep.subr.bf16.mxu1 %v3126_v9 }
 0x83a   :  { %3440 = vmatpush1.bf16.msra.mxu0 %v2997_v34 }
 0x83b   :  { %3481 = vmatpush1.bf16.msra.mxu1 %v3125_v23  ;;  %3441 = vmatprep.subr.bf16.mxu0 %v3006_v2 }
 0x83c   :  { %3482 = vmatprep.subr.bf16.mxu1 %v3134_v58 }
 0x83e   :  { %3442 = vmatpush1.bf16.msra.mxu0 %v3005_v22 }
 0x83f   :  { %3483 = vmatpush1.bf16.msra.mxu1 %v3133_v44  ;;  %3443 = vmatprep.subr.bf16.mxu0 %v3014_v50 }
 0x840   :  { %3484 = vmatprep.subr.bf16.mxu1 %v3142_v13 }
 0x842   :  { %3444 = vmatpush1.bf16.msra.mxu0 %v3013_v39 }
 0x843   :  { %3485 = vmatpush1.bf16.msra.mxu1 %v3141_v57  ;;  %3445 = vmatprep.subr.bf16.mxu0 %v3022_v59 }
 0x844   :  { %3486 = vmatprep.subr.bf16.mxu1 %v3150_v31 }
 0x846   :  { %3446 = vmatpush1.bf16.msra.mxu0 %v3021_v41  ;;  %v7115_v41 = vld [vmem:[#allocation45_spill] sm:$0xff] }
 0x847   :  { %3487 = vmatpush1.bf16.msra.mxu1 %v3149_v42  ;;  %3447 = vmatprep.subr.bf16.mxu0 %v3030_v56  ;;  %v3532_v42 = vrot.slane %v6537_v29, %v7115_v41 }
 0x848   :  { %3488 = vmatprep.subr.bf16.mxu1 %v3158_v51 }
 0x84a   :  { %3448 = vmatpush1.bf16.msra.mxu0 %v3029_v62  ;;  %v7116_v62 = vld [vmem:[#allocation47_spill] sm:$0xff] }
 0x84b   :  { %3489 = vmatpush1.bf16.msra.mxu1 %v3157_v37  ;;  %3449 = vmatprep.subr.bf16.mxu0 %v3038_v32 }
 0x84c   :  { %3490 = vmatprep.subr.bf16.mxu1 %v3166_v45 }
 0x84e   :  { %3450 = vmatpush1.bf16.msra.mxu0 %v3037_v10 }
 0x84f   :  { %3491 = vmatpush1.bf16.msra.mxu1 %v3165_v12  ;;  %3451 = vmatprep.subr.bf16.mxu0 %v3046_v20 }
 0x850   :  { %3492 = vmatprep.subr.bf16.mxu1 %v3174_v47 }
 0x852   :  { %3452 = vmatpush1.bf16.msra.mxu0 %v3045_v1 }
 0x853   :  { %3493 = vmatpush1.bf16.msra.mxu1 %v3173_v35 }
 0x855   :  { %3454 = vmatmul.mubr.bf16.vlgmr.msra.gmra.mrb[72].mxu0 %v7109_v55 }
 0x856   :  { %3495 = vmatmul.mubr.bf16.vlgmr.msra.gmra.mrb[80].mxu1 %v7110_v4 }
 0x868   :  { %v3209_v17 = vpop.f32.mrb[60].mxu0 }
 0x869   :  { %v3250_v38 = vpop.f32.mrb[68].mxu1  ;;  %v3211_v43 = vpop.f32.mrb[61].mxu0 }
 0x86a   :  { %v3251_v8 = vadd.f32 %v3250_v38, %v3209_v17  ;;  %v3252_v0 = vpop.f32.mrb[69].mxu1  ;;  %v3213_v25 = vpop.f32.mrb[62].mxu0 }
 0x86b   :  { %v3253_v54 = vadd.f32 %v3252_v0, %v3211_v43  ;;  %v3254_v30 = vpop.f32.mrb[70].mxu1  ;;  %v3214_v27 = vpop.f32.mrb[63].mxu0  ;;  %v7117_v43 = vld [vmem:[#allocation46_spill] sm:$0xff]  ;;  %v7118_v25 = vld [vmem:[#allocation48_spill] sm:$0xff] }
 0x86c   :  { %v3503_v55 = vadd.f32 %v3251_v8, %v6498_v14  ;;  %v3255_v4 = vpop.f32.mrb[71].mxu1  ;;  %v7114_v14 = vld [vmem:[#allocation42_spill] sm:$0xff]  ;;  %v3540_v0 = vrot.slane %v6537_v29, %v7117_v43 }
 0x86d   :  { %v3504_v36 = vadd.f32 %v3253_v54, %v6501_v21  ;;  %v3528_v9 = vrot.slane %v6537_v29, %v7114_v14 }
 0x86e   :  { %v6545_v3 = vadd.f32 %v3516_v6, %v3503_v55 }
 0x86f   :  { %v3554_v15 = vadd.f32 %v3520_v18, %v3504_v36 }
 0x870   :  { %v3561_v19 = vmax.f32 %v6545_v3, 0.0 }
 0x871   :  { %v3562_v52 = vmax.f32 %v3554_v15, 0.0 }
 0x8a8   :  { %v3291_v28 = vpop.f32.mrb[64].mxu0 }
 0x8a9   :  { %v3332_v63 = vpop.f32.mrb[72].mxu1  ;;  %v3293_v40 = vpop.f32.mrb[65].mxu0 }
 0x8aa   :  { %v3333_v48 = vadd.f32 %v3332_v63, %v3291_v28  ;;  %v3334_v61 = vpop.f32.mrb[73].mxu1  ;;  %v3295_v34 = vpop.f32.mrb[66].mxu0 }
 0x8ab   :  { %v3335_v60 = vadd.f32 %v3334_v61, %v3293_v40  ;;  %v3336_v21 = vpop.f32.mrb[74].mxu1  ;;  %v3296_v2 = vpop.f32.mrb[67].mxu0 }
 0x8ac   :  { %v3505_v23 = vadd.f32 %v3333_v48, %v6504_v11  ;;  %v3337_v58 = vpop.f32.mrb[75].mxu1 }
 0x8ad   :  { %v3506_v22 = vadd.f32 %v3335_v60, %v6507_v7  ;;  %v3536_v7 = vrot.slane %v6537_v29, %v7116_v62 }
 0x8ae   :  { %v6554_v44 = vadd.f32 %v3524_v26, %v3505_v23 }
 0x8af   :  { %v6556_v50 = vadd.f32 %v3528_v9, %v3506_v22 }
 0x8b0   :  { %v3563_v13 = vmax.f32 %v6554_v44, 0.0 }
 0x8b1   :  { %v3564_v39 = vmax.f32 %v6556_v50, 0.0 }
 0x8e8   :  { %v3373_v57 = vpop.f32.mrb[68].mxu0 }
 0x8e9   :  { %v3414_v59 = vpop.f32.mrb[76].mxu1  ;;  %v3375_v56 = vpop.f32.mrb[69].mxu0 }
 0x8ea   :  { %v3415_v31 = vadd.f32 %v3414_v59, %v3373_v57  ;;  %v3416_v11 = vpop.f32.mrb[77].mxu1  ;;  %v3377_v37 = vpop.f32.mrb[70].mxu0 }
 0x8eb   :  { %v3417_v51 = vadd.f32 %v3416_v11, %v3375_v56  ;;  %v3418_v32 = vpop.f32.mrb[78].mxu1  ;;  %v3378_v10 = vpop.f32.mrb[71].mxu0 }
 0x8ec   :  { %v3507_v45 = vadd.f32 %v3415_v31, %v6510_v46  ;;  %v3419_v12 = vpop.f32.mrb[79].mxu1 }
 0x8ed   :  { %v3508_v20 = vadd.f32 %v3417_v51, %v6513_v53  ;;  %v3544_v53 = vrot.slane %v6537_v29, %v7118_v25 }
 0x8ee   :  { %v6566_v47 = vadd.f32 %v3532_v42, %v3507_v45 }
 0x8ef   :  { %v6568_v1 = vadd.f32 %v3536_v7, %v3508_v20 }
 0x8f0   :  { %v3565_v35 = vmax.f32 %v6566_v47, 0.0 }
 0x8f1   :  { %v3566_v17 = vmax.f32 %v6568_v1, 0.0 }
 0x928   :  { %v3455_v38 = vpop.f32.mrb[72].mxu0 }
 0x929   :  { %v3496_v8 = vpop.f32.mrb[80].mxu1  ;;  %v3457_v54 = vpop.f32.mrb[73].mxu0 }
 0x92a   :  { %v3497_v6 = vadd.f32 %v3496_v8, %v3455_v38  ;;  %v3498_v46 = vpop.f32.mrb[81].mxu1  ;;  %v3459_v30 = vpop.f32.mrb[74].mxu0 }
 0x92b   :  { %v3499_v18 = vadd.f32 %v3498_v46, %v3457_v54  ;;  %v3500_v55 = vpop.f32.mrb[82].mxu1  ;;  %v3460_v4 = vpop.f32.mrb[75].mxu0 }
 0x92c   :  { %v3509_v27 = vadd.f32 %v3497_v6, %v6516_v5  ;;  %v3501_v36 = vpop.f32.mrb[83].mxu1 }
 0x92d   :  { %v3510_v15 = vadd.f32 %v3499_v18, %v6519_v49 }
 0x92e   :  { %v6578_v28 = vadd.f32 %v3540_v0, %v3509_v27 }
 0x92f   :  { %v6580_v63 = vadd.f32 %v3544_v53, %v3510_v15 }
 0x930   :  { %v3567_v48 = vmax.f32 %v6578_v28, 0.0 }
 0x931   :  { %v3568_v26 = vmax.f32 %v6580_v63, 0.0 }
 0x932   :  { %5262 = dma.done.wait [#allocation4 + $0x4], 32768 }
 0x933   :  { %5263 = vsyncadd [#allocation4 + $0x4], 4294934528  ;;  %v3574_v40 = vpack.c.bf16 %v3562_v52, %v3562_v52  ;;  %v3582_v29 = vld [vmem:[#allocation3 + $0x8] sm:$0xff]  ;;  %v3584_v61 = vld [vmem:[#allocation3 + $0x18] sm:$0xff]  ;;  %vm4709_vm1 = vcmask 7168  }
 0x934   :  { %v3581_v5 = vld [vmem:[#allocation3] sm:$0xff]  ;;  %3859 = vmatprep.subr.bf16.mxu0 %v3582_v29  ;;  %4023 = vmatprep.subr.bf16.mxu1 %v3584_v61  ;;  %v3583_v60 = vld [vmem:[#allocation3 + $0x10] sm:$0xff]  ;;  %v3586_v49 = vld [vmem:[#allocation3 + $0x28] sm:$0xff] }
 0x935   :  { %3891 = vmatprep.mubr.bf16.mxu0 %v3574_v40  ;;  %4055 = vmatprep.mubr.bf16.mxu1 %v3574_v40  ;;  %v3588_v9 = vld [vmem:[#allocation3 + $0x38] sm:$0xff]  ;;  %v3585_v34 = vld [vmem:[#allocation3 + $0x20] sm:$0xff]  ;;  %v3587_v21 = vld [vmem:[#allocation3 + $0x30] sm:$0xff] }
 0x936   :  { %3860 = vmatpush1.bf16.msra.mxu0 %v3581_v5  ;;  %4024 = vmatpush1.bf16.msra.mxu1 %v3583_v60  ;;  %v3590_v23 = vld [vmem:[#allocation3 + $0x48] sm:$0xff]  ;;  %v3592_v2 = vld [vmem:[#allocation3 + $0x58] sm:$0xff]  ;;  %v3589_v52 = vld [vmem:[#allocation3 + $0x40] sm:$0xff] }
 0x937   :  { %3861 = vmatprep.subr.bf16.mxu0 %v3586_v49  ;;  %4025 = vmatprep.subr.bf16.mxu1 %v3588_v9  ;;  %v3591_v58 = vld [vmem:[#allocation3 + $0x50] sm:$0xff]  ;;  %v3594_v22 = vld [vmem:[#allocation3 + $0x68] sm:$0xff]  ;;  %v3596_v57 = vld [vmem:[#allocation3 + $0x78] sm:$0xff] }
 0x938   :  { %v3593_v59 = vld [vmem:[#allocation3 + $0x60] sm:$0xff]  ;;  %v3595_v31 = vld [vmem:[#allocation3 + $0x70] sm:$0xff]  ;;  %v3598_v41 = vld [vmem:[#allocation3 + $0x88] sm:$0xff] }
 0x939   :  { %v3600_v42 = vld [vmem:[#allocation3 + $0x98] sm:$0xff]  ;;  %v3597_v56 = vld [vmem:[#allocation3 + $0x80] sm:$0xff]  ;;  %v3599_v11 = vld [vmem:[#allocation3 + $0x90] sm:$0xff] }
 0x93a   :  { %3862 = vmatpush1.bf16.msra.mxu0 %v3585_v34  ;;  %4026 = vmatpush1.bf16.msra.mxu1 %v3587_v21  ;;  %v3602_v51 = vld [vmem:[#allocation3 + $0xa8] sm:$0xff]  ;;  %v3604_v62 = vld [vmem:[#allocation3 + $0xb8] sm:$0xff]  ;;  %v3601_v7 = vld [vmem:[#allocation3 + $0xa0] sm:$0xff] }
 0x93b   :  { %3863 = vmatprep.subr.bf16.mxu0 %v3590_v23  ;;  %4027 = vmatprep.subr.bf16.mxu1 %v3592_v2  ;;  %v3603_v37 = vld [vmem:[#allocation3 + $0xb0] sm:$0xff]  ;;  %v3606_v32 = vld [vmem:[#allocation3 + $0xc8] sm:$0xff]  ;;  %v3608_v45 = vld [vmem:[#allocation3 + $0xd8] sm:$0xff] }
 0x93c   :  { %v3605_v10 = vld [vmem:[#allocation3 + $0xc0] sm:$0xff]  ;;  %v3607_v12 = vld [vmem:[#allocation3 + $0xd0] sm:$0xff]  ;;  %v3610_v20 = vld [vmem:[#allocation3 + $0xe8] sm:$0xff] }
 0x93d   :  { %v3612_v38 = vld [vmem:[#allocation3 + $0xf8] sm:$0xff]  ;;  %v3609_v8 = vld [vmem:[#allocation3 + $0xe0] sm:$0xff]  ;;  %v3611_v6 = vld [vmem:[#allocation3 + $0xf0] sm:$0xff] }
 0x93e   :  { %3864 = vmatpush1.bf16.msra.mxu0 %v3589_v52  ;;  %4028 = vmatpush1.bf16.msra.mxu1 %v3591_v58  ;;  %v3614_v43 = vld [vmem:[#allocation3 + $0x108] sm:$0xff]  ;;  %v3616_v0 = vld [vmem:[#allocation3 + $0x118] sm:$0xff]  ;;  %v3613_v54 = vld [vmem:[#allocation3 + $0x100] sm:$0xff] }
 0x93f   :  { %3865 = vmatprep.subr.bf16.mxu0 %v3594_v22  ;;  %4029 = vmatprep.subr.bf16.mxu1 %v3596_v57  ;;  %v3615_v46 = vld [vmem:[#allocation3 + $0x110] sm:$0xff]  ;;  %v3618_v18 = vld [vmem:[#allocation3 + $0x128] sm:$0xff]  ;;  %v3620_v25 = vld [vmem:[#allocation3 + $0x138] sm:$0xff] }
 0x940   :  { %v3617_v53 = vld [vmem:[#allocation3 + $0x120] sm:$0xff]  ;;  %v3619_v30 = vld [vmem:[#allocation3 + $0x130] sm:$0xff]  ;;  %v3622_v55 = vld [vmem:[#allocation3 + $0x148] sm:$0xff] }
 0x941   :  { %v3624_v27 = vld [vmem:[#allocation3 + $0x158] sm:$0xff]  ;;  %v3621_v4 = vld [vmem:[#allocation3 + $0x140] sm:$0xff]  ;;  %v3623_v36 = vld [vmem:[#allocation3 + $0x150] sm:$0xff] }
 0x942   :  { %3866 = vmatpush1.bf16.msra.mxu0 %v3593_v59  ;;  %4030 = vmatpush1.bf16.msra.mxu1 %v3595_v31  ;;  %v3626_v15 = vld [vmem:[#allocation3 + $0x168] sm:$0xff]  ;;  %v3628_v40 = vld [vmem:[#allocation3 + $0x178] sm:$0xff]  ;;  %v3625_v29 = vld [vmem:[#allocation3 + $0x160] sm:$0xff] }
 0x943   :  { %3867 = vmatprep.subr.bf16.mxu0 %v3598_v41  ;;  %4031 = vmatprep.subr.bf16.mxu1 %v3600_v42  ;;  %v3627_v61 = vld [vmem:[#allocation3 + $0x170] sm:$0xff]  ;;  %v3630_v5 = vld [vmem:[#allocation3 + $0x188] sm:$0xff]  ;;  %v3632_v60 = vld [vmem:[#allocation3 + $0x198] sm:$0xff] }
 0x944   :  { %v3629_v49 = vld [vmem:[#allocation3 + $0x180] sm:$0xff]  ;;  %v3631_v9 = vld [vmem:[#allocation3 + $0x190] sm:$0xff]  ;;  %v3634_v34 = vld [vmem:[#allocation3 + $0x1a8] sm:$0xff] }
 0x945   :  { %v3636_v21 = vld [vmem:[#allocation3 + $0x1b8] sm:$0xff]  ;;  %v3633_v23 = vld [vmem:[#allocation3 + $0x1a0] sm:$0xff]  ;;  %v3635_v2 = vld [vmem:[#allocation3 + $0x1b0] sm:$0xff] }
 0x946   :  { %3868 = vmatpush1.bf16.msra.mxu0 %v3597_v56  ;;  %4032 = vmatpush1.bf16.msra.mxu1 %v3599_v11  ;;  %v3638_v52 = vld [vmem:[#allocation3 + $0x1c8] sm:$0xff]  ;;  %v3640_v58 = vld [vmem:[#allocation3 + $0x1d8] sm:$0xff]  ;;  %v3637_v22 = vld [vmem:[#allocation3 + $0x1c0] sm:$0xff] }
 0x947   :  { %3869 = vmatprep.subr.bf16.mxu0 %v3602_v51  ;;  %4033 = vmatprep.subr.bf16.mxu1 %v3604_v62  ;;  %v3639_v57 = vld [vmem:[#allocation3 + $0x1d0] sm:$0xff]  ;;  %v3642_v59 = vld [vmem:[#allocation3 + $0x1e8] sm:$0xff]  ;;  %v3644_v31 = vld [vmem:[#allocation3 + $0x1f8] sm:$0xff]  ;;  %v3573_v51 = vpack.c.bf16 %v3561_v19, %v3561_v19 }
 0x948   :  { %v3641_v41 = vld [vmem:[#allocation3 + $0x1e0] sm:$0xff]  ;;  %v3643_v42 = vld [vmem:[#allocation3 + $0x1f0] sm:$0xff]  ;;  %v3646_v56 = vld [vmem:[#allocation3 + $0x208] sm:$0xff] }
 0x949   :  { %v3648_v11 = vld [vmem:[#allocation3 + $0x218] sm:$0xff]  ;;  %v3645_v62 = vld [vmem:[#allocation3 + $0x200] sm:$0xff]  ;;  %v3651_v3 = vld [vmem:[#allocation3 + $0x230] sm:$0xff] }
 0x94a   :  { %3870 = vmatpush1.bf16.msra.mxu0 %v3601_v7  ;;  %4034 = vmatpush1.bf16.msra.mxu1 %v3603_v37  ;;  %v3647_v7 = vld [vmem:[#allocation3 + $0x210] sm:$0xff]  ;;  %v3650_v37 = vld [vmem:[#allocation3 + $0x228] sm:$0xff]  ;;  %v3713_v44 = vld [vmem:[#allocation3 + $0x420] sm:$0xff] }
 0x94b   :  { %3871 = vmatprep.subr.bf16.mxu0 %v3606_v32  ;;  %4035 = vmatprep.subr.bf16.mxu1 %v3608_v45  ;;  %v3652_v32 = vld [vmem:[#allocation3 + $0x238] sm:$0xff]  ;;  %v3576_v45 = vpack.c.bf16 %v3564_v39, %v3564_v39  ;;  %v3654_v19 = vld [vmem:[#allocation3 + $0x248] sm:$0xff]  ;;  %v3719_v1 = vld [vmem:[#allocation3 + $0x450] sm:$0xff] }
 0x94c   :  { %v3658_v50 = vld [vmem:[#allocation3 + $0x268] sm:$0xff]  ;;  %v3660_v39 = vld [vmem:[#allocation3 + $0x278] sm:$0xff]  ;;  %v3777_v47 = vld [vmem:[#allocation3 + $0x620] sm:$0xff] }
 0x94d   :  { %v3783_v63 = vld [vmem:[#allocation3 + $0x650] sm:$0xff] }
 0x94e   :  { %3872 = vmatpush1.bf16.msra.mxu0 %v3605_v10  ;;  %4036 = vmatpush1.bf16.msra.mxu1 %v3607_v12  ;;  %v3649_v10 = vld [vmem:[#allocation3 + $0x220] sm:$0xff]  ;;  %v3656_v12 = vld [vmem:[#allocation3 + $0x258] sm:$0xff]  ;;  %v4986_v28 = vld [vmem:[#allocation14 + $0x44] ss:$8 sps:$4 sm:$0xff]  }
 0x94f   :  { %3873 = vmatprep.subr.bf16.mxu0 %v3610_v20  ;;  %4037 = vmatprep.subr.bf16.mxu1 %v3612_v38  ;;  %v3653_v20 = vld [vmem:[#allocation3 + $0x240] sm:$0xff]  ;;  %v3655_v38 = vld [vmem:[#allocation3 + $0x250] sm:$0xff] }
 0x952   :  { %3874 = vmatpush1.bf16.msra.mxu0 %v3609_v8  ;;  %4038 = vmatpush1.bf16.msra.mxu1 %v3611_v6  ;;  %v3657_v8 = vld [vmem:[#allocation3 + $0x260] sm:$0xff]  ;;  %v3659_v6 = vld [vmem:[#allocation3 + $0x270] sm:$0xff] }
 0x953   :  { %3875 = vmatprep.subr.bf16.mxu0 %v3614_v43  ;;  %4039 = vmatprep.subr.bf16.mxu1 %v3616_v0  ;;  %v3662_v43 = vld [vmem:[#allocation3 + $0x288] sm:$0xff]  ;;  %v3664_v0 = vld [vmem:[#allocation3 + $0x298] sm:$0xff] }
 0x956   :  { %3876 = vmatpush1.bf16.msra.mxu0 %v3613_v54  ;;  %4040 = vmatpush1.bf16.msra.mxu1 %v3615_v46  ;;  %v3661_v54 = vld [vmem:[#allocation3 + $0x280] sm:$0xff]  ;;  %v3663_v46 = vld [vmem:[#allocation3 + $0x290] sm:$0xff] }
 0x957   :  { %3877 = vmatprep.subr.bf16.mxu0 %v3618_v18  ;;  %4041 = vmatprep.subr.bf16.mxu1 %v3620_v25  ;;  %v3666_v18 = vld [vmem:[#allocation3 + $0x2a8] sm:$0xff]  ;;  %v3668_v25 = vld [vmem:[#allocation3 + $0x2b8] sm:$0xff] }
 0x95a   :  { %3878 = vmatpush1.bf16.msra.mxu0 %v3617_v53  ;;  %4042 = vmatpush1.bf16.msra.mxu1 %v3619_v30  ;;  %v3665_v53 = vld [vmem:[#allocation3 + $0x2a0] sm:$0xff]  ;;  %v3667_v30 = vld [vmem:[#allocation3 + $0x2b0] sm:$0xff] }
 0x95b   :  { %3879 = vmatprep.subr.bf16.mxu0 %v3622_v55  ;;  %4043 = vmatprep.subr.bf16.mxu1 %v3624_v27  ;;  %v3670_v55 = vld [vmem:[#allocation3 + $0x2c8] sm:$0xff]  ;;  %v3672_v27 = vld [vmem:[#allocation3 + $0x2d8] sm:$0xff] }
 0x95e   :  { %3880 = vmatpush1.bf16.msra.mxu0 %v3621_v4  ;;  %4044 = vmatpush1.bf16.msra.mxu1 %v3623_v36  ;;  %v3669_v4 = vld [vmem:[#allocation3 + $0x2c0] sm:$0xff]  ;;  %v3671_v36 = vld [vmem:[#allocation3 + $0x2d0] sm:$0xff] }
 0x95f   :  { %3881 = vmatprep.subr.bf16.mxu0 %v3626_v15  ;;  %4045 = vmatprep.subr.bf16.mxu1 %v3628_v40  ;;  %v3674_v15 = vld [vmem:[#allocation3 + $0x2e8] sm:$0xff]  ;;  %v3676_v40 = vld [vmem:[#allocation3 + $0x2f8] sm:$0xff] }
 0x962   :  { %3882 = vmatpush1.bf16.msra.mxu0 %v3625_v29  ;;  %4046 = vmatpush1.bf16.msra.mxu1 %v3627_v61  ;;  %v3673_v29 = vld [vmem:[#allocation3 + $0x2e0] sm:$0xff]  ;;  %v3675_v61 = vld [vmem:[#allocation3 + $0x2f0] sm:$0xff] }
 0x963   :  { %3883 = vmatprep.subr.bf16.mxu0 %v3630_v5  ;;  %4047 = vmatprep.subr.bf16.mxu1 %v3632_v60  ;;  %v3678_v5 = vld [vmem:[#allocation3 + $0x308] sm:$0xff]  ;;  %v3680_v60 = vld [vmem:[#allocation3 + $0x318] sm:$0xff] }
 0x966   :  { %3884 = vmatpush1.bf16.msra.mxu0 %v3629_v49  ;;  %4048 = vmatpush1.bf16.msra.mxu1 %v3631_v9  ;;  %v3677_v49 = vld [vmem:[#allocation3 + $0x300] sm:$0xff]  ;;  %v3679_v9 = vld [vmem:[#allocation3 + $0x310] sm:$0xff] }
 0x967   :  { %3885 = vmatprep.subr.bf16.mxu0 %v3634_v34  ;;  %4049 = vmatprep.subr.bf16.mxu1 %v3636_v21  ;;  %v3682_v34 = vld [vmem:[#allocation3 + $0x328] sm:$0xff]  ;;  %v3684_v21 = vld [vmem:[#allocation3 + $0x338] sm:$0xff] }
 0x96a   :  { %3886 = vmatpush1.bf16.msra.mxu0 %v3633_v23  ;;  %4050 = vmatpush1.bf16.msra.mxu1 %v3635_v2  ;;  %v3681_v23 = vld [vmem:[#allocation3 + $0x320] sm:$0xff]  ;;  %v3683_v2 = vld [vmem:[#allocation3 + $0x330] sm:$0xff] }
 0x96b   :  { %3887 = vmatprep.subr.bf16.mxu0 %v3638_v52  ;;  %4051 = vmatprep.subr.bf16.mxu1 %v3640_v58  ;;  %v3686_v52 = vld [vmem:[#allocation3 + $0x348] sm:$0xff]  ;;  %v3688_v58 = vld [vmem:[#allocation3 + $0x358] sm:$0xff] }
 0x96e   :  { %3888 = vmatpush1.bf16.msra.mxu0 %v3637_v22  ;;  %4052 = vmatpush1.bf16.msra.mxu1 %v3639_v57  ;;  %v3685_v22 = vld [vmem:[#allocation3 + $0x340] sm:$0xff]  ;;  %v3687_v57 = vld [vmem:[#allocation3 + $0x350] sm:$0xff] }
 0x96f   :  { %3889 = vmatprep.subr.bf16.mxu0 %v3642_v59  ;;  %4053 = vmatprep.subr.bf16.mxu1 %v3644_v31  ;;  %v3690_v59 = vld [vmem:[#allocation3 + $0x368] sm:$0xff]  ;;  %v3692_v31 = vld [vmem:[#allocation3 + $0x378] sm:$0xff] }
 0x972   :  { %3890 = vmatpush1.bf16.msra.mxu0 %v3641_v41  ;;  %4054 = vmatpush1.bf16.msra.mxu1 %v3643_v42  ;;  %v3689_v41 = vld [vmem:[#allocation3 + $0x360] sm:$0xff]  ;;  %v3691_v42 = vld [vmem:[#allocation3 + $0x370] sm:$0xff] }
 0x973   :  { %3900 = vmatprep.subr.bf16.mxu0 %v3646_v56  ;;  %4064 = vmatprep.subr.bf16.mxu1 %v3648_v11  ;;  %v3694_v56 = vld [vmem:[#allocation3 + $0x388] sm:$0xff]  ;;  %v3696_v11 = vld [vmem:[#allocation3 + $0x398] sm:$0xff] }
 0x975   :  { %3892 = vmatmul.mubr.bf16.vlgmr.msra.gmra.mrb[76].mxu0 %v3573_v51  ;;  %4056 = vmatmul.mubr.bf16.vlgmr.msra.gmra.mrb[84].mxu1 %v3573_v51  ;;  %v3693_v51 = vld [vmem:[#allocation3 + $0x380] sm:$0xff] }
 0x976   :  { %3901 = vmatpush1.bf16.msra.mxu0 %v3645_v62  ;;  %4065 = vmatpush1.bf16.msra.mxu1 %v3647_v7  ;;  %v3695_v62 = vld [vmem:[#allocation3 + $0x390] sm:$0xff]  ;;  %v3698_v7 = vld [vmem:[#allocation3 + $0x3a8] sm:$0xff] }
 0x977   :  { %3902 = vmatprep.subr.bf16.mxu0 %v3650_v37  ;;  %4066 = vmatprep.subr.bf16.mxu1 %v3652_v32  ;;  %v3700_v37 = vld [vmem:[#allocation3 + $0x3b8] sm:$0xff]  ;;  %v3697_v32 = vld [vmem:[#allocation3 + $0x3a0] sm:$0xff] }
 0x978   :  { %3932 = vmatprep.mubr.bf16.mxu0 %v3576_v45  ;;  %4096 = vmatprep.mubr.bf16.mxu1 %v3576_v45  ;;  %v3699_v45 = vld [vmem:[#allocation3 + $0x3b0] sm:$0xff] }
 0x97a   :  { %3903 = vmatpush1.bf16.msra.mxu0 %v3649_v10  ;;  %4067 = vmatpush1.bf16.msra.mxu1 %v3651_v3  ;;  %v3702_v10 = vld [vmem:[#allocation3 + $0x3c8] sm:$0xff]  ;;  %v3704_v3 = vld [vmem:[#allocation3 + $0x3d8] sm:$0xff] }
 0x97b   :  { %3904 = vmatprep.subr.bf16.mxu0 %v3654_v19  ;;  %4068 = vmatprep.subr.bf16.mxu1 %v3656_v12  ;;  %v3701_v19 = vld [vmem:[#allocation3 + $0x3c0] sm:$0xff]  ;;  %v3703_v12 = vld [vmem:[#allocation3 + $0x3d0] sm:$0xff] }
 0x97e   :  { %3905 = vmatpush1.bf16.msra.mxu0 %v3653_v20  ;;  %4069 = vmatpush1.bf16.msra.mxu1 %v3655_v38  ;;  %v3706_v20 = vld [vmem:[#allocation3 + $0x3e8] sm:$0xff]  ;;  %v3708_v38 = vld [vmem:[#allocation3 + $0x3f8] sm:$0xff] }
 0x97f   :  { %3906 = vmatprep.subr.bf16.mxu0 %v3658_v50  ;;  %4070 = vmatprep.subr.bf16.mxu1 %v3660_v39  ;;  %v3705_v50 = vld [vmem:[#allocation3 + $0x3e0] sm:$0xff]  ;;  %v3707_v39 = vld [vmem:[#allocation3 + $0x3f0] sm:$0xff] }
 0x982   :  { %3907 = vmatpush1.bf16.msra.mxu0 %v3657_v8  ;;  %4071 = vmatpush1.bf16.msra.mxu1 %v3659_v6  ;;  %v3710_v8 = vld [vmem:[#allocation3 + $0x408] sm:$0xff]  ;;  %v3712_v6 = vld [vmem:[#allocation3 + $0x418] sm:$0xff] }
 0x983   :  { %3908 = vmatprep.subr.bf16.mxu0 %v3662_v43  ;;  %4072 = vmatprep.subr.bf16.mxu1 %v3664_v0  ;;  %v3575_v43 = vpack.c.bf16 %v3563_v13, %v3563_v13  ;;  %v3709_v0 = vld [vmem:[#allocation3 + $0x400] sm:$0xff]  ;;  %v3715_v13 = vld [vmem:[#allocation3 + $0x430] sm:$0xff] }
 0x986   :  { %3909 = vmatpush1.bf16.msra.mxu0 %v3661_v54  ;;  %4073 = vmatpush1.bf16.msra.mxu1 %v3663_v46  ;;  %v3711_v54 = vld [vmem:[#allocation3 + $0x410] sm:$0xff]  ;;  %v3714_v46 = vld [vmem:[#allocation3 + $0x428] sm:$0xff] }
 0x987   :  { %3910 = vmatprep.subr.bf16.mxu0 %v3666_v18  ;;  %4074 = vmatprep.subr.bf16.mxu1 %v3668_v25  ;;  %v3716_v18 = vld [vmem:[#allocation3 + $0x438] sm:$0xff]  ;;  %v3578_v25 = vpack.c.bf16 %v3566_v17, %v3566_v17 }
 0x988   :  { %v3724_v17 = vld [vmem:[#allocation3 + $0x478] sm:$0xff] }
 0x98a   :  { %3911 = vmatpush1.bf16.msra.mxu0 %v3665_v53  ;;  %4075 = vmatpush1.bf16.msra.mxu1 %v3667_v30  ;;  %v3718_v53 = vld [vmem:[#allocation3 + $0x448] sm:$0xff]  ;;  %v3720_v30 = vld [vmem:[#allocation3 + $0x458] sm:$0xff] }
 0x98b   :  { %3912 = vmatprep.subr.bf16.mxu0 %v3670_v55  ;;  %4076 = vmatprep.subr.bf16.mxu1 %v3672_v27  ;;  %v3717_v55 = vld [vmem:[#allocation3 + $0x440] sm:$0xff]  ;;  %v3722_v27 = vld [vmem:[#allocation3 + $0x468] sm:$0xff] }
 0x98e   :  { %3913 = vmatpush1.bf16.msra.mxu0 %v3669_v4  ;;  %4077 = vmatpush1.bf16.msra.mxu1 %v3671_v36  ;;  %v3721_v4 = vld [vmem:[#allocation3 + $0x460] sm:$0xff]  ;;  %v3723_v36 = vld [vmem:[#allocation3 + $0x470] sm:$0xff] }
 0x98f   :  { %3914 = vmatprep.subr.bf16.mxu0 %v3674_v15  ;;  %4078 = vmatprep.subr.bf16.mxu1 %v3676_v40  ;;  %v3726_v15 = vld [vmem:[#allocation3 + $0x488] sm:$0xff]  ;;  %v3728_v40 = vld [vmem:[#allocation3 + $0x498] sm:$0xff] }
 0x992   :  { %3915 = vmatpush1.bf16.msra.mxu0 %v3673_v29  ;;  %4079 = vmatpush1.bf16.msra.mxu1 %v3675_v61  ;;  %v3725_v29 = vld [vmem:[#allocation3 + $0x480] sm:$0xff]  ;;  %v3727_v61 = vld [vmem:[#allocation3 + $0x490] sm:$0xff] }
 0x993   :  { %3916 = vmatprep.subr.bf16.mxu0 %v3678_v5  ;;  %4080 = vmatprep.subr.bf16.mxu1 %v3680_v60  ;;  %v3730_v5 = vld [vmem:[#allocation3 + $0x4a8] sm:$0xff]  ;;  %v3732_v60 = vld [vmem:[#allocation3 + $0x4b8] sm:$0xff] }
 0x996   :  { %3917 = vmatpush1.bf16.msra.mxu0 %v3677_v49  ;;  %4081 = vmatpush1.bf16.msra.mxu1 %v3679_v9  ;;  %v3729_v49 = vld [vmem:[#allocation3 + $0x4a0] sm:$0xff]  ;;  %v3731_v9 = vld [vmem:[#allocation3 + $0x4b0] sm:$0xff] }
 0x997   :  { %3918 = vmatprep.subr.bf16.mxu0 %v3682_v34  ;;  %4082 = vmatprep.subr.bf16.mxu1 %v3684_v21  ;;  %v3734_v34 = vld [vmem:[#allocation3 + $0x4c8] sm:$0xff]  ;;  %v3736_v21 = vld [vmem:[#allocation3 + $0x4d8] sm:$0xff] }
 0x99a   :  { %3919 = vmatpush1.bf16.msra.mxu0 %v3681_v23  ;;  %4083 = vmatpush1.bf16.msra.mxu1 %v3683_v2  ;;  %v3733_v23 = vld [vmem:[#allocation3 + $0x4c0] sm:$0xff]  ;;  %v3735_v2 = vld [vmem:[#allocation3 + $0x4d0] sm:$0xff] }
 0x99b   :  { %3920 = vmatprep.subr.bf16.mxu0 %v3686_v52  ;;  %4084 = vmatprep.subr.bf16.mxu1 %v3688_v58  ;;  %v3738_v52 = vld [vmem:[#allocation3 + $0x4e8] sm:$0xff]  ;;  %v3740_v58 = vld [vmem:[#allocation3 + $0x4f8] sm:$0xff] }
 0x99e   :  { %3921 = vmatpush1.bf16.msra.mxu0 %v3685_v22  ;;  %4085 = vmatpush1.bf16.msra.mxu1 %v3687_v57  ;;  %v3737_v22 = vld [vmem:[#allocation3 + $0x4e0] sm:$0xff]  ;;  %v3739_v57 = vld [vmem:[#allocation3 + $0x4f0] sm:$0xff] }
 0x99f   :  { %3922 = vmatprep.subr.bf16.mxu0 %v3690_v59  ;;  %4086 = vmatprep.subr.bf16.mxu1 %v3692_v31  ;;  %v3742_v59 = vld [vmem:[#allocation3 + $0x508] sm:$0xff]  ;;  %v3744_v31 = vld [vmem:[#allocation3 + $0x518] sm:$0xff] }
 0x9a2   :  { %3923 = vmatpush1.bf16.msra.mxu0 %v3689_v41  ;;  %4087 = vmatpush1.bf16.msra.mxu1 %v3691_v42  ;;  %v3741_v41 = vld [vmem:[#allocation3 + $0x500] sm:$0xff]  ;;  %v3743_v42 = vld [vmem:[#allocation3 + $0x510] sm:$0xff] }
 0x9a3   :  { %3924 = vmatprep.subr.bf16.mxu0 %v3694_v56  ;;  %4088 = vmatprep.subr.bf16.mxu1 %v3696_v11  ;;  %v3746_v56 = vld [vmem:[#allocation3 + $0x528] sm:$0xff]  ;;  %v3748_v11 = vld [vmem:[#allocation3 + $0x538] sm:$0xff] }
 0x9a6   :  { %3925 = vmatpush1.bf16.msra.mxu0 %v3693_v51  ;;  %4089 = vmatpush1.bf16.msra.mxu1 %v3695_v62  ;;  %v3745_v51 = vld [vmem:[#allocation3 + $0x520] sm:$0xff]  ;;  %v3747_v62 = vld [vmem:[#allocation3 + $0x530] sm:$0xff] }
 0x9a7   :  { %3926 = vmatprep.subr.bf16.mxu0 %v3698_v7  ;;  %4090 = vmatprep.subr.bf16.mxu1 %v3700_v37  ;;  %v3750_v7 = vld [vmem:[#allocation3 + $0x548] sm:$0xff]  ;;  %v3752_v37 = vld [vmem:[#allocation3 + $0x558] sm:$0xff] }
 0x9aa   :  { %3927 = vmatpush1.bf16.msra.mxu0 %v3697_v32  ;;  %4091 = vmatpush1.bf16.msra.mxu1 %v3699_v45  ;;  %v3749_v32 = vld [vmem:[#allocation3 + $0x540] sm:$0xff]  ;;  %v3751_v45 = vld [vmem:[#allocation3 + $0x550] sm:$0xff] }
 0x9ab   :  { %3928 = vmatprep.subr.bf16.mxu0 %v3702_v10  ;;  %4092 = vmatprep.subr.bf16.mxu1 %v3704_v3  ;;  %v3754_v10 = vld [vmem:[#allocation3 + $0x568] sm:$0xff]  ;;  %v3756_v3 = vld [vmem:[#allocation3 + $0x578] sm:$0xff] }
 0x9ae   :  { %3929 = vmatpush1.bf16.msra.mxu0 %v3701_v19  ;;  %4093 = vmatpush1.bf16.msra.mxu1 %v3703_v12  ;;  %v3753_v19 = vld [vmem:[#allocation3 + $0x560] sm:$0xff]  ;;  %v3755_v12 = vld [vmem:[#allocation3 + $0x570] sm:$0xff] }
 0x9af   :  { %3930 = vmatprep.subr.bf16.mxu0 %v3706_v20  ;;  %4094 = vmatprep.subr.bf16.mxu1 %v3708_v38  ;;  %v3758_v20 = vld [vmem:[#allocation3 + $0x588] sm:$0xff]  ;;  %v3760_v38 = vld [vmem:[#allocation3 + $0x598] sm:$0xff] }
 0x9b2   :  { %3931 = vmatpush1.bf16.msra.mxu0 %v3705_v50  ;;  %4095 = vmatpush1.bf16.msra.mxu1 %v3707_v39  ;;  %v3757_v50 = vld [vmem:[#allocation3 + $0x580] sm:$0xff]  ;;  %v3759_v39 = vld [vmem:[#allocation3 + $0x590] sm:$0xff] }
 0x9b3   :  { %3941 = vmatprep.subr.bf16.mxu0 %v3710_v8  ;;  %4105 = vmatprep.subr.bf16.mxu1 %v3712_v6  ;;  %v3762_v8 = vld [vmem:[#allocation3 + $0x5a8] sm:$0xff]  ;;  %v3764_v6 = vld [vmem:[#allocation3 + $0x5b8] sm:$0xff] }
 0x9b5   :  { %3933 = vmatmul.mubr.bf16.vlgmr.msra.gmra.mrb[76].mxu0 %v3575_v43  ;;  %4097 = vmatmul.mubr.bf16.vlgmr.msra.gmra.mrb[84].mxu1 %v3575_v43  ;;  %v3761_v43 = vld [vmem:[#allocation3 + $0x5a0] sm:$0xff] }
 0x9b6   :  { %3942 = vmatpush1.bf16.msra.mxu0 %v3709_v0  ;;  %4106 = vmatpush1.bf16.msra.mxu1 %v3711_v54  ;;  %v3763_v0 = vld [vmem:[#allocation3 + $0x5b0] sm:$0xff]  ;;  %v3766_v54 = vld [vmem:[#allocation3 + $0x5c8] sm:$0xff] }
 0x9b7   :  { %3943 = vmatprep.subr.bf16.mxu0 %v3714_v46  ;;  %4107 = vmatprep.subr.bf16.mxu1 %v3716_v18  ;;  %v3768_v46 = vld [vmem:[#allocation3 + $0x5d8] sm:$0xff]  ;;  %v3765_v18 = vld [vmem:[#allocation3 + $0x5c0] sm:$0xff] }
 0x9b8   :  { %3973 = vmatprep.mubr.bf16.mxu0 %v3578_v25  ;;  %4137 = vmatprep.mubr.bf16.mxu1 %v3578_v25  ;;  %v3767_v25 = vld [vmem:[#allocation3 + $0x5d0] sm:$0xff] }
 0x9ba   :  { %3944 = vmatpush1.bf16.msra.mxu0 %v3713_v44  ;;  %4108 = vmatpush1.bf16.msra.mxu1 %v3715_v13  ;;  %v3770_v44 = vld [vmem:[#allocation3 + $0x5e8] sm:$0xff]  ;;  %v3772_v13 = vld [vmem:[#allocation3 + $0x5f8] sm:$0xff] }
 0x9bb   :  { %3945 = vmatprep.subr.bf16.mxu0 %v3718_v53  ;;  %4109 = vmatprep.subr.bf16.mxu1 %v3720_v30  ;;  %v3769_v53 = vld [vmem:[#allocation3 + $0x5e0] sm:$0xff]  ;;  %v3771_v30 = vld [vmem:[#allocation3 + $0x5f0] sm:$0xff] }
 0x9be   :  { %3946 = vmatpush1.bf16.msra.mxu0 %v3717_v55  ;;  %4110 = vmatpush1.bf16.msra.mxu1 %v3719_v1  ;;  %v3774_v55 = vld [vmem:[#allocation3 + $0x608] sm:$0xff]  ;;  %v3776_v1 = vld [vmem:[#allocation3 + $0x618] sm:$0xff] }
 0x9bf   :  { %3947 = vmatprep.subr.bf16.mxu0 %v3722_v27  ;;  %4111 = vmatprep.subr.bf16.mxu1 %v3724_v17  ;;  %v3577_v27 = vpack.c.bf16 %v3565_v35, %v3565_v35  ;;  %v3773_v17 = vld [vmem:[#allocation3 + $0x600] sm:$0xff]  ;;  %v3779_v35 = vld [vmem:[#allocation3 + $0x630] sm:$0xff] }
 0x9c2   :  { %3948 = vmatpush1.bf16.msra.mxu0 %v3721_v4  ;;  %4112 = vmatpush1.bf16.msra.mxu1 %v3723_v36  ;;  %v3775_v4 = vld [vmem:[#allocation3 + $0x610] sm:$0xff]  ;;  %v3778_v36 = vld [vmem:[#allocation3 + $0x628] sm:$0xff] }
 0x9c3   :  { %3949 = vmatprep.subr.bf16.mxu0 %v3726_v15  ;;  %4113 = vmatprep.subr.bf16.mxu1 %v3728_v40  ;;  %v3780_v15 = vld [vmem:[#allocation3 + $0x638] sm:$0xff]  ;;  %v3580_v40 = vpack.c.bf16 %v3568_v26, %v3568_v26 }
 0x9c4   :  { %v3788_v26 = vld [vmem:[#allocation3 + $0x678] sm:$0xff] }
 0x9c6   :  { %3950 = vmatpush1.bf16.msra.mxu0 %v3725_v29  ;;  %4114 = vmatpush1.bf16.msra.mxu1 %v3727_v61  ;;  %v3782_v29 = vld [vmem:[#allocation3 + $0x648] sm:$0xff]  ;;  %v3784_v61 = vld [vmem:[#allocation3 + $0x658] sm:$0xff] }
 0x9c7   :  { %3951 = vmatprep.subr.bf16.mxu0 %v3730_v5  ;;  %4115 = vmatprep.subr.bf16.mxu1 %v3732_v60  ;;  %v3781_v5 = vld [vmem:[#allocation3 + $0x640] sm:$0xff]  ;;  %v3786_v60 = vld [vmem:[#allocation3 + $0x668] sm:$0xff] }
 0x9ca   :  { %3952 = vmatpush1.bf16.msra.mxu0 %v3729_v49  ;;  %4116 = vmatpush1.bf16.msra.mxu1 %v3731_v9  ;;  %v3785_v49 = vld [vmem:[#allocation3 + $0x660] sm:$0xff]  ;;  %v3787_v9 = vld [vmem:[#allocation3 + $0x670] sm:$0xff] }
 0x9cb   :  { %3953 = vmatprep.subr.bf16.mxu0 %v3734_v34  ;;  %4117 = vmatprep.subr.bf16.mxu1 %v3736_v21  ;;  %v3790_v34 = vld [vmem:[#allocation3 + $0x688] sm:$0xff]  ;;  %v3792_v21 = vld [vmem:[#allocation3 + $0x698] sm:$0xff] }
 0x9ce   :  { %3954 = vmatpush1.bf16.msra.mxu0 %v3733_v23  ;;  %4118 = vmatpush1.bf16.msra.mxu1 %v3735_v2  ;;  %v3789_v23 = vld [vmem:[#allocation3 + $0x680] sm:$0xff]  ;;  %v3791_v2 = vld [vmem:[#allocation3 + $0x690] sm:$0xff] }
 0x9cf   :  { %3955 = vmatprep.subr.bf16.mxu0 %v3738_v52  ;;  %4119 = vmatprep.subr.bf16.mxu1 %v3740_v58  ;;  %v3794_v52 = vld [vmem:[#allocation3 + $0x6a8] sm:$0xff]  ;;  %v3796_v58 = vld [vmem:[#allocation3 + $0x6b8] sm:$0xff] }
 0x9d2   :  { %3956 = vmatpush1.bf16.msra.mxu0 %v3737_v22  ;;  %4120 = vmatpush1.bf16.msra.mxu1 %v3739_v57  ;;  %v3793_v22 = vld [vmem:[#allocation3 + $0x6a0] sm:$0xff]  ;;  %v3795_v57 = vld [vmem:[#allocation3 + $0x6b0] sm:$0xff] }
 0x9d3   :  { %3957 = vmatprep.subr.bf16.mxu0 %v3742_v59  ;;  %4121 = vmatprep.subr.bf16.mxu1 %v3744_v31  ;;  %v3798_v59 = vld [vmem:[#allocation3 + $0x6c8] sm:$0xff]  ;;  %v3800_v31 = vld [vmem:[#allocation3 + $0x6d8] sm:$0xff] }
 0x9d6   :  { %3958 = vmatpush1.bf16.msra.mxu0 %v3741_v41  ;;  %4122 = vmatpush1.bf16.msra.mxu1 %v3743_v42  ;;  %v3797_v41 = vld [vmem:[#allocation3 + $0x6c0] sm:$0xff]  ;;  %v3799_v42 = vld [vmem:[#allocation3 + $0x6d0] sm:$0xff] }
 0x9d7   :  { %3959 = vmatprep.subr.bf16.mxu0 %v3746_v56  ;;  %4123 = vmatprep.subr.bf16.mxu1 %v3748_v11  ;;  %v3802_v56 = vld [vmem:[#allocation3 + $0x6e8] sm:$0xff]  ;;  %v3804_v11 = vld [vmem:[#allocation3 + $0x6f8] sm:$0xff] }
 0x9da   :  { %3960 = vmatpush1.bf16.msra.mxu0 %v3745_v51  ;;  %4124 = vmatpush1.bf16.msra.mxu1 %v3747_v62  ;;  %v3801_v51 = vld [vmem:[#allocation3 + $0x6e0] sm:$0xff]  ;;  %v3803_v62 = vld [vmem:[#allocation3 + $0x6f0] sm:$0xff] }
 0x9db   :  { %3961 = vmatprep.subr.bf16.mxu0 %v3750_v7  ;;  %4125 = vmatprep.subr.bf16.mxu1 %v3752_v37  ;;  %v3806_v7 = vld [vmem:[#allocation3 + $0x708] sm:$0xff]  ;;  %v3808_v37 = vld [vmem:[#allocation3 + $0x718] sm:$0xff] }
 0x9de   :  { %3962 = vmatpush1.bf16.msra.mxu0 %v3749_v32  ;;  %4126 = vmatpush1.bf16.msra.mxu1 %v3751_v45  ;;  %v3805_v32 = vld [vmem:[#allocation3 + $0x700] sm:$0xff]  ;;  %v3807_v45 = vld [vmem:[#allocation3 + $0x710] sm:$0xff] }
 0x9df   :  { %3963 = vmatprep.subr.bf16.mxu0 %v3754_v10  ;;  %4127 = vmatprep.subr.bf16.mxu1 %v3756_v3  ;;  %v3810_v10 = vld [vmem:[#allocation3 + $0x728] sm:$0xff]  ;;  %v3812_v3 = vld [vmem:[#allocation3 + $0x738] sm:$0xff] }
 0x9e2   :  { %3964 = vmatpush1.bf16.msra.mxu0 %v3753_v19  ;;  %4128 = vmatpush1.bf16.msra.mxu1 %v3755_v12  ;;  %v3809_v19 = vld [vmem:[#allocation3 + $0x720] sm:$0xff]  ;;  %v3811_v12 = vld [vmem:[#allocation3 + $0x730] sm:$0xff] }
 0x9e3   :  { %3965 = vmatprep.subr.bf16.mxu0 %v3758_v20  ;;  %4129 = vmatprep.subr.bf16.mxu1 %v3760_v38  ;;  %v3814_v20 = vld [vmem:[#allocation3 + $0x748] sm:$0xff]  ;;  %v3816_v38 = vld [vmem:[#allocation3 + $0x758] sm:$0xff] }
 0x9e6   :  { %3966 = vmatpush1.bf16.msra.mxu0 %v3757_v50  ;;  %4130 = vmatpush1.bf16.msra.mxu1 %v3759_v39  ;;  %v3813_v50 = vld [vmem:[#allocation3 + $0x740] sm:$0xff]  ;;  %v3815_v39 = vld [vmem:[#allocation3 + $0x750] sm:$0xff] }
 0x9e7   :  { %3967 = vmatprep.subr.bf16.mxu0 %v3762_v8  ;;  %4131 = vmatprep.subr.bf16.mxu1 %v3764_v6  ;;  %v3818_v8 = vld [vmem:[#allocation3 + $0x768] sm:$0xff]  ;;  %v3820_v6 = vld [vmem:[#allocation3 + $0x778] sm:$0xff] }
 0x9ea   :  { %3968 = vmatpush1.bf16.msra.mxu0 %v3761_v43  ;;  %4132 = vmatpush1.bf16.msra.mxu1 %v3763_v0  ;;  %v3817_v43 = vld [vmem:[#allocation3 + $0x760] sm:$0xff]  ;;  %v3819_v0 = vld [vmem:[#allocation3 + $0x770] sm:$0xff] }
 0x9eb   :  { %3969 = vmatprep.subr.bf16.mxu0 %v3766_v54  ;;  %4133 = vmatprep.subr.bf16.mxu1 %v3768_v46  ;;  %v3822_v54 = vld [vmem:[#allocation3 + $0x788] sm:$0xff]  ;;  %v3824_v46 = vld [vmem:[#allocation3 + $0x798] sm:$0xff] }
 0x9ee   :  { %3970 = vmatpush1.bf16.msra.mxu0 %v3765_v18  ;;  %4134 = vmatpush1.bf16.msra.mxu1 %v3767_v25  ;;  %v3821_v18 = vld [vmem:[#allocation3 + $0x780] sm:$0xff]  ;;  %v3823_v25 = vld [vmem:[#allocation3 + $0x790] sm:$0xff] }
 0x9ef   :  { %3971 = vmatprep.subr.bf16.mxu0 %v3770_v44  ;;  %4135 = vmatprep.subr.bf16.mxu1 %v3772_v13  ;;  %v3826_v44 = vld [vmem:[#allocation3 + $0x7a8] sm:$0xff]  ;;  %v3828_v13 = vld [vmem:[#allocation3 + $0x7b8] sm:$0xff] }
 0x9f2   :  { %3972 = vmatpush1.bf16.msra.mxu0 %v3769_v53  ;;  %4136 = vmatpush1.bf16.msra.mxu1 %v3771_v30  ;;  %v3825_v53 = vld [vmem:[#allocation3 + $0x7a0] sm:$0xff]  ;;  %v3827_v30 = vld [vmem:[#allocation3 + $0x7b0] sm:$0xff] }
 0x9f3   :  { %3982 = vmatprep.subr.bf16.mxu0 %v3774_v55  ;;  %4146 = vmatprep.subr.bf16.mxu1 %v3776_v1  ;;  %v3830_v55 = vld [vmem:[#allocation3 + $0x7c8] sm:$0xff]  ;;  %v3832_v1 = vld [vmem:[#allocation3 + $0x7d8] sm:$0xff] }
 0x9f5   :  { %3974 = vmatmul.mubr.bf16.vlgmr.msra.gmra.mrb[76].mxu0 %v3577_v27  ;;  %4138 = vmatmul.mubr.bf16.vlgmr.msra.gmra.mrb[84].mxu1 %v3577_v27  ;;  %v3829_v27 = vld [vmem:[#allocation3 + $0x7c0] sm:$0xff] }
 0x9f6   :  { %3983 = vmatpush1.bf16.msra.mxu0 %v3773_v17  ;;  %4147 = vmatpush1.bf16.msra.mxu1 %v3775_v4  ;;  %v3831_v17 = vld [vmem:[#allocation3 + $0x7d0] sm:$0xff]  ;;  %v3834_v4 = vld [vmem:[#allocation3 + $0x7e8] sm:$0xff] }
 0x9f7   :  { %3984 = vmatprep.subr.bf16.mxu0 %v3778_v36  ;;  %4148 = vmatprep.subr.bf16.mxu1 %v3780_v15  ;;  %v3836_v36 = vld [vmem:[#allocation3 + $0x7f8] sm:$0xff]  ;;  %v3833_v15 = vld [vmem:[#allocation3 + $0x7e0] sm:$0xff] }
 0x9f8   :  { %4014 = vmatprep.mubr.bf16.mxu0 %v3580_v40  ;;  %4178 = vmatprep.mubr.bf16.mxu1 %v3580_v40  ;;  %v3835_v40 = vld [vmem:[#allocation3 + $0x7f0] sm:$0xff] }
 0x9fa   :  { %3985 = vmatpush1.bf16.msra.mxu0 %v3777_v47  ;;  %4149 = vmatpush1.bf16.msra.mxu1 %v3779_v35  ;;  %v4974_v47 = vld [vmem:[#allocation14 + $0x4] ss:$8 sps:$4 sm:$0xff]   ;;  %v3579_v35 = vpack.c.bf16 %v3567_v48, %v3567_v48  ;;  %v4984_v48 = vld [vmem:[#allocation14 + $0x40] ss:$8 sps:$4 sm:$0xff]  }
 0x9fb   :  { %3986 = vmatprep.subr.bf16.mxu0 %v3782_v29  ;;  %4150 = vmatprep.subr.bf16.mxu1 %v3784_v61  ;;  %v4972_v29 = vld [vmem:[#allocation14] ss:$8 sps:$4 sm:$0xff]   ;;  %v4977_v61 = vld [vmem:[#allocation14 + $0x14] ss:$8 sps:$4 sm:$0xff]  }
 0x9fe   :  { %3987 = vmatpush1.bf16.msra.mxu0 %v3781_v5  ;;  %4151 = vmatpush1.bf16.msra.mxu1 %v3783_v63  ;;  %v4975_v5 = vld [vmem:[#allocation14 + $0x10] ss:$8 sps:$4 sm:$0xff]   ;;  %v4980_v63 = vld [vmem:[#allocation14 + $0x24] ss:$8 sps:$4 sm:$0xff]  }
 0x9ff   :  { %3988 = vmatprep.subr.bf16.mxu0 %v3786_v60  ;;  %4152 = vmatprep.subr.bf16.mxu1 %v3788_v26  ;;  %v4978_v60 = vld [vmem:[#allocation14 + $0x20] ss:$8 sps:$4 sm:$0xff]   ;;  %v4983_v26 = vld [vmem:[#allocation14 + $0x34] ss:$8 sps:$4 sm:$0xff]  }
 0xa02   :  { %3989 = vmatpush1.bf16.msra.mxu0 %v3785_v49  ;;  %4153 = vmatpush1.bf16.msra.mxu1 %v3787_v9  ;;  %v4981_v49 = vld [vmem:[#allocation14 + $0x30] ss:$8 sps:$4 sm:$0xff]   ;;  %v4989_v9 = vld [vmem:[#allocation14 + $0x54] ss:$8 sps:$4 sm:$0xff]  }
 0xa03   :  { %3990 = vmatprep.subr.bf16.mxu0 %v3790_v34  ;;  %4154 = vmatprep.subr.bf16.mxu1 %v3792_v21  ;;  %v4987_v34 = vld [vmem:[#allocation14 + $0x50] ss:$8 sps:$4 sm:$0xff]   ;;  %v4992_v21 = vld [vmem:[#allocation14 + $0x64] ss:$8 sps:$4 sm:$0xff]  }
 0xa06   :  { %3991 = vmatpush1.bf16.msra.mxu0 %v3789_v23  ;;  %4155 = vmatpush1.bf16.msra.mxu1 %v3791_v2  ;;  %v4990_v23 = vld [vmem:[#allocation14 + $0x60] ss:$8 sps:$4 sm:$0xff]   ;;  %v4995_v2 = vld [vmem:[#allocation14 + $0x74] ss:$8 sps:$4 sm:$0xff]  }
 0xa07   :  { %3992 = vmatprep.subr.bf16.mxu0 %v3794_v52  ;;  %4156 = vmatprep.subr.bf16.mxu1 %v3796_v58  ;;  %v4993_v52 = vld [vmem:[#allocation14 + $0x70] ss:$8 sps:$4 sm:$0xff]   ;;  %v4998_v58 = vld [vmem:[#allocation14 + $0x84] ss:$8 sps:$4 sm:$0xff]  }
 0xa0a   :  { %3993 = vmatpush1.bf16.msra.mxu0 %v3793_v22  ;;  %4157 = vmatpush1.bf16.msra.mxu1 %v3795_v57  ;;  %v4996_v22 = vld [vmem:[#allocation14 + $0x80] ss:$8 sps:$4 sm:$0xff]   ;;  %v5001_v57 = vld [vmem:[#allocation14 + $0x94] ss:$8 sps:$4 sm:$0xff]  }
 0xa0b   :  { %3994 = vmatprep.subr.bf16.mxu0 %v3798_v59  ;;  %4158 = vmatprep.subr.bf16.mxu1 %v3800_v31  ;;  %v4999_v59 = vld [vmem:[#allocation14 + $0x90] ss:$8 sps:$4 sm:$0xff]   ;;  %v5004_v31 = vld [vmem:[#allocation14 + $0xa4] ss:$8 sps:$4 sm:$0xff]  }
 0xa0e   :  { %3995 = vmatpush1.bf16.msra.mxu0 %v3797_v41  ;;  %4159 = vmatpush1.bf16.msra.mxu1 %v3799_v42  ;;  %v5002_v41 = vld [vmem:[#allocation14 + $0xa0] ss:$8 sps:$4 sm:$0xff]   ;;  %v5007_v42 = vld [vmem:[#allocation14 + $0xb4] ss:$8 sps:$4 sm:$0xff]  }
 0xa0f   :  { %3996 = vmatprep.subr.bf16.mxu0 %v3802_v56  ;;  %4160 = vmatprep.subr.bf16.mxu1 %v3804_v11  ;;  %v5005_v56 = vld [vmem:[#allocation14 + $0xb0] ss:$8 sps:$4 sm:$0xff]   ;;  %v5010_v11 = vld [vmem:[#allocation14 + $0xc4] ss:$8 sps:$4 sm:$0xff]  }
 0xa12   :  { %3997 = vmatpush1.bf16.msra.mxu0 %v3801_v51  ;;  %4161 = vmatpush1.bf16.msra.mxu1 %v3803_v62  ;;  %v5008_v51 = vld [vmem:[#allocation14 + $0xc0] ss:$8 sps:$4 sm:$0xff]   ;;  %v5013_v62 = vld [vmem:[#allocation14 + $0xd4] ss:$8 sps:$4 sm:$0xff]  }
 0xa13   :  { %3998 = vmatprep.subr.bf16.mxu0 %v3806_v7  ;;  %4162 = vmatprep.subr.bf16.mxu1 %v3808_v37  ;;  %v5011_v7 = vld [vmem:[#allocation14 + $0xd0] ss:$8 sps:$4 sm:$0xff]   ;;  %v5016_v37 = vld [vmem:[#allocation14 + $0xe4] ss:$8 sps:$4 sm:$0xff]  }
 0xa16   :  { %3999 = vmatpush1.bf16.msra.mxu0 %v3805_v32  ;;  %4163 = vmatpush1.bf16.msra.mxu1 %v3807_v45  ;;  %v5014_v32 = vld [vmem:[#allocation14 + $0xe0] ss:$8 sps:$4 sm:$0xff]   ;;  %v5019_v45 = vld [vmem:[#allocation14 + $0xf4] ss:$8 sps:$4 sm:$0xff]  }
 0xa17   :  { %4000 = vmatprep.subr.bf16.mxu0 %v3810_v10  ;;  %4164 = vmatprep.subr.bf16.mxu1 %v3812_v3  ;;  %v5017_v10 = vld [vmem:[#allocation14 + $0xf0] ss:$8 sps:$4 sm:$0xff]   ;;  %v5022_v3 = vld [vmem:[#allocation14 + $0x104] ss:$8 sps:$4 sm:$0xff]  }
 0xa1a   :  { %4001 = vmatpush1.bf16.msra.mxu0 %v3809_v19  ;;  %4165 = vmatpush1.bf16.msra.mxu1 %v3811_v12  ;;  %v6605_v19 = vld [vmem:[#allocation13] sm:$0xf] }
 0xa1b   :  { %4002 = vmatprep.subr.bf16.mxu0 %v3814_v20  ;;  %4166 = vmatprep.subr.bf16.mxu1 %v3816_v38  ;;  %v3842_v12 = vrot.slane %v6605_v19, %v7111_v24  ;;  %v3846_v20 = vrot.slane %v6605_v19, %v7112_v16  ;;  %v3854_v38 = vrot.slane %v6605_v19, %v7114_v14 }
 0xa1e   :  { %4003 = vmatpush1.bf16.msra.mxu0 %v3813_v50  ;;  %4167 = vmatpush1.bf16.msra.mxu1 %v3815_v39 }
 0xa1f   :  { %4004 = vmatprep.subr.bf16.mxu0 %v3818_v8  ;;  %4168 = vmatprep.subr.bf16.mxu1 %v3820_v6 }
 0xa22   :  { %4005 = vmatpush1.bf16.msra.mxu0 %v3817_v43  ;;  %4169 = vmatpush1.bf16.msra.mxu1 %v3819_v0 }
 0xa23   :  { %4006 = vmatprep.subr.bf16.mxu0 %v3822_v54  ;;  %4170 = vmatprep.subr.bf16.mxu1 %v3824_v46 }
 0xa26   :  { %4007 = vmatpush1.bf16.msra.mxu0 %v3821_v18  ;;  %4171 = vmatpush1.bf16.msra.mxu1 %v3823_v25 }
 0xa27   :  { %4008 = vmatprep.subr.bf16.mxu0 %v3826_v44  ;;  %4172 = vmatprep.subr.bf16.mxu1 %v3828_v13 }
 0xa2a   :  { %4009 = vmatpush1.bf16.msra.mxu0 %v3825_v53  ;;  %4173 = vmatpush1.bf16.msra.mxu1 %v3827_v30 }
 0xa2b   :  { %4010 = vmatprep.subr.bf16.mxu0 %v3830_v55  ;;  %4174 = vmatprep.subr.bf16.mxu1 %v3832_v1  ;;  %v5020_v1 = vld [vmem:[#allocation14 + $0x100] ss:$8 sps:$4 sm:$0xff]  }
 0xa2e   :  { %4011 = vmatpush1.bf16.msra.mxu0 %v3829_v27  ;;  %4175 = vmatpush1.bf16.msra.mxu1 %v3831_v17  ;;  %v5025_v17 = vld [vmem:[#allocation14 + $0x114] ss:$8 sps:$4 sm:$0xff]  }
 0xa2f   :  { %4012 = vmatprep.subr.bf16.mxu0 %v3834_v4  ;;  %4176 = vmatprep.subr.bf16.mxu1 %v3836_v36  ;;  %v5023_v4 = vld [vmem:[#allocation14 + $0x110] ss:$8 sps:$4 sm:$0xff]   ;;  %v5028_v36 = vld [vmem:[#allocation14 + $0x124] ss:$8 sps:$4 sm:$0xff]  }
 0xa32   :  { %4013 = vmatpush1.bf16.msra.mxu0 %v3833_v15  ;;  %4177 = vmatpush1.bf16.msra.mxu1 %v3835_v40  ;;  %v5026_v15 = vld [vmem:[#allocation14 + $0x120] ss:$8 sps:$4 sm:$0xff]   ;;  %v5031_v40 = vld [vmem:[#allocation14 + $0x134] ss:$8 sps:$4 sm:$0xff]  }
 0xa33   :  { %4591 = vmatprep.subr.bf16.mxu0 %v4974_v47  ;;  %v5029_v47 = vld [vmem:[#allocation14 + $0x130] ss:$8 sps:$4 sm:$0xff]  }
 0xa35   :  { %4015 = vmatmul.mubr.bf16.vlgmr.msra.gmra.mrb[76].mxu0 %v3579_v35  ;;  %4179 = vmatmul.mubr.bf16.vlgmr.msra.gmra.mrb[84].mxu1 %v3579_v35  ;;  %v5034_v35 = vld [vmem:[#allocation14 + $0x144] ss:$8 sps:$4 sm:$0xff]  }
 0xa36   :  { %4592 = vmatpush1.bf16.msra.mxu0 %v4972_v29  ;;  %v5032_v29 = vld [vmem:[#allocation14 + $0x140] ss:$8 sps:$4 sm:$0xff]  }
 0xa37   :  { %4593 = vmatprep.subr.bf16.mxu0 %v4977_v61  ;;  %v5037_v61 = vld [vmem:[#allocation14 + $0x154] ss:$8 sps:$4 sm:$0xff]  }
 0xa3a   :  { %4594 = vmatpush1.bf16.msra.mxu0 %v4975_v5  ;;  %v5035_v5 = vld [vmem:[#allocation14 + $0x150] ss:$8 sps:$4 sm:$0xff]  }
 0xa3b   :  { %4595 = vmatprep.subr.bf16.mxu0 %v4980_v63  ;;  %v5040_v63 = vld [vmem:[#allocation14 + $0x164] ss:$8 sps:$4 sm:$0xff]  }
 0xa3e   :  { %4596 = vmatpush1.bf16.msra.mxu0 %v4978_v60  ;;  %v5038_v60 = vld [vmem:[#allocation14 + $0x160] ss:$8 sps:$4 sm:$0xff]  }
 0xa3f   :  { %4597 = vmatprep.subr.bf16.mxu0 %v4983_v26  ;;  %v5043_v26 = vld [vmem:[#allocation14 + $0x174] ss:$8 sps:$4 sm:$0xff]  }
 0xa42   :  { %4598 = vmatpush1.bf16.msra.mxu0 %v4981_v49  ;;  %v5041_v49 = vld [vmem:[#allocation14 + $0x170] ss:$8 sps:$4 sm:$0xff]  }
 0xa43   :  { %4599 = vmatprep.subr.bf16.mxu0 %v4986_v28  ;;  %v5046_v28 = vld [vmem:[#allocation14 + $0x184] ss:$8 sps:$4 sm:$0xff]  }
 0xa46   :  { %4600 = vmatpush1.bf16.msra.mxu0 %v4984_v48  ;;  %v5044_v48 = vld [vmem:[#allocation14 + $0x180] ss:$8 sps:$4 sm:$0xff]  }
 0xa47   :  { %4601 = vmatprep.subr.bf16.mxu0 %v4989_v9  ;;  %v5049_v9 = vld [vmem:[#allocation14 + $0x194] ss:$8 sps:$4 sm:$0xff]  }
 0xa4a   :  { %4602 = vmatpush1.bf16.msra.mxu0 %v4987_v34  ;;  %v5047_v34 = vld [vmem:[#allocation14 + $0x190] ss:$8 sps:$4 sm:$0xff]  }
 0xa4b   :  { %4603 = vmatprep.subr.bf16.mxu0 %v4992_v21  ;;  %v5052_v21 = vld [vmem:[#allocation14 + $0x1a4] ss:$8 sps:$4 sm:$0xff]  }
 0xa4e   :  { %4604 = vmatpush1.bf16.msra.mxu0 %v4990_v23  ;;  %v5050_v23 = vld [vmem:[#allocation14 + $0x1a0] ss:$8 sps:$4 sm:$0xff]  }
 0xa4f   :  { %4605 = vmatprep.subr.bf16.mxu0 %v4995_v2  ;;  %v5055_v2 = vld [vmem:[#allocation14 + $0x1b4] ss:$8 sps:$4 sm:$0xff]  }
 0xa52   :  { %4606 = vmatpush1.bf16.msra.mxu0 %v4993_v52  ;;  %v5053_v52 = vld [vmem:[#allocation14 + $0x1b0] ss:$8 sps:$4 sm:$0xff]  }
 0xa53   :  { %4607 = vmatprep.subr.bf16.mxu0 %v4998_v58  ;;  %v5058_v58 = vld [vmem:[#allocation14 + $0x1c4] ss:$8 sps:$4 sm:$0xff]  }
 0xa56   :  { %4608 = vmatpush1.bf16.msra.mxu0 %v4996_v22  ;;  %v5056_v22 = vld [vmem:[#allocation14 + $0x1c0] ss:$8 sps:$4 sm:$0xff]  }
 0xa57   :  { %4609 = vmatprep.subr.bf16.mxu0 %v5001_v57  ;;  %v5061_v57 = vld [vmem:[#allocation14 + $0x1d4] ss:$8 sps:$4 sm:$0xff]  }
 0xa5a   :  { %4610 = vmatpush1.bf16.msra.mxu0 %v4999_v59  ;;  %v5059_v59 = vld [vmem:[#allocation14 + $0x1d0] ss:$8 sps:$4 sm:$0xff]  }
 0xa5b   :  { %4611 = vmatprep.subr.bf16.mxu0 %v5004_v31  ;;  %v3850_v31 = vrot.slane %v6605_v19, %v7113_v33 }
 0xa5e   :  { %4612 = vmatpush1.bf16.msra.mxu0 %v5002_v41  ;;  %v5064_v41 = vld [vmem:[#allocation14 + $0x1e4] ss:$8 sps:$4 sm:$0xff]  }
 0xa5f   :  { %4613 = vmatprep.subr.bf16.mxu0 %v5007_v42  ;;  %v5062_v42 = vld [vmem:[#allocation14 + $0x1e0] ss:$8 sps:$4 sm:$0xff]  }
 0xa62   :  { %4614 = vmatpush1.bf16.msra.mxu0 %v5005_v56 }
 0xa63   :  { %4615 = vmatprep.subr.bf16.mxu0 %v5010_v11  ;;  %v5067_v11 = vld [vmem:[#allocation14 + $0x1f4] ss:$8 sps:$4 sm:$0xff]  }
 0xa66   :  { %4616 = vmatpush1.bf16.msra.mxu0 %v5008_v51  ;;  %v5065_v51 = vld [vmem:[#allocation14 + $0x1f0] ss:$8 sps:$4 sm:$0xff]  }
 0xa67   :  { %4617 = vmatprep.subr.bf16.mxu0 %v5013_v62 }
 0xa6a   :  { %4618 = vmatpush1.bf16.msra.mxu0 %v5011_v7 }
 0xa6b   :  { %4619 = vmatprep.subr.bf16.mxu0 %v5016_v37  ;;  %v4675_v37 = vld [vmem:[#allocation17] sm:$0x3] }
 0xa6e   :  { %4620 = vmatpush1.bf16.msra.mxu0 %v5014_v32  ;;  %v4676_v32 = vunpack.c.l.bf16 %v4675_v37 }
 0xa6f   :  { %4621 = vmatprep.subr.bf16.mxu0 %v5019_v45  ;;  %v4259_v45 = vld [vmem:[#allocation16] sm:$0x3] }
 0xa70   :  { %v4268_v19 = vrot.slane %v4259_v45, %v7112_v16 }
 0xa72   :  { %4622 = vmatpush1.bf16.msra.mxu0 %v5017_v10  ;;  %v4264_v10 = vrot.slane %v4259_v45, %v7111_v24 }
 0xa73   :  { %4632 = vmatprep.subr.bf16.mxu0 %v5022_v3  ;;  %v4681_v3 = vrot.slane %v4676_v32, %v7111_v24 }
 0xb08   :  { %v4016_v50 = vpop.f32.mrb[76].mxu0  ;;  %v6613_v39 = vpop.f32.mrb[84].mxu1 }
 0xb09   :  { %v4906_v8 = vadd.f32 %v4016_v50, %v3842_v12  ;;  %v4018_v6 = vpop.f32.mrb[77].mxu0  ;;  %v4182_v43 = vpop.f32.mrb[85].mxu1  ;;  %v4908_v56 = vadd.f32 %v6613_v39, %v3850_v31  ;;  %v4685_v12 = vrot.slane %v4676_v32, %v7113_v33  ;;  %v4691_v39 = vrot.slane %v4681_v3, %v7111_v24 }
 0xb0a   :  { %v4907_v0 = vadd.f32 %v4018_v6, %v3846_v20  ;;  %v4909_v54 = vadd.f32 %v4182_v43, %v3854_v38  ;;  %v4020_v46 = vpop.f32.mrb[78].mxu0  ;;  %v4184_v18 = vpop.f32.mrb[86].mxu1 }
 0xb0b   :  { %v4187_v25 = vmax.f32 %v4906_v8, 0.0  ;;  %v4021_v44 = vpop.f32.mrb[79].mxu0  ;;  %v4185_v13 = vpop.f32.mrb[87].mxu1  ;;  %v4189_v62 = vmax.f32 %v4908_v56, 0.0  ;;  %v4695_v43 = vrot.slane %v4685_v12, %v7111_v24 }
 0xb0c   :  { %v4188_v53 = vmax.f32 %v4907_v0, 0.0  ;;  %v4190_v30 = vmax.f32 %v4909_v54, 0.0  ;;  %v4900_v13 = vld [vmem:[#allocation5] ss:$0 sm:$0xff] }
 0xb0d   :  { %v4191_v27 = vpack.c.bf16 %v4187_v25, %v4187_v25  ;;  %v4193_v7 = vpack.c.bf16 %v4189_v62, %v4189_v62 }
 0xb0e   :  { %v4192_v55 = vpack.c.bf16 %v4188_v53, %v4188_v53  ;;  %v4194_v14 = vpack.c.bf16 %v4190_v30, %v4190_v30 }
 0xb10   :  { %4623 = vmatprep.mubr.bf16.mxu0 %v4192_v55 }
 0xb11   :  { %4624 = vmatmul.mubr.bf16.vlgmr.msra.gmra.mrb[80].mxu0 %v4191_v27 }
 0xb12   :  { %4633 = vmatpush1.bf16.msra.mxu0 %v5020_v1  ;;  %4664 = vmatprep.mubr.bf16.mxu0 %v4194_v14 }
 0xb13   :  { %4634 = vmatprep.subr.bf16.mxu0 %v5025_v17 }
 0xb16   :  { %4635 = vmatpush1.bf16.msra.mxu0 %v5023_v4 }
 0xb17   :  { %4636 = vmatprep.subr.bf16.mxu0 %v5028_v36 }
 0xb1a   :  { %4637 = vmatpush1.bf16.msra.mxu0 %v5026_v15 }
 0xb1b   :  { %4638 = vmatprep.subr.bf16.mxu0 %v5031_v40 }
 0xb1e   :  { %4639 = vmatpush1.bf16.msra.mxu0 %v5029_v47 }
 0xb1f   :  { %4640 = vmatprep.subr.bf16.mxu0 %v5034_v35 }
 0xb22   :  { %4641 = vmatpush1.bf16.msra.mxu0 %v5032_v29 }
 0xb23   :  { %4642 = vmatprep.subr.bf16.mxu0 %v5037_v61 }
 0xb26   :  { %4643 = vmatpush1.bf16.msra.mxu0 %v5035_v5 }
 0xb27   :  { %4644 = vmatprep.subr.bf16.mxu0 %v5040_v63 }
 0xb2a   :  { %4645 = vmatpush1.bf16.msra.mxu0 %v5038_v60 }
 0xb2b   :  { %4646 = vmatprep.subr.bf16.mxu0 %v5043_v26 }
 0xb2e   :  { %4647 = vmatpush1.bf16.msra.mxu0 %v5041_v49 }
 0xb2f   :  { %4648 = vmatprep.subr.bf16.mxu0 %v5046_v28 }
 0xb32   :  { %4649 = vmatpush1.bf16.msra.mxu0 %v5044_v48 }
 0xb33   :  { %4650 = vmatprep.subr.bf16.mxu0 %v5049_v9 }
 0xb36   :  { %4651 = vmatpush1.bf16.msra.mxu0 %v5047_v34 }
 0xb37   :  { %4652 = vmatprep.subr.bf16.mxu0 %v5052_v21 }
 0xb3a   :  { %4653 = vmatpush1.bf16.msra.mxu0 %v5050_v23 }
 0xb3b   :  { %4654 = vmatprep.subr.bf16.mxu0 %v5055_v2 }
 0xb3e   :  { %4655 = vmatpush1.bf16.msra.mxu0 %v5053_v52 }
 0xb3f   :  { %4656 = vmatprep.subr.bf16.mxu0 %v5058_v58 }
 0xb42   :  { %4657 = vmatpush1.bf16.msra.mxu0 %v5056_v22 }
 0xb43   :  { %4658 = vmatprep.subr.bf16.mxu0 %v5061_v57 }
 0xb46   :  { %4659 = vmatpush1.bf16.msra.mxu0 %v5059_v59 }
 0xb47   :  { %4660 = vmatprep.subr.bf16.mxu0 %v5064_v41 }
 0xb4a   :  { %4661 = vmatpush1.bf16.msra.mxu0 %v5062_v42 }
 0xb4b   :  { %4662 = vmatprep.subr.bf16.mxu0 %v5067_v11 }
 0xb4e   :  { %4663 = vmatpush1.bf16.msra.mxu0 %v5065_v51 }
 0xb51   :  { %4665 = vmatmul.mubr.bf16.vlgmr.msra.gmra.mrb[80].mxu0 %v4193_v7 }
 0xc24   :  { %v4666_v20 = vpop.f32.mrb[80].mxu0 }
 0xc25   :  { %v4910_v38 = vadd.f32 %v4666_v20, %v4264_v10  ;;  %v4668_v50 = vpop.f32.mrb[81].mxu0 }
 0xc26   :  { %v4911_v8 = vadd.f32 %v4668_v50, %v4268_v19  ;;  %v4670_v6 = vpop.f32.mrb[82].mxu0 }
 0xc27   :  { %v4673_v0 = vmax.f32 %v4910_v38, 0.0  ;;  %v4671_v54 = vpop.f32.mrb[83].mxu0 }
 0xc28   :  { %v4674_v46 = vmax.f32 %v4911_v8, 0.0 }
 0xc29   :  { %v4696_v18 = vmul.f32 %v4691_v39, %v4673_v0 }
 0xc2a   :  { %v4697_v25 = vmul.f32 %v4695_v43, %v4674_v46 }
 0xc2c   :  { %v4698_v44 = vadd.f32 %v4697_v25, %v4696_v18 }
 0xc2e   :  { %4699 = vadd.xlane.f32.xlu0 %v4698_v44 }
 0xcbb   :  { %v4700_v16 = vpop.xlane.xlu0 %4699 }
 0xcbc   :  { %v4708_v33 = vadd.f32 %v4900_v13, %v4700_v16 }
 0xcbe   :  { %4710 = vst.msk [vmem:[%s6638_s11] sm:$0xff] %vm4709_vm1, %v4708_v33 }
 0xcbf   :  { %4715 = vsyncpa [#allocation7], 1 }
 0xcc0   :  { %4716 = vsyncpa [#allocation9], 1 }
 0xcc1   :  { %4717 = vsyncpa [#allocation12], 1 }
 0xcc2   :  { %4718 = vsyncpa [#allocation15], 1 }
 0xcc3   :  { %4719 = vsyncpa [#allocation18], 1 }
 0xcc4   :  { %4720 = vsyncmov [#allocation4] }
 0xcc7   :  { %s4721_s4 = vpop.sfrf %4720 }
 0xcc8   :  { %p4901_p8 = scmp.ne.s32.totalorder %s4721_s4, 0 }
 0xcca   :  { %4725 = shalt.err (%p4901_p8)  }
 0xccb   :  { %4727 = vsyncmov [#allocation4 + $0x1] }
 0xcce   :  { %s4728_s19 = vpop.sfrf %4727 }
 0xccf   :  { %p4902_p9 = scmp.ne.s32.totalorder %s4728_s19, 0 }
 0xcd1   :  { %4732 = shalt.err (%p4902_p9)  }
 0xcd2   :  { %4734 = vsyncmov [#allocation4 + $0x2] }
 0xcd5   :  { %s4735_s1 = vpop.sfrf %4734 }
 0xcd6   :  { %p4903_p10 = scmp.ne.s32.totalorder %s4735_s1, 0 }
 0xcd8   :  { %4739 = shalt.err (%p4903_p10)  }
 0xcd9   :  { %4741 = vsyncmov [#allocation4 + $0x3] }
 0xcdc   :  { %s4742_s0 = vpop.sfrf %4741 }
 0xcdd   :  { %p4904_p11 = scmp.ne.s32.totalorder %s4742_s0, 0 }
 0xcdf   :  { %4746 = shalt.err (%p4904_p11)  }
 0xce0   :  { %4748 = vsyncmov [#allocation4 + $0x4] }
 0xce3   :  { %s4749_s11 = vpop.sfrf %4748 }
 0xce4   :  { %p4905_p12 = scmp.ne.s32.totalorder %s4749_s11, 0 }
 0xce6   :  { %4753 = shalt.err (%p4905_p12)  }

</bundles_post_ra>
